<compile_context>
chip_gen: v6e
topology: v6e:2x2x1
jax: 0.10.0
libtpu: 0.0.40
codegen_flags: <defaults>
</compile_context>

<pallas_src>
import functools

import jax
import jax.numpy as jnp
from jax import lax
from jax.experimental import pallas as pl
from jax.experimental.pallas import tpu as pltpu


_EXPM_SCALE_LOG2 = 6     # exp(M) = exp(M / 2^6)^(2^6)
_EXPM_TAYLOR_ORDER = 8   # Taylor order of the scaled exponential
_VMEM_LIMIT = 32 * 1024 * 1024  # explicit scoped-VMEM limit, safe on v5e/v6e/v7x


def _bmm(x, y):
    # Batched (b, k, k) @ (b, k, k) matmul with f32 accumulation (single batch dim).
    return jnp.einsum("tij,tjk->tik", x, y, preferred_element_type=jnp.float32)


# -----------------------------------------------------------------------------
# Fused kernel: projection + expm + time-ordered product with a VMEM carry.
# -----------------------------------------------------------------------------
def _fused_dev_kernel(dx_ref, a_ref, out_ref):
    # dx_ref : (TC, D)         path increments of this (batch, time-chunk)
    # a_ref  : (D, C, 2m, 2m)  skew-Hermitian generators, real block form (resident)
    # out_ref: (C, 2m, 2m)     running time-ordered product (carry across chunks)
    chunk_idx = pl.program_id(1)
    tc, d_in = dx_ref.shape
    _, n_ch, twom, _ = a_ref.shape

    @pl.when(chunk_idx == 0)
    def _init():
        rows = lax.broadcasted_iota(jnp.int32, (n_ch, twom, twom), 1)
        cols = lax.broadcasted_iota(jnp.int32, (n_ch, twom, twom), 2)
        out_ref[...] = (rows == cols).astype(jnp.float32)

    dx = dx_ref[...]                       # (TC, D)
    a = a_ref[...]                         # (D, C, 2m, 2m)
    eye = (lax.broadcasted_iota(jnp.int32, (twom, twom), 0)
           == lax.broadcasted_iota(jnp.int32, (twom, twom), 1)).astype(jnp.float32)
    inv_scale = jnp.float32(1.0 / (1 << _EXPM_SCALE_LOG2))

    # 1) Projection (VPU broadcast-MAC).  dx[t, d] is splat over a (2m, 2m) tile
    #    via a lane broadcast of the column followed by a sublane broadcast of
    #    the row (both plain 2D broadcast forms).  D and TC are tiny -> unrolled.
    dx_cols = [jnp.broadcast_to(dx[:, d:d + 1], (tc, twom)) for d in range(d_in)]
    per_step = []
    for t in range(tc):
        coef = jnp.broadcast_to(dx_cols[0][t:t + 1, :], (twom, twom))
        v = coef * a[0]                                   # (C, 2m, 2m)
        for d in range(1, d_in):
            coef = jnp.broadcast_to(dx_cols[d][t:t + 1, :], (twom, twom))
            v = v + coef * a[d]
        per_step.append(v)
    # Channel-major batch (index = c*TC + t) so dyadic pairing stays in-channel.
    s = jnp.stack([per_step[t][c] for c in range(n_ch) for t in range(tc)], axis=0)
    s = s * inv_scale                                     # (C*TC, 2m, 2m)

    # 2) exp(s) by order-q Taylor in Horner form + 2^k squarings, one batched
    #    einsum per step over all C*TC chunk matrices (keeps the MXU fed).
    # TODO(synk): torch.matrix_exp uses exact Pade with adaptive squaring; this
    # fixed-order scheme is f32-exact only for the bounded-norm skew-Hermitian
    # increments this layer produces.
    e = eye + s * jnp.float32(1.0 / _EXPM_TAYLOR_ORDER)
    for k in range(_EXPM_TAYLOR_ORDER - 1, 0, -1):
        e = eye + _bmm(s, e) * jnp.float32(1.0 / k)
    for _ in range(_EXPM_SCALE_LOG2):
        e = _bmm(e, e)

    # 3) Order-preserving dyadic combine of the TC factors inside each channel
    #    (log2(TC) levels of independent matmuls instead of a serial chain).
    while e.shape[0] > n_ch:
        pairs = e.reshape(e.shape[0] // 2, 2, twom, twom)
        e = _bmm(pairs[:, 0], pairs[:, 1])
    # e: (C, 2m, 2m) chunk product per channel, channel order.

    # 4) Fold into the carry: P_c <- P_c @ E_c (single batched matmul; one real
    #    (2m,2m) matmul per complex product thanks to the block embedding).
    out_ref[...] = jnp.einsum("cij,cjk->cik", out_ref[...], e,
                              preferred_element_type=jnp.float32)


def development_product(dx, a_blk, *, time_chunk):
    n, tp, d_in = dx.shape
    _, n_ch, twom, _ = a_blk.shape
    return pl.pallas_call(
        _fused_dev_kernel,
        grid=(n, tp // time_chunk),
        in_specs=[
            pl.BlockSpec((None, time_chunk, d_in), lambda b, t: (b, t, 0)),
            pl.BlockSpec((d_in, n_ch, twom, twom), lambda b, t: (0, 0, 0, 0)),
        ],
        out_specs=pl.BlockSpec((None, n_ch, twom, twom), lambda b, t: (b, 0, 0, 0)),
        out_shape=jax.ShapeDtypeStruct((n, n_ch, twom, twom), jnp.float32),
        compiler_params=pltpu.CompilerParams(
            dimension_semantics=("parallel", "arbitrary"),
            vmem_limit_bytes=_VMEM_LIMIT),
    )(dx, a_blk)


# -----------------------------------------------------------------------------
# Full forward pass.
# -----------------------------------------------------------------------------
@functools.partial(jax.jit, static_argnames=("channels", "hidden_size",
                                             "include_initial", "time_chunk"))
def unitary_development_forward(x, a_r, a_i, *, channels, hidden_size,
                                include_initial=False, time_chunk=8):
    # time_chunk must be a power of two and sublane-aligned (>= 8).
    assert time_chunk >= 8 and time_chunk % 8 == 0
    assert (time_chunk & (time_chunk - 1)) == 0
    N, L, D = x.shape
    C, m = channels, hidden_size
    if include_initial:
        x = jnp.concatenate([jnp.zeros((N, 1, D), x.dtype), x], axis=1)
    T = x.shape[1] - 1
    dx = (x[:, 1:] - x[:, :-1]).astype(jnp.float32)                 # (N, T, D)

    # Skew-Hermitian (unitary Lie-algebra) parametrization, real block embedding.
    # TODO(synk): confirm the 0.5*(A - A^H) convention against the reference
    # Projection/unitary parametrization (some implementations drop the 0.5).
    A = a_r.astype(jnp.float32) + 1j * a_i.astype(jnp.float32)      # (D, C, m, m)
    A = 0.5 * (A - jnp.conj(jnp.swapaxes(A, -1, -2)))
    Ar, Ai = jnp.real(A), jnp.imag(A)
    top = jnp.concatenate([Ar, Ai], axis=-1)                        # (D, C, m, 2m)
    bot = jnp.concatenate([-Ai, Ar], axis=-1)
    a_blk = jnp.concatenate([top, bot], axis=-2)                    # (D, C, 2m, 2m)

    # Pad time to a multiple of the chunk (zero increment -> exp = identity).
    TC = time_chunk
    Tp = max(TC, ((T + TC - 1) // TC) * TC)
    if Tp != T:
        dx = jnp.concatenate([dx, jnp.zeros((N, Tp - T, D), jnp.float32)], axis=1)

    pblk = development_product(dx, a_blk, time_chunk=TC)            # (N, C, 2m, 2m)
    return (pblk[..., :m, :m] + 1j * pblk[..., :m, m:]).astype(jnp.complex64)


# -----------------------------------------------------------------------------
# Pure-JAX reference (mirrors the PyTorch module) for a correctness check.
# -----------------------------------------------------------------------------
def _reference_forward(x, a_r, a_i, *, channels, hidden_size):
    N, L, D = x.shape
    C, m = channels, hidden_size
    dx = (x[:, 1:] - x[:, :-1]).astype(jnp.complex64)               # (N, T, D)
    A = a_r.astype(jnp.float32) + 1j * a_i.astype(jnp.float32)
    A = 0.5 * (A - jnp.conj(jnp.swapaxes(A, -1, -2)))
    M = jnp.einsum("ntd,dcij->ntcij", dx, A.astype(jnp.complex64))
    T = M.shape[1]
    U = jax.vmap(jax.scipy.linalg.expm)(M.reshape(-1, m, m)).reshape(N, T, C, m, m)
    P = jnp.broadcast_to(jnp.eye(m, dtype=jnp.complex64), (N, C, m, m))
    for t in range(T):
        P = jnp.einsum("ncij,ncjk->ncik", P, U[:, t])
    return P


if __name__ == "__main__":
    # Small shapes implied by the module: x (N, L, input_size); output (N, C, m, m).
    N, L, D = 2, 9, 4          # batch=2, seq=9 (-> T=8 increments), input_size=4
    C, m = 4, 8                # channels=4, hidden_size=8

    key = jax.random.PRNGKey(0)
    kx, kr, ki = jax.random.split(key, 3)
    x = jax.random.normal(kx, (N, L, D), dtype=jnp.float32)
    a_r = 0.2 * jax.random.normal(kr, (D, C, m, m), dtype=jnp.float32)
    a_i = 0.2 * jax.random.normal(ki, (D, C, m, m), dtype=jnp.float32)

    out = unitary_development_forward(x, a_r, a_i, channels=C, hidden_size=m)
    out = jax.block_until_ready(out)

    assert out.shape == (N, C, m, m), out.shape
    assert out.dtype == jnp.complex64, out.dtype
    assert bool(jnp.all(jnp.isfinite(out.real))) and bool(jnp.all(jnp.isfinite(out.imag)))

    with jax.default_matmul_precision("float32"):
        ref = jax.block_until_ready(
            _reference_forward(x, a_r, a_i, channels=C, hidden_size=m))
    err = float(jnp.max(jnp.abs(out - ref)))
    assert err < 1e-2, f"max abs error vs reference: {err}"

    print("KERNEL_OK")
</pallas_src>

<mosaic_0001>
module attributes {stable_mosaic.version = 11 : i64} {
  func.func @_fused_dev_kernel(%arg0: i32, %arg1: i32, %arg2: memref<1x8x4xf32, #tpu.memory_space<vmem>>, %arg3: memref<4x4x16x16xf32, #tpu.memory_space<vmem>>, %arg4: memref<1x4x16x16xf32, #tpu.memory_space<vmem>>) attributes {dimension_semantics = [#tpu.dimension_semantics<parallel>, #tpu.dimension_semantics<arbitrary>], iteration_bounds = array<i64: 2, 1>, scalar_prefetch = 0 : i64, scratch_operands = 0 : i64, tpu.core_type = #tpu.core_type<tc>, window_params = [{transform_indices = @transform_0, window_bounds = array<i64: 1, 8, 4>}, {pipeline_mode = #tpu.pipeline_mode<synchronous>, transform_indices = @transform_1, window_bounds = array<i64: 4, 4, 16, 16>}, {transform_indices = @transform_2, window_bounds = array<i64: 1, 4, 16, 16>}]} {
    %c0_i32 = arith.constant 0 : i32
    %0 = arith.cmpi eq, %arg1, %c0_i32 : i32
    %1 = arith.extui %0 : i1 to i32
    %c0_i32_0 = arith.constant 0 : i32
    %2 = arith.cmpi ne, %1, %c0_i32_0 : i32
    scf.if %2 {
      %481 = tpu.iota {dimensions = array<i32: 1>} : vector<4x16x16xi32>
      %482 = tpu.iota {dimensions = array<i32: 2>} : vector<4x16x16xi32>
      %483 = arith.cmpi eq, %481, %482 : vector<4x16x16xi32>
      %484 = arith.extui %483 : vector<4x16x16xi1> to vector<4x16x16xi32>
      %485 = arith.sitofp %484 : vector<4x16x16xi32> to vector<4x16x16xf32>
      %c0_40 = arith.constant 0 : index
      %c0_41 = arith.constant 0 : index
      %c0_42 = arith.constant 0 : index
      %c0_43 = arith.constant 0 : index
      %486 = vector.load %arg4[%c0_40, %c0_41, %c0_42, %c0_43] : memref<1x4x16x16xf32, #tpu.memory_space<vmem>>, vector<1x4x16x16xf32>
      %487 = vector.shape_cast %486 : vector<1x4x16x16xf32> to vector<4x16x16xf32>
      %488 = vector.shape_cast %485 : vector<4x16x16xf32> to vector<1x4x16x16xf32>
      tpu.vector_store %arg4[%c0_40, %c0_41, %c0_42, %c0_43], %488 {strides = array<i32>} : memref<1x4x16x16xf32, #tpu.memory_space<vmem>>, vector<1x4x16x16xf32>,
    } else {
    }
    %c0 = arith.constant 0 : index
    %c0_1 = arith.constant 0 : index
    %c0_2 = arith.constant 0 : index
    %3 = vector.load %arg2[%c0, %c0_1, %c0_2] : memref<1x8x4xf32, #tpu.memory_space<vmem>>, vector<1x8x4xf32>
    %4 = vector.shape_cast %3 : vector<1x8x4xf32> to vector<8x4xf32>
    %c0_3 = arith.constant 0 : index
    %c0_4 = arith.constant 0 : index
    %c0_5 = arith.constant 0 : index
    %c0_6 = arith.constant 0 : index
    %5 = vector.load %arg3[%c0_3, %c0_4, %c0_5, %c0_6] : memref<4x4x16x16xf32, #tpu.memory_space<vmem>>, vector<4x4x16x16xf32>
    %6 = tpu.iota {dimensions = array<i32: 0>} : vector<16x16xi32>
    %7 = tpu.iota {dimensions = array<i32: 1>} : vector<16x16xi32>
    %8 = arith.cmpi eq, %6, %7 : vector<16x16xi32>
    %9 = arith.extui %8 : vector<16x16xi1> to vector<16x16xi32>
    %10 = arith.sitofp %9 : vector<16x16xi32> to vector<16x16xf32>
    %11 = vector.extract_strided_slice %4 {offsets = [0, 0], sizes = [8, 1], strides = [1, 1]} : vector<8x4xf32> to vector<8x1xf32>
    %12 = vector.shape_cast %11 : vector<8x1xf32> to vector<8x1xf32>
    %13 = vector.broadcast %12 : vector<8x1xf32> to vector<8x16xf32>
    %14 = vector.extract_strided_slice %4 {offsets = [0, 1], sizes = [8, 1], strides = [1, 1]} : vector<8x4xf32> to vector<8x1xf32>
    %15 = vector.shape_cast %14 : vector<8x1xf32> to vector<8x1xf32>
    %16 = vector.broadcast %15 : vector<8x1xf32> to vector<8x16xf32>
    %17 = vector.extract_strided_slice %4 {offsets = [0, 2], sizes = [8, 1], strides = [1, 1]} : vector<8x4xf32> to vector<8x1xf32>
    %18 = vector.shape_cast %17 : vector<8x1xf32> to vector<8x1xf32>
    %19 = vector.broadcast %18 : vector<8x1xf32> to vector<8x16xf32>
    %20 = vector.extract_strided_slice %4 {offsets = [0, 3], sizes = [8, 1], strides = [1, 1]} : vector<8x4xf32> to vector<8x1xf32>
    %21 = vector.shape_cast %20 : vector<8x1xf32> to vector<8x1xf32>
    %22 = vector.broadcast %21 : vector<8x1xf32> to vector<8x16xf32>
    %23 = vector.extract_strided_slice %13 {offsets = [0, 0], sizes = [1, 16], strides = [1, 1]} : vector<8x16xf32> to vector<1x16xf32>
    %24 = vector.shape_cast %23 : vector<1x16xf32> to vector<1x16xf32>
    %25 = vector.broadcast %24 : vector<1x16xf32> to vector<16x16xf32>
    %26 = vector.extract_strided_slice %5 {offsets = [0, 0, 0, 0], sizes = [1, 4, 16, 16], strides = [1, 1, 1, 1]} : vector<4x4x16x16xf32> to vector<1x4x16x16xf32>
    %27 = vector.shape_cast %26 : vector<1x4x16x16xf32> to vector<4x16x16xf32>
    %28 = vector.shape_cast %25 : vector<16x16xf32> to vector<1x16x16xf32>
    %29 = vector.broadcast %28 : vector<1x16x16xf32> to vector<4x16x16xf32>
    %30 = arith.mulf %29, %27 : vector<4x16x16xf32>
    %31 = vector.extract_strided_slice %16 {offsets = [0, 0], sizes = [1, 16], strides = [1, 1]} : vector<8x16xf32> to vector<1x16xf32>
    %32 = vector.shape_cast %31 : vector<1x16xf32> to vector<1x16xf32>
    %33 = vector.broadcast %32 : vector<1x16xf32> to vector<16x16xf32>
    %34 = vector.extract_strided_slice %5 {offsets = [1, 0, 0, 0], sizes = [1, 4, 16, 16], strides = [1, 1, 1, 1]} : vector<4x4x16x16xf32> to vector<1x4x16x16xf32>
    %35 = vector.shape_cast %34 : vector<1x4x16x16xf32> to vector<4x16x16xf32>
    %36 = vector.shape_cast %33 : vector<16x16xf32> to vector<1x16x16xf32>
    %37 = vector.broadcast %36 : vector<1x16x16xf32> to vector<4x16x16xf32>
    %38 = arith.mulf %37, %35 : vector<4x16x16xf32>
    %39 = arith.addf %30, %38 : vector<4x16x16xf32>
    %40 = vector.extract_strided_slice %19 {offsets = [0, 0], sizes = [1, 16], strides = [1, 1]} : vector<8x16xf32> to vector<1x16xf32>
    %41 = vector.shape_cast %40 : vector<1x16xf32> to vector<1x16xf32>
    %42 = vector.broadcast %41 : vector<1x16xf32> to vector<16x16xf32>
    %43 = vector.extract_strided_slice %5 {offsets = [2, 0, 0, 0], sizes = [1, 4, 16, 16], strides = [1, 1, 1, 1]} : vector<4x4x16x16xf32> to vector<1x4x16x16xf32>
    %44 = vector.shape_cast %43 : vector<1x4x16x16xf32> to vector<4x16x16xf32>
    %45 = vector.shape_cast %42 : vector<16x16xf32> to vector<1x16x16xf32>
    %46 = vector.broadcast %45 : vector<1x16x16xf32> to vector<4x16x16xf32>
    %47 = arith.mulf %46, %44 : vector<4x16x16xf32>
    %48 = arith.addf %39, %47 : vector<4x16x16xf32>
    %49 = vector.extract_strided_slice %22 {offsets = [0, 0], sizes = [1, 16], strides = [1, 1]} : vector<8x16xf32> to vector<1x16xf32>
    %50 = vector.shape_cast %49 : vector<1x16xf32> to vector<1x16xf32>
    %51 = vector.broadcast %50 : vector<1x16xf32> to vector<16x16xf32>
    %52 = vector.extract_strided_slice %5 {offsets = [3, 0, 0, 0], sizes = [1, 4, 16, 16], strides = [1, 1, 1, 1]} : vector<4x4x16x16xf32> to vector<1x4x16x16xf32>
    %53 = vector.shape_cast %52 : vector<1x4x16x16xf32> to vector<4x16x16xf32>
    %54 = vector.shape_cast %51 : vector<16x16xf32> to vector<1x16x16xf32>
    %55 = vector.broadcast %54 : vector<1x16x16xf32> to vector<4x16x16xf32>
    %56 = arith.mulf %55, %53 : vector<4x16x16xf32>
    %57 = arith.addf %48, %56 : vector<4x16x16xf32>
    %58 = vector.extract_strided_slice %13 {offsets = [1, 0], sizes = [1, 16], strides = [1, 1]} : vector<8x16xf32> to vector<1x16xf32>
    %59 = vector.shape_cast %58 : vector<1x16xf32> to vector<1x16xf32>
    %60 = vector.broadcast %59 : vector<1x16xf32> to vector<16x16xf32>
    %61 = vector.extract_strided_slice %5 {offsets = [0, 0, 0, 0], sizes = [1, 4, 16, 16], strides = [1, 1, 1, 1]} : vector<4x4x16x16xf32> to vector<1x4x16x16xf32>
    %62 = vector.shape_cast %61 : vector<1x4x16x16xf32> to vector<4x16x16xf32>
    %63 = vector.shape_cast %60 : vector<16x16xf32> to vector<1x16x16xf32>
    %64 = vector.broadcast %63 : vector<1x16x16xf32> to vector<4x16x16xf32>
    %65 = arith.mulf %64, %62 : vector<4x16x16xf32>
    %66 = vector.extract_strided_slice %16 {offsets = [1, 0], sizes = [1, 16], strides = [1, 1]} : vector<8x16xf32> to vector<1x16xf32>
    %67 = vector.shape_cast %66 : vector<1x16xf32> to vector<1x16xf32>
    %68 = vector.broadcast %67 : vector<1x16xf32> to vector<16x16xf32>
    %69 = vector.extract_strided_slice %5 {offsets = [1, 0, 0, 0], sizes = [1, 4, 16, 16], strides = [1, 1, 1, 1]} : vector<4x4x16x16xf32> to vector<1x4x16x16xf32>
    %70 = vector.shape_cast %69 : vector<1x4x16x16xf32> to vector<4x16x16xf32>
    %71 = vector.shape_cast %68 : vector<16x16xf32> to vector<1x16x16xf32>
    %72 = vector.broadcast %71 : vector<1x16x16xf32> to vector<4x16x16xf32>
    %73 = arith.mulf %72, %70 : vector<4x16x16xf32>
    %74 = arith.addf %65, %73 : vector<4x16x16xf32>
    %75 = vector.extract_strided_slice %19 {offsets = [1, 0], sizes = [1, 16], strides = [1, 1]} : vector<8x16xf32> to vector<1x16xf32>
    %76 = vector.shape_cast %75 : vector<1x16xf32> to vector<1x16xf32>
    %77 = vector.broadcast %76 : vector<1x16xf32> to vector<16x16xf32>
    %78 = vector.extract_strided_slice %5 {offsets = [2, 0, 0, 0], sizes = [1, 4, 16, 16], strides = [1, 1, 1, 1]} : vector<4x4x16x16xf32> to vector<1x4x16x16xf32>
    %79 = vector.shape_cast %78 : vector<1x4x16x16xf32> to vector<4x16x16xf32>
    %80 = vector.shape_cast %77 : vector<16x16xf32> to vector<1x16x16xf32>
    %81 = vector.broadcast %80 : vector<1x16x16xf32> to vector<4x16x16xf32>
    %82 = arith.mulf %81, %79 : vector<4x16x16xf32>
    %83 = arith.addf %74, %82 : vector<4x16x16xf32>
    %84 = vector.extract_strided_slice %22 {offsets = [1, 0], sizes = [1, 16], strides = [1, 1]} : vector<8x16xf32> to vector<1x16xf32>
    %85 = vector.shape_cast %84 : vector<1x16xf32> to vector<1x16xf32>
    %86 = vector.broadcast %85 : vector<1x16xf32> to vector<16x16xf32>
    %87 = vector.extract_strided_slice %5 {offsets = [3, 0, 0, 0], sizes = [1, 4, 16, 16], strides = [1, 1, 1, 1]} : vector<4x4x16x16xf32> to vector<1x4x16x16xf32>
    %88 = vector.shape_cast %87 : vector<1x4x16x16xf32> to vector<4x16x16xf32>
    %89 = vector.shape_cast %86 : vector<16x16xf32> to vector<1x16x16xf32>
    %90 = vector.broadcast %89 : vector<1x16x16xf32> to vector<4x16x16xf32>
    %91 = arith.mulf %90, %88 : vector<4x16x16xf32>
    %92 = arith.addf %83, %91 : vector<4x16x16xf32>
    %93 = vector.extract_strided_slice %13 {offsets = [2, 0], sizes = [1, 16], strides = [1, 1]} : vector<8x16xf32> to vector<1x16xf32>
    %94 = vector.shape_cast %93 : vector<1x16xf32> to vector<1x16xf32>
    %95 = vector.broadcast %94 : vector<1x16xf32> to vector<16x16xf32>
    %96 = vector.extract_strided_slice %5 {offsets = [0, 0, 0, 0], sizes = [1, 4, 16, 16], strides = [1, 1, 1, 1]} : vector<4x4x16x16xf32> to vector<1x4x16x16xf32>
    %97 = vector.shape_cast %96 : vector<1x4x16x16xf32> to vector<4x16x16xf32>
    %98 = vector.shape_cast %95 : vector<16x16xf32> to vector<1x16x16xf32>
    %99 = vector.broadcast %98 : vector<1x16x16xf32> to vector<4x16x16xf32>
    %100 = arith.mulf %99, %97 : vector<4x16x16xf32>
    %101 = vector.extract_strided_slice %16 {offsets = [2, 0], sizes = [1, 16], strides = [1, 1]} : vector<8x16xf32> to vector<1x16xf32>
    %102 = vector.shape_cast %101 : vector<1x16xf32> to vector<1x16xf32>
    %103 = vector.broadcast %102 : vector<1x16xf32> to vector<16x16xf32>
    %104 = vector.extract_strided_slice %5 {offsets = [1, 0, 0, 0], sizes = [1, 4, 16, 16], strides = [1, 1, 1, 1]} : vector<4x4x16x16xf32> to vector<1x4x16x16xf32>
    %105 = vector.shape_cast %104 : vector<1x4x16x16xf32> to vector<4x16x16xf32>
    %106 = vector.shape_cast %103 : vector<16x16xf32> to vector<1x16x16xf32>
    %107 = vector.broadcast %106 : vector<1x16x16xf32> to vector<4x16x16xf32>
    %108 = arith.mulf %107, %105 : vector<4x16x16xf32>
    %109 = arith.addf %100, %108 : vector<4x16x16xf32>
    %110 = vector.extract_strided_slice %19 {offsets = [2, 0], sizes = [1, 16], strides = [1, 1]} : vector<8x16xf32> to vector<1x16xf32>
    %111 = vector.shape_cast %110 : vector<1x16xf32> to vector<1x16xf32>
    %112 = vector.broadcast %111 : vector<1x16xf32> to vector<16x16xf32>
    %113 = vector.extract_strided_slice %5 {offsets = [2, 0, 0, 0], sizes = [1, 4, 16, 16], strides = [1, 1, 1, 1]} : vector<4x4x16x16xf32> to vector<1x4x16x16xf32>
    %114 = vector.shape_cast %113 : vector<1x4x16x16xf32> to vector<4x16x16xf32>
    %115 = vector.shape_cast %112 : vector<16x16xf32> to vector<1x16x16xf32>
    %116 = vector.broadcast %115 : vector<1x16x16xf32> to vector<4x16x16xf32>
    %117 = arith.mulf %116, %114 : vector<4x16x16xf32>
    %118 = arith.addf %109, %117 : vector<4x16x16xf32>
    %119 = vector.extract_strided_slice %22 {offsets = [2, 0], sizes = [1, 16], strides = [1, 1]} : vector<8x16xf32> to vector<1x16xf32>
    %120 = vector.shape_cast %119 : vector<1x16xf32> to vector<1x16xf32>
    %121 = vector.broadcast %120 : vector<1x16xf32> to vector<16x16xf32>
    %122 = vector.extract_strided_slice %5 {offsets = [3, 0, 0, 0], sizes = [1, 4, 16, 16], strides = [1, 1, 1, 1]} : vector<4x4x16x16xf32> to vector<1x4x16x16xf32>
    %123 = vector.shape_cast %122 : vector<1x4x16x16xf32> to vector<4x16x16xf32>
    %124 = vector.shape_cast %121 : vector<16x16xf32> to vector<1x16x16xf32>
    %125 = vector.broadcast %124 : vector<1x16x16xf32> to vector<4x16x16xf32>
    %126 = arith.mulf %125, %123 : vector<4x16x16xf32>
    %127 = arith.addf %118, %126 : vector<4x16x16xf32>
    %128 = vector.extract_strided_slice %13 {offsets = [3, 0], sizes = [1, 16], strides = [1, 1]} : vector<8x16xf32> to vector<1x16xf32>
    %129 = vector.shape_cast %128 : vector<1x16xf32> to vector<1x16xf32>
    %130 = vector.broadcast %129 : vector<1x16xf32> to vector<16x16xf32>
    %131 = vector.extract_strided_slice %5 {offsets = [0, 0, 0, 0], sizes = [1, 4, 16, 16], strides = [1, 1, 1, 1]} : vector<4x4x16x16xf32> to vector<1x4x16x16xf32>
    %132 = vector.shape_cast %131 : vector<1x4x16x16xf32> to vector<4x16x16xf32>
    %133 = vector.shape_cast %130 : vector<16x16xf32> to vector<1x16x16xf32>
    %134 = vector.broadcast %133 : vector<1x16x16xf32> to vector<4x16x16xf32>
    %135 = arith.mulf %134, %132 : vector<4x16x16xf32>
    %136 = vector.extract_strided_slice %16 {offsets = [3, 0], sizes = [1, 16], strides = [1, 1]} : vector<8x16xf32> to vector<1x16xf32>
    %137 = vector.shape_cast %136 : vector<1x16xf32> to vector<1x16xf32>
    %138 = vector.broadcast %137 : vector<1x16xf32> to vector<16x16xf32>
    %139 = vector.extract_strided_slice %5 {offsets = [1, 0, 0, 0], sizes = [1, 4, 16, 16], strides = [1, 1, 1, 1]} : vector<4x4x16x16xf32> to vector<1x4x16x16xf32>
    %140 = vector.shape_cast %139 : vector<1x4x16x16xf32> to vector<4x16x16xf32>
    %141 = vector.shape_cast %138 : vector<16x16xf32> to vector<1x16x16xf32>
    %142 = vector.broadcast %141 : vector<1x16x16xf32> to vector<4x16x16xf32>
    %143 = arith.mulf %142, %140 : vector<4x16x16xf32>
    %144 = arith.addf %135, %143 : vector<4x16x16xf32>
    %145 = vector.extract_strided_slice %19 {offsets = [3, 0], sizes = [1, 16], strides = [1, 1]} : vector<8x16xf32> to vector<1x16xf32>
    %146 = vector.shape_cast %145 : vector<1x16xf32> to vector<1x16xf32>
    %147 = vector.broadcast %146 : vector<1x16xf32> to vector<16x16xf32>
    %148 = vector.extract_strided_slice %5 {offsets = [2, 0, 0, 0], sizes = [1, 4, 16, 16], strides = [1, 1, 1, 1]} : vector<4x4x16x16xf32> to vector<1x4x16x16xf32>
    %149 = vector.shape_cast %148 : vector<1x4x16x16xf32> to vector<4x16x16xf32>
    %150 = vector.shape_cast %147 : vector<16x16xf32> to vector<1x16x16xf32>
    %151 = vector.broadcast %150 : vector<1x16x16xf32> to vector<4x16x16xf32>
    %152 = arith.mulf %151, %149 : vector<4x16x16xf32>
    %153 = arith.addf %144, %152 : vector<4x16x16xf32>
    %154 = vector.extract_strided_slice %22 {offsets = [3, 0], sizes = [1, 16], strides = [1, 1]} : vector<8x16xf32> to vector<1x16xf32>
    %155 = vector.shape_cast %154 : vector<1x16xf32> to vector<1x16xf32>
    %156 = vector.broadcast %155 : vector<1x16xf32> to vector<16x16xf32>
    %157 = vector.extract_strided_slice %5 {offsets = [3, 0, 0, 0], sizes = [1, 4, 16, 16], strides = [1, 1, 1, 1]} : vector<4x4x16x16xf32> to vector<1x4x16x16xf32>
    %158 = vector.shape_cast %157 : vector<1x4x16x16xf32> to vector<4x16x16xf32>
    %159 = vector.shape_cast %156 : vector<16x16xf32> to vector<1x16x16xf32>
    %160 = vector.broadcast %159 : vector<1x16x16xf32> to vector<4x16x16xf32>
    %161 = arith.mulf %160, %158 : vector<4x16x16xf32>
    %162 = arith.addf %153, %161 : vector<4x16x16xf32>
    %163 = vector.extract_strided_slice %13 {offsets = [4, 0], sizes = [1, 16], strides = [1, 1]} : vector<8x16xf32> to vector<1x16xf32>
    %164 = vector.shape_cast %163 : vector<1x16xf32> to vector<1x16xf32>
    %165 = vector.broadcast %164 : vector<1x16xf32> to vector<16x16xf32>
    %166 = vector.extract_strided_slice %5 {offsets = [0, 0, 0, 0], sizes = [1, 4, 16, 16], strides = [1, 1, 1, 1]} : vector<4x4x16x16xf32> to vector<1x4x16x16xf32>
    %167 = vector.shape_cast %166 : vector<1x4x16x16xf32> to vector<4x16x16xf32>
    %168 = vector.shape_cast %165 : vector<16x16xf32> to vector<1x16x16xf32>
    %169 = vector.broadcast %168 : vector<1x16x16xf32> to vector<4x16x16xf32>
    %170 = arith.mulf %169, %167 : vector<4x16x16xf32>
    %171 = vector.extract_strided_slice %16 {offsets = [4, 0], sizes = [1, 16], strides = [1, 1]} : vector<8x16xf32> to vector<1x16xf32>
    %172 = vector.shape_cast %171 : vector<1x16xf32> to vector<1x16xf32>
    %173 = vector.broadcast %172 : vector<1x16xf32> to vector<16x16xf32>
    %174 = vector.extract_strided_slice %5 {offsets = [1, 0, 0, 0], sizes = [1, 4, 16, 16], strides = [1, 1, 1, 1]} : vector<4x4x16x16xf32> to vector<1x4x16x16xf32>
    %175 = vector.shape_cast %174 : vector<1x4x16x16xf32> to vector<4x16x16xf32>
    %176 = vector.shape_cast %173 : vector<16x16xf32> to vector<1x16x16xf32>
    %177 = vector.broadcast %176 : vector<1x16x16xf32> to vector<4x16x16xf32>
    %178 = arith.mulf %177, %175 : vector<4x16x16xf32>
    %179 = arith.addf %170, %178 : vector<4x16x16xf32>
    %180 = vector.extract_strided_slice %19 {offsets = [4, 0], sizes = [1, 16], strides = [1, 1]} : vector<8x16xf32> to vector<1x16xf32>
    %181 = vector.shape_cast %180 : vector<1x16xf32> to vector<1x16xf32>
    %182 = vector.broadcast %181 : vector<1x16xf32> to vector<16x16xf32>
    %183 = vector.extract_strided_slice %5 {offsets = [2, 0, 0, 0], sizes = [1, 4, 16, 16], strides = [1, 1, 1, 1]} : vector<4x4x16x16xf32> to vector<1x4x16x16xf32>
    %184 = vector.shape_cast %183 : vector<1x4x16x16xf32> to vector<4x16x16xf32>
    %185 = vector.shape_cast %182 : vector<16x16xf32> to vector<1x16x16xf32>
    %186 = vector.broadcast %185 : vector<1x16x16xf32> to vector<4x16x16xf32>
    %187 = arith.mulf %186, %184 : vector<4x16x16xf32>
    %188 = arith.addf %179, %187 : vector<4x16x16xf32>
    %189 = vector.extract_strided_slice %22 {offsets = [4, 0], sizes = [1, 16], strides = [1, 1]} : vector<8x16xf32> to vector<1x16xf32>
    %190 = vector.shape_cast %189 : vector<1x16xf32> to vector<1x16xf32>
    %191 = vector.broadcast %190 : vector<1x16xf32> to vector<16x16xf32>
    %192 = vector.extract_strided_slice %5 {offsets = [3, 0, 0, 0], sizes = [1, 4, 16, 16], strides = [1, 1, 1, 1]} : vector<4x4x16x16xf32> to vector<1x4x16x16xf32>
    %193 = vector.shape_cast %192 : vector<1x4x16x16xf32> to vector<4x16x16xf32>
    %194 = vector.shape_cast %191 : vector<16x16xf32> to vector<1x16x16xf32>
    %195 = vector.broadcast %194 : vector<1x16x16xf32> to vector<4x16x16xf32>
    %196 = arith.mulf %195, %193 : vector<4x16x16xf32>
    %197 = arith.addf %188, %196 : vector<4x16x16xf32>
    %198 = vector.extract_strided_slice %13 {offsets = [5, 0], sizes = [1, 16], strides = [1, 1]} : vector<8x16xf32> to vector<1x16xf32>
    %199 = vector.shape_cast %198 : vector<1x16xf32> to vector<1x16xf32>
    %200 = vector.broadcast %199 : vector<1x16xf32> to vector<16x16xf32>
    %201 = vector.extract_strided_slice %5 {offsets = [0, 0, 0, 0], sizes = [1, 4, 16, 16], strides = [1, 1, 1, 1]} : vector<4x4x16x16xf32> to vector<1x4x16x16xf32>
    %202 = vector.shape_cast %201 : vector<1x4x16x16xf32> to vector<4x16x16xf32>
    %203 = vector.shape_cast %200 : vector<16x16xf32> to vector<1x16x16xf32>
    %204 = vector.broadcast %203 : vector<1x16x16xf32> to vector<4x16x16xf32>
    %205 = arith.mulf %204, %202 : vector<4x16x16xf32>
    %206 = vector.extract_strided_slice %16 {offsets = [5, 0], sizes = [1, 16], strides = [1, 1]} : vector<8x16xf32> to vector<1x16xf32>
    %207 = vector.shape_cast %206 : vector<1x16xf32> to vector<1x16xf32>
    %208 = vector.broadcast %207 : vector<1x16xf32> to vector<16x16xf32>
    %209 = vector.extract_strided_slice %5 {offsets = [1, 0, 0, 0], sizes = [1, 4, 16, 16], strides = [1, 1, 1, 1]} : vector<4x4x16x16xf32> to vector<1x4x16x16xf32>
    %210 = vector.shape_cast %209 : vector<1x4x16x16xf32> to vector<4x16x16xf32>
    %211 = vector.shape_cast %208 : vector<16x16xf32> to vector<1x16x16xf32>
    %212 = vector.broadcast %211 : vector<1x16x16xf32> to vector<4x16x16xf32>
    %213 = arith.mulf %212, %210 : vector<4x16x16xf32>
    %214 = arith.addf %205, %213 : vector<4x16x16xf32>
    %215 = vector.extract_strided_slice %19 {offsets = [5, 0], sizes = [1, 16], strides = [1, 1]} : vector<8x16xf32> to vector<1x16xf32>
    %216 = vector.shape_cast %215 : vector<1x16xf32> to vector<1x16xf32>
    %217 = vector.broadcast %216 : vector<1x16xf32> to vector<16x16xf32>
    %218 = vector.extract_strided_slice %5 {offsets = [2, 0, 0, 0], sizes = [1, 4, 16, 16], strides = [1, 1, 1, 1]} : vector<4x4x16x16xf32> to vector<1x4x16x16xf32>
    %219 = vector.shape_cast %218 : vector<1x4x16x16xf32> to vector<4x16x16xf32>
    %220 = vector.shape_cast %217 : vector<16x16xf32> to vector<1x16x16xf32>
    %221 = vector.broadcast %220 : vector<1x16x16xf32> to vector<4x16x16xf32>
    %222 = arith.mulf %221, %219 : vector<4x16x16xf32>
    %223 = arith.addf %214, %222 : vector<4x16x16xf32>
    %224 = vector.extract_strided_slice %22 {offsets = [5, 0], sizes = [1, 16], strides = [1, 1]} : vector<8x16xf32> to vector<1x16xf32>
    %225 = vector.shape_cast %224 : vector<1x16xf32> to vector<1x16xf32>
    %226 = vector.broadcast %225 : vector<1x16xf32> to vector<16x16xf32>
    %227 = vector.extract_strided_slice %5 {offsets = [3, 0, 0, 0], sizes = [1, 4, 16, 16], strides = [1, 1, 1, 1]} : vector<4x4x16x16xf32> to vector<1x4x16x16xf32>
    %228 = vector.shape_cast %227 : vector<1x4x16x16xf32> to vector<4x16x16xf32>
    %229 = vector.shape_cast %226 : vector<16x16xf32> to vector<1x16x16xf32>
    %230 = vector.broadcast %229 : vector<1x16x16xf32> to vector<4x16x16xf32>
    %231 = arith.mulf %230, %228 : vector<4x16x16xf32>
    %232 = arith.addf %223, %231 : vector<4x16x16xf32>
    %233 = vector.extract_strided_slice %13 {offsets = [6, 0], sizes = [1, 16], strides = [1, 1]} : vector<8x16xf32> to vector<1x16xf32>
    %234 = vector.shape_cast %233 : vector<1x16xf32> to vector<1x16xf32>
    %235 = vector.broadcast %234 : vector<1x16xf32> to vector<16x16xf32>
    %236 = vector.extract_strided_slice %5 {offsets = [0, 0, 0, 0], sizes = [1, 4, 16, 16], strides = [1, 1, 1, 1]} : vector<4x4x16x16xf32> to vector<1x4x16x16xf32>
    %237 = vector.shape_cast %236 : vector<1x4x16x16xf32> to vector<4x16x16xf32>
    %238 = vector.shape_cast %235 : vector<16x16xf32> to vector<1x16x16xf32>
    %239 = vector.broadcast %238 : vector<1x16x16xf32> to vector<4x16x16xf32>
    %240 = arith.mulf %239, %237 : vector<4x16x16xf32>
    %241 = vector.extract_strided_slice %16 {offsets = [6, 0], sizes = [1, 16], strides = [1, 1]} : vector<8x16xf32> to vector<1x16xf32>
    %242 = vector.shape_cast %241 : vector<1x16xf32> to vector<1x16xf32>
    %243 = vector.broadcast %242 : vector<1x16xf32> to vector<16x16xf32>
    %244 = vector.extract_strided_slice %5 {offsets = [1, 0, 0, 0], sizes = [1, 4, 16, 16], strides = [1, 1, 1, 1]} : vector<4x4x16x16xf32> to vector<1x4x16x16xf32>
    %245 = vector.shape_cast %244 : vector<1x4x16x16xf32> to vector<4x16x16xf32>
    %246 = vector.shape_cast %243 : vector<16x16xf32> to vector<1x16x16xf32>
    %247 = vector.broadcast %246 : vector<1x16x16xf32> to vector<4x16x16xf32>
    %248 = arith.mulf %247, %245 : vector<4x16x16xf32>
    %249 = arith.addf %240, %248 : vector<4x16x16xf32>
    %250 = vector.extract_strided_slice %19 {offsets = [6, 0], sizes = [1, 16], strides = [1, 1]} : vector<8x16xf32> to vector<1x16xf32>
    %251 = vector.shape_cast %250 : vector<1x16xf32> to vector<1x16xf32>
    %252 = vector.broadcast %251 : vector<1x16xf32> to vector<16x16xf32>
    %253 = vector.extract_strided_slice %5 {offsets = [2, 0, 0, 0], sizes = [1, 4, 16, 16], strides = [1, 1, 1, 1]} : vector<4x4x16x16xf32> to vector<1x4x16x16xf32>
    %254 = vector.shape_cast %253 : vector<1x4x16x16xf32> to vector<4x16x16xf32>
    %255 = vector.shape_cast %252 : vector<16x16xf32> to vector<1x16x16xf32>
    %256 = vector.broadcast %255 : vector<1x16x16xf32> to vector<4x16x16xf32>
    %257 = arith.mulf %256, %254 : vector<4x16x16xf32>
    %258 = arith.addf %249, %257 : vector<4x16x16xf32>
    %259 = vector.extract_strided_slice %22 {offsets = [6, 0], sizes = [1, 16], strides = [1, 1]} : vector<8x16xf32> to vector<1x16xf32>
    %260 = vector.shape_cast %259 : vector<1x16xf32> to vector<1x16xf32>
    %261 = vector.broadcast %260 : vector<1x16xf32> to vector<16x16xf32>
    %262 = vector.extract_strided_slice %5 {offsets = [3, 0, 0, 0], sizes = [1, 4, 16, 16], strides = [1, 1, 1, 1]} : vector<4x4x16x16xf32> to vector<1x4x16x16xf32>
    %263 = vector.shape_cast %262 : vector<1x4x16x16xf32> to vector<4x16x16xf32>
    %264 = vector.shape_cast %261 : vector<16x16xf32> to vector<1x16x16xf32>
    %265 = vector.broadcast %264 : vector<1x16x16xf32> to vector<4x16x16xf32>
    %266 = arith.mulf %265, %263 : vector<4x16x16xf32>
    %267 = arith.addf %258, %266 : vector<4x16x16xf32>
    %268 = vector.extract_strided_slice %13 {offsets = [7, 0], sizes = [1, 16], strides = [1, 1]} : vector<8x16xf32> to vector<1x16xf32>
    %269 = vector.shape_cast %268 : vector<1x16xf32> to vector<1x16xf32>
    %270 = vector.broadcast %269 : vector<1x16xf32> to vector<16x16xf32>
    %271 = vector.extract_strided_slice %5 {offsets = [0, 0, 0, 0], sizes = [1, 4, 16, 16], strides = [1, 1, 1, 1]} : vector<4x4x16x16xf32> to vector<1x4x16x16xf32>
    %272 = vector.shape_cast %271 : vector<1x4x16x16xf32> to vector<4x16x16xf32>
    %273 = vector.shape_cast %270 : vector<16x16xf32> to vector<1x16x16xf32>
    %274 = vector.broadcast %273 : vector<1x16x16xf32> to vector<4x16x16xf32>
    %275 = arith.mulf %274, %272 : vector<4x16x16xf32>
    %276 = vector.extract_strided_slice %16 {offsets = [7, 0], sizes = [1, 16], strides = [1, 1]} : vector<8x16xf32> to vector<1x16xf32>
    %277 = vector.shape_cast %276 : vector<1x16xf32> to vector<1x16xf32>
    %278 = vector.broadcast %277 : vector<1x16xf32> to vector<16x16xf32>
    %279 = vector.extract_strided_slice %5 {offsets = [1, 0, 0, 0], sizes = [1, 4, 16, 16], strides = [1, 1, 1, 1]} : vector<4x4x16x16xf32> to vector<1x4x16x16xf32>
    %280 = vector.shape_cast %279 : vector<1x4x16x16xf32> to vector<4x16x16xf32>
    %281 = vector.shape_cast %278 : vector<16x16xf32> to vector<1x16x16xf32>
    %282 = vector.broadcast %281 : vector<1x16x16xf32> to vector<4x16x16xf32>
    %283 = arith.mulf %282, %280 : vector<4x16x16xf32>
    %284 = arith.addf %275, %283 : vector<4x16x16xf32>
    %285 = vector.extract_strided_slice %19 {offsets = [7, 0], sizes = [1, 16], strides = [1, 1]} : vector<8x16xf32> to vector<1x16xf32>
    %286 = vector.shape_cast %285 : vector<1x16xf32> to vector<1x16xf32>
    %287 = vector.broadcast %286 : vector<1x16xf32> to vector<16x16xf32>
    %288 = vector.extract_strided_slice %5 {offsets = [2, 0, 0, 0], sizes = [1, 4, 16, 16], strides = [1, 1, 1, 1]} : vector<4x4x16x16xf32> to vector<1x4x16x16xf32>
    %289 = vector.shape_cast %288 : vector<1x4x16x16xf32> to vector<4x16x16xf32>
    %290 = vector.shape_cast %287 : vector<16x16xf32> to vector<1x16x16xf32>
    %291 = vector.broadcast %290 : vector<1x16x16xf32> to vector<4x16x16xf32>
    %292 = arith.mulf %291, %289 : vector<4x16x16xf32>
    %293 = arith.addf %284, %292 : vector<4x16x16xf32>
    %294 = vector.extract_strided_slice %22 {offsets = [7, 0], sizes = [1, 16], strides = [1, 1]} : vector<8x16xf32> to vector<1x16xf32>
    %295 = vector.shape_cast %294 : vector<1x16xf32> to vector<1x16xf32>
    %296 = vector.broadcast %295 : vector<1x16xf32> to vector<16x16xf32>
    %297 = vector.extract_strided_slice %5 {offsets = [3, 0, 0, 0], sizes = [1, 4, 16, 16], strides = [1, 1, 1, 1]} : vector<4x4x16x16xf32> to vector<1x4x16x16xf32>
    %298 = vector.shape_cast %297 : vector<1x4x16x16xf32> to vector<4x16x16xf32>
    %299 = vector.shape_cast %296 : vector<16x16xf32> to vector<1x16x16xf32>
    %300 = vector.broadcast %299 : vector<1x16x16xf32> to vector<4x16x16xf32>
    %301 = arith.mulf %300, %298 : vector<4x16x16xf32>
    %302 = arith.addf %293, %301 : vector<4x16x16xf32>
    %303 = vector.extract_strided_slice %57 {offsets = [0, 0, 0], sizes = [1, 16, 16], strides = [1, 1, 1]} : vector<4x16x16xf32> to vector<1x16x16xf32>
    %304 = vector.shape_cast %303 : vector<1x16x16xf32> to vector<16x16xf32>
    %305 = vector.extract_strided_slice %92 {offsets = [0, 0, 0], sizes = [1, 16, 16], strides = [1, 1, 1]} : vector<4x16x16xf32> to vector<1x16x16xf32>
    %306 = vector.shape_cast %305 : vector<1x16x16xf32> to vector<16x16xf32>
    %307 = vector.extract_strided_slice %127 {offsets = [0, 0, 0], sizes = [1, 16, 16], strides = [1, 1, 1]} : vector<4x16x16xf32> to vector<1x16x16xf32>
    %308 = vector.shape_cast %307 : vector<1x16x16xf32> to vector<16x16xf32>
    %309 = vector.extract_strided_slice %162 {offsets = [0, 0, 0], sizes = [1, 16, 16], strides = [1, 1, 1]} : vector<4x16x16xf32> to vector<1x16x16xf32>
    %310 = vector.shape_cast %309 : vector<1x16x16xf32> to vector<16x16xf32>
    %311 = vector.extract_strided_slice %197 {offsets = [0, 0, 0], sizes = [1, 16, 16], strides = [1, 1, 1]} : vector<4x16x16xf32> to vector<1x16x16xf32>
    %312 = vector.shape_cast %311 : vector<1x16x16xf32> to vector<16x16xf32>
    %313 = vector.extract_strided_slice %232 {offsets = [0, 0, 0], sizes = [1, 16, 16], strides = [1, 1, 1]} : vector<4x16x16xf32> to vector<1x16x16xf32>
    %314 = vector.shape_cast %313 : vector<1x16x16xf32> to vector<16x16xf32>
    %315 = vector.extract_strided_slice %267 {offsets = [0, 0, 0], sizes = [1, 16, 16], strides = [1, 1, 1]} : vector<4x16x16xf32> to vector<1x16x16xf32>
    %316 = vector.shape_cast %315 : vector<1x16x16xf32> to vector<16x16xf32>
    %317 = vector.extract_strided_slice %302 {offsets = [0, 0, 0], sizes = [1, 16, 16], strides = [1, 1, 1]} : vector<4x16x16xf32> to vector<1x16x16xf32>
    %318 = vector.shape_cast %317 : vector<1x16x16xf32> to vector<16x16xf32>
    %319 = vector.extract_strided_slice %57 {offsets = [1, 0, 0], sizes = [1, 16, 16], strides = [1, 1, 1]} : vector<4x16x16xf32> to vector<1x16x16xf32>
    %320 = vector.shape_cast %319 : vector<1x16x16xf32> to vector<16x16xf32>
    %321 = vector.extract_strided_slice %92 {offsets = [1, 0, 0], sizes = [1, 16, 16], strides = [1, 1, 1]} : vector<4x16x16xf32> to vector<1x16x16xf32>
    %322 = vector.shape_cast %321 : vector<1x16x16xf32> to vector<16x16xf32>
    %323 = vector.extract_strided_slice %127 {offsets = [1, 0, 0], sizes = [1, 16, 16], strides = [1, 1, 1]} : vector<4x16x16xf32> to vector<1x16x16xf32>
    %324 = vector.shape_cast %323 : vector<1x16x16xf32> to vector<16x16xf32>
    %325 = vector.extract_strided_slice %162 {offsets = [1, 0, 0], sizes = [1, 16, 16], strides = [1, 1, 1]} : vector<4x16x16xf32> to vector<1x16x16xf32>
    %326 = vector.shape_cast %325 : vector<1x16x16xf32> to vector<16x16xf32>
    %327 = vector.extract_strided_slice %197 {offsets = [1, 0, 0], sizes = [1, 16, 16], strides = [1, 1, 1]} : vector<4x16x16xf32> to vector<1x16x16xf32>
    %328 = vector.shape_cast %327 : vector<1x16x16xf32> to vector<16x16xf32>
    %329 = vector.extract_strided_slice %232 {offsets = [1, 0, 0], sizes = [1, 16, 16], strides = [1, 1, 1]} : vector<4x16x16xf32> to vector<1x16x16xf32>
    %330 = vector.shape_cast %329 : vector<1x16x16xf32> to vector<16x16xf32>
    %331 = vector.extract_strided_slice %267 {offsets = [1, 0, 0], sizes = [1, 16, 16], strides = [1, 1, 1]} : vector<4x16x16xf32> to vector<1x16x16xf32>
    %332 = vector.shape_cast %331 : vector<1x16x16xf32> to vector<16x16xf32>
    %333 = vector.extract_strided_slice %302 {offsets = [1, 0, 0], sizes = [1, 16, 16], strides = [1, 1, 1]} : vector<4x16x16xf32> to vector<1x16x16xf32>
    %334 = vector.shape_cast %333 : vector<1x16x16xf32> to vector<16x16xf32>
    %335 = vector.extract_strided_slice %57 {offsets = [2, 0, 0], sizes = [1, 16, 16], strides = [1, 1, 1]} : vector<4x16x16xf32> to vector<1x16x16xf32>
    %336 = vector.shape_cast %335 : vector<1x16x16xf32> to vector<16x16xf32>
    %337 = vector.extract_strided_slice %92 {offsets = [2, 0, 0], sizes = [1, 16, 16], strides = [1, 1, 1]} : vector<4x16x16xf32> to vector<1x16x16xf32>
    %338 = vector.shape_cast %337 : vector<1x16x16xf32> to vector<16x16xf32>
    %339 = vector.extract_strided_slice %127 {offsets = [2, 0, 0], sizes = [1, 16, 16], strides = [1, 1, 1]} : vector<4x16x16xf32> to vector<1x16x16xf32>
    %340 = vector.shape_cast %339 : vector<1x16x16xf32> to vector<16x16xf32>
    %341 = vector.extract_strided_slice %162 {offsets = [2, 0, 0], sizes = [1, 16, 16], strides = [1, 1, 1]} : vector<4x16x16xf32> to vector<1x16x16xf32>
    %342 = vector.shape_cast %341 : vector<1x16x16xf32> to vector<16x16xf32>
    %343 = vector.extract_strided_slice %197 {offsets = [2, 0, 0], sizes = [1, 16, 16], strides = [1, 1, 1]} : vector<4x16x16xf32> to vector<1x16x16xf32>
    %344 = vector.shape_cast %343 : vector<1x16x16xf32> to vector<16x16xf32>
    %345 = vector.extract_strided_slice %232 {offsets = [2, 0, 0], sizes = [1, 16, 16], strides = [1, 1, 1]} : vector<4x16x16xf32> to vector<1x16x16xf32>
    %346 = vector.shape_cast %345 : vector<1x16x16xf32> to vector<16x16xf32>
    %347 = vector.extract_strided_slice %267 {offsets = [2, 0, 0], sizes = [1, 16, 16], strides = [1, 1, 1]} : vector<4x16x16xf32> to vector<1x16x16xf32>
    %348 = vector.shape_cast %347 : vector<1x16x16xf32> to vector<16x16xf32>
    %349 = vector.extract_strided_slice %302 {offsets = [2, 0, 0], sizes = [1, 16, 16], strides = [1, 1, 1]} : vector<4x16x16xf32> to vector<1x16x16xf32>
    %350 = vector.shape_cast %349 : vector<1x16x16xf32> to vector<16x16xf32>
    %351 = vector.extract_strided_slice %57 {offsets = [3, 0, 0], sizes = [1, 16, 16], strides = [1, 1, 1]} : vector<4x16x16xf32> to vector<1x16x16xf32>
    %352 = vector.shape_cast %351 : vector<1x16x16xf32> to vector<16x16xf32>
    %353 = vector.extract_strided_slice %92 {offsets = [3, 0, 0], sizes = [1, 16, 16], strides = [1, 1, 1]} : vector<4x16x16xf32> to vector<1x16x16xf32>
    %354 = vector.shape_cast %353 : vector<1x16x16xf32> to vector<16x16xf32>
    %355 = vector.extract_strided_slice %127 {offsets = [3, 0, 0], sizes = [1, 16, 16], strides = [1, 1, 1]} : vector<4x16x16xf32> to vector<1x16x16xf32>
    %356 = vector.shape_cast %355 : vector<1x16x16xf32> to vector<16x16xf32>
    %357 = vector.extract_strided_slice %162 {offsets = [3, 0, 0], sizes = [1, 16, 16], strides = [1, 1, 1]} : vector<4x16x16xf32> to vector<1x16x16xf32>
    %358 = vector.shape_cast %357 : vector<1x16x16xf32> to vector<16x16xf32>
    %359 = vector.extract_strided_slice %197 {offsets = [3, 0, 0], sizes = [1, 16, 16], strides = [1, 1, 1]} : vector<4x16x16xf32> to vector<1x16x16xf32>
    %360 = vector.shape_cast %359 : vector<1x16x16xf32> to vector<16x16xf32>
    %361 = vector.extract_strided_slice %232 {offsets = [3, 0, 0], sizes = [1, 16, 16], strides = [1, 1, 1]} : vector<4x16x16xf32> to vector<1x16x16xf32>
    %362 = vector.shape_cast %361 : vector<1x16x16xf32> to vector<16x16xf32>
    %363 = vector.extract_strided_slice %267 {offsets = [3, 0, 0], sizes = [1, 16, 16], strides = [1, 1, 1]} : vector<4x16x16xf32> to vector<1x16x16xf32>
    %364 = vector.shape_cast %363 : vector<1x16x16xf32> to vector<16x16xf32>
    %365 = vector.extract_strided_slice %302 {offsets = [3, 0, 0], sizes = [1, 16, 16], strides = [1, 1, 1]} : vector<4x16x16xf32> to vector<1x16x16xf32>
    %366 = vector.shape_cast %365 : vector<1x16x16xf32> to vector<16x16xf32>
    %367 = vector.shape_cast %304 : vector<16x16xf32> to vector<1x16x16xf32>
    %368 = vector.shape_cast %306 : vector<16x16xf32> to vector<1x16x16xf32>
    %369 = vector.shape_cast %308 : vector<16x16xf32> to vector<1x16x16xf32>
    %370 = vector.shape_cast %310 : vector<16x16xf32> to vector<1x16x16xf32>
    %371 = vector.shape_cast %312 : vector<16x16xf32> to vector<1x16x16xf32>
    %372 = vector.shape_cast %314 : vector<16x16xf32> to vector<1x16x16xf32>
    %373 = vector.shape_cast %316 : vector<16x16xf32> to vector<1x16x16xf32>
    %374 = vector.shape_cast %318 : vector<16x16xf32> to vector<1x16x16xf32>
    %375 = vector.shape_cast %320 : vector<16x16xf32> to vector<1x16x16xf32>
    %376 = vector.shape_cast %322 : vector<16x16xf32> to vector<1x16x16xf32>
    %377 = vector.shape_cast %324 : vector<16x16xf32> to vector<1x16x16xf32>
    %378 = vector.shape_cast %326 : vector<16x16xf32> to vector<1x16x16xf32>
    %379 = vector.shape_cast %328 : vector<16x16xf32> to vector<1x16x16xf32>
    %380 = vector.shape_cast %330 : vector<16x16xf32> to vector<1x16x16xf32>
    %381 = vector.shape_cast %332 : vector<16x16xf32> to vector<1x16x16xf32>
    %382 = vector.shape_cast %334 : vector<16x16xf32> to vector<1x16x16xf32>
    %383 = vector.shape_cast %336 : vector<16x16xf32> to vector<1x16x16xf32>
    %384 = vector.shape_cast %338 : vector<16x16xf32> to vector<1x16x16xf32>
    %385 = vector.shape_cast %340 : vector<16x16xf32> to vector<1x16x16xf32>
    %386 = vector.shape_cast %342 : vector<16x16xf32> to vector<1x16x16xf32>
    %387 = vector.shape_cast %344 : vector<16x16xf32> to vector<1x16x16xf32>
    %388 = vector.shape_cast %346 : vector<16x16xf32> to vector<1x16x16xf32>
    %389 = vector.shape_cast %348 : vector<16x16xf32> to vector<1x16x16xf32>
    %390 = vector.shape_cast %350 : vector<16x16xf32> to vector<1x16x16xf32>
    %391 = vector.shape_cast %352 : vector<16x16xf32> to vector<1x16x16xf32>
    %392 = vector.shape_cast %354 : vector<16x16xf32> to vector<1x16x16xf32>
    %393 = vector.shape_cast %356 : vector<16x16xf32> to vector<1x16x16xf32>
    %394 = vector.shape_cast %358 : vector<16x16xf32> to vector<1x16x16xf32>
    %395 = vector.shape_cast %360 : vector<16x16xf32> to vector<1x16x16xf32>
    %396 = vector.shape_cast %362 : vector<16x16xf32> to vector<1x16x16xf32>
    %397 = vector.shape_cast %364 : vector<16x16xf32> to vector<1x16x16xf32>
    %398 = vector.shape_cast %366 : vector<16x16xf32> to vector<1x16x16xf32>
    %399 = tpu.concatenate %367, %368, %369, %370, %371, %372, %373, %374, %375, %376, %377, %378, %379, %380, %381, %382 in 0 : vector<1x16x16xf32>, vector<1x16x16xf32>, vector<1x16x16xf32>, vector<1x16x16xf32>, vector<1x16x16xf32>, vector<1x16x16xf32>, vector<1x16x16xf32>, vector<1x16x16xf32>, vector<1x16x16xf32>, vector<1x16x16xf32>, vector<1x16x16xf32>, vector<1x16x16xf32>, vector<1x16x16xf32>, vector<1x16x16xf32>, vector<1x16x16xf32>, vector<1x16x16xf32> -> vector<16x16x16xf32>
    %400 = tpu.concatenate %383, %384, %385, %386, %387, %388, %389, %390, %391, %392, %393, %394, %395, %396, %397, %398 in 0 : vector<1x16x16xf32>, vector<1x16x16xf32>, vector<1x16x16xf32>, vector<1x16x16xf32>, vector<1x16x16xf32>, vector<1x16x16xf32>, vector<1x16x16xf32>, vector<1x16x16xf32>, vector<1x16x16xf32>, vector<1x16x16xf32>, vector<1x16x16xf32>, vector<1x16x16xf32>, vector<1x16x16xf32>, vector<1x16x16xf32>, vector<1x16x16xf32>, vector<1x16x16xf32> -> vector<16x16x16xf32>
    %401 = tpu.concatenate %399, %400 in 0 : vector<16x16x16xf32>, vector<16x16x16xf32> -> vector<32x16x16xf32>
    %cst = arith.constant 1.562500e-02 : f32
    %402 = vector.broadcast %cst : f32 to vector<32x16x16xf32>
    %403 = arith.mulf %401, %402 : vector<32x16x16xf32>
    %cst_7 = arith.constant 1.250000e-01 : f32
    %404 = vector.broadcast %cst_7 : f32 to vector<32x16x16xf32>
    %405 = arith.mulf %403, %404 : vector<32x16x16xf32>
    %406 = vector.shape_cast %10 : vector<16x16xf32> to vector<1x16x16xf32>
    %407 = vector.broadcast %406 : vector<1x16x16xf32> to vector<32x16x16xf32>
    %408 = arith.addf %407, %405 : vector<32x16x16xf32>
    "tpu.trace_start"() <{level = 10 : i32, message = "tij,tjk->tik"}> : () -> ()
    %cst_8 = arith.constant dense<0.000000e+00> : vector<32x16x16xf32>
    %409 = tpu.matmul %403, %408, %cst_8 {dimension_numbers = #tpu.dot_dimension_numbers<[2], [1], [1], [2], [0, 0, 0, 1, 1, 2], [0], [0]>} : vector<32x16x16xf32>, vector<32x16x16xf32>, vector<32x16x16xf32> -> vector<32x16x16xf32>
    "tpu.trace_stop"() : () -> ()
    %cst_9 = arith.constant 0.142857149 : f32
    %410 = vector.broadcast %cst_9 : f32 to vector<32x16x16xf32>
    %411 = arith.mulf %409, %410 : vector<32x16x16xf32>
    %412 = vector.shape_cast %10 : vector<16x16xf32> to vector<1x16x16xf32>
    %413 = vector.broadcast %412 : vector<1x16x16xf32> to vector<32x16x16xf32>
    %414 = arith.addf %413, %411 : vector<32x16x16xf32>
    "tpu.trace_start"() <{level = 10 : i32, message = "tij,tjk->tik"}> : () -> ()
    %cst_10 = arith.constant dense<0.000000e+00> : vector<32x16x16xf32>
    %415 = tpu.matmul %403, %414, %cst_10 {dimension_numbers = #tpu.dot_dimension_numbers<[2], [1], [1], [2], [0, 0, 0, 1, 1, 2], [0], [0]>} : vector<32x16x16xf32>, vector<32x16x16xf32>, vector<32x16x16xf32> -> vector<32x16x16xf32>
    "tpu.trace_stop"() : () -> ()
    %cst_11 = arith.constant 0.166666672 : f32
    %416 = vector.broadcast %cst_11 : f32 to vector<32x16x16xf32>
    %417 = arith.mulf %415, %416 : vector<32x16x16xf32>
    %418 = vector.shape_cast %10 : vector<16x16xf32> to vector<1x16x16xf32>
    %419 = vector.broadcast %418 : vector<1x16x16xf32> to vector<32x16x16xf32>
    %420 = arith.addf %419, %417 : vector<32x16x16xf32>
    "tpu.trace_start"() <{level = 10 : i32, message = "tij,tjk->tik"}> : () -> ()
    %cst_12 = arith.constant dense<0.000000e+00> : vector<32x16x16xf32>
    %421 = tpu.matmul %403, %420, %cst_12 {dimension_numbers = #tpu.dot_dimension_numbers<[2], [1], [1], [2], [0, 0, 0, 1, 1, 2], [0], [0]>} : vector<32x16x16xf32>, vector<32x16x16xf32>, vector<32x16x16xf32> -> vector<32x16x16xf32>
    "tpu.trace_stop"() : () -> ()
    %cst_13 = arith.constant 2.000000e-01 : f32
    %422 = vector.broadcast %cst_13 : f32 to vector<32x16x16xf32>
    %423 = arith.mulf %421, %422 : vector<32x16x16xf32>
    %424 = vector.shape_cast %10 : vector<16x16xf32> to vector<1x16x16xf32>
    %425 = vector.broadcast %424 : vector<1x16x16xf32> to vector<32x16x16xf32>
    %426 = arith.addf %425, %423 : vector<32x16x16xf32>
    "tpu.trace_start"() <{level = 10 : i32, message = "tij,tjk->tik"}> : () -> ()
    %cst_14 = arith.constant dense<0.000000e+00> : vector<32x16x16xf32>
    %427 = tpu.matmul %403, %426, %cst_14 {dimension_numbers = #tpu.dot_dimension_numbers<[2], [1], [1], [2], [0, 0, 0, 1, 1, 2], [0], [0]>} : vector<32x16x16xf32>, vector<32x16x16xf32>, vector<32x16x16xf32> -> vector<32x16x16xf32>
    "tpu.trace_stop"() : () -> ()
    %cst_15 = arith.constant 2.500000e-01 : f32
    %428 = vector.broadcast %cst_15 : f32 to vector<32x16x16xf32>
    %429 = arith.mulf %427, %428 : vector<32x16x16xf32>
    %430 = vector.shape_cast %10 : vector<16x16xf32> to vector<1x16x16xf32>
    %431 = vector.broadcast %430 : vector<1x16x16xf32> to vector<32x16x16xf32>
    %432 = arith.addf %431, %429 : vector<32x16x16xf32>
    "tpu.trace_start"() <{level = 10 : i32, message = "tij,tjk->tik"}> : () -> ()
    %cst_16 = arith.constant dense<0.000000e+00> : vector<32x16x16xf32>
    %433 = tpu.matmul %403, %432, %cst_16 {dimension_numbers = #tpu.dot_dimension_numbers<[2], [1], [1], [2], [0, 0, 0, 1, 1, 2], [0], [0]>} : vector<32x16x16xf32>, vector<32x16x16xf32>, vector<32x16x16xf32> -> vector<32x16x16xf32>
    "tpu.trace_stop"() : () -> ()
    %cst_17 = arith.constant 0.333333343 : f32
    %434 = vector.broadcast %cst_17 : f32 to vector<32x16x16xf32>
    %435 = arith.mulf %433, %434 : vector<32x16x16xf32>
    %436 = vector.shape_cast %10 : vector<16x16xf32> to vector<1x16x16xf32>
    %437 = vector.broadcast %436 : vector<1x16x16xf32> to vector<32x16x16xf32>
    %438 = arith.addf %437, %435 : vector<32x16x16xf32>
    "tpu.trace_start"() <{level = 10 : i32, message = "tij,tjk->tik"}> : () -> ()
    %cst_18 = arith.constant dense<0.000000e+00> : vector<32x16x16xf32>
    %439 = tpu.matmul %403, %438, %cst_18 {dimension_numbers = #tpu.dot_dimension_numbers<[2], [1], [1], [2], [0, 0, 0, 1, 1, 2], [0], [0]>} : vector<32x16x16xf32>, vector<32x16x16xf32>, vector<32x16x16xf32> -> vector<32x16x16xf32>
    "tpu.trace_stop"() : () -> ()
    %cst_19 = arith.constant 5.000000e-01 : f32
    %440 = vector.broadcast %cst_19 : f32 to vector<32x16x16xf32>
    %441 = arith.mulf %439, %440 : vector<32x16x16xf32>
    %442 = vector.shape_cast %10 : vector<16x16xf32> to vector<1x16x16xf32>
    %443 = vector.broadcast %442 : vector<1x16x16xf32> to vector<32x16x16xf32>
    %444 = arith.addf %443, %441 : vector<32x16x16xf32>
    "tpu.trace_start"() <{level = 10 : i32, message = "tij,tjk->tik"}> : () -> ()
    %cst_20 = arith.constant dense<0.000000e+00> : vector<32x16x16xf32>
    %445 = tpu.matmul %403, %444, %cst_20 {dimension_numbers = #tpu.dot_dimension_numbers<[2], [1], [1], [2], [0, 0, 0, 1, 1, 2], [0], [0]>} : vector<32x16x16xf32>, vector<32x16x16xf32>, vector<32x16x16xf32> -> vector<32x16x16xf32>
    "tpu.trace_stop"() : () -> ()
    %cst_21 = arith.constant 1.000000e+00 : f32
    %446 = vector.broadcast %cst_21 : f32 to vector<32x16x16xf32>
    %447 = arith.mulf %445, %446 : vector<32x16x16xf32>
    %448 = vector.shape_cast %10 : vector<16x16xf32> to vector<1x16x16xf32>
    %449 = vector.broadcast %448 : vector<1x16x16xf32> to vector<32x16x16xf32>
    %450 = arith.addf %449, %447 : vector<32x16x16xf32>
    "tpu.trace_start"() <{level = 10 : i32, message = "tij,tjk->tik"}> : () -> ()
    %cst_22 = arith.constant dense<0.000000e+00> : vector<32x16x16xf32>
    %451 = tpu.matmul %450, %450, %cst_22 {dimension_numbers = #tpu.dot_dimension_numbers<[2], [1], [1], [2], [0, 0, 0, 1, 1, 2], [0], [0]>} : vector<32x16x16xf32>, vector<32x16x16xf32>, vector<32x16x16xf32> -> vector<32x16x16xf32>
    %cst_23 = arith.constant dense<0.000000e+00> : vector<32x16x16xf32>
    %452 = tpu.matmul %451, %451, %cst_23 {dimension_numbers = #tpu.dot_dimension_numbers<[2], [1], [1], [2], [0, 0, 0, 1, 1, 2], [0], [0]>} : vector<32x16x16xf32>, vector<32x16x16xf32>, vector<32x16x16xf32> -> vector<32x16x16xf32>
    %cst_24 = arith.constant dense<0.000000e+00> : vector<32x16x16xf32>
    %453 = tpu.matmul %452, %452, %cst_24 {dimension_numbers = #tpu.dot_dimension_numbers<[2], [1], [1], [2], [0, 0, 0, 1, 1, 2], [0], [0]>} : vector<32x16x16xf32>, vector<32x16x16xf32>, vector<32x16x16xf32> -> vector<32x16x16xf32>
    %cst_25 = arith.constant dense<0.000000e+00> : vector<32x16x16xf32>
    %454 = tpu.matmul %453, %453, %cst_25 {dimension_numbers = #tpu.dot_dimension_numbers<[2], [1], [1], [2], [0, 0, 0, 1, 1, 2], [0], [0]>} : vector<32x16x16xf32>, vector<32x16x16xf32>, vector<32x16x16xf32> -> vector<32x16x16xf32>
    %cst_26 = arith.constant dense<0.000000e+00> : vector<32x16x16xf32>
    %455 = tpu.matmul %454, %454, %cst_26 {dimension_numbers = #tpu.dot_dimension_numbers<[2], [1], [1], [2], [0, 0, 0, 1, 1, 2], [0], [0]>} : vector<32x16x16xf32>, vector<32x16x16xf32>, vector<32x16x16xf32> -> vector<32x16x16xf32>
    %cst_27 = arith.constant dense<0.000000e+00> : vector<32x16x16xf32>
    %456 = tpu.matmul %455, %455, %cst_27 {dimension_numbers = #tpu.dot_dimension_numbers<[2], [1], [1], [2], [0, 0, 0, 1, 1, 2], [0], [0]>} : vector<32x16x16xf32>, vector<32x16x16xf32>, vector<32x16x16xf32> -> vector<32x16x16xf32>
    "tpu.trace_stop"() : () -> ()
    %457 = vector.shape_cast %456 : vector<32x16x16xf32> to vector<16x2x16x16xf32>
    %458 = vector.extract_strided_slice %457 {offsets = [0, 0, 0, 0], sizes = [16, 1, 16, 16], strides = [1, 1, 1, 1]} : vector<16x2x16x16xf32> to vector<16x1x16x16xf32>
    %459 = vector.shape_cast %458 : vector<16x1x16x16xf32> to vector<16x16x16xf32>
    %460 = vector.extract_strided_slice %457 {offsets = [0, 1, 0, 0], sizes = [16, 1, 16, 16], strides = [1, 1, 1, 1]} : vector<16x2x16x16xf32> to vector<16x1x16x16xf32>
    %461 = vector.shape_cast %460 : vector<16x1x16x16xf32> to vector<16x16x16xf32>
    "tpu.trace_start"() <{level = 10 : i32, message = "tij,tjk->tik"}> : () -> ()
    %cst_28 = arith.constant dense<0.000000e+00> : vector<16x16x16xf32>
    %462 = tpu.matmul %459, %461, %cst_28 {dimension_numbers = #tpu.dot_dimension_numbers<[2], [1], [1], [2], [0, 0, 0, 1, 1, 2], [0], [0]>} : vector<16x16x16xf32>, vector<16x16x16xf32>, vector<16x16x16xf32> -> vector<16x16x16xf32>
    "tpu.trace_stop"() : () -> ()
    %463 = vector.shape_cast %462 : vector<16x16x16xf32> to vector<8x2x16x16xf32>
    %464 = vector.extract_strided_slice %463 {offsets = [0, 0, 0, 0], sizes = [8, 1, 16, 16], strides = [1, 1, 1, 1]} : vector<8x2x16x16xf32> to vector<8x1x16x16xf32>
    %465 = vector.shape_cast %464 : vector<8x1x16x16xf32> to vector<8x16x16xf32>
    %466 = vector.extract_strided_slice %463 {offsets = [0, 1, 0, 0], sizes = [8, 1, 16, 16], strides = [1, 1, 1, 1]} : vector<8x2x16x16xf32> to vector<8x1x16x16xf32>
    %467 = vector.shape_cast %466 : vector<8x1x16x16xf32> to vector<8x16x16xf32>
    "tpu.trace_start"() <{level = 10 : i32, message = "tij,tjk->tik"}> : () -> ()
    %cst_29 = arith.constant dense<0.000000e+00> : vector<8x16x16xf32>
    %468 = tpu.matmul %465, %467, %cst_29 {dimension_numbers = #tpu.dot_dimension_numbers<[2], [1], [1], [2], [0, 0, 0, 1, 1, 2], [0], [0]>} : vector<8x16x16xf32>, vector<8x16x16xf32>, vector<8x16x16xf32> -> vector<8x16x16xf32>
    "tpu.trace_stop"() : () -> ()
    %469 = vector.shape_cast %468 : vector<8x16x16xf32> to vector<4x2x16x16xf32>
    %470 = vector.extract_strided_slice %469 {offsets = [0, 0, 0, 0], sizes = [4, 1, 16, 16], strides = [1, 1, 1, 1]} : vector<4x2x16x16xf32> to vector<4x1x16x16xf32>
    %471 = vector.shape_cast %470 : vector<4x1x16x16xf32> to vector<4x16x16xf32>
    %472 = vector.extract_strided_slice %469 {offsets = [0, 1, 0, 0], sizes = [4, 1, 16, 16], strides = [1, 1, 1, 1]} : vector<4x2x16x16xf32> to vector<4x1x16x16xf32>
    %473 = vector.shape_cast %472 : vector<4x1x16x16xf32> to vector<4x16x16xf32>
    "tpu.trace_start"() <{level = 10 : i32, message = "tij,tjk->tik"}> : () -> ()
    %cst_30 = arith.constant dense<0.000000e+00> : vector<4x16x16xf32>
    %474 = tpu.matmul %471, %473, %cst_30 {dimension_numbers = #tpu.dot_dimension_numbers<[2], [1], [1], [2], [0, 0, 0, 1, 1, 2], [0], [0]>} : vector<4x16x16xf32>, vector<4x16x16xf32>, vector<4x16x16xf32> -> vector<4x16x16xf32>
    "tpu.trace_stop"() : () -> ()
    %c0_31 = arith.constant 0 : index
    %c0_32 = arith.constant 0 : index
    %c0_33 = arith.constant 0 : index
    %c0_34 = arith.constant 0 : index
    %475 = vector.load %arg4[%c0_31, %c0_32, %c0_33, %c0_34] : memref<1x4x16x16xf32, #tpu.memory_space<vmem>>, vector<1x4x16x16xf32>
    %476 = vector.shape_cast %475 : vector<1x4x16x16xf32> to vector<4x16x16xf32>
    "tpu.trace_start"() <{level = 10 : i32, message = "cij,cjk->cik"}> : () -> ()
    %cst_35 = arith.constant dense<0.000000e+00> : vector<4x16x16xf32>
    %477 = tpu.matmul %476, %474, %cst_35 {dimension_numbers = #tpu.dot_dimension_numbers<[2], [1], [1], [2], [0, 0, 0, 1, 1, 2], [0], [0]>} : vector<4x16x16xf32>, vector<4x16x16xf32>, vector<4x16x16xf32> -> vector<4x16x16xf32>
    "tpu.trace_stop"() : () -> ()
    %c0_36 = arith.constant 0 : index
    %c0_37 = arith.constant 0 : index
    %c0_38 = arith.constant 0 : index
    %c0_39 = arith.constant 0 : index
    %478 = vector.load %arg4[%c0_36, %c0_37, %c0_38, %c0_39] : memref<1x4x16x16xf32, #tpu.memory_space<vmem>>, vector<1x4x16x16xf32>
    %479 = vector.shape_cast %478 : vector<1x4x16x16xf32> to vector<4x16x16xf32>
    %480 = vector.shape_cast %477 : vector<4x16x16xf32> to vector<1x4x16x16xf32>
    tpu.vector_store %arg4[%c0_36, %c0_37, %c0_38, %c0_39], %480 {strides = array<i32>} : memref<1x4x16x16xf32, #tpu.memory_space<vmem>>, vector<1x4x16x16xf32>,
    return
  }
  func.func @transform_0(%arg0: i32, %arg1: i32) -> (i32, i32, i32) {
    %c0_i32 = arith.constant 0 : i32
    %c0_i32_0 = arith.constant 0 : i32
    return %arg0, %arg1, %c0_i32 : i32, i32, i32
  }
  func.func @transform_1(%arg0: i32, %arg1: i32) -> (i32, i32, i32, i32) {
    %c0_i32 = arith.constant 0 : i32
    %c0_i32_0 = arith.constant 0 : i32
    %c0_i32_1 = arith.constant 0 : i32
    %c0_i32_2 = arith.constant 0 : i32
    %c0_i32_3 = arith.constant 0 : i32
    return %c0_i32, %c0_i32_0, %c0_i32_1, %c0_i32_2 : i32, i32, i32, i32
  }
  func.func @transform_2(%arg0: i32, %arg1: i32) -> (i32, i32, i32, i32) {
    %c0_i32 = arith.constant 0 : i32
    %c0_i32_0 = arith.constant 0 : i32
    %c0_i32_1 = arith.constant 0 : i32
    %c0_i32_2 = arith.constant 0 : i32
    return %arg0, %c0_i32, %c0_i32_0, %c0_i32_1 : i32, i32, i32, i32
  }
}

</mosaic_0001>

<bundles_post_ra>
// kernel: sub.2
= control target key start
LH: loop header
LB: loop body
LE: loop exit
PB: predicated region body
PF: predicated region fallthrough
CT: control target
= control target key end

     0   :  { %s56_s0 = inlined_call_operand.vmem [shape: f32[2,8,4], index: 0, kind: input, shape index: {}]   ;;  %s57_s1 = inlined_call_operand.vmem [shape: f32[2,8,4], index: 1, kind: input, shape index: {}]   ;;  %s58_s2 = inlined_call_operand.vmem [shape: f32[2,8,4], index: 2, kind: output, shape index: {}]  }
   0x1   :  { %v3_v0 = vld [vmem:[%s56_s0] sm:$0xff]  ;;  %v20_v2 = vld [vmem:[%s56_s0 + $0x8] sm:$0xff] }
   0x2   :  { %v4_v1 = vld [vmem:[%s57_s1] sm:$0xff]  ;;  %v21_v4 = vld [vmem:[%s57_s1 + $0x8] sm:$0xff] }
   0x3   :  { %v7_v3 = vsub.f32 %v3_v0, %v4_v1  ;;  %v16_v5 = vsub.f32 %v20_v2, %v21_v4 }
   0x5   :  { %9 = vst [vmem:[%s58_s2] sm:$0xff] %v7_v3  ;;  %22 = vst [vmem:[%s58_s2 + $0x8] sm:$0xff] %v16_v5 }

// kernel: custom-call
= control target key start
LH: loop header
LB: loop body
LE: loop exit
PB: predicated region body
PF: predicated region fallthrough
CT: control target
= control target key end

     0   :  { %s92_s0 = inlined_call_operand.vmem [shape: f32[2,4,8,8], index: 0, kind: input, shape index: {}]   ;;  %s93_s1 = inlined_call_operand.vmem [shape: f32[2,4,8,8], index: 1, kind: input, shape index: {}]   ;;  %s94_s2 = inlined_call_operand.hbm [shape: c64[2,4,8,8], index: 2, kind: output, shape index: {}]  }
   0x1   :  { %s3_s11 = scalar_lea.hbm %s94_s2, 1024 }
   0x2   :  { %4 = vsyncpa [#allocation0], 0  ;;  %s5_s14 = sshll.u32 %s92_s0, 4  ;;  %s6_s14 = int_to_ptr.vmem [resolvable:$true] %s5_s14 }
   0x3   :  { %s18_s15 = scalar_lea.vmem %s6_s14, 1024  ;;  %p23_p1 = scmp.lt.s32.totalorder %s6_s14, %s6_s14 }
   0x4   :  { %p19_p0 = scmp.ne.s32.totalorder %s6_s14, %s18_s15  ;;  %p24_p2 = scmp.lt.s32.totalorder %s18_s15, %s18_s15 }
   0x6   :  { %p25_p3 = por %p24_p2, %p23_p1 }
   0x8   :  { %p26_p4 = pnand %p25_p3, %p19_p0 }
   0xa   :  { %29 = shalt.err (!%p26_p4)  }
   0xb   :  { %8 = dma.vmem_to_hbm [thread:$0]  %s6_s14, 1024, %s94_s2, [#allocation0] }
   0xc   :  { %61 = dma.done.wait [#allocation0], 1024  }
   0xd   :  { %62 = vsyncadd [#allocation0], 4294966272 }
   0xe   :  { %10 = vsyncpa [#allocation0], 1 }
   0xf   :  { %11 = vsyncpa [#allocation1], 0  ;;  %s12_s0 = sshll.u32 %s93_s1, 4  ;;  %s13_s0 = int_to_ptr.vmem [resolvable:$true] %s12_s0 }
  0x10   :  { %s38_s20 = scalar_lea.vmem %s13_s0, 1024  ;;  %p43_p6 = scmp.lt.s32.totalorder %s13_s0, %s13_s0 }
  0x11   :  { %p39_p5 = scmp.ne.s32.totalorder %s13_s0, %s38_s20  ;;  %p44_p7 = scmp.lt.s32.totalorder %s38_s20, %s38_s20 }
  0x13   :  { %p45_p8 = por %p44_p7, %p43_p6 }
  0x15   :  { %p46_p9 = pnand %p45_p8, %p39_p5 }
  0x17   :  { %49 = shalt.err (!%p46_p9)  }
  0x18   :  { %15 = dma.vmem_to_hbm [thread:$0]  %s13_s0, 1024, %s3_s11, [#allocation1] }
  0x19   :  { %63 = dma.done.wait [#allocation1], 1024  }
  0x1a   :  { %64 = vsyncadd [#allocation1], 4294966272 }
  0x1b   :  { %17 = vsyncpa [#allocation1], 1 }

// kernel: unitary_development_forward.1
= control target key start
LH: loop header
LB: loop body
LE: loop exit
PB: predicated region body
PF: predicated region fallthrough
CT: control target
= control target key end

     0   :  { %s43065_s9 = smov 0   ;;  %s43067_s10 = smov 0   ;;  %s46070_s0 = inlined_call_operand.vmem [shape: f32[2,8,4], index: 0, kind: input, shape index: {}]   ;;  %s46071_s1 = inlined_call_operand.vmem [shape: f32[4,4,16,16], index: 1, kind: input, shape index: {}]   ;;  %s46072_s2 = inlined_call_operand.vmem [shape: f32[2,4,16,16], index: 2, kind: output, shape index: {}]  }
   0x1   :  { %s43069_s11 = smov 0  }
   0x2 LB: > { %s24_s12 = sadd.s32 1, %s43040_s10  ;;  %p37079_p0 = scmp.ge.s32.totalorder %s43044_s11, 1  ;;  %s43044_s11 = sphi %s43069_s11, %s12_s11   ;;  %s43040_s10 = sphi %s43067_s10, %s46331_s10   ;;  %s43036_s9 = sphi %s43065_s9, %s46330_s9  }
   0x3   : > { %p26_p1 = scmp.ge.s32.totalorder %s24_s12, 2  ;;  %p128_p2 = scmp.lt.s32.totalorder %s43044_s11, 3 }
   0x5   : > { %s46333_s12 = smov (%p26_p1, %s24_s12), 0  ;;  %p129_p3 = pnand %p37079_p0, %p128_p2 }
   0x7   : > { %132 = sbr.rel (%p129_p3) target bundleno = 3762 (0xeb2), region = 28 }
   0xc   : > { %p152_p4 = scmp.lt.s32.totalorder %s43036_s9, 1  ;;  %s43046_s17 = smov 127   ;;  %v168_v8 = vlaneseq  ;;  %vm179_vm2 = vcmask 130048   ;;  %v43049_v12 = vmov 0.0   ;;  %v43160_v39 = vld [vmem:[%s46071_s1 + $0x10] sm:$0xff]  ;;  %v43165_v40 = vld [vmem:[%s46071_s1] sm:$0xff] }
   0xd   : > { %s43047_s18 = smov 125   ;;  %s43048_s19 = smov 126   ;;  %46136 = vst [vmem:[#allocation3_spill] sm:$0xff] %v43160_v39  ;;  %v43170_v41 = vld [vmem:[%s46071_s1 + $0x18] sm:$0xff]  ;;  %v43175_v42 = vld [vmem:[%s46071_s1 + $0x20] sm:$0xff]  ;;  %v43180_v43 = vld [vmem:[%s46071_s1 + $0x28] sm:$0xff] }
   0xe   : > { %s46335_s9 = smov (!%p152_p4, %s43036_s9), 1  ;;  %v169_v9 = vshrl.u32 %v168_v8, 7  ;;  %v172_v11 = vand.u32 127, %v168_v8  ;;  %46137 = vst [vmem:[#allocation4_spill] sm:$0xff] %v43170_v41  ;;  %v43187_v45 = vld [vmem:[%s46071_s1 + $0x30] sm:$0xff]  ;;  %v43192_v46 = vld [vmem:[%s46071_s1 + $0x38] sm:$0xff] }
   0xf   : > { %s37080_s13 = sshll.u32 %s46335_s9, 3  ;;  %s37985_s20 = sshll.u32 %s46335_s9, 6  ;;  %v43197_v47 = vld [vmem:[%s46071_s1 + $0x40] sm:$0xff]  ;;  %v43202_v48 = vld [vmem:[%s46071_s1 + $0x50] sm:$0xff]  ;;  %v43207_v49 = vld [vmem:[%s46071_s1 + $0x58] sm:$0xff] }
  0x10   : > { %s158_s16 = scalar_lea.vmem %s46070_s0, %s37080_s13  ;;  %v170_v10 = vadd.s32 8, %v169_v9  ;;  %s43124_s23 = scalar_lea.vmem %s46072_s2, %s37985_s20  ;;  %vm173_vm0 = vcmp.eq.s32.totalorder %v169_v9, %v172_v11  ;;  %46138 = vst [vmem:[#allocation5_spill] sm:$0xff] %v43197_v47  ;;  %46139 = vst [vmem:[#allocation6_spill] sm:$0xff] %v43202_v48  ;;  %v43212_v50 = vld [vmem:[%s46071_s1 + $0x60] sm:$0xff]  ;;  %v43223_v54 = vld [vmem:[%s46071_s1 + $0x68] sm:$0xff] }
  0x11   : > { %v188_v0 = vld [vmem:[%s158_s16] sm:$0xff]  ;;  %v43126_v13 = vsel %vm173_vm0, 1.0, %v43049_v12  ;;  %46140 = vst [vmem:[#allocation7_spill] sm:$0xff] %v43207_v49  ;;  %v43228_v55 = vld [vmem:[%s46071_s1 + $0x70] sm:$0xff]  ;;  %v43233_v56 = vld [vmem:[%s46071_s1 + $0x78] sm:$0xff] }
  0x12   : > { %244 = vrot.lane.b32.xlu0 %v188_v0, %s43046_s17  ;;  %286 = vrot.lane.b32.xlu1 %v188_v0, %s43047_s18  ;;  %v307_v1 = vrot.slane %v188_v0, 1  ;;  %42914 = vpush %v188_v0  ;;  %v382_v2 = vrot.slane %v188_v0, 2  ;;  %v457_v3 = vrot.slane %v188_v0, 3  ;;  %v532_v4 = vrot.slane %v188_v0, 4  ;;  %46135 = vst [vmem:[#allocation2_spill] sm:$0xff] %v43126_v13  ;;  %v43267_v8 = vld [vmem:[%s46071_s1 + $0x90] sm:$0xff] }
  0x13   : > { %v43098_v5 = vrot.slane %v188_v0, 5  ;;  %v43106_v6 = vrot.slane %v188_v0, 6  ;;  %v43111_v7 = vrot.slane %v188_v0, 7  ;;  %vm174_vm1 = vcmp.eq.s32.totalorder %v170_v10, %v172_v11  ;;  %180 = vst.msk [vmem:[%s43124_s23] sm:$0xff] %vm179_vm2, %v43126_v13  ;;  %182 = vst.msk [vmem:[%s43124_s23 + $0x10] sm:$0xff] %vm179_vm2, %v43126_v13  ;;  %v43272_v9 = vld [vmem:[%s46071_s1 + $0x98] sm:$0xff] }
  0x14   : > { %v43128_v14 = vsel %vm174_vm1, 1.0, %v43049_v12  ;;  %184 = vst.msk [vmem:[%s43124_s23 + $0x20] sm:$0xff] %vm179_vm2, %v43126_v13  ;;  %186 = vst.msk [vmem:[%s43124_s23 + $0x30] sm:$0xff] %vm179_vm2, %v43126_v13  ;;  %v43277_v10 = vld [vmem:[%s46071_s1 + $0xa0] sm:$0xff] }
  0x15   : > { %181 = vst.msk [vmem:[%s43124_s23 + $0x8] sm:$0xff] %vm179_vm2, %v43128_v14  ;;  %183 = vst.msk [vmem:[%s43124_s23 + $0x18] sm:$0xff] %vm179_vm2, %v43128_v14 }
  0x16   : > { %265 = vrot.lane.b32.xlu0 %v188_v0, %s43048_s19  ;;  %319 = vrot.lane.b32.xlu1 %v307_v1, %s43046_s17  ;;  %185 = vst.msk [vmem:[%s43124_s23 + $0x28] sm:$0xff] %vm179_vm2, %v43128_v14  ;;  %187 = vst.msk [vmem:[%s43124_s23 + $0x38] sm:$0xff] %vm179_vm2, %v43128_v14 }
  0x17   : > { %46141 = vst [vmem:[#allocation8_spill] sm:$0xff] %v43267_v8  ;;  %46142 = vst [vmem:[#allocation9_spill] sm:$0xff] %v43272_v9 }
  0x1a   : > { %340 = vrot.lane.b32.xlu0 %v307_v1, %s43048_s19  ;;  %361 = vrot.lane.b32.xlu1 %v307_v1, %s43047_s18 }
  0x1e   : > { %394 = vrot.lane.b32.xlu0 %v382_v2, %s43046_s17  ;;  %415 = vrot.lane.b32.xlu1 %v382_v2, %s43048_s19 }
  0x22   : > { %436 = vrot.lane.b32.xlu0 %v382_v2, %s43047_s18  ;;  %469 = vrot.lane.b32.xlu1 %v457_v3, %s43046_s17 }
  0x26   : > { %490 = vrot.lane.b32.xlu0 %v457_v3, %s43048_s19  ;;  %511 = vrot.lane.b32.xlu1 %v457_v3, %s43047_s18 }
  0x2a   : > { %544 = vrot.lane.b32.xlu0 %v532_v4, %s43046_s17  ;;  %565 = vrot.lane.b32.xlu1 %v532_v4, %s43048_s19 }
  0x2e   : > { %586 = vrot.lane.b32.xlu0 %v532_v4, %s43047_s18  ;;  %619 = vrot.lane.b32.xlu1 %v43098_v5, %s43046_s17 }
  0x32   : > { %640 = vrot.lane.b32.xlu0 %v43098_v5, %s43048_s19  ;;  %661 = vrot.lane.b32.xlu1 %v43098_v5, %s43047_s18 }
  0x36   : > { %694 = vrot.lane.b32.xlu0 %v43106_v6, %s43046_s17  ;;  %715 = vrot.lane.b32.xlu1 %v43106_v6, %s43048_s19 }
  0x3a   : > { %736 = vrot.lane.b32.xlu0 %v43106_v6, %s43047_s18  ;;  %769 = vrot.lane.b32.xlu1 %v43111_v7, %s43046_s17 }
  0x3e   : > { %790 = vrot.lane.b32.xlu0 %v43111_v7, %s43048_s19  ;;  %811 = vrot.lane.b32.xlu1 %v43111_v7, %s43047_s18 }
  0x43   : > { %s42915_s24 = spop %42914 }
  0x44   : > { %v43182_v44 = vstv %s42915_s24 }
  0x45   : > { %v238_v51 = vmul.f32 %v43182_v44, %v43160_v39  ;;  %v239_v52 = vmul.f32 %v43182_v44, %v43170_v41  ;;  %v240_v53 = vmul.f32 %v43182_v44, %v43175_v42  ;;  %v241_v57 = vmul.f32 %v43182_v44, %v43180_v43 }
  0x46   : > { %v242_v58 = vmul.f32 %v43182_v44, %v43187_v45  ;;  %v243_v59 = vmul.f32 %v43182_v44, %v43192_v46  ;;  %v236_v61 = vmul.f32 %v43182_v44, %v43165_v40 }
  0x84   : > { %v245_v15 = vpop.permute.xlu0 %244  ;;  %v287_v16 = vpop.permute.xlu1 %286 }
  0x85   : > { %42916 = vpush %v245_v15 }
  0x88   : > { %v266_v17 = vpop.permute.xlu0 %265  ;;  %v320_v18 = vpop.permute.xlu1 %319 }
  0x89   : > { %42918 = vpush %v266_v17  ;;  %v43282_v17 = vld [vmem:[%s46071_s1 + $0xa8] sm:$0xff] }
  0x8a   : > { %42920 = vpush %v287_v16 }
  0x8b   : > { %42922 = vpush %v307_v1 }
  0x8c   : > { %42924 = vpush %v320_v18  ;;  %v341_v19 = vpop.permute.xlu0 %340  ;;  %v362_v20 = vpop.permute.xlu1 %361  ;;  %v43287_v18 = vld [vmem:[%s46071_s1 + $0xb0] sm:$0xff] }
  0x8d   : > { %42926 = vpush %v341_v19  ;;  %v43292_v19 = vld [vmem:[%s46071_s1 + $0xb8] sm:$0xff] }
  0x8e   : > { %42928 = vpush %v362_v20 }
  0x8f   : > { %42930 = vpush %v382_v2 }
  0x90   : > { %v395_v21 = vpop.permute.xlu0 %394  ;;  %v416_v22 = vpop.permute.xlu1 %415 }
  0x91   : > { %42932 = vpush %v395_v21 }
  0x92   : > { %42934 = vpush %v416_v22 }
  0x94   : > { %v437_v23 = vpop.permute.xlu0 %436  ;;  %v470_v24 = vpop.permute.xlu1 %469 }
  0x95   : > { %42936 = vpush %v437_v23 }
  0x96   : > { %42938 = vpush %v457_v3 }
  0x97   : > { %42940 = vpush %v470_v24 }
  0x98   : > { %v491_v25 = vpop.permute.xlu0 %490  ;;  %v512_v26 = vpop.permute.xlu1 %511 }
  0x99   : > { %42942 = vpush %v491_v25  ;;  %v43305_v25 = vld [vmem:[%s46071_s1 + $0xc0] sm:$0xff] }
  0x9a   : > { %42944 = vpush %v512_v26 }
  0x9b   : > { %42946 = vpush %v532_v4 }
  0x9c   : > { %v545_v27 = vpop.permute.xlu0 %544  ;;  %v566_v28 = vpop.permute.xlu1 %565 }
  0x9d   : > { %42948 = vpush %v545_v27 }
  0x9e   : > { %42950 = vpush %v566_v28 }
  0xa0   : > { %v587_v29 = vpop.permute.xlu0 %586  ;;  %v620_v30 = vpop.permute.xlu1 %619 }
  0xa1   : > { %42952 = vpush %v587_v29 }
  0xa2   : > { %42954 = vpush %v43098_v5  ;;  %v43262_v5 = vld [vmem:[%s46071_s1 + $0x80] sm:$0xff] }
  0xa3   : > { %42956 = vpush %v620_v30 }
  0xa4   : > { %v641_v31 = vpop.permute.xlu0 %640  ;;  %v662_v32 = vpop.permute.xlu1 %661 }
  0xa5   : > { %42958 = vpush %v641_v31  ;;  %v43320_v31 = vld [vmem:[%s46071_s1 + $0xd0] sm:$0xff] }
  0xa6   : > { %42960 = vpush %v662_v32  ;;  %v43325_v32 = vld [vmem:[%s46071_s1 + $0xd8] sm:$0xff] }
  0xa7   : > { %42962 = vpush %v43106_v6 }
  0xa8   : > { %v695_v33 = vpop.permute.xlu0 %694  ;;  %v716_v34 = vpop.permute.xlu1 %715 }
  0xa9   : > { %42964 = vpush %v695_v33  ;;  %v43330_v33 = vld [vmem:[%s46071_s1 + $0xe0] sm:$0xff] }
  0xaa   : > { %42966 = vpush %v716_v34 }
  0xac   : > { %v737_v35 = vpop.permute.xlu0 %736  ;;  %v770_v36 = vpop.permute.xlu1 %769 }
  0xad   : > { %42968 = vpush %v737_v35 }
  0xae   : > { %42970 = vpush %v43111_v7 }
  0xaf   : > { %42972 = vpush %v770_v36 }
  0xb0   : > { %v791_v37 = vpop.permute.xlu0 %790  ;;  %v812_v38 = vpop.permute.xlu1 %811 }
  0xb1   : > { %42974 = vpush %v791_v37  ;;  %v43335_v37 = vld [vmem:[%s46071_s1 + $0xe8] sm:$0xff] }
  0xb2   : > { %42976 = vpush %v812_v38  ;;  %v43340_v38 = vld [vmem:[%s46071_s1 + $0xf0] sm:$0xff] }
  0xb6   : > { %s42917_s29 = spop %42916 }
  0xb7   : > { %v43241_v60 = vstv %s42917_s29 }
  0xb8   : > { %v249_v62 = vmul.f32 %v43241_v60, %v43197_v47  ;;  %v251_v63 = vmul.f32 %v43241_v60, %v43202_v48  ;;  %v252_v0 = vmul.f32 %v43241_v60, %v43207_v49  ;;  %v253_v1 = vmul.f32 %v43241_v60, %v43212_v50 }
  0xb9   : > { %v254_v2 = vmul.f32 %v43241_v60, %v43223_v54  ;;  %v255_v3 = vmul.f32 %v43241_v60, %v43228_v55  ;;  %v256_v4 = vmul.f32 %v43241_v60, %v43233_v56 }
  0xba   : > { %v259_v6 = vadd.f32 %v251_v63, %v238_v51  ;;  %v260_v7 = vadd.f32 %v252_v0, %v239_v52  ;;  %s42919_s13 = spop %42918  ;;  %v261_v11 = vadd.f32 %v253_v1, %v240_v53  ;;  %v257_v20 = vadd.f32 %v249_v62, %v236_v61  ;;  %v43345_v51 = vld [vmem:[%s46071_s1 + $0xf8] sm:$0xff] }
  0xbb   : > { %v262_v12 = vadd.f32 %v254_v2, %v241_v57  ;;  %v263_v15 = vadd.f32 %v255_v3, %v242_v58  ;;  %v264_v16 = vadd.f32 %v256_v4, %v243_v59  ;;  %s42921_s20 = spop %42920  ;;  %v43294_v21 = vstv %s42919_s13 }
  0xbc   : > { %v270_v22 = vmul.f32 %v43294_v21, %v43262_v5  ;;  %v272_v23 = vmul.f32 %v43294_v21, %v43267_v8  ;;  %v273_v24 = vmul.f32 %v43294_v21, %v43272_v9  ;;  %v43307_v26 = vstv %s42921_s20  ;;  %s42923_s8 = spop %42922 }
  0xbd   : > { %v274_v27 = vmul.f32 %v43294_v21, %v43277_v10  ;;  %v275_v28 = vmul.f32 %v43294_v21, %v43282_v17  ;;  %v276_v29 = vmul.f32 %v43294_v21, %v43287_v18  ;;  %v277_v30 = vmul.f32 %v43294_v21, %v43292_v19  ;;  %s42925_s9 = spop %42924 }
  0xbe   : > { %v278_v34 = vadd.f32 %v270_v22, %v257_v20  ;;  %v280_v35 = vadd.f32 %v272_v23, %v259_v6  ;;  %v281_v36 = vadd.f32 %v273_v24, %v260_v7  ;;  %v291_v59 = vmul.f32 %v43307_v26, %v43305_v25  ;;  %s42927_s13 = spop %42926 }
  0xbf   : > { %v282_v52 = vadd.f32 %v274_v27, %v261_v11  ;;  %v283_v53 = vadd.f32 %v275_v28, %v262_v12  ;;  %v284_v57 = vadd.f32 %v276_v29, %v263_v15  ;;  %v285_v58 = vadd.f32 %v277_v30, %v264_v16  ;;  %s42929_s14 = spop %42928 }
  0xc0   : > { %v293_v61 = vmul.f32 %v43307_v26, %v43320_v31  ;;  %v294_v62 = vmul.f32 %v43307_v26, %v43325_v32  ;;  %v295_v63 = vmul.f32 %v43307_v26, %v43330_v33  ;;  %v296_v0 = vmul.f32 %v43307_v26, %v43335_v37  ;;  %s42931_s19 = spop %42930 }
  0xc1   : > { %v297_v1 = vmul.f32 %v43307_v26, %v43340_v38  ;;  %v298_v2 = vmul.f32 %v43307_v26, %v43345_v51  ;;  %v299_v3 = vadd.f32 %v291_v59, %v278_v34  ;;  %v309_v20 = vstv %s42923_s8 }
  0xc2   : > { %v43361_v4 = vadd.f32 %v293_v61, %v280_v35  ;;  %v43363_v6 = vadd.f32 %v294_v62, %v281_v36  ;;  %v43365_v7 = vadd.f32 %v295_v63, %v282_v52  ;;  %v43367_v11 = vadd.f32 %v296_v0, %v283_v53  ;;  %s42933_s22 = spop %42932 }
  0xc3   : > { %v43369_v12 = vadd.f32 %v297_v1, %v284_v57  ;;  %v43371_v15 = vadd.f32 %v298_v2, %v285_v58  ;;  %v43373_v16 = vmul.f32 0.015625, %v299_v3  ;;  %v322_v22 = vstv %s42925_s9  ;;  %s42935_s24 = spop %42934 }
  0xc4   : > { %46143 = vst [vmem:[#allocation10_spill] sm:$0xff] %v43361_v4  ;;  %46144 = vst [vmem:[#allocation11_spill] sm:$0xff] %v43363_v6  ;;  %v311_v23 = vmul.f32 %v309_v20, %v43165_v40  ;;  %v313_v24 = vmul.f32 %v309_v20, %v43160_v39  ;;  %v314_v27 = vmul.f32 %v309_v20, %v43170_v41  ;;  %v343_v53 = vstv %s42927_s13 }
  0xc5   : > { %46145 = vst [vmem:[#allocation12_spill] sm:$0xff] %v43365_v7  ;;  %46146 = vst [vmem:[#allocation13_spill] sm:$0xff] %v43367_v11  ;;  %39782 = vmatprep.mubr.msk.f32.mxu0 %vm179_vm2, %v43373_v16  ;;  %v315_v28 = vmul.f32 %v309_v20, %v43175_v42  ;;  %v316_v29 = vmul.f32 %v309_v20, %v43180_v43  ;;  %v317_v30 = vmul.f32 %v309_v20, %v43187_v45 }
  0xc6   : > { %46147 = vst [vmem:[#allocation14_spill] sm:$0xff] %v43369_v12  ;;  %46148 = vst [vmem:[#allocation15_spill] sm:$0xff] %v43371_v15  ;;  %v318_v34 = vmul.f32 %v309_v20, %v43192_v46  ;;  %v324_v35 = vmul.f32 %v322_v22, %v43197_v47  ;;  %v326_v36 = vmul.f32 %v322_v22, %v43202_v48  ;;  %v43394_v6 = vstv %s42929_s14  ;;  %s42937_s25 = spop %42936 }
  0xc7   : > { %46149 = vst [vmem:[#allocation16_spill] sm:$0xff] %v43373_v16  ;;  %v327_v52 = vmul.f32 %v322_v22, %v43207_v49  ;;  %v328_v57 = vmul.f32 %v322_v22, %v43212_v50  ;;  %v329_v58 = vmul.f32 %v322_v22, %v43223_v54  ;;  %v330_v59 = vmul.f32 %v322_v22, %v43228_v55  ;;  %s42939_s28 = spop %42938 }
  0xc8   : > { %v331_v61 = vmul.f32 %v322_v22, %v43233_v56  ;;  %v332_v62 = vadd.f32 %v324_v35, %v311_v23  ;;  %v334_v63 = vadd.f32 %v326_v36, %v313_v24  ;;  %v345_v15 = vmul.f32 %v343_v53, %v43262_v5  ;;  %s42941_s29 = spop %42940 }
  0xc9   : > { %v335_v0 = vadd.f32 %v327_v52, %v314_v27  ;;  %v336_v1 = vadd.f32 %v328_v57, %v315_v28  ;;  %v337_v2 = vadd.f32 %v329_v58, %v316_v29  ;;  %v338_v3 = vadd.f32 %v330_v59, %v317_v30  ;;  %v43403_v30 = vld [vmem:[%s46071_s1 + $0x8] sm:$0xff] }
  0xca   : > { %v339_v12 = vadd.f32 %v331_v61, %v318_v34  ;;  %v347_v7 = vmul.f32 %v343_v53, %v43267_v8  ;;  %v348_v11 = vmul.f32 %v343_v53, %v43272_v9  ;;  %v349_v4 = vmul.f32 %v343_v53, %v43277_v10  ;;  %s42943_s30 = spop %42942 }
  0xcb   : > { %v350_v13 = vmul.f32 %v343_v53, %v43282_v17  ;;  %v351_v23 = vmul.f32 %v343_v53, %v43287_v18  ;;  %v352_v24 = vmul.f32 %v343_v53, %v43292_v19  ;;  %v353_v27 = vadd.f32 %v345_v15, %v332_v62  ;;  %s42945_s3 = spop %42944 }
  0xcc   : > { %v355_v28 = vadd.f32 %v347_v7, %v334_v63  ;;  %v356_v29 = vadd.f32 %v348_v11, %v335_v0  ;;  %v357_v34 = vadd.f32 %v349_v4, %v336_v1  ;;  %v312_v57 = vmul.f32 %v309_v20, %v43403_v30  ;;  %v43415_v11 = vld [vmem:[%s46071_s1 + $0x48] sm:$0xff]  ;;  %s42947_s4 = spop %42946 }
  0xcd   : > { %v358_v35 = vadd.f32 %v350_v13, %v337_v2  ;;  %v359_v36 = vadd.f32 %v351_v23, %v338_v3  ;;  %v360_v52 = vadd.f32 %v352_v24, %v339_v12  ;;  %v366_v58 = vmul.f32 %v43394_v6, %v43305_v25  ;;  %v43433_v0 = vld [vmem:[%s46071_s1 + $0x88] sm:$0xff] }
  0xce   : > { %v368_v59 = vmul.f32 %v43394_v6, %v43320_v31  ;;  %v369_v7 = vmul.f32 %v43394_v6, %v43325_v32  ;;  %v370_v13 = vmul.f32 %v43394_v6, %v43330_v33  ;;  %v371_v4 = vmul.f32 %v43394_v6, %v43335_v37  ;;  %46152 = vst [vmem:[#allocation19_spill] sm:$0xff] %v43433_v0  ;;  %s42949_s5 = spop %42948 }
  0xcf   : > { %v372_v12 = vmul.f32 %v43394_v6, %v43340_v38  ;;  %v373_v15 = vmul.f32 %v43394_v6, %v43345_v51  ;;  %v325_v20 = vmul.f32 %v322_v22, %v43415_v11  ;;  %v374_v61 = vadd.f32 %v366_v58, %v353_v27  ;;  %s42951_s6 = spop %42950 }
  0xd0   : > { %v43426_v62 = vadd.f32 %v368_v59, %v355_v28  ;;  %v43428_v63 = vadd.f32 %v369_v7, %v356_v29  ;;  %v43435_v1 = vadd.f32 %v370_v13, %v357_v34  ;;  %v43437_v2 = vadd.f32 %v371_v4, %v358_v35 }
  0xd1   : > { %v43439_v3 = vadd.f32 %v372_v12, %v359_v36  ;;  %v43441_v23 = vadd.f32 %v373_v15, %v360_v52  ;;  %v43443_v22 = vmul.f32 0.015625, %v374_v61  ;;  %v237_v24 = vmul.f32 %v43182_v44, %v43403_v30 }
  0xd2   : > { %46150 = vst [vmem:[#allocation17_spill] sm:$0xff] %v43426_v62  ;;  %46151 = vst [vmem:[#allocation18_spill] sm:$0xff] %v43428_v63  ;;  %v250_v27 = vmul.f32 %v43241_v60, %v43415_v11  ;;  %v271_v28 = vmul.f32 %v43294_v21, %v43433_v0  ;;  %v43451_v29 = vstv %s42931_s19  ;;  %v43453_v34 = vstv %s42933_s22  ;;  %s42953_s7 = spop %42952 }
  0xd3   : > { %46153 = vst [vmem:[#allocation20_spill] sm:$0xff] %v43435_v1  ;;  %46154 = vst [vmem:[#allocation21_spill] sm:$0xff] %v43437_v2  ;;  %39789 = vmatprep.mubr.msk.f32.mxu1 %vm179_vm2, %v43443_v22  ;;  %v333_v35 = vadd.f32 %v325_v20, %v312_v57  ;;  %v346_v36 = vmul.f32 %v343_v53, %v43433_v0  ;;  %v388_v44 = vmul.f32 %v43451_v29, %v43160_v39  ;;  %s42955_s8 = spop %42954 }
  0xd4   : > { %46155 = vst [vmem:[#allocation22_spill] sm:$0xff] %v43439_v3  ;;  %46156 = vst [vmem:[#allocation23_spill] sm:$0xff] %v43441_v23  ;;  %v389_v60 = vmul.f32 %v43451_v29, %v43170_v41  ;;  %v390_v21 = vmul.f32 %v43451_v29, %v43175_v42  ;;  %v391_v52 = vmul.f32 %v43451_v29, %v43180_v43  ;;  %v43474_v13 = vstv %s42935_s24  ;;  %v43487_v23 = vld [vmem:[%s46071_s1 + $0xc8] sm:$0xff]  ;;  %s42957_s9 = spop %42956 }
  0xd5   : > { %46157 = vst [vmem:[#allocation24_spill] sm:$0xff] %v43443_v22  ;;  %v392_v58 = vmul.f32 %v43451_v29, %v43187_v45  ;;  %v393_v57 = vmul.f32 %v43451_v29, %v43192_v46  ;;  %v258_v59 = vadd.f32 %v250_v27, %v237_v24  ;;  %v401_v53 = vmul.f32 %v43453_v34, %v43202_v48 }
  0xd6   : > { %v402_v7 = vmul.f32 %v43453_v34, %v43207_v49  ;;  %v403_v4 = vmul.f32 %v43453_v34, %v43212_v50  ;;  %v404_v12 = vmul.f32 %v43453_v34, %v43223_v54  ;;  %v405_v15 = vmul.f32 %v43453_v34, %v43228_v55  ;;  %s42959_s13 = spop %42958 }
  0xd7   : > { %v406_v20 = vmul.f32 %v43453_v34, %v43233_v56  ;;  %v279_v61 = vadd.f32 %v271_v28, %v258_v59  ;;  %v354_v24 = vadd.f32 %v346_v36, %v333_v35  ;;  %v409_v27 = vadd.f32 %v401_v53, %v388_v44  ;;  %s42961_s14 = spop %42960 }
  0xd8   : > { %v410_v3 = vadd.f32 %v402_v7, %v389_v60  ;;  %v411_v1 = vadd.f32 %v403_v4, %v390_v21  ;;  %v412_v2 = vadd.f32 %v404_v12, %v391_v52  ;;  %v413_v63 = vadd.f32 %v405_v15, %v392_v58  ;;  %s42963_s15 = spop %42962 }
  0xd9   : > { %v414_v62 = vadd.f32 %v406_v20, %v393_v57  ;;  %v367_v22 = vmul.f32 %v43394_v6, %v43487_v23  ;;  %v422_v16 = vmul.f32 %v43474_v13, %v43267_v8  ;;  %v423_v28 = vmul.f32 %v43474_v13, %v43272_v9 }
  0xda   : > { %v43495_v35 = vstv %s42937_s25  ;;  %v424_v36 = vmul.f32 %v43474_v13, %v43277_v10  ;;  %v425_v44 = vmul.f32 %v43474_v13, %v43282_v17  ;;  %v426_v60 = vmul.f32 %v43474_v13, %v43287_v18  ;;  %s42965_s16 = spop %42964 }
  0xdb   : > { %v427_v6 = vmul.f32 %v43474_v13, %v43292_v19  ;;  %v292_v21 = vmul.f32 %v43307_v26, %v43487_v23  ;;  %v430_v52 = vadd.f32 %v422_v16, %v409_v27  ;;  %v431_v58 = vadd.f32 %v423_v28, %v410_v3  ;;  %s42967_s17 = spop %42966 }
  0xdc   : > { %v432_v57 = vadd.f32 %v424_v36, %v411_v1  ;;  %v433_v59 = vadd.f32 %v425_v44, %v412_v2  ;;  %v434_v53 = vadd.f32 %v426_v60, %v413_v63  ;;  %v375_v12 = vadd.f32 %v367_v22, %v354_v24 }
  0xdd   : > { %v435_v7 = vadd.f32 %v427_v6, %v414_v62  ;;  %v300_v4 = vadd.f32 %v292_v21, %v279_v61  ;;  %v443_v15 = vmul.f32 %v43495_v35, %v43320_v31  ;;  %v444_v20 = vmul.f32 %v43495_v35, %v43325_v32 }
  0xde   : > { %v445_v0 = vmul.f32 %v43495_v35, %v43330_v33  ;;  %v446_v26 = vmul.f32 %v43495_v35, %v43335_v37  ;;  %v447_v16 = vmul.f32 %v43495_v35, %v43340_v38  ;;  %v448_v62 = vmul.f32 %v43495_v35, %v43345_v51  ;;  %s42969_s18 = spop %42968 }
  0xdf   : > { %v386_v63 = vmul.f32 %v43451_v29, %v43165_v40  ;;  %v399_v1 = vmul.f32 %v43453_v34, %v43197_v47  ;;  %v43523_v2 = vadd.f32 %v443_v15, %v430_v52  ;;  %v43525_v3 = vadd.f32 %v444_v20, %v431_v58  ;;  %s42971_s19 = spop %42970 }
  0xe0   : > { %v43527_v22 = vadd.f32 %v445_v0, %v432_v57  ;;  %v43529_v61 = vadd.f32 %v446_v26, %v433_v59  ;;  %v43531_v24 = vadd.f32 %v447_v16, %v434_v53  ;;  %v43533_v27 = vadd.f32 %v448_v62, %v435_v7  ;;  %s42973_s20 = spop %42972 }
  0xe1   : > { %46158 = vst [vmem:[#allocation25_spill] sm:$0xff] %v43523_v2  ;;  %46159 = vst [vmem:[#allocation26_spill] sm:$0xff] %v43525_v3  ;;  %v43535_v28 = vmul.f32 0.015625, %v300_v4  ;;  %v43537_v36 = vmul.f32 0.015625, %v375_v12  ;;  %v387_v44 = vmul.f32 %v43451_v29, %v43403_v30  ;;  %v400_v60 = vmul.f32 %v43453_v34, %v43415_v11 }
  0xe2   : > { %46160 = vst [vmem:[#allocation27_spill] sm:$0xff] %v43527_v22  ;;  %46161 = vst [vmem:[#allocation28_spill] sm:$0xff] %v43529_v61  ;;  %v43543_v6 = vstv %s42939_s28  ;;  %v43545_v0 = vstv %s42941_s29  ;;  %v407_v21 = vadd.f32 %v399_v1, %v386_v63  ;;  %v420_v52 = vmul.f32 %v43474_v13, %v43262_v5  ;;  %s42975_s21 = spop %42974 }
  0xe3   : > { %46162 = vst [vmem:[#allocation29_spill] sm:$0xff] %v43531_v24  ;;  %46163 = vst [vmem:[#allocation30_spill] sm:$0xff] %v43533_v27  ;;  %v463_v58 = vmul.f32 %v43543_v6, %v43160_v39  ;;  %v464_v57 = vmul.f32 %v43543_v6, %v43170_v41  ;;  %v465_v29 = vmul.f32 %v43543_v6, %v43175_v42  ;;  %v897_v12 = vmul.f32 0.125, %v43535_v28  ;;  %s42977_s22 = spop %42976 }
  0xe4   : > { %46164 = vst [vmem:[#allocation31_spill] sm:$0xff] %v43535_v28  ;;  %46165 = vst [vmem:[#allocation32_spill] sm:$0xff] %v43537_v36  ;;  %v466_v34 = vmul.f32 %v43543_v6, %v43180_v43  ;;  %v467_v59 = vmul.f32 %v43543_v6, %v43187_v45  ;;  %v468_v53 = vmul.f32 %v43543_v6, %v43192_v46  ;;  %v43566_v15 = vstv %s42943_s30 }
  0xe5   : > { %v476_v7 = vmul.f32 %v43545_v0, %v43202_v48  ;;  %v477_v4 = vmul.f32 %v43545_v0, %v43207_v49  ;;  %v478_v20 = vmul.f32 %v43545_v0, %v43212_v50  ;;  %v479_v26 = vmul.f32 %v43545_v0, %v43223_v54 }
  0xe6   : > { %v480_v16 = vmul.f32 %v43545_v0, %v43228_v55  ;;  %v481_v62 = vmul.f32 %v43545_v0, %v43233_v56  ;;  %v428_v63 = vadd.f32 %v420_v52, %v407_v21  ;;  %v441_v1 = vmul.f32 %v43495_v35, %v43305_v25 }
  0xe7   : > { %v484_v24 = vadd.f32 %v476_v7, %v463_v58  ;;  %v485_v27 = vadd.f32 %v477_v4, %v464_v57  ;;  %v486_v22 = vadd.f32 %v478_v20, %v465_v29  ;;  %v487_v61 = vadd.f32 %v479_v26, %v466_v34 }
  0xe8   : > { %v488_v2 = vadd.f32 %v480_v16, %v467_v59  ;;  %v489_v3 = vadd.f32 %v481_v62, %v468_v53  ;;  %v461_v49 = vmul.f32 %v43543_v6, %v43165_v40  ;;  %v474_v48 = vmul.f32 %v43545_v0, %v43197_v47  ;;  %v46166_v16 = vld [vmem:[#allocation19_spill] sm:$0xff] }
  0xe9   : > { %v961_v41 = vadd.f32 %v43128_v14, %v897_v12  ;;  %v497_v21 = vmul.f32 %v43566_v15, %v43267_v8  ;;  %v498_v52 = vmul.f32 %v43566_v15, %v43272_v9  ;;  %v499_v58 = vmul.f32 %v43566_v15, %v43277_v10  ;;  %v46167_v8 = vld [vmem:[#allocation16_spill] sm:$0xff] }
  0xea   : > { %v500_v57 = vmul.f32 %v43566_v15, %v43282_v17  ;;  %v501_v29 = vmul.f32 %v43566_v15, %v43287_v18  ;;  %v408_v34 = vadd.f32 %v400_v60, %v387_v44  ;;  %v449_v59 = vadd.f32 %v441_v1, %v428_v63 }
  0xeb   : > { %39778 = vmatprep.subr.mxu0 %v961_v41  ;;  %v502_v53 = vmul.f32 %v43566_v15, %v43292_v19  ;;  %v505_v7 = vadd.f32 %v497_v21, %v484_v24  ;;  %v506_v4 = vadd.f32 %v498_v52, %v485_v27  ;;  %v507_v12 = vadd.f32 %v499_v58, %v486_v22  ;;  %v46168_v22 = vld [vmem:[#allocation2_spill] sm:$0xff] }
  0xec   : > { %39779 = vmatpush3.msra.mxu0 %v961_v41  ;;  %v508_v20 = vadd.f32 %v500_v57, %v487_v61  ;;  %v509_v26 = vadd.f32 %v501_v29, %v488_v2  ;;  %v421_v62 = vmul.f32 %v43474_v13, %v46166_v16  ;;  %v896_v39 = vmul.f32 0.125, %v46167_v8 }
  0xed   : > { %v510_v9 = vadd.f32 %v502_v53, %v489_v3  ;;  %v43598_v47 = vstv %s42945_s3  ;;  %v482_v44 = vadd.f32 %v474_v48, %v461_v49  ;;  %v495_v60 = vmul.f32 %v43566_v15, %v43262_v5 }
  0xee   : > { %v518_v24 = vmul.f32 %v43598_v47, %v43320_v31  ;;  %v519_v41 = vmul.f32 %v43598_v47, %v43325_v32  ;;  %v960_v2 = vadd.f32 %v46168_v22, %v896_v39  ;;  %v520_v13 = vmul.f32 %v43598_v47, %v43330_v33 }
  0xef   : > { %v521_v3 = vmul.f32 %v43598_v47, %v43335_v37  ;;  %v522_v48 = vmul.f32 %v43598_v47, %v43340_v38  ;;  %v43613_v49 = vmul.f32 0.015625, %v449_v59  ;;  %v523_v61 = vmul.f32 %v43598_v47, %v43345_v51 }
  0xf0   : > { %v43617_v27 = vadd.f32 %v518_v24, %v505_v7  ;;  %v899_v63 = vmul.f32 0.125, %v43537_v36  ;;  %39780 = vmatprep.subr.mxu0 %v960_v2  ;;  %v43620_v39 = vadd.f32 %v519_v41, %v506_v4  ;;  %v43622_v1 = vadd.f32 %v520_v13, %v507_v12 }
  0xf1   : > { %46169 = vst [vmem:[#allocation19_spill] sm:$0xff] %v43613_v49  ;;  %v43624_v21 = vadd.f32 %v521_v3, %v508_v20  ;;  %v43626_v52 = vadd.f32 %v522_v48, %v509_v26  ;;  %39781 = vmatpush3.msra.mxu0 %v960_v2  ;;  %v43628_v58 = vadd.f32 %v523_v61, %v510_v9  ;;  %v43637_v4 = vstv %s42947_s4  ;;  %v46173_v61 = vld [vmem:[#allocation24_spill] sm:$0xff] }
  0xf2   : > { %46170 = vst [vmem:[#allocation2_spill] sm:$0xff] %v43622_v1  ;;  %v429_v57 = vadd.f32 %v421_v62, %v408_v34  ;;  %v442_v29 = vmul.f32 %v43495_v35, %v43487_v23  ;;  %v503_v59 = vadd.f32 %v495_v60, %v482_v44  ;;  %v516_v53 = vmul.f32 %v43598_v47, %v43305_v25 }
  0xf3   : > { %46171 = vst [vmem:[#allocation33_spill] sm:$0xff] %v43626_v52  ;;  %46172 = vst [vmem:[#allocation34_spill] sm:$0xff] %v43628_v58  ;;  %39783 = vmatmul.mubr.msk.f32.vlgmr.msra.gmra.mxu0 %vm179_vm2, %v43535_v28  ;;  %v963_v7 = vadd.f32 %v43128_v14, %v899_v63  ;;  %v43641_v9 = vstv %s42949_s5  ;;  %v540_v35 = vmul.f32 %v43637_v4, %v43175_v42  ;;  %v898_v63 = vmul.f32 0.125, %v46173_v61  ;;  %v46192_v58 = vld [vmem:[#allocation6_spill] sm:$0xff] }
  0xf4   : > { %39796 = vmatprep.mubr.msk.f32.mxu0 %vm179_vm2, %v43613_v49  ;;  %v541_v34 = vmul.f32 %v43637_v4, %v43180_v43  ;;  %v542_v12 = vmul.f32 %v43637_v4, %v43187_v45  ;;  %v543_v20 = vmul.f32 %v43637_v4, %v43192_v46  ;;  %v450_v26 = vadd.f32 %v442_v29, %v429_v57 }
  0xf5   : > { %39785 = vmatprep.subr.mxu1 %v963_v7  ;;  %v524_v62 = vadd.f32 %v516_v53, %v503_v59  ;;  %v553_v44 = vmul.f32 %v43641_v9, %v43212_v50  ;;  %v554_v60 = vmul.f32 %v43641_v9, %v43223_v54  ;;  %v555_v24 = vmul.f32 %v43641_v9, %v43228_v55 }
  0xf6   : > { %39786 = vmatpush3.msra.mxu1 %v963_v7  ;;  %v556_v41 = vmul.f32 %v43641_v9, %v43233_v56  ;;  %v43660_v57 = vstv %s42951_s6  ;;  %v43662_v29 = vmul.f32 0.015625, %v450_v26  ;;  %v462_v59 = vmul.f32 %v43543_v6, %v43403_v30  ;;  %v46176_v6 = vld [vmem:[#allocation5_spill] sm:$0xff] }
  0xf7   : > { %v561_v2 = vadd.f32 %v553_v44, %v540_v35  ;;  %v562_v13 = vadd.f32 %v554_v60, %v541_v34  ;;  %v563_v3 = vadd.f32 %v555_v24, %v542_v12  ;;  %v475_v53 = vmul.f32 %v43545_v0, %v43415_v11 }
  0xf8   : > { %v564_v48 = vadd.f32 %v556_v41, %v543_v20  ;;  %46174 = vst [vmem:[#allocation35_spill] sm:$0xff] %v43662_v29  ;;  %v43668_v7 = vmul.f32 0.015625, %v524_v62  ;;  %v962_v35 = vadd.f32 %v46168_v22, %v898_v63  ;;  %v574_v34 = vmul.f32 %v43660_v57, %v43277_v10 }
  0xf9   : > { %v575_v12 = vmul.f32 %v43660_v57, %v43282_v17  ;;  %v576_v20 = vmul.f32 %v43660_v57, %v43287_v18  ;;  %v536_v26 = vmul.f32 %v43637_v4, %v43165_v40  ;;  %v549_v44 = vmul.f32 %v43641_v9, %v46176_v6 }
  0xfa   : > { %46175 = vst [vmem:[#allocation36_spill] sm:$0xff] %v43668_v7  ;;  %v577_v0 = vmul.f32 %v43660_v57, %v43292_v19  ;;  %v43683_v62 = vstv %s42953_s7  ;;  %39787 = vmatprep.subr.mxu1 %v962_v35  ;;  %v582_v60 = vadd.f32 %v574_v34, %v561_v2  ;;  %v483_v63 = vadd.f32 %v475_v53, %v462_v59 }
  0xfb   : > { %v583_v24 = vadd.f32 %v575_v12, %v562_v13  ;;  %v584_v41 = vadd.f32 %v576_v20, %v563_v3  ;;  %39788 = vmatpush3.msra.mxu1 %v962_v35  ;;  %v496_v61 = vmul.f32 %v43566_v15, %v46166_v16  ;;  %v595_v8 = vmul.f32 %v43683_v62, %v43330_v33 }
  0xfc   : > { %v585_v28 = vadd.f32 %v577_v0, %v564_v48  ;;  %39790 = vmatmul.mubr.msk.f32.vlgmr.msra.gmra.mxu1 %vm179_vm2, %v43537_v36  ;;  %v596_v52 = vmul.f32 %v43683_v62, %v43335_v37  ;;  %v597_v2 = vmul.f32 %v43683_v62, %v43340_v38  ;;  %v557_v13 = vadd.f32 %v549_v44, %v536_v26 }
  0xfd   : > { %v598_v3 = vmul.f32 %v43683_v62, %v43345_v51  ;;  %v901_v48 = vmul.f32 0.125, %v43662_v29  ;;  %39803 = vmatprep.mubr.msk.f32.mxu1 %vm179_vm2, %v43668_v7  ;;  %v570_v15 = vmul.f32 %v43660_v57, %v43262_v5  ;;  %v43702_v59 = vadd.f32 %v595_v8, %v582_v60 }
  0xfe   : > { %v43704_v53 = vadd.f32 %v596_v52, %v583_v24  ;;  %v43706_v35 = vadd.f32 %v597_v2, %v584_v41  ;;  %v504_v12 = vadd.f32 %v496_v61, %v483_v63  ;;  %v517_v20 = vmul.f32 %v43598_v47, %v43487_v23 }
  0xff   : > { %46177 = vst [vmem:[#allocation5_spill] sm:$0xff] %v43702_v59  ;;  %v43708_v34 = vadd.f32 %v598_v3, %v585_v28  ;;  %v965_v26 = vadd.f32 %v43128_v14, %v901_v48  ;;  %v43713_v44 = vstv %s42955_s8  ;;  %v578_v0 = vadd.f32 %v570_v15, %v557_v13  ;;  %v46195_v59 = vld [vmem:[#allocation8_spill] sm:$0xff] }
 0x100   : > { %46178 = vst [vmem:[#allocation37_spill] sm:$0xff] %v43706_v35  ;;  %v591_v8 = vmul.f32 %v43683_v62, %v43305_v25  ;;  %v43717_v60 = vstv %s42957_s9  ;;  %v615_v28 = vmul.f32 %v43713_v44, %v43175_v42  ;;  %v616_v52 = vmul.f32 %v43713_v44, %v43180_v43 }
 0x101   : > { %46179 = vst [vmem:[#allocation38_spill] sm:$0xff] %v43708_v34  ;;  %39792 = vmatprep.subr.mxu0 %v965_v26  ;;  %v617_v47 = vmul.f32 %v43713_v44, %v43187_v45  ;;  %v618_v61 = vmul.f32 %v43713_v44, %v43192_v46  ;;  %v525_v24 = vadd.f32 %v517_v20, %v504_v12  ;;  %v900_v12 = vmul.f32 0.125, %v43613_v49 }
 0x102   : > { %39793 = vmatpush3.msra.mxu0 %v965_v26  ;;  %v628_v41 = vmul.f32 %v43717_v60, %v43212_v50  ;;  %v629_v63 = vmul.f32 %v43717_v60, %v43223_v54  ;;  %v630_v42 = vmul.f32 %v43717_v60, %v43228_v55  ;;  %v631_v43 = vmul.f32 %v43717_v60, %v43233_v56 }
 0x103   : > { %v599_v2 = vadd.f32 %v591_v8, %v578_v0  ;;  %v43736_v20 = vstv %s42959_s13  ;;  %v43738_v50 = vmul.f32 0.015625, %v525_v24  ;;  %v537_v54 = vmul.f32 %v43637_v4, %v43403_v30 }
 0x104   : > { %v636_v13 = vadd.f32 %v628_v41, %v615_v28  ;;  %v637_v3 = vadd.f32 %v629_v63, %v616_v52  ;;  %v638_v48 = vadd.f32 %v630_v42, %v617_v47  ;;  %v639_v15 = vadd.f32 %v631_v43, %v618_v61 }
 0x105   : > { %46180 = vst [vmem:[#allocation39_spill] sm:$0xff] %v43738_v50  ;;  %v964_v26 = vadd.f32 %v46168_v22, %v900_v12  ;;  %v649_v36 = vmul.f32 %v43736_v20, %v43277_v10  ;;  %v650_v0 = vmul.f32 %v43736_v20, %v43282_v17  ;;  %v651_v8 = vmul.f32 %v43736_v20, %v43287_v18 }
 0x106   : > { %v550_v28 = vmul.f32 %v43641_v9, %v43415_v11  ;;  %v43751_v52 = vmul.f32 0.015625, %v599_v2  ;;  %v652_v47 = vmul.f32 %v43736_v20, %v43292_v19  ;;  %v43755_v61 = vstv %s42961_s14 }
 0x107   : > { %39794 = vmatprep.subr.mxu0 %v964_v26  ;;  %v657_v24 = vadd.f32 %v649_v36, %v636_v13  ;;  %v658_v41 = vadd.f32 %v650_v0, %v637_v3  ;;  %v659_v10 = vadd.f32 %v651_v8, %v638_v48  ;;  %v611_v17 = vmul.f32 %v43713_v44, %v43165_v40 }
 0x108   : > { %46181 = vst [vmem:[#allocation40_spill] sm:$0xff] %v43751_v52  ;;  %v624_v63 = vmul.f32 %v43717_v60, %v46176_v6  ;;  %39795 = vmatpush3.msra.mxu0 %v964_v26  ;;  %v660_v42 = vadd.f32 %v652_v47, %v639_v15  ;;  %v670_v43 = vmul.f32 %v43755_v61, %v43330_v33  ;;  %v903_v48 = vmul.f32 0.125, %v43738_v50 }
 0x109   : > { %39797 = vmatmul.mubr.msk.f32.vlgmr.msra.gmra.mxu0 %vm179_vm2, %v43662_v29  ;;  %v671_v2 = vmul.f32 %v43755_v61, %v43335_v37  ;;  %v672_v36 = vmul.f32 %v43755_v61, %v43340_v38  ;;  %v558_v13 = vadd.f32 %v550_v28, %v537_v54  ;;  %v673_v3 = vmul.f32 %v43755_v61, %v43345_v51 }
 0x10a   : > { %39810 = vmatprep.mubr.msk.f32.mxu0 %vm179_vm2, %v43751_v52  ;;  %v571_v15 = vmul.f32 %v43660_v57, %v46166_v16  ;;  %v43776_v33 = vadd.f32 %v670_v43, %v657_v24  ;;  %v632_v26 = vadd.f32 %v624_v63, %v611_v17  ;;  %v645_v54 = vmul.f32 %v43736_v20, %v43262_v5 }
 0x10b   : > { %v43778_v12 = vadd.f32 %v671_v2, %v658_v41  ;;  %v43780_v37 = vadd.f32 %v672_v36, %v659_v10  ;;  %v43784_v0 = vadd.f32 %v673_v3, %v660_v42  ;;  %v967_v8 = vadd.f32 %v43128_v14, %v903_v48 }
 0x10c   : > { %46182 = vst [vmem:[#allocation41_spill] sm:$0xff] %v43776_v33  ;;  %v43787_v28 = vstv %s42963_s15  ;;  %v579_v47 = vadd.f32 %v571_v15, %v558_v13  ;;  %v592_v24 = vmul.f32 %v43683_v62, %v43487_v23  ;;  %v43791_v43 = vstv %s42965_s16 }
 0x10d   : > { %46183 = vst [vmem:[#allocation42_spill] sm:$0xff] %v43778_v12  ;;  %46184 = vst [vmem:[#allocation43_spill] sm:$0xff] %v43780_v37  ;;  %v653_v41 = vadd.f32 %v645_v54, %v632_v26  ;;  %v666_v10 = vmul.f32 %v43755_v61, %v43305_v25  ;;  %39799 = vmatprep.subr.mxu1 %v967_v8  ;;  %v692_v17 = vmul.f32 %v43787_v28, %v43187_v45 }
 0x10e   : > { %46185 = vst [vmem:[#allocation44_spill] sm:$0xff] %v43784_v0  ;;  %v693_v63 = vmul.f32 %v43787_v28, %v43192_v46  ;;  %39800 = vmatpush3.msra.mxu1 %v967_v8  ;;  %v705_v42 = vmul.f32 %v43791_v43, %v43228_v55  ;;  %v706_v2 = vmul.f32 %v43791_v43, %v43233_v56  ;;  %v902_v15 = vmul.f32 0.125, %v43668_v7  ;;  %v46191_v0 = vld [vmem:[#allocation4_spill] sm:$0xff] }
 0x10f   : > { %v600_v36 = vadd.f32 %v592_v24, %v579_v47  ;;  %v674_v13 = vadd.f32 %v666_v10, %v653_v41  ;;  %v43804_v26 = vstv %s42967_s17  ;;  %v612_v54 = vmul.f32 %v43713_v44, %v43403_v30 }
 0x110   : > { %v713_v3 = vadd.f32 %v705_v42, %v692_v17  ;;  %v714_v48 = vadd.f32 %v706_v2, %v693_v63  ;;  %v625_v8 = vmul.f32 %v43717_v60, %v43415_v11  ;;  %v966_v29 = vadd.f32 %v46168_v22, %v902_v15 }
 0x111   : > { %v726_v49 = vmul.f32 %v43804_v26, %v43287_v18  ;;  %v43813_v47 = vmul.f32 0.015625, %v600_v36  ;;  %v43815_v24 = vmul.f32 0.015625, %v674_v13  ;;  %v727_v41 = vmul.f32 %v43804_v26, %v43292_v19 }
 0x112   : > { %v43819_v10 = vstv %s42969_s18  ;;  %v686_v17 = vmul.f32 %v43787_v28, %v43165_v40  ;;  %v699_v63 = vmul.f32 %v43791_v43, %v46176_v6  ;;  %39801 = vmatprep.subr.mxu1 %v966_v29  ;;  %v633_v15 = vadd.f32 %v625_v8, %v612_v54 }
 0x113   : > { %46186 = vst [vmem:[#allocation45_spill] sm:$0xff] %v43813_v47  ;;  %46187 = vst [vmem:[#allocation46_spill] sm:$0xff] %v43815_v24  ;;  %v734_v42 = vadd.f32 %v726_v49, %v713_v3  ;;  %39802 = vmatpush3.msra.mxu1 %v966_v29  ;;  %v735_v2 = vadd.f32 %v727_v41, %v714_v48  ;;  %v747_v36 = vmul.f32 %v43819_v10, %v43340_v38  ;;  %v46190_v41 = vld [vmem:[#allocation3_spill] sm:$0xff] }
 0x114   : > { %39804 = vmatmul.mubr.msk.f32.vlgmr.msra.gmra.mxu1 %vm179_vm2, %v43738_v50  ;;  %v646_v13 = vmul.f32 %v43736_v20, %v46166_v16  ;;  %v687_v7 = vmul.f32 %v43787_v28, %v43403_v30  ;;  %v748_v37 = vmul.f32 %v43819_v10, %v43345_v51  ;;  %v905_v49 = vmul.f32 0.125, %v43813_v47 }
 0x115   : > { %39817 = vmatprep.mubr.msk.f32.mxu1 %vm179_vm2, %v43815_v24  ;;  %v700_v29 = vmul.f32 %v43791_v43, %v43415_v11  ;;  %v707_v3 = vadd.f32 %v699_v63, %v686_v17  ;;  %v720_v48 = vmul.f32 %v43804_v26, %v43262_v5  ;;  %v43842_v54 = vadd.f32 %v747_v36, %v734_v42 }
 0x116   : > { %v43844_v8 = vadd.f32 %v748_v37, %v735_v2  ;;  %v538_v50 = vmul.f32 %v43637_v4, %v46190_v41  ;;  %v539_v35 = vmul.f32 %v43637_v4, %v46191_v0  ;;  %v551_v34 = vmul.f32 %v43641_v9, %v46192_v58 }
 0x117   : > { %46188 = vst [vmem:[#allocation47_spill] sm:$0xff] %v43842_v54  ;;  %v654_v33 = vadd.f32 %v646_v13, %v633_v15  ;;  %v969_v17 = vadd.f32 %v43128_v14, %v905_v49  ;;  %v43853_v63 = vstv %s42971_s19  ;;  %v43855_v12 = vstv %s42973_s20  ;;  %v46193_v13 = vld [vmem:[#allocation7_spill] sm:$0xff] }
 0x118   : > { %46189 = vst [vmem:[#allocation48_spill] sm:$0xff] %v43844_v8  ;;  %v667_v37 = vmul.f32 %v43755_v61, %v43487_v23  ;;  %v708_v42 = vadd.f32 %v700_v29, %v687_v7  ;;  %v721_v2 = vmul.f32 %v43804_v26, %v46166_v16  ;;  %v728_v36 = vadd.f32 %v720_v48, %v707_v3 }
 0x119   : > { %v741_v4 = vmul.f32 %v43819_v10, %v43305_v25  ;;  %39806 = vmatprep.subr.mxu0 %v969_v17  ;;  %v762_v58 = vmul.f32 %v43853_v63, %v43403_v30  ;;  %v767_v0 = vmul.f32 %v43853_v63, %v43187_v45  ;;  %v768_v15 = vmul.f32 %v43853_v63, %v43192_v46  ;;  %v46194_v30 = vld [vmem:[#allocation10_spill] sm:$0xff] }
 0x11a   : > { %v552_v7 = vmul.f32 %v43641_v9, %v46193_v13  ;;  %39807 = vmatpush3.msra.mxu0 %v969_v17  ;;  %v761_v49 = vmul.f32 %v43853_v63, %v43165_v40  ;;  %v774_v29 = vmul.f32 %v43855_v12, %v46176_v6  ;;  %v775_v3 = vmul.f32 %v43855_v12, %v43415_v11 }
 0x11b   : > { %v43878_v48 = vmul.f32 0.015625, %v46194_v30  ;;  %v780_v45 = vmul.f32 %v43855_v12, %v43228_v55  ;;  %v781_v46 = vmul.f32 %v43855_v12, %v43233_v56  ;;  %v559_v9 = vadd.f32 %v551_v34, %v538_v50  ;;  %v46196_v34 = vld [vmem:[#allocation9_spill] sm:$0xff] }
 0x11c   : > { %v675_v41 = vadd.f32 %v667_v37, %v654_v33  ;;  %v729_v17 = vadd.f32 %v721_v2, %v708_v42  ;;  %v742_v40 = vmul.f32 %v43819_v10, %v43487_v23  ;;  %v749_v6 = vadd.f32 %v741_v4, %v728_v36 }
 0x11d   : > { %v783_v13 = vadd.f32 %v775_v3, %v762_v58  ;;  %v788_v54 = vadd.f32 %v780_v45, %v767_v0  ;;  %v789_v11 = vadd.f32 %v781_v46, %v768_v15  ;;  %v560_v30 = vadd.f32 %v552_v7, %v539_v35 }
 0x11e   : > { %v782_v8 = vadd.f32 %v774_v29, %v761_v49  ;;  %v904_v1 = vmul.f32 0.125, %v43751_v52  ;;  %v43887_v55 = vstv %s42975_s21  ;;  %v572_v56 = vmul.f32 %v43660_v57, %v46195_v59  ;;  %v46200_v49 = vld [vmem:[#allocation18_spill] sm:$0xff] }
 0x11f   : > { %v573_v50 = vmul.f32 %v43660_v57, %v46196_v34  ;;  %v795_v33 = vmul.f32 %v43887_v55, %v43262_v5  ;;  %v796_v37 = vmul.f32 %v43887_v55, %v46166_v16  ;;  %v43897_v42 = vmul.f32 0.015625, %v675_v41  ;;  %v46198_v5 = vld [vmem:[#allocation11_spill] sm:$0xff]  ;;  %v46199_v16 = vld [vmem:[#allocation17_spill] sm:$0xff] }
 0x120   : > { %v968_v35 = vadd.f32 %v46168_v22, %v904_v1  ;;  %v801_v2 = vmul.f32 %v43887_v55, %v43287_v18  ;;  %v43902_v36 = vstv %s42977_s22  ;;  %v750_v4 = vadd.f32 %v742_v40, %v729_v17 }
 0x121   : > { %v43904_v59 = vmul.f32 0.015625, %v749_v6  ;;  %v802_v57 = vmul.f32 %v43887_v55, %v43292_v19  ;;  %v804_v58 = vadd.f32 %v796_v37, %v783_v13  ;;  %v43909_v0 = vmul.f32 0.015625, %v46198_v5 }
 0x122   : > { %v43912_v15 = vmul.f32 0.015625, %v46199_v16  ;;  %39808 = vmatprep.subr.mxu0 %v968_v35  ;;  %v803_v1 = vadd.f32 %v795_v33, %v782_v8  ;;  %v809_v7 = vadd.f32 %v801_v2, %v788_v54  ;;  %v43915_v18 = vmul.f32 0.015625, %v46200_v49  ;;  %v43961_v33 = vld [vmem:[%s46071_s1 + $0x50] sm:$0xff] }
 0x123   : > { %46197 = vst [vmem:[#allocation3_spill] sm:$0xff] %v43904_v59  ;;  %39809 = vmatpush3.msra.mxu0 %v968_v35  ;;  %v810_v29 = vadd.f32 %v802_v57, %v789_v11  ;;  %v816_v3 = vmul.f32 %v43902_v36, %v43305_v25  ;;  %v817_v19 = vmul.f32 %v43902_v36, %v43487_v23  ;;  %v43927_v8 = vmul.f32 0.015625, %v750_v4  ;;  %v43949_v11 = vld [vmem:[%s46071_s1 + $0x10] sm:$0xff] }
 0x124   : > { %v580_v45 = vadd.f32 %v572_v56, %v559_v9  ;;  %v581_v46 = vadd.f32 %v573_v50, %v560_v30  ;;  %v593_v41 = vmul.f32 %v43683_v62, %v43320_v31  ;;  %39811 = vmatmul.mubr.msk.f32.vlgmr.msra.gmra.mxu0 %vm179_vm2, %v43813_v47  ;;  %v822_v54 = vmul.f32 %v43902_v36, %v43340_v38  ;;  %v43006_v31 = vld [vmem:[%s46071_s1 + $0x18] sm:$0xff] }
 0x125   : > { %v823_v17 = vmul.f32 %v43902_v36, %v43345_v51  ;;  %v825_v25 = vadd.f32 %v817_v19, %v804_v58  ;;  %v907_v40 = vmul.f32 0.125, %v43897_v42  ;;  %39824 = vmatprep.mubr.msk.f32.mxu0 %vm179_vm2, %v43904_v59  ;;  %v689_v23 = vmul.f32 %v43006_v31, %v43787_v28  ;;  %v43007_v38 = vld [vmem:[%s46071_s1 + $0x58] sm:$0xff] }
 0x126   : > { %v702_v9 = vmul.f32 %v43007_v38, %v43791_v43  ;;  %v824_v6 = vadd.f32 %v816_v3, %v803_v1  ;;  %v43942_v51 = vadd.f32 %v822_v54, %v809_v7  ;;  %v594_v13 = vmul.f32 %v43683_v62, %v43325_v32  ;;  %v43010_v58 = vld [vmem:[%s46071_s1 + $0x98] sm:$0xff]  ;;  %v46201_v3 = vld [vmem:[#allocation26_spill] sm:$0xff] }
 0x127   : > { %v613_v30 = vmul.f32 %v43949_v11, %v43713_v44  ;;  %v43953_v56 = vadd.f32 %v823_v17, %v810_v29  ;;  %v43955_v34 = vmul.f32 0.015625, %v825_v25  ;;  %v614_v50 = vmul.f32 %v43006_v31, %v43713_v44 }
 0x128   : > { %v626_v32 = vmul.f32 %v43961_v33, %v43717_v60  ;;  %v627_v62 = vmul.f32 %v43007_v38, %v43717_v60  ;;  %v688_v37 = vmul.f32 %v43949_v11, %v43787_v28  ;;  %v701_v35 = vmul.f32 %v43961_v33, %v43791_v43 }
 0x129   : > { %v971_v2 = vadd.f32 %v43128_v14, %v907_v40  ;;  %v906_v44 = vmul.f32 0.125, %v43815_v24  ;;  %v909_v4 = vmul.f32 0.125, %v43927_v8  ;;  %v710_v57 = vadd.f32 %v702_v9, %v689_v23 }
 0x12a   : > { %v723_v5 = vmul.f32 %v43010_v58, %v43804_v26  ;;  %v43977_v60 = vmul.f32 0.015625, %v824_v6  ;;  %v908_v16 = vmul.f32 0.125, %v43904_v59  ;;  %v913_v49 = vmul.f32 0.125, %v43909_v0 }
 0x12b   : > { %39813 = vmatprep.subr.mxu1 %v971_v2  ;;  %v970_v1 = vadd.f32 %v46168_v22, %v906_v44  ;;  %v973_v7 = vadd.f32 %v43128_v14, %v909_v4  ;;  %v911_v29 = vmul.f32 0.125, %v43955_v34  ;;  %v43985_v19 = vmul.f32 0.015625, %v46201_v3  ;;  %v46202_v44 = vld [vmem:[#allocation25_spill] sm:$0xff]  ;;  %v43011_v3 = vld [vmem:[%s46071_s1 + $0x90] sm:$0xff] }
 0x12c   : > { %v601_v54 = vadd.f32 %v593_v41, %v580_v45  ;;  %v602_v17 = vadd.f32 %v594_v13, %v581_v46  ;;  %v635_v25 = vadd.f32 %v627_v62, %v614_v50  ;;  %39814 = vmatpush3.msra.mxu1 %v971_v2  ;;  %v648_v40 = vmul.f32 %v43010_v58, %v43736_v20  ;;  %v43012_v41 = vld [vmem:[%s46071_s1 + $0xd8] sm:$0xff] }
 0x12d   : > { %v709_v23 = vadd.f32 %v701_v35, %v688_v37  ;;  %39815 = vmatprep.subr.mxu1 %v970_v1  ;;  %39820 = vmatprep.subr.mxu0 %v973_v7  ;;  %v972_v9 = vadd.f32 %v46168_v22, %v908_v16  ;;  %v912_v6 = vmul.f32 0.125, %v43878_v48  ;;  %v43991_v4 = vmul.f32 0.015625, %v46202_v44 }
 0x12e   : > { %v722_v45 = vmul.f32 %v43011_v3, %v43804_v26  ;;  %v731_v46 = vadd.f32 %v723_v5, %v710_v57  ;;  %v744_v13 = vmul.f32 %v43012_v41, %v43819_v10  ;;  %39816 = vmatpush3.msra.mxu1 %v970_v1  ;;  %39821 = vmatpush3.msra.mxu0 %v973_v7  ;;  %v910_v35 = vmul.f32 0.125, %v43977_v60 }
 0x12f   : > { %v634_v50 = vadd.f32 %v626_v32, %v613_v30  ;;  %39818 = vmatmul.mubr.msk.f32.vlgmr.msra.gmra.mxu1 %vm179_vm2, %v43897_v42  ;;  %39822 = vmatprep.subr.mxu0 %v972_v9  ;;  %v977_v62 = vadd.f32 %v43128_v14, %v913_v49  ;;  %v975_v37 = vadd.f32 %v43128_v14, %v911_v29  ;;  %v917_v30 = vmul.f32 0.125, %v43985_v19 }
 0x130   : > { %v647_v2 = vmul.f32 %v43011_v3, %v43736_v20  ;;  %v764_v57 = vmul.f32 %v43006_v31, %v43853_v63  ;;  %v777_v5 = vmul.f32 %v43007_v38, %v43855_v12  ;;  %39831 = vmatprep.mubr.msk.f32.mxu1 %vm179_vm2, %v43977_v60  ;;  %39823 = vmatpush3.msra.mxu0 %v972_v9  ;;  %v44012_v32 = vmul.f32 0.015625, %v602_v17  ;;  %v43013_v38 = vld [vmem:[%s46071_s1 + $0xd0] sm:$0xff] }
 0x131   : > { %v656_v16 = vadd.f32 %v648_v40, %v635_v25  ;;  %v669_v1 = vmul.f32 %v43012_v41, %v43755_v61  ;;  %39825 = vmatmul.mubr.msk.f32.vlgmr.msra.gmra.mxu0 %vm179_vm2, %v43927_v8  ;;  %39834 = vmatprep.subr.mxu0 %v977_v62  ;;  %v976_v20 = vadd.f32 %v46168_v22, %v912_v6  ;;  %v915_v29 = vmul.f32 0.125, %v43915_v18 }
 0x132   : > { %v730_v31 = vadd.f32 %v722_v45, %v709_v23  ;;  %v743_v7 = vmul.f32 %v43013_v38, %v43819_v10  ;;  %v752_v49 = vadd.f32 %v744_v13, %v731_v46  ;;  %39835 = vmatpush3.msra.mxu0 %v977_v62  ;;  %39838 = vmatprep.mubr.msk.f32.mxu0 %vm179_vm2, %v43878_v48  ;;  %v916_v23 = vmul.f32 0.125, %v43991_v4 }
 0x133   : > { %v763_v17 = vmul.f32 %v43949_v11, %v43853_v63  ;;  %v776_v25 = vmul.f32 %v43961_v33, %v43855_v12  ;;  %39827 = vmatprep.subr.mxu1 %v975_v37  ;;  %39836 = vmatprep.subr.mxu0 %v976_v20  ;;  %v974_v40 = vadd.f32 %v46168_v22, %v910_v35  ;;  %v44032_v9 = vmul.f32 0.015625, %v43620_v39 }
 0x134   : > { %v785_v6 = vadd.f32 %v777_v5, %v764_v57  ;;  %v798_v44 = vmul.f32 %v43010_v58, %v43887_v55  ;;  %39828 = vmatpush3.msra.mxu1 %v975_v37  ;;  %39837 = vmatpush3.msra.mxu0 %v976_v20  ;;  %v981_v45 = vadd.f32 %v43128_v14, %v917_v30  ;;  %v44036_v11 = vmul.f32 0.015625, %v601_v54 }
 0x135   : > { %v655_v46 = vadd.f32 %v647_v2, %v634_v50  ;;  %v668_v33 = vmul.f32 %v43013_v38, %v43755_v61  ;;  %39829 = vmatprep.subr.mxu1 %v974_v40  ;;  %39839 = vmatmul.mubr.msk.f32.vlgmr.msra.gmra.mxu0 %vm179_vm2, %v43909_v0  ;;  %v914_v13 = vmul.f32 0.125, %v43912_v15  ;;  %v677_v39 = vadd.f32 %v669_v1, %v656_v16 }
 0x136   : > { %v751_v62 = vadd.f32 %v743_v7, %v730_v31  ;;  %39848 = vmatprep.subr.mxu0 %v981_v45  ;;  %39830 = vmatpush3.msra.mxu1 %v974_v40  ;;  %v979_v58 = vadd.f32 %v43128_v14, %v915_v29  ;;  %v921_v37 = vmul.f32 0.125, %v44012_v32  ;;  %v44045_v54 = vmul.f32 0.015625, %v43617_v27 }
 0x137   : > { %v784_v50 = vadd.f32 %v776_v25, %v763_v17  ;;  %v797_v61 = vmul.f32 %v43011_v3, %v43887_v55  ;;  %39849 = vmatpush3.msra.mxu0 %v981_v45  ;;  %39852 = vmatprep.mubr.msk.f32.mxu0 %vm179_vm2, %v43991_v4  ;;  %v980_v35 = vadd.f32 %v46168_v22, %v916_v23  ;;  %v44051_v2 = vmul.f32 0.015625, %v752_v49  ;;  %v46203_v23 = vld [vmem:[#allocation13_spill] sm:$0xff] }
 0x138   : > { %v806_v57 = vadd.f32 %v798_v44, %v785_v6  ;;  %v819_v5 = vmul.f32 %v43012_v41, %v43902_v36  ;;  %39832 = vmatmul.mubr.msk.f32.vlgmr.msra.gmra.mxu1 %vm179_vm2, %v43955_v34  ;;  %39841 = vmatprep.subr.mxu1 %v979_v58  ;;  %v919_v27 = vmul.f32 0.125, %v44032_v9  ;;  %v676_v30 = vadd.f32 %v668_v33, %v655_v46  ;;  %v43014_v44 = vld [vmem:[%s46071_s1 + $0x28] sm:$0xff] }
 0x139   : > { %39850 = vmatprep.subr.mxu0 %v980_v35  ;;  %39842 = vmatpush3.msra.mxu1 %v979_v58  ;;  %v978_v3 = vadd.f32 %v46168_v22, %v914_v13  ;;  %v920_v16 = vmul.f32 0.125, %v44036_v11  ;;  %v44059_v1 = vmul.f32 0.015625, %v677_v39  ;;  %v985_v41 = vadd.f32 %v43128_v14, %v921_v37  ;;  %v43015_v46 = vld [vmem:[%s46071_s1 + $0x68] sm:$0xff] }
 0x13a   : > { %39845 = vmatprep.mubr.msk.f32.mxu1 %vm179_vm2, %v43912_v15  ;;  %39851 = vmatpush3.msra.mxu0 %v980_v35  ;;  %v44064_v20 = vmul.f32 0.015625, %v751_v62  ;;  %v805_v31 = vadd.f32 %v797_v61, %v784_v50  ;;  %v818_v7 = vmul.f32 %v43013_v38, %v43902_v36  ;;  %v918_v49 = vmul.f32 0.125, %v44045_v54  ;;  %v46204_v61 = vld [vmem:[#allocation12_spill] sm:$0xff] }
 0x13b   : > { %39843 = vmatprep.subr.mxu1 %v978_v3  ;;  %39853 = vmatmul.mubr.msk.f32.vlgmr.msra.gmra.mxu0 %vm179_vm2, %v43985_v19  ;;  %v827_v29 = vadd.f32 %v819_v5, %v806_v57  ;;  %v983_v17 = vadd.f32 %v43128_v14, %v919_v27  ;;  %v925_v25 = vmul.f32 0.125, %v44051_v2  ;;  %v44072_v40 = vmul.f32 0.015625, %v676_v30  ;;  %v43016_v57 = vld [vmem:[%s46071_s1 + $0x20] sm:$0xff] }
 0x13c   : > { %39862 = vmatprep.subr.mxu0 %v985_v41  ;;  %39844 = vmatpush3.msra.mxu1 %v978_v3  ;;  %v984_v38 = vadd.f32 %v46168_v22, %v920_v16  ;;  %v44078_v6 = vmul.f32 0.015625, %v46203_v23  ;;  %v691_v45 = vmul.f32 %v43014_v44, %v43787_v28  ;;  %v704_v33 = vmul.f32 %v43015_v46, %v43791_v43  ;;  %v43017_v27 = vld [vmem:[%s46071_s1 + $0x60] sm:$0xff] }
 0x13d   : > { %39863 = vmatpush3.msra.mxu0 %v985_v41  ;;  %39866 = vmatprep.mubr.msk.f32.mxu0 %vm179_vm2, %v44036_v11  ;;  %v923_v13 = vmul.f32 0.125, %v44059_v1  ;;  %v826_v39 = vadd.f32 %v818_v7, %v805_v31  ;;  %v982_v62 = vadd.f32 %v46168_v22, %v918_v49  ;;  %v924_v58 = vmul.f32 0.125, %v44064_v20  ;;  %v43018_v41 = vld [vmem:[%s46071_s1 + $0xa8] sm:$0xff]  ;;  %v43019_v23 = vld [vmem:[%s46071_s1 + $0xa0] sm:$0xff] }
 0x13e   : > { %39846 = vmatmul.mubr.msk.f32.vlgmr.msra.gmra.mxu1 %vm179_vm2, %v43915_v18  ;;  %39855 = vmatprep.subr.mxu1 %v983_v17  ;;  %v44093_v37 = vmul.f32 0.015625, %v827_v29  ;;  %v989_v50 = vadd.f32 %v43128_v14, %v925_v25  ;;  %v44099_v35 = vmul.f32 0.015625, %v46204_v61  ;;  %v690_v5 = vmul.f32 %v43016_v57, %v43787_v28  ;;  %v46205_v29 = vld [vmem:[#allocation28_spill] sm:$0xff] }
 0x13f   : > { %39864 = vmatprep.subr.mxu0 %v984_v38  ;;  %39856 = vmatpush3.msra.mxu1 %v983_v17  ;;  %v703_v30 = vmul.f32 %v43017_v27, %v43791_v43  ;;  %v922_v3 = vmul.f32 0.125, %v44072_v40  ;;  %v712_v16 = vadd.f32 %v704_v33, %v691_v45  ;;  %v725_v31 = vmul.f32 %v43018_v41, %v43804_v26 }
 0x140   : > { %39859 = vmatprep.mubr.msk.f32.mxu1 %vm179_vm2, %v44045_v54  ;;  %39865 = vmatpush3.msra.mxu0 %v984_v38  ;;  %v987_v28 = vadd.f32 %v43128_v14, %v923_v13  ;;  %v929_v7 = vmul.f32 0.125, %v44078_v6  ;;  %v44118_v43 = vmul.f32 0.015625, %v826_v39  ;;  %v988_v49 = vadd.f32 %v46168_v22, %v924_v58  ;;  %v46206_v39 = vld [vmem:[#allocation21_spill] sm:$0xff] }
 0x141   : > { %39857 = vmatprep.subr.mxu1 %v982_v62  ;;  %39867 = vmatmul.mubr.msk.f32.vlgmr.msra.gmra.mxu0 %vm179_vm2, %v44012_v32  ;;  %v44124_v17 = vmul.f32 0.015625, %v46205_v29  ;;  %v927_v25 = vmul.f32 0.125, %v44093_v37  ;;  %v711_v38 = vadd.f32 %v703_v30, %v690_v5  ;;  %v724_v45 = vmul.f32 %v43019_v23, %v43804_v26  ;;  %v46207_v5 = vld [vmem:[#allocation27_spill] sm:$0xff] }
 0x142   : > { %39876 = vmatprep.subr.mxu0 %v989_v50  ;;  %39858 = vmatpush3.msra.mxu1 %v982_v62  ;;  %v986_v33 = vadd.f32 %v46168_v22, %v922_v3  ;;  %v928_v13 = vmul.f32 0.125, %v44099_v35  ;;  %v44136_v62 = vmul.f32 0.015625, %v46206_v39  ;;  %v733_v58 = vadd.f32 %v725_v31, %v712_v16 }
 0x143   : > { %39877 = vmatpush3.msra.mxu0 %v989_v50  ;;  %39880 = vmatprep.mubr.msk.f32.mxu0 %vm179_vm2, %v44064_v20  ;;  %v43020_v50 = vld [vmem:[%s46071_s1 + $0xe8] sm:$0xff]  ;;  %v993_v26 = vadd.f32 %v43128_v14, %v929_v7  ;;  %v44146_v30 = vmul.f32 0.015625, %v46207_v5  ;;  %v926_v3 = vmul.f32 0.125, %v44118_v43  ;;  %v766_v16 = vmul.f32 %v43014_v44, %v43853_v63  ;;  %v46208_v7 = vld [vmem:[#allocation20_spill] sm:$0xff] }
 0x144   : > { %39860 = vmatmul.mubr.msk.f32.vlgmr.msra.gmra.mxu1 %vm179_vm2, %v44032_v9  ;;  %39869 = vmatprep.subr.mxu1 %v987_v28  ;;  %v746_v61 = vmul.f32 %v43020_v50, %v43819_v10  ;;  %v779_v31 = vmul.f32 %v43015_v46, %v43855_v12  ;;  %v44156_v29 = vmul.f32 0.015625, %v46208_v7  ;;  %v44159_v39 = vmul.f32 0.015625, %v43704_v53  ;;  %v43021_v46 = vld [vmem:[%s46071_s1 + $0xe0] sm:$0xff] }
 0x145   : > { %39878 = vmatprep.subr.mxu0 %v988_v49  ;;  %39870 = vmatpush3.msra.mxu1 %v987_v28  ;;  %v991_v28 = vadd.f32 %v43128_v14, %v927_v25  ;;  %v992_v44 = vadd.f32 %v46168_v22, %v928_v13  ;;  %v732_v5 = vadd.f32 %v724_v45, %v711_v38  ;;  %v931_v53 = vmul.f32 0.125, %v44136_v62 }
 0x146   : > { %39873 = vmatprep.mubr.msk.f32.mxu1 %vm179_vm2, %v44072_v40  ;;  %39879 = vmatpush3.msra.mxu0 %v988_v49  ;;  %v933_v49 = vmul.f32 0.125, %v44124_v17  ;;  %v745_v25 = vmul.f32 %v43021_v46, %v43819_v10  ;;  %v778_v7 = vmul.f32 %v43017_v27, %v43855_v12  ;;  %v990_v38 = vadd.f32 %v46168_v22, %v926_v3  ;;  %v46210_v3 = vld [vmem:[#allocation2_spill] sm:$0xff] }
 0x147   : > { %39871 = vmatprep.subr.mxu1 %v986_v33  ;;  %39881 = vmatmul.mubr.msk.f32.vlgmr.msra.gmra.mxu0 %vm179_vm2, %v44051_v2  ;;  %v932_v45 = vmul.f32 0.125, %v44146_v30  ;;  %v44176_v13 = vmul.f32 0.015625, %v43624_v21  ;;  %v787_v10 = vadd.f32 %v779_v31, %v766_v16  ;;  %v930_v27 = vmul.f32 0.125, %v44156_v29 }
 0x148   : > { %39890 = vmatprep.subr.mxu0 %v993_v26  ;;  %39872 = vmatpush3.msra.mxu1 %v986_v33  ;;  %v754_v33 = vadd.f32 %v746_v61, %v733_v58  ;;  %v800_v58 = vmul.f32 %v43018_v41, %v43887_v55  ;;  %v753_v21 = vadd.f32 %v745_v25, %v732_v5  ;;  %v937_v61 = vmul.f32 0.125, %v44159_v39 }
 0x149   : > { %39891 = vmatpush3.msra.mxu0 %v993_v26  ;;  %39894 = vmatprep.mubr.msk.f32.mxu0 %vm179_vm2, %v44099_v35  ;;  %v765_v26 = vmul.f32 %v43016_v57, %v43853_v63  ;;  %v997_v63 = vadd.f32 %v43128_v14, %v933_v49  ;;  %v46209_v57 = vld [vmem:[#allocation5_spill] sm:$0xff]  ;;  %v995_v41 = vadd.f32 %v43128_v14, %v931_v53  ;;  %v44191_v16 = vmul.f32 0.015625, %v46210_v3 }
 0x14a   : > { %39874 = vmatmul.mubr.msk.f32.vlgmr.msra.gmra.mxu1 %vm179_vm2, %v44059_v1  ;;  %39883 = vmatprep.subr.mxu1 %v991_v28  ;;  %v44183_v12 = vmul.f32 0.015625, %v46209_v57  ;;  %v996_v49 = vadd.f32 %v46168_v22, %v932_v45  ;;  %v808_v5 = vadd.f32 %v800_v58, %v787_v10  ;;  %v821_v25 = vmul.f32 %v43020_v50, %v43902_v36 }
 0x14b   : > { %39892 = vmatprep.subr.mxu0 %v992_v44  ;;  %39884 = vmatpush3.msra.mxu1 %v991_v28  ;;  %v786_v31 = vadd.f32 %v778_v7, %v765_v26  ;;  %v799_v28 = vmul.f32 %v43019_v23, %v43887_v55  ;;  %v935_v53 = vmul.f32 0.125, %v44176_v13  ;;  %v994_v55 = vadd.f32 %v46168_v22, %v930_v27  ;;  %v46211_v26 = vld [vmem:[#allocation42_spill] sm:$0xff]  ;;  %v46212_v27 = vld [vmem:[#allocation41_spill] sm:$0xff] }
 0x14c   : > { %39887 = vmatprep.mubr.msk.f32.mxu1 %vm179_vm2, %v44118_v43  ;;  %39893 = vmatpush3.msra.mxu0 %v992_v44  ;;  %v44197_v44 = vmul.f32 0.015625, %v754_v33  ;;  %v936_v23 = vmul.f32 0.125, %v44183_v12  ;;  %v44206_v7 = vmul.f32 0.015625, %v46211_v26  ;;  %v1001_v50 = vadd.f32 %v43128_v14, %v937_v61 }
 0x14d   : > { %39885 = vmatprep.subr.mxu1 %v990_v38  ;;  %39895 = vmatmul.mubr.msk.f32.vlgmr.msra.gmra.mxu0 %vm179_vm2, %v44078_v6  ;;  %v44211_v33 = vmul.f32 0.015625, %v753_v21  ;;  %v820_v45 = vmul.f32 %v43021_v46, %v43902_v36  ;;  %v934_v10 = vmul.f32 0.125, %v44191_v16  ;;  %v829_v58 = vadd.f32 %v821_v25, %v808_v5  ;;  %v46213_v46 = vld [vmem:[#allocation15_spill] sm:$0xff]  ;;  %v46216_v25 = vld [vmem:[#allocation14_spill] sm:$0xff] }
 0x14e   : > { %39904 = vmatprep.subr.mxu0 %v997_v63  ;;  %39886 = vmatpush3.msra.mxu1 %v990_v38  ;;  %v807_v38 = vadd.f32 %v799_v28, %v786_v31  ;;  %v941_v57 = vmul.f32 0.125, %v44197_v44  ;;  %v1000_v36 = vadd.f32 %v46168_v22, %v936_v23  ;;  %v44226_v21 = vmul.f32 0.015625, %v46213_v46 }
 0x14f   : > { %39905 = vmatpush3.msra.mxu0 %v997_v63  ;;  %39908 = vmatprep.mubr.msk.f32.mxu0 %vm179_vm2, %v44146_v30  ;;  %v999_v63 = vadd.f32 %v43128_v14, %v935_v53  ;;  %v939_v61 = vmul.f32 0.125, %v44206_v7  ;;  %v998_v31 = vadd.f32 %v46168_v22, %v934_v10  ;;  %v940_v28 = vmul.f32 0.125, %v44211_v33 }
 0x150   : > { %39888 = vmatmul.mubr.msk.f32.vlgmr.msra.gmra.mxu1 %vm179_vm2, %v44093_v37  ;;  %39897 = vmatprep.subr.mxu1 %v995_v41  ;;  %46214 = vst [vmem:[#allocation4_spill] sm:$0xff] %v44226_v21  ;;  %v828_v3 = vadd.f32 %v820_v45, %v807_v38  ;;  %v1005_v5 = vadd.f32 %v43128_v14, %v941_v57  ;;  %v44239_v53 = vmul.f32 0.015625, %v46216_v25  ;;  %v945_v26 = vmul.f32 0.125, %v44226_v21  ;;  %v46218_v45 = vld [vmem:[#allocation30_spill] sm:$0xff] }
 0x151   : > { %39906 = vmatprep.subr.mxu0 %v996_v49  ;;  %39898 = vmatpush3.msra.mxu1 %v995_v41  ;;  %v44220_v41 = vmul.f32 0.015625, %v46212_v27  ;;  %v1003_v23 = vadd.f32 %v43128_v14, %v939_v61  ;;  %v1004_v38 = vadd.f32 %v46168_v22, %v940_v28  ;;  %v44252_v10 = vmul.f32 0.015625, %v46218_v45  ;;  %v46219_v27 = vld [vmem:[#allocation23_spill] sm:$0xff]  ;;  %v46220_v61 = vld [vmem:[#allocation29_spill] sm:$0xff]  ;;  %v46222_v25 = vld [vmem:[#allocation22_spill] sm:$0xff] }
 0x152   : > { %39901 = vmatprep.mubr.msk.f32.mxu1 %vm179_vm2, %v44156_v29  ;;  %39907 = vmatpush3.msra.mxu0 %v996_v49  ;;  %v44233_v49 = vmul.f32 0.015625, %v829_v58  ;;  %v944_v57 = vmul.f32 0.125, %v44239_v53  ;;  %v1009_v46 = vadd.f32 %v43128_v14, %v945_v26  ;;  %v46224_v26 = vld [vmem:[#allocation38_spill] sm:$0xff] }
 0x153   : > { %39899 = vmatprep.subr.mxu1 %v994_v55  ;;  %39909 = vmatmul.mubr.msk.f32.vlgmr.msra.gmra.mxu0 %vm179_vm2, %v44124_v17 }
 0x154   : > { %39918 = vmatprep.subr.mxu0 %v1001_v50  ;;  %39900 = vmatpush3.msra.mxu1 %v994_v55  ;;  %46215 = vst [vmem:[#allocation6_spill] sm:$0xff] %v44233_v49  ;;  %v938_v55 = vmul.f32 0.125, %v44220_v41  ;;  %v943_v58 = vmul.f32 0.125, %v44233_v49 }
 0x155   : > { %39919 = vmatpush3.msra.mxu0 %v1001_v50  ;;  %39922 = vmatprep.mubr.msk.f32.mxu0 %vm179_vm2, %v44183_v12  ;;  %v44246_v50 = vmul.f32 0.015625, %v828_v3  ;;  %v44266_v3 = vmul.f32 0.015625, %v46220_v61  ;;  %v46226_v61 = vld [vmem:[#allocation37_spill] sm:$0xff] }
 0x156   : > { %39902 = vmatmul.mubr.msk.f32.vlgmr.msra.gmra.mxu1 %vm179_vm2, %v44136_v62  ;;  %39911 = vmatprep.subr.mxu1 %v999_v63  ;;  %v1007_v28 = vadd.f32 %v43128_v14, %v943_v58 }
 0x157   : > { %39920 = vmatprep.subr.mxu0 %v1000_v36  ;;  %39912 = vmatpush3.msra.mxu1 %v999_v63  ;;  %46217 = vst [vmem:[#allocation7_spill] sm:$0xff] %v44246_v50  ;;  %v1002_v63 = vadd.f32 %v46168_v22, %v938_v55  ;;  %46221 = vst [vmem:[#allocation10_spill] sm:$0xff] %v44266_v3  ;;  %v44274_v55 = vmul.f32 0.015625, %v46222_v25  ;;  %v44294_v25 = vmul.f32 0.015625, %v46226_v61 }
 0x158   : > { %39915 = vmatprep.mubr.msk.f32.mxu1 %vm179_vm2, %v44191_v16  ;;  %39921 = vmatpush3.msra.mxu0 %v1000_v36  ;;  %v44260_v36 = vmul.f32 0.015625, %v46219_v27  ;;  %v46225_v27 = vld [vmem:[#allocation34_spill] sm:$0xff] }
 0x159   : > { %39913 = vmatprep.subr.mxu1 %v998_v31  ;;  %39923 = vmatmul.mubr.msk.f32.vlgmr.msra.gmra.mxu0 %vm179_vm2, %v44159_v39  ;;  %46223 = vst [vmem:[#allocation8_spill] sm:$0xff] %v44274_v55  ;;  %46227 = vst [vmem:[#allocation9_spill] sm:$0xff] %v44294_v25 }
 0x15a   : > { %39932 = vmatprep.subr.mxu0 %v1005_v5  ;;  %39914 = vmatpush3.msra.mxu1 %v998_v31  ;;  %v942_v31 = vmul.f32 0.125, %v44246_v50  ;;  %v947_v45 = vmul.f32 0.125, %v44260_v36 }
 0x15b   : > { %39933 = vmatpush3.msra.mxu0 %v1005_v5  ;;  %39936 = vmatprep.mubr.msk.f32.mxu0 %vm179_vm2, %v44211_v33  ;;  %v949_v5 = vmul.f32 0.125, %v44252_v10 }
 0x15c   : > { %39916 = vmatmul.mubr.msk.f32.vlgmr.msra.gmra.mxu1 %vm179_vm2, %v44176_v13  ;;  %39925 = vmatprep.subr.mxu1 %v1003_v23  ;;  %v1006_v58 = vadd.f32 %v46168_v22, %v942_v31  ;;  %v946_v31 = vmul.f32 0.125, %v44274_v55 }
 0x15d   : > { %39934 = vmatprep.subr.mxu0 %v1004_v38  ;;  %39926 = vmatpush3.msra.mxu1 %v1003_v23  ;;  %v1008_v23 = vadd.f32 %v46168_v22, %v944_v57  ;;  %v1013_v57 = vadd.f32 %v43128_v14, %v949_v5 }
 0x15e   : > { %39929 = vmatprep.mubr.msk.f32.mxu1 %vm179_vm2, %v44220_v41  ;;  %39935 = vmatpush3.msra.mxu0 %v1004_v38  ;;  %v44280_v38 = vmul.f32 0.015625, %v46224_v26 }
 0x15f   : > { %39927 = vmatprep.subr.mxu1 %v1002_v63  ;;  %39937 = vmatmul.mubr.msk.f32.vlgmr.msra.gmra.mxu0 %vm179_vm2, %v44197_v44 }
 0x160   : > { %39946 = vmatprep.subr.mxu0 %v1009_v46  ;;  %39928 = vmatpush3.msra.mxu1 %v1002_v63  ;;  %v948_v63 = vmul.f32 0.125, %v44266_v3  ;;  %v953_v26 = vmul.f32 0.125, %v44280_v38 }
 0x161   : > { %39947 = vmatpush3.msra.mxu0 %v1009_v46  ;;  %39950 = vmatprep.mubr.msk.f32.mxu0 %vm179_vm2, %v44239_v53  ;;  %v44288_v46 = vmul.f32 0.015625, %v46225_v27  ;;  %v46228_v27 = vld [vmem:[#allocation33_spill] sm:$0xff] }
 0x162   : > { %39930 = vmatmul.mubr.msk.f32.vlgmr.msra.gmra.mxu1 %vm179_vm2, %v44206_v7  ;;  %39939 = vmatprep.subr.mxu1 %v1007_v28  ;;  %v1012_v5 = vadd.f32 %v46168_v22, %v948_v63  ;;  %v1017_v63 = vadd.f32 %v43128_v14, %v953_v26 }
 0x163   : > { %39948 = vmatprep.subr.mxu0 %v1008_v23  ;;  %39940 = vmatpush3.msra.mxu1 %v1007_v28  ;;  %v1011_v28 = vadd.f32 %v43128_v14, %v947_v45  ;;  %v951_v45 = vmul.f32 0.125, %v44288_v46 }
 0x164   : > { %39943 = vmatprep.mubr.msk.f32.mxu1 %vm179_vm2, %v44246_v50  ;;  %39949 = vmatpush3.msra.mxu0 %v1008_v23  ;;  %v44302_v50 = vmul.f32 0.015625, %v46228_v27  ;;  %v46230_v23 = vld [vmem:[#allocation48_spill] sm:$0xff] }
 0x165   : > { %39941 = vmatprep.subr.mxu1 %v1006_v58  ;;  %39951 = vmatmul.mubr.msk.f32.vlgmr.msra.gmra.mxu0 %vm179_vm2, %v44226_v21  ;;  %v44308_v61 = vmul.f32 0.015625, %v46230_v23  ;;  %v46232_v27 = vld [vmem:[#allocation44_spill] sm:$0xff]  ;;  %v46234_v23 = vld [vmem:[#allocation47_spill] sm:$0xff] }
 0x166   : > { %39960 = vmatprep.subr.mxu0 %v1013_v57  ;;  %39942 = vmatpush3.msra.mxu1 %v1006_v58  ;;  %46229 = vst [vmem:[#allocation11_spill] sm:$0xff] %v44302_v50  ;;  %v1010_v58 = vadd.f32 %v46168_v22, %v946_v31  ;;  %v44316_v21 = vmul.f32 0.015625, %v46232_v27  ;;  %v950_v31 = vmul.f32 0.125, %v44302_v50 }
 0x167   : > { %39961 = vmatpush3.msra.mxu0 %v1013_v57  ;;  %39964 = vmatprep.mubr.msk.f32.mxu0 %vm179_vm2, %v44266_v3  ;;  %46231 = vst [vmem:[#allocation17_spill] sm:$0xff] %v44308_v61  ;;  %v952_v57 = vmul.f32 0.125, %v44294_v25  ;;  %v957_v27 = vmul.f32 0.125, %v44308_v61  ;;  %v46235_v3 = vld [vmem:[#allocation43_spill] sm:$0xff] }
 0x168   : > { %39944 = vmatmul.mubr.msk.f32.vlgmr.msra.gmra.mxu1 %vm179_vm2, %v44233_v49  ;;  %39953 = vmatprep.subr.mxu1 %v1011_v28  ;;  %46233 = vst [vmem:[#allocation18_spill] sm:$0xff] %v44316_v21  ;;  %v44322_v49 = vmul.f32 0.015625, %v46234_v23 }
 0x169   : > { %39962 = vmatprep.subr.mxu0 %v1012_v5  ;;  %39954 = vmatpush3.msra.mxu1 %v1011_v28  ;;  %v1015_v28 = vadd.f32 %v43128_v14, %v951_v45  ;;  %v1016_v26 = vadd.f32 %v46168_v22, %v952_v57  ;;  %v1021_v57 = vadd.f32 %v43128_v14, %v957_v27 }
 0x16a   : > { %39957 = vmatprep.mubr.msk.f32.mxu1 %vm179_vm2, %v44274_v55  ;;  %39963 = vmatpush3.msra.mxu0 %v1012_v5  ;;  %v44330_v55 = vmul.f32 0.015625, %v46235_v3  ;;  %v955_v5 = vmul.f32 0.125, %v44316_v21  ;;  %v1014_v3 = vadd.f32 %v46168_v22, %v950_v31  ;;  %v956_v45 = vmul.f32 0.125, %v44322_v49 }
 0x16b   : > { %39955 = vmatprep.subr.mxu1 %v1010_v58  ;;  %39965 = vmatmul.mubr.msk.f32.vlgmr.msra.gmra.mxu0 %vm179_vm2, %v44252_v10 }
 0x16c   : > { %39974 = vmatprep.subr.mxu0 %v1017_v63  ;;  %39956 = vmatpush3.msra.mxu1 %v1010_v58  ;;  %v44339_v58 = vmul.f32 0.015625, %v43953_v56  ;;  %v954_v56 = vmul.f32 0.125, %v44330_v55  ;;  %v1019_v23 = vadd.f32 %v43128_v14, %v955_v5  ;;  %v1020_v31 = vadd.f32 %v46168_v22, %v956_v45  ;;  %v46238_v5 = vld [vmem:[#allocation16_spill] sm:$0xff] }
 0x16d   : > { %39975 = vmatpush3.msra.mxu0 %v1017_v63  ;;  %39978 = vmatprep.mubr.msk.f32.mxu0 %vm179_vm2, %v44294_v25  ;;  %v44347_v63 = vmul.f32 0.015625, %v43942_v51  ;;  %v46239_v45 = vld [vmem:[#allocation24_spill] sm:$0xff] }
 0x16e   : > { %39958 = vmatmul.mubr.msk.f32.vlgmr.msra.gmra.mxu1 %vm179_vm2, %v44260_v36  ;;  %39967 = vmatprep.subr.mxu1 %v1015_v28  ;;  %46236 = vst [vmem:[#allocation26_spill] sm:$0xff] %v44339_v58  ;;  %v1018_v51 = vadd.f32 %v46168_v22, %v954_v56 }
 0x16f   : > { %39976 = vmatprep.subr.mxu0 %v1016_v26  ;;  %39968 = vmatpush3.msra.mxu1 %v1015_v28  ;;  %46237 = vst [vmem:[#allocation25_spill] sm:$0xff] %v44347_v63  ;;  %v959_v28 = vmul.f32 0.125, %v44339_v58  ;;  %v958_v27 = vmul.f32 0.125, %v44347_v63 }
 0x170   : > { %39971 = vmatprep.mubr.msk.f32.mxu1 %vm179_vm2, %v44302_v50  ;;  %39977 = vmatpush3.msra.mxu0 %v1016_v26 }
 0x171   : > { %39969 = vmatprep.subr.mxu1 %v1014_v3  ;;  %39979 = vmatmul.mubr.msk.f32.vlgmr.msra.gmra.mxu0 %vm179_vm2, %v44280_v38  ;;  %v1023_v26 = vadd.f32 %v43128_v14, %v959_v28 }
 0x172   : > { %39988 = vmatprep.subr.mxu0 %v1021_v57  ;;  %39970 = vmatpush3.msra.mxu1 %v1014_v3  ;;  %v1022_v3 = vadd.f32 %v46168_v22, %v958_v27  ;;  %v46240_v27 = vld [vmem:[#allocation31_spill] sm:$0xff] }
 0x173   : > { %39989 = vmatpush3.msra.mxu0 %v1021_v57  ;;  %39992 = vmatprep.mubr.msk.f32.mxu0 %vm179_vm2, %v44322_v49 }
 0x174   : > { %39972 = vmatmul.mubr.msk.f32.vlgmr.msra.gmra.mxu1 %vm179_vm2, %v44288_v46  ;;  %39981 = vmatprep.subr.mxu1 %v1019_v23 }
 0x175   : > { %39990 = vmatprep.subr.mxu0 %v1020_v31  ;;  %39982 = vmatpush3.msra.mxu1 %v1019_v23 }
 0x176   : > { %39985 = vmatprep.mubr.msk.f32.mxu1 %vm179_vm2, %v44330_v55  ;;  %39991 = vmatpush3.msra.mxu0 %v1020_v31 }
 0x177   : > { %39983 = vmatprep.subr.mxu1 %v1018_v51  ;;  %39993 = vmatmul.mubr.msk.f32.vlgmr.msra.gmra.mxu0 %vm179_vm2, %v44308_v61 }
 0x178   : > { %39984 = vmatpush3.msra.mxu1 %v1018_v51  ;;  %40006 = vmatprep.mubr.msk.f32.mxu0 %vm179_vm2, %v46238_v5 }
 0x179   : > { %39986 = vmatmul.mubr.msk.f32.vlgmr.msra.gmra.mxu1 %vm179_vm2, %v44316_v21  ;;  %39995 = vmatprep.subr.mxu1 %v1023_v26 }
 0x17a   : > { %39996 = vmatpush3.msra.mxu1 %v1023_v26  ;;  %39999 = vmatprep.mubr.msk.f32.mxu1 %vm179_vm2, %v44347_v63  ;;  %v46241_v26 = vld [vmem:[#allocation19_spill] sm:$0xff] }
 0x17b   : > { %39997 = vmatprep.subr.mxu1 %v1022_v3 }
 0x17c   : > { %39998 = vmatpush3.msra.mxu1 %v1022_v3 }
 0x17d   : > { %40000 = vmatmul.mubr.msk.f32.vlgmr.msra.gmra.mxu1 %vm179_vm2, %v44339_v58 }
 0x17e   : > { %40013 = vmatprep.mubr.msk.f32.mxu1 %vm179_vm2, %v46239_v45 }
 0x1b3   : > { %v39784_v57 = vpop.f32.mrf.mxu0 }
 0x1b4   : > { %v3618_v56 = vmul.f32 0.14285715, %v39784_v57 }
 0x1b5   : > { %v1097_v23 = vpop.f32.mrf.mxu0 }
 0x1b6   : > { %v3682_v31 = vadd.f32 %v43128_v14, %v3618_v56  ;;  %v3617_v28 = vmul.f32 0.14285715, %v1097_v23  ;;  %v46242_v23 = vld [vmem:[#allocation32_spill] sm:$0xff] }
 0x1b8   : > { %v3681_v51 = vadd.f32 %v46168_v22, %v3617_v28  ;;  %40002 = vmatprep.subr.mxu0 %v3682_v31 }
 0x1b9   : > { %40003 = vmatpush3.msra.mxu0 %v3682_v31  ;;  %v46243_v31 = vld [vmem:[#allocation36_spill] sm:$0xff] }
 0x1ba   : > { %40004 = vmatprep.subr.mxu0 %v3681_v51 }
 0x1bb   : > { %40005 = vmatpush3.msra.mxu0 %v3681_v51 }
 0x1bc   : > { %40007 = vmatmul.mubr.msk.f32.vlgmr.msra.gmra.mxu0 %vm179_vm2, %v46240_v27  ;;  %v39791_v3 = vpop.f32.mrf.mxu1 }
 0x1bd   : > { %40020 = vmatprep.mubr.msk.f32.mxu0 %vm179_vm2, %v46241_v26  ;;  %v3620_v45 = vmul.f32 0.14285715, %v39791_v3 }
 0x1be   : > { %v1178_v58 = vpop.f32.mrf.mxu1 }
 0x1bf   : > { %v3684_v57 = vadd.f32 %v43128_v14, %v3620_v45  ;;  %v3619_v63 = vmul.f32 0.14285715, %v1178_v58 }
 0x1c1   : > { %v3683_v56 = vadd.f32 %v46168_v22, %v3619_v63  ;;  %40009 = vmatprep.subr.mxu1 %v3684_v57  ;;  %v46244_v63 = vld [vmem:[#allocation35_spill] sm:$0xff] }
 0x1c2   : > { %40010 = vmatpush3.msra.mxu1 %v3684_v57 }
 0x1c3   : > { %40011 = vmatprep.subr.mxu1 %v3683_v56 }
 0x1c4   : > { %40012 = vmatpush3.msra.mxu1 %v3683_v56 }
 0x1c5   : > { %40014 = vmatmul.mubr.msk.f32.vlgmr.msra.gmra.mxu1 %vm179_vm2, %v46242_v23 }
 0x1c6   : > { %40027 = vmatprep.mubr.msk.f32.mxu1 %vm179_vm2, %v46243_v31 }
 0x1c9   : > { %v39798_v28 = vpop.f32.mrf.mxu0 }
 0x1ca   : > { %v3622_v51 = vmul.f32 0.14285715, %v39798_v28 }
 0x1cb   : > { %v1259_v26 = vpop.f32.mrf.mxu0 }
 0x1cc   : > { %v3686_v3 = vadd.f32 %v43128_v14, %v3622_v51  ;;  %v3621_v27 = vmul.f32 0.14285715, %v1259_v26 }
 0x1ce   : > { %v3685_v58 = vadd.f32 %v46168_v22, %v3621_v27  ;;  %40016 = vmatprep.subr.mxu0 %v3686_v3  ;;  %v46245_v27 = vld [vmem:[#allocation39_spill] sm:$0xff] }
 0x1cf   : > { %40017 = vmatpush3.msra.mxu0 %v3686_v3 }
 0x1d0   : > { %40018 = vmatprep.subr.mxu0 %v3685_v58 }
 0x1d1   : > { %40019 = vmatpush3.msra.mxu0 %v3685_v58 }
 0x1d2   : > { %40021 = vmatmul.mubr.msk.f32.vlgmr.msra.gmra.mxu0 %vm179_vm2, %v46244_v63 }
 0x1d3   : > { %40034 = vmatprep.mubr.msk.f32.mxu0 %vm179_vm2, %v43751_v52 }
 0x1d4   : > { %v39805_v45 = vpop.f32.mrf.mxu1 }
 0x1d5   : > { %v3624_v57 = vmul.f32 0.14285715, %v39805_v45 }
 0x1d6   : > { %v1340_v56 = vpop.f32.mrf.mxu1 }
 0x1d7   : > { %v3688_v28 = vadd.f32 %v43128_v14, %v3624_v57  ;;  %v3623_v31 = vmul.f32 0.14285715, %v1340_v56 }
 0x1d9   : > { %v3687_v26 = vadd.f32 %v46168_v22, %v3623_v31  ;;  %40023 = vmatprep.subr.mxu1 %v3688_v28 }
 0x1da   : > { %40024 = vmatpush3.msra.mxu1 %v3688_v28 }
 0x1db   : > { %40025 = vmatprep.subr.mxu1 %v3687_v26 }
 0x1dc   : > { %40026 = vmatpush3.msra.mxu1 %v3687_v26 }
 0x1dd   : > { %40028 = vmatmul.mubr.msk.f32.vlgmr.msra.gmra.mxu1 %vm179_vm2, %v46245_v27 }
 0x1de   : > { %40041 = vmatprep.mubr.msk.f32.mxu1 %vm179_vm2, %v43815_v24 }
 0x1e4   : > { %v39812_v51 = vpop.f32.mrf.mxu0 }
 0x1e5   : > { %v3626_v3 = vmul.f32 0.14285715, %v39812_v51 }
 0x1e6   : > { %v1421_v58 = vpop.f32.mrf.mxu0 }
 0x1e7   : > { %v3690_v45 = vadd.f32 %v43128_v14, %v3626_v3  ;;  %v3625_v52 = vmul.f32 0.14285715, %v1421_v58 }
 0x1e9   : > { %v3689_v57 = vadd.f32 %v46168_v22, %v3625_v52  ;;  %40030 = vmatprep.subr.mxu0 %v3690_v45 }
 0x1ea   : > { %40031 = vmatpush3.msra.mxu0 %v3690_v45 }
 0x1eb   : > { %40032 = vmatprep.subr.mxu0 %v3689_v57 }
 0x1ec   : > { %40033 = vmatpush3.msra.mxu0 %v3689_v57 }
 0x1ed   : > { %40035 = vmatmul.mubr.msk.f32.vlgmr.msra.gmra.mxu0 %vm179_vm2, %v43813_v47 }
 0x1ee   : > { %40048 = vmatprep.mubr.msk.f32.mxu0 %vm179_vm2, %v43904_v59 }
 0x1ef   : > { %v39819_v31 = vpop.f32.mrf.mxu1 }
 0x1f0   : > { %v3628_v56 = vmul.f32 0.14285715, %v39819_v31 }
 0x1f1   : > { %v1502_v28 = vpop.f32.mrf.mxu1  ;;  %v39826_v26 = vpop.f32.mrf.mxu0 }
 0x1f2   : > { %v3692_v51 = vadd.f32 %v43128_v14, %v3628_v56  ;;  %v3627_v3 = vmul.f32 0.14285715, %v1502_v28  ;;  %v3630_v58 = vmul.f32 0.14285715, %v39826_v26 }
 0x1f3   : > { %v1583_v24 = vpop.f32.mrf.mxu0 }
 0x1f4   : > { %v3691_v52 = vadd.f32 %v46168_v22, %v3627_v3  ;;  %40037 = vmatprep.subr.mxu1 %v3692_v51  ;;  %v3694_v45 = vadd.f32 %v43128_v14, %v3630_v58  ;;  %v3629_v57 = vmul.f32 0.14285715, %v1583_v24 }
 0x1f5   : > { %40038 = vmatpush3.msra.mxu1 %v3692_v51  ;;  %v39840_v47 = vpop.f32.mrf.mxu0 }
 0x1f6   : > { %40039 = vmatprep.subr.mxu1 %v3691_v52  ;;  %v3693_v59 = vadd.f32 %v46168_v22, %v3629_v57  ;;  %v3634_v27 = vmul.f32 0.14285715, %v39840_v47  ;;  %40044 = vmatprep.subr.mxu0 %v3694_v45 }
 0x1f7   : > { %40040 = vmatpush3.msra.mxu1 %v3691_v52  ;;  %v1745_v31 = vpop.f32.mrf.mxu0  ;;  %40045 = vmatpush3.msra.mxu0 %v3694_v45 }
 0x1f8   : > { %40042 = vmatmul.mubr.msk.f32.vlgmr.msra.gmra.mxu1 %vm179_vm2, %v43897_v42  ;;  %v3698_v56 = vadd.f32 %v43128_v14, %v3634_v27  ;;  %v39833_v28 = vpop.f32.mrf.mxu1  ;;  %v3633_v26 = vmul.f32 0.14285715, %v1745_v31  ;;  %40046 = vmatprep.subr.mxu0 %v3693_v59 }
 0x1f9   : > { %40055 = vmatprep.mubr.msk.f32.mxu1 %vm179_vm2, %v43977_v60  ;;  %v3632_v24 = vmul.f32 0.14285715, %v39833_v28  ;;  %40047 = vmatpush3.msra.mxu0 %v3693_v59 }
 0x1fa   : > { %v3697_v51 = vadd.f32 %v46168_v22, %v3633_v26  ;;  %v1664_v47 = vpop.f32.mrf.mxu1  ;;  %40049 = vmatmul.mubr.msk.f32.vlgmr.msra.gmra.mxu0 %vm179_vm2, %v43927_v8  ;;  %40058 = vmatprep.subr.mxu0 %v3698_v56 }
 0x1fb   : > { %v3696_v3 = vadd.f32 %v43128_v14, %v3632_v24  ;;  %v3631_v58 = vmul.f32 0.14285715, %v1664_v47  ;;  %v39854_v52 = vpop.f32.mrf.mxu0  ;;  %40059 = vmatpush3.msra.mxu0 %v3698_v56  ;;  %40062 = vmatprep.mubr.msk.f32.mxu0 %vm179_vm2, %v43878_v48 }
 0x1fc   : > { %v3638_v27 = vmul.f32 0.14285715, %v39854_v52  ;;  %40060 = vmatprep.subr.mxu0 %v3697_v51 }
 0x1fd   : > { %v3695_v45 = vadd.f32 %v46168_v22, %v3631_v58  ;;  %v1907_v59 = vpop.f32.mrf.mxu0  ;;  %40051 = vmatprep.subr.mxu1 %v3696_v3  ;;  %40061 = vmatpush3.msra.mxu0 %v3697_v51 }
 0x1fe   : > { %v3702_v57 = vadd.f32 %v43128_v14, %v3638_v27  ;;  %v39847_v31 = vpop.f32.mrf.mxu1  ;;  %v3637_v28 = vmul.f32 0.14285715, %v1907_v59  ;;  %40052 = vmatpush3.msra.mxu1 %v3696_v3  ;;  %40063 = vmatmul.mubr.msk.f32.vlgmr.msra.gmra.mxu0 %vm179_vm2, %v43909_v0 }
 0x1ff   : > { %v3636_v26 = vmul.f32 0.14285715, %v39847_v31  ;;  %40053 = vmatprep.subr.mxu1 %v3695_v45  ;;  %40076 = vmatprep.mubr.msk.f32.mxu0 %vm179_vm2, %v43991_v4 }
 0x200   : > { %v3701_v56 = vadd.f32 %v46168_v22, %v3637_v28  ;;  %v1826_v24 = vpop.f32.mrf.mxu1  ;;  %40072 = vmatprep.subr.mxu0 %v3702_v57  ;;  %40054 = vmatpush3.msra.mxu1 %v3695_v45 }
 0x201   : > { %v3700_v51 = vadd.f32 %v43128_v14, %v3636_v26  ;;  %v3635_v47 = vmul.f32 0.14285715, %v1826_v24  ;;  %v39868_v58 = vpop.f32.mrf.mxu0  ;;  %40073 = vmatpush3.msra.mxu0 %v3702_v57  ;;  %40056 = vmatmul.mubr.msk.f32.vlgmr.msra.gmra.mxu1 %vm179_vm2, %v43955_v34 }
 0x202   : > { %v3642_v3 = vmul.f32 0.14285715, %v39868_v58  ;;  %40074 = vmatprep.subr.mxu0 %v3701_v56  ;;  %40069 = vmatprep.mubr.msk.f32.mxu1 %vm179_vm2, %v43912_v15 }
 0x203   : > { %v3699_v52 = vadd.f32 %v46168_v22, %v3635_v47  ;;  %v2069_v27 = vpop.f32.mrf.mxu0  ;;  %40065 = vmatprep.subr.mxu1 %v3700_v51  ;;  %40075 = vmatpush3.msra.mxu0 %v3701_v56 }
 0x204   : > { %v3706_v45 = vadd.f32 %v43128_v14, %v3642_v3  ;;  %v39861_v59 = vpop.f32.mrf.mxu1  ;;  %v3641_v31 = vmul.f32 0.14285715, %v2069_v27  ;;  %40066 = vmatpush3.msra.mxu1 %v3700_v51  ;;  %40077 = vmatmul.mubr.msk.f32.vlgmr.msra.gmra.mxu0 %vm179_vm2, %v43985_v19 }
 0x205   : > { %v3640_v57 = vmul.f32 0.14285715, %v39861_v59  ;;  %40067 = vmatprep.subr.mxu1 %v3699_v52  ;;  %40090 = vmatprep.mubr.msk.f32.mxu0 %vm179_vm2, %v44036_v11 }
 0x206   : > { %v3705_v28 = vadd.f32 %v46168_v22, %v3641_v31  ;;  %v1988_v26 = vpop.f32.mrf.mxu1  ;;  %40086 = vmatprep.subr.mxu0 %v3706_v45  ;;  %40068 = vmatpush3.msra.mxu1 %v3699_v52 }
 0x207   : > { %v3704_v56 = vadd.f32 %v43128_v14, %v3640_v57  ;;  %v3639_v24 = vmul.f32 0.14285715, %v1988_v26  ;;  %v39882_v47 = vpop.f32.mrf.mxu0  ;;  %40087 = vmatpush3.msra.mxu0 %v3706_v45  ;;  %40070 = vmatmul.mubr.msk.f32.vlgmr.msra.gmra.mxu1 %vm179_vm2, %v43915_v18 }
 0x208   : > { %v3646_v51 = vmul.f32 0.14285715, %v39882_v47  ;;  %40088 = vmatprep.subr.mxu0 %v3705_v28  ;;  %40083 = vmatprep.mubr.msk.f32.mxu1 %vm179_vm2, %v44045_v54 }
 0x209   : > { %v3703_v58 = vadd.f32 %v46168_v22, %v3639_v24  ;;  %v2231_v3 = vpop.f32.mrf.mxu0  ;;  %40079 = vmatprep.subr.mxu1 %v3704_v56  ;;  %40089 = vmatpush3.msra.mxu0 %v3705_v28 }
 0x20a   : > { %v3710_v52 = vadd.f32 %v43128_v14, %v3646_v51  ;;  %v39875_v27 = vpop.f32.mrf.mxu1  ;;  %v3645_v59 = vmul.f32 0.14285715, %v2231_v3  ;;  %40080 = vmatpush3.msra.mxu1 %v3704_v56  ;;  %40091 = vmatmul.mubr.msk.f32.vlgmr.msra.gmra.mxu0 %vm179_vm2, %v44012_v32 }
 0x20b   : > { %v3644_v45 = vmul.f32 0.14285715, %v39875_v27  ;;  %40081 = vmatprep.subr.mxu1 %v3703_v58  ;;  %40104 = vmatprep.mubr.msk.f32.mxu0 %vm179_vm2, %v44064_v20 }
 0x20c   : > { %v3709_v31 = vadd.f32 %v46168_v22, %v3645_v59  ;;  %v2150_v57 = vpop.f32.mrf.mxu1  ;;  %40100 = vmatprep.subr.mxu0 %v3710_v52  ;;  %40082 = vmatpush3.msra.mxu1 %v3703_v58 }
 0x20d   : > { %v3708_v28 = vadd.f32 %v43128_v14, %v3644_v45  ;;  %v3643_v26 = vmul.f32 0.14285715, %v2150_v57  ;;  %v39896_v24 = vpop.f32.mrf.mxu0  ;;  %40101 = vmatpush3.msra.mxu0 %v3710_v52  ;;  %40084 = vmatmul.mubr.msk.f32.vlgmr.msra.gmra.mxu1 %vm179_vm2, %v44032_v9 }
 0x20e   : > { %v3650_v56 = vmul.f32 0.14285715, %v39896_v24  ;;  %40102 = vmatprep.subr.mxu0 %v3709_v31  ;;  %40097 = vmatprep.mubr.msk.f32.mxu1 %vm179_vm2, %v44072_v40 }
 0x20f   : > { %v3707_v47 = vadd.f32 %v46168_v22, %v3643_v26  ;;  %v2393_v51 = vpop.f32.mrf.mxu0  ;;  %40093 = vmatprep.subr.mxu1 %v3708_v28  ;;  %40103 = vmatpush3.msra.mxu0 %v3709_v31 }
 0x210   : > { %v3714_v58 = vadd.f32 %v43128_v14, %v3650_v56  ;;  %v39889_v3 = vpop.f32.mrf.mxu1  ;;  %v3649_v27 = vmul.f32 0.14285715, %v2393_v51  ;;  %40094 = vmatpush3.msra.mxu1 %v3708_v28  ;;  %40105 = vmatmul.mubr.msk.f32.vlgmr.msra.gmra.mxu0 %vm179_vm2, %v44051_v2 }
 0x211   : > { %v3648_v52 = vmul.f32 0.14285715, %v39889_v3  ;;  %40095 = vmatprep.subr.mxu1 %v3707_v47  ;;  %40118 = vmatprep.mubr.msk.f32.mxu0 %vm179_vm2, %v44099_v35 }
 0x212   : > { %v3713_v59 = vadd.f32 %v46168_v22, %v3649_v27  ;;  %v2312_v45 = vpop.f32.mrf.mxu1  ;;  %40114 = vmatprep.subr.mxu0 %v3714_v58  ;;  %40096 = vmatpush3.msra.mxu1 %v3707_v47 }
 0x213   : > { %v3712_v31 = vadd.f32 %v43128_v14, %v3648_v52  ;;  %v3647_v57 = vmul.f32 0.14285715, %v2312_v45  ;;  %v39910_v26 = vpop.f32.mrf.mxu0  ;;  %40115 = vmatpush3.msra.mxu0 %v3714_v58  ;;  %40098 = vmatmul.mubr.msk.f32.vlgmr.msra.gmra.mxu1 %vm179_vm2, %v44059_v1 }
 0x214   : > { %v3654_v28 = vmul.f32 0.14285715, %v39910_v26  ;;  %40116 = vmatprep.subr.mxu0 %v3713_v59  ;;  %40111 = vmatprep.mubr.msk.f32.mxu1 %vm179_vm2, %v44118_v43 }
 0x215   : > { %v3711_v24 = vadd.f32 %v46168_v22, %v3647_v57  ;;  %v2555_v56 = vpop.f32.mrf.mxu0  ;;  %40107 = vmatprep.subr.mxu1 %v3712_v31  ;;  %40117 = vmatpush3.msra.mxu0 %v3713_v59 }
 0x216   : > { %v3718_v47 = vadd.f32 %v43128_v14, %v3654_v28  ;;  %v39903_v51 = vpop.f32.mrf.mxu1  ;;  %v3653_v3 = vmul.f32 0.14285715, %v2555_v56  ;;  %40108 = vmatpush3.msra.mxu1 %v3712_v31  ;;  %40119 = vmatmul.mubr.msk.f32.vlgmr.msra.gmra.mxu0 %vm179_vm2, %v44078_v6 }
 0x217   : > { %v3652_v58 = vmul.f32 0.14285715, %v39903_v51  ;;  %40109 = vmatprep.subr.mxu1 %v3711_v24  ;;  %40132 = vmatprep.mubr.msk.f32.mxu0 %vm179_vm2, %v44146_v30 }
 0x218   : > { %v3717_v27 = vadd.f32 %v46168_v22, %v3653_v3  ;;  %v2474_v52 = vpop.f32.mrf.mxu1  ;;  %40128 = vmatprep.subr.mxu0 %v3718_v47  ;;  %40110 = vmatpush3.msra.mxu1 %v3711_v24 }
 0x219   : > { %v3716_v59 = vadd.f32 %v43128_v14, %v3652_v58  ;;  %v3651_v45 = vmul.f32 0.14285715, %v2474_v52  ;;  %v39924_v57 = vpop.f32.mrf.mxu0  ;;  %40129 = vmatpush3.msra.mxu0 %v3718_v47  ;;  %40112 = vmatmul.mubr.msk.f32.vlgmr.msra.gmra.mxu1 %vm179_vm2, %v44093_v37 }
 0x21a   : > { %v3658_v31 = vmul.f32 0.14285715, %v39924_v57  ;;  %40130 = vmatprep.subr.mxu0 %v3717_v27  ;;  %40125 = vmatprep.mubr.msk.f32.mxu1 %vm179_vm2, %v44156_v29 }
 0x21b   : > { %v3715_v26 = vadd.f32 %v46168_v22, %v3651_v45  ;;  %v2717_v28 = vpop.f32.mrf.mxu0  ;;  %40121 = vmatprep.subr.mxu1 %v3716_v59  ;;  %40131 = vmatpush3.msra.mxu0 %v3717_v27 }
 0x21c   : > { %v3722_v24 = vadd.f32 %v43128_v14, %v3658_v31  ;;  %v39917_v56 = vpop.f32.mrf.mxu1  ;;  %v3657_v51 = vmul.f32 0.14285715, %v2717_v28  ;;  %40122 = vmatpush3.msra.mxu1 %v3716_v59  ;;  %40133 = vmatmul.mubr.msk.f32.vlgmr.msra.gmra.mxu0 %vm179_vm2, %v44124_v17 }
 0x21d   : > { %v3656_v47 = vmul.f32 0.14285715, %v39917_v56  ;;  %40123 = vmatprep.subr.mxu1 %v3715_v26  ;;  %40146 = vmatprep.mubr.msk.f32.mxu0 %vm179_vm2, %v44183_v12 }
 0x21e   : > { %v3721_v3 = vadd.f32 %v46168_v22, %v3657_v51  ;;  %v2636_v58 = vpop.f32.mrf.mxu1  ;;  %40142 = vmatprep.subr.mxu0 %v3722_v24  ;;  %40124 = vmatpush3.msra.mxu1 %v3715_v26 }
 0x21f   : > { %v3720_v27 = vadd.f32 %v43128_v14, %v3656_v47  ;;  %v3655_v52 = vmul.f32 0.14285715, %v2636_v58  ;;  %v39938_v45 = vpop.f32.mrf.mxu0  ;;  %40143 = vmatpush3.msra.mxu0 %v3722_v24  ;;  %40126 = vmatmul.mubr.msk.f32.vlgmr.msra.gmra.mxu1 %vm179_vm2, %v44136_v62 }
 0x220   : > { %v3662_v59 = vmul.f32 0.14285715, %v39938_v45  ;;  %40144 = vmatprep.subr.mxu0 %v3721_v3  ;;  %40139 = vmatprep.mubr.msk.f32.mxu1 %vm179_vm2, %v44191_v16 }
 0x221   : > { %v3719_v57 = vadd.f32 %v46168_v22, %v3655_v52  ;;  %v2879_v31 = vpop.f32.mrf.mxu0  ;;  %40135 = vmatprep.subr.mxu1 %v3720_v27  ;;  %40145 = vmatpush3.msra.mxu0 %v3721_v3 }
 0x222   : > { %v3726_v26 = vadd.f32 %v43128_v14, %v3662_v59  ;;  %v39931_v28 = vpop.f32.mrf.mxu1  ;;  %v3661_v56 = vmul.f32 0.14285715, %v2879_v31  ;;  %40136 = vmatpush3.msra.mxu1 %v3720_v27  ;;  %40147 = vmatmul.mubr.msk.f32.vlgmr.msra.gmra.mxu0 %vm179_vm2, %v44159_v39 }
 0x223   : > { %v3660_v24 = vmul.f32 0.14285715, %v39931_v28  ;;  %40137 = vmatprep.subr.mxu1 %v3719_v57  ;;  %40160 = vmatprep.mubr.msk.f32.mxu0 %vm179_vm2, %v44211_v33 }
 0x224   : > { %v3725_v51 = vadd.f32 %v46168_v22, %v3661_v56  ;;  %v2798_v47 = vpop.f32.mrf.mxu1  ;;  %40156 = vmatprep.subr.mxu0 %v3726_v26  ;;  %40138 = vmatpush3.msra.mxu1 %v3719_v57 }
 0x225   : > { %v3724_v3 = vadd.f32 %v43128_v14, %v3660_v24  ;;  %v3659_v58 = vmul.f32 0.14285715, %v2798_v47  ;;  %v39952_v52 = vpop.f32.mrf.mxu0  ;;  %40157 = vmatpush3.msra.mxu0 %v3726_v26  ;;  %40140 = vmatmul.mubr.msk.f32.vlgmr.msra.gmra.mxu1 %vm179_vm2, %v44176_v13 }
 0x226   : > { %v3666_v27 = vmul.f32 0.14285715, %v39952_v52  ;;  %40158 = vmatprep.subr.mxu0 %v3725_v51  ;;  %40153 = vmatprep.mubr.msk.f32.mxu1 %vm179_vm2, %v44220_v41  ;;  %v46246_v52 = vld [vmem:[#allocation7_spill] sm:$0xff] }
 0x227   : > { %v3723_v45 = vadd.f32 %v46168_v22, %v3659_v58  ;;  %v3041_v59 = vpop.f32.mrf.mxu0  ;;  %40149 = vmatprep.subr.mxu1 %v3724_v3  ;;  %40159 = vmatpush3.msra.mxu0 %v3725_v51 }
 0x228   : > { %v3730_v57 = vadd.f32 %v43128_v14, %v3666_v27  ;;  %v39945_v31 = vpop.f32.mrf.mxu1  ;;  %v3665_v28 = vmul.f32 0.14285715, %v3041_v59  ;;  %40150 = vmatpush3.msra.mxu1 %v3724_v3  ;;  %40161 = vmatmul.mubr.msk.f32.vlgmr.msra.gmra.mxu0 %vm179_vm2, %v44197_v44 }
 0x229   : > { %v3664_v26 = vmul.f32 0.14285715, %v39945_v31  ;;  %40151 = vmatprep.subr.mxu1 %v3723_v45  ;;  %40174 = vmatprep.mubr.msk.f32.mxu0 %vm179_vm2, %v44239_v53 }
 0x22a   : > { %v3729_v56 = vadd.f32 %v46168_v22, %v3665_v28  ;;  %v2960_v24 = vpop.f32.mrf.mxu1  ;;  %40170 = vmatprep.subr.mxu0 %v3730_v57  ;;  %40152 = vmatpush3.msra.mxu1 %v3723_v45 }
 0x22b   : > { %v3728_v51 = vadd.f32 %v43128_v14, %v3664_v26  ;;  %v3663_v47 = vmul.f32 0.14285715, %v2960_v24  ;;  %v39966_v58 = vpop.f32.mrf.mxu0  ;;  %40171 = vmatpush3.msra.mxu0 %v3730_v57  ;;  %40154 = vmatmul.mubr.msk.f32.vlgmr.msra.gmra.mxu1 %vm179_vm2, %v44206_v7  ;;  %v46247_v26 = vld [vmem:[#allocation4_spill] sm:$0xff]  ;;  %v46248_v24 = vld [vmem:[#allocation10_spill] sm:$0xff] }
 0x22c   : > { %v3670_v3 = vmul.f32 0.14285715, %v39966_v58  ;;  %40172 = vmatprep.subr.mxu0 %v3729_v56  ;;  %40167 = vmatprep.mubr.msk.f32.mxu1 %vm179_vm2, %v46246_v52 }
 0x22d   : > { %v3727_v27 = vadd.f32 %v46168_v22, %v3663_v47  ;;  %v3203_v59 = vpop.f32.mrf.mxu0  ;;  %40163 = vmatprep.subr.mxu1 %v3728_v51  ;;  %40173 = vmatpush3.msra.mxu0 %v3729_v56 }
 0x22e   : > { %v3734_v45 = vadd.f32 %v43128_v14, %v3670_v3  ;;  %v39959_v31 = vpop.f32.mrf.mxu1  ;;  %v3669_v28 = vmul.f32 0.14285715, %v3203_v59  ;;  %40164 = vmatpush3.msra.mxu1 %v3728_v51  ;;  %40175 = vmatmul.mubr.msk.f32.vlgmr.msra.gmra.mxu0 %vm179_vm2, %v46247_v26  ;;  %v46249_v59 = vld [vmem:[#allocation6_spill] sm:$0xff] }
 0x22f   : > { %v3668_v57 = vmul.f32 0.14285715, %v39959_v31  ;;  %40165 = vmatprep.subr.mxu1 %v3727_v27  ;;  %40188 = vmatprep.mubr.msk.f32.mxu0 %vm179_vm2, %v46248_v24  ;;  %v46250_v31 = vld [vmem:[#allocation8_spill] sm:$0xff] }
 0x230   : > { %v3733_v58 = vadd.f32 %v46168_v22, %v3669_v28  ;;  %v3122_v52 = vpop.f32.mrf.mxu1  ;;  %40184 = vmatprep.subr.mxu0 %v3734_v45  ;;  %40166 = vmatpush3.msra.mxu1 %v3727_v27 }
 0x231   : > { %v3732_v56 = vadd.f32 %v43128_v14, %v3668_v57  ;;  %v3667_v47 = vmul.f32 0.14285715, %v3122_v52  ;;  %v39980_v3 = vpop.f32.mrf.mxu0  ;;  %40185 = vmatpush3.msra.mxu0 %v3734_v45  ;;  %40168 = vmatmul.mubr.msk.f32.vlgmr.msra.gmra.mxu1 %vm179_vm2, %v46249_v59 }
 0x232   : > { %v3674_v51 = vmul.f32 0.14285715, %v39980_v3  ;;  %40186 = vmatprep.subr.mxu0 %v3733_v58  ;;  %40181 = vmatprep.mubr.msk.f32.mxu1 %vm179_vm2, %v46250_v31 }
 0x233   : > { %v3731_v24 = vadd.f32 %v46168_v22, %v3667_v47  ;;  %v3365_v26 = vpop.f32.mrf.mxu0  ;;  %40177 = vmatprep.subr.mxu1 %v3732_v56  ;;  %40187 = vmatpush3.msra.mxu0 %v3733_v58 }
 0x234   : > { %v3738_v27 = vadd.f32 %v43128_v14, %v3674_v51  ;;  %v39973_v28 = vpop.f32.mrf.mxu1  ;;  %v3673_v57 = vmul.f32 0.14285715, %v3365_v26  ;;  %40178 = vmatpush3.msra.mxu1 %v3732_v56  ;;  %40189 = vmatmul.mubr.msk.f32.vlgmr.msra.gmra.mxu0 %vm179_vm2, %v44252_v10 }
 0x235   : > { %v3672_v52 = vmul.f32 0.14285715, %v39973_v28  ;;  %40179 = vmatprep.subr.mxu1 %v3731_v24  ;;  %40202 = vmatprep.mubr.msk.f32.mxu0 %vm179_vm2, %v44294_v25 }
 0x236   : > { %v3737_v45 = vadd.f32 %v46168_v22, %v3673_v57  ;;  %v3284_v3 = vpop.f32.mrf.mxu1  ;;  %40198 = vmatprep.subr.mxu0 %v3738_v27  ;;  %40180 = vmatpush3.msra.mxu1 %v3731_v24 }
 0x237   : > { %v3736_v58 = vadd.f32 %v43128_v14, %v3672_v52  ;;  %v3671_v47 = vmul.f32 0.14285715, %v3284_v3  ;;  %v39994_v51 = vpop.f32.mrf.mxu0  ;;  %40199 = vmatpush3.msra.mxu0 %v3738_v27  ;;  %40182 = vmatmul.mubr.msk.f32.vlgmr.msra.gmra.mxu1 %vm179_vm2, %v44260_v36 }
 0x238   : > { %v3678_v26 = vmul.f32 0.14285715, %v39994_v51  ;;  %40200 = vmatprep.subr.mxu0 %v3737_v45  ;;  %40195 = vmatprep.mubr.msk.f32.mxu1 %vm179_vm2, %v44302_v50 }
 0x239   : > { %v3735_v56 = vadd.f32 %v46168_v22, %v3671_v47  ;;  %v39987_v28 = vpop.f32.mrf.mxu1  ;;  %v3527_v57 = vpop.f32.mrf.mxu0  ;;  %40191 = vmatprep.subr.mxu1 %v3736_v58  ;;  %40201 = vmatpush3.msra.mxu0 %v3737_v45 }
 0x23a   : > { %v3742_v24 = vadd.f32 %v43128_v14, %v3678_v26  ;;  %v3676_v52 = vmul.f32 0.14285715, %v39987_v28  ;;  %v3677_v3 = vmul.f32 0.14285715, %v3527_v57  ;;  %40192 = vmatpush3.msra.mxu1 %v3736_v58  ;;  %40203 = vmatmul.mubr.msk.f32.vlgmr.msra.gmra.mxu0 %vm179_vm2, %v44280_v38 }
 0x23b   : > { %v3446_v27 = vpop.f32.mrf.mxu1  ;;  %40193 = vmatprep.subr.mxu1 %v3735_v56  ;;  %40216 = vmatprep.mubr.msk.f32.mxu0 %vm179_vm2, %v44322_v49 }
 0x23c   : > { %v3740_v51 = vadd.f32 %v43128_v14, %v3676_v52  ;;  %v3741_v47 = vadd.f32 %v46168_v22, %v3677_v3  ;;  %v3675_v50 = vmul.f32 0.14285715, %v3446_v27  ;;  %40212 = vmatprep.subr.mxu0 %v3742_v24  ;;  %40194 = vmatpush3.msra.mxu1 %v3735_v56  ;;  %v46253_v3 = vld [vmem:[#allocation24_spill] sm:$0xff] }
 0x23d   : > { %v40001_v45 = vpop.f32.mrf.mxu1  ;;  %40213 = vmatpush3.msra.mxu0 %v3742_v24  ;;  %40196 = vmatmul.mubr.msk.f32.vlgmr.msra.gmra.mxu1 %vm179_vm2, %v44288_v46  ;;  %v46252_v24 = vld [vmem:[#allocation26_spill] sm:$0xff] }
 0x23e   : > { %v3739_v58 = vadd.f32 %v46168_v22, %v3675_v50  ;;  %v3680_v26 = vmul.f32 0.14285715, %v40001_v45  ;;  %40205 = vmatprep.subr.mxu1 %v3740_v51  ;;  %40214 = vmatprep.subr.mxu0 %v3741_v47  ;;  %v46251_v50 = vld [vmem:[#allocation25_spill] sm:$0xff] }
 0x23f   : > { %v3608_v28 = vpop.f32.mrf.mxu1  ;;  %40206 = vmatpush3.msra.mxu1 %v3740_v51  ;;  %40209 = vmatprep.mubr.msk.f32.mxu1 %vm179_vm2, %v44330_v55 }
 0x240   : > { %v3744_v57 = vadd.f32 %v43128_v14, %v3680_v26  ;;  %v3679_v52 = vmul.f32 0.14285715, %v3608_v28  ;;  %40215 = vmatpush3.msra.mxu0 %v3741_v47  ;;  %40207 = vmatprep.subr.mxu1 %v3739_v58  ;;  %v46254_v28 = vld [vmem:[#allocation31_spill] sm:$0xff] }
 0x241   : > { %40217 = vmatmul.mubr.msk.f32.vlgmr.msra.gmra.mxu0 %vm179_vm2, %v44308_v61  ;;  %40208 = vmatpush3.msra.mxu1 %v3739_v58 }
 0x242   : > { %v3743_v56 = vadd.f32 %v46168_v22, %v3679_v52  ;;  %40230 = vmatprep.mubr.msk.f32.mxu0 %vm179_vm2, %v46238_v5  ;;  %40210 = vmatmul.mubr.msk.f32.vlgmr.msra.gmra.mxu1 %vm179_vm2, %v44316_v21 }
 0x243   : > { %40219 = vmatprep.subr.mxu1 %v3744_v57  ;;  %40223 = vmatprep.mubr.msk.f32.mxu1 %vm179_vm2, %v46251_v50 }
 0x244   : > { %40220 = vmatpush3.msra.mxu1 %v3744_v57  ;;  %v46255_v57 = vld [vmem:[#allocation19_spill] sm:$0xff] }
 0x245   : > { %40221 = vmatprep.subr.mxu1 %v3743_v56 }
 0x246   : > { %40222 = vmatpush3.msra.mxu1 %v3743_v56 }
 0x247   : > { %40224 = vmatmul.mubr.msk.f32.vlgmr.msra.gmra.mxu1 %vm179_vm2, %v46252_v24 }
 0x248   : > { %40237 = vmatprep.mubr.msk.f32.mxu1 %vm179_vm2, %v46253_v3 }
 0x27c   : > { %v40008_v27 = vpop.f32.mrf.mxu0 }
 0x27d   : > { %v6146_v51 = vmul.f32 0.16666667, %v40008_v27 }
 0x27e   : > { %v3811_v47 = vpop.f32.mrf.mxu0 }
 0x27f   : > { %v6210_v45 = vadd.f32 %v43128_v14, %v6146_v51  ;;  %v6145_v58 = vmul.f32 0.16666667, %v3811_v47  ;;  %v46256_v47 = vld [vmem:[#allocation36_spill] sm:$0xff] }
 0x281   : > { %v6209_v26 = vadd.f32 %v46168_v22, %v6145_v58  ;;  %40226 = vmatprep.subr.mxu0 %v6210_v45 }
 0x282   : > { %40227 = vmatpush3.msra.mxu0 %v6210_v45 }
 0x283   : > { %40228 = vmatprep.subr.mxu0 %v6209_v26 }
 0x284   : > { %40229 = vmatpush3.msra.mxu0 %v6209_v26 }
 0x285   : > { %40231 = vmatmul.mubr.msk.f32.vlgmr.msra.gmra.mxu0 %vm179_vm2, %v46254_v28  ;;  %v40015_v52 = vpop.f32.mrf.mxu1 }
 0x286   : > { %40244 = vmatprep.mubr.msk.f32.mxu0 %vm179_vm2, %v46255_v57  ;;  %v6148_v56 = vmul.f32 0.16666667, %v40015_v52 }
 0x287   : > { %v3886_v3 = vpop.f32.mrf.mxu1 }
 0x288   : > { %v6212_v27 = vadd.f32 %v43128_v14, %v6148_v56  ;;  %v6147_v24 = vmul.f32 0.16666667, %v3886_v3 }
 0x28a   : > { %v6211_v51 = vadd.f32 %v46168_v22, %v6147_v24  ;;  %40233 = vmatprep.subr.mxu1 %v6212_v27  ;;  %v46257_v24 = vld [vmem:[#allocation40_spill] sm:$0xff] }
 0x28b   : > { %40234 = vmatpush3.msra.mxu1 %v6212_v27 }
 0x28c   : > { %40235 = vmatprep.subr.mxu1 %v6211_v51 }
 0x28d   : > { %40236 = vmatpush3.msra.mxu1 %v6211_v51 }
 0x28e   : > { %40238 = vmatmul.mubr.msk.f32.vlgmr.msra.gmra.mxu1 %vm179_vm2, %v46242_v23 }
 0x28f   : > { %40251 = vmatprep.mubr.msk.f32.mxu1 %vm179_vm2, %v46256_v47 }
 0x292   : > { %v40022_v45 = vpop.f32.mrf.mxu0 }
 0x293   : > { %v6150_v58 = vmul.f32 0.16666667, %v40022_v45 }
 0x294   : > { %v3961_v26 = vpop.f32.mrf.mxu0 }
 0x295   : > { %v6214_v52 = vadd.f32 %v43128_v14, %v6150_v58  ;;  %v6149_v57 = vmul.f32 0.16666667, %v3961_v26  ;;  %v46259_v26 = vld [vmem:[#allocation46_spill] sm:$0xff] }
 0x297   : > { %v6213_v3 = vadd.f32 %v46168_v22, %v6149_v57  ;;  %40240 = vmatprep.subr.mxu0 %v6214_v52  ;;  %v46258_v57 = vld [vmem:[#allocation39_spill] sm:$0xff] }
 0x298   : > { %40241 = vmatpush3.msra.mxu0 %v6214_v52 }
 0x299   : > { %40242 = vmatprep.subr.mxu0 %v6213_v3 }
 0x29a   : > { %40243 = vmatpush3.msra.mxu0 %v6213_v3 }
 0x29b   : > { %40245 = vmatmul.mubr.msk.f32.vlgmr.msra.gmra.mxu0 %vm179_vm2, %v46244_v63 }
 0x29c   : > { %40258 = vmatprep.mubr.msk.f32.mxu0 %vm179_vm2, %v46257_v24 }
 0x29d   : > { %v40029_v56 = vpop.f32.mrf.mxu1 }
 0x29e   : > { %v6152_v27 = vmul.f32 0.16666667, %v40029_v56 }
 0x29f   : > { %v4036_v51 = vpop.f32.mrf.mxu1 }
 0x2a0   : > { %v6216_v45 = vadd.f32 %v43128_v14, %v6152_v27  ;;  %v6151_v47 = vmul.f32 0.16666667, %v4036_v51  ;;  %v46261_v51 = vld [vmem:[#allocation3_spill] sm:$0xff] }
 0x2a2   : > { %v6215_v58 = vadd.f32 %v46168_v22, %v6151_v47  ;;  %40247 = vmatprep.subr.mxu1 %v6216_v45  ;;  %v46260_v47 = vld [vmem:[#allocation45_spill] sm:$0xff] }
 0x2a3   : > { %40248 = vmatpush3.msra.mxu1 %v6216_v45 }
 0x2a4   : > { %40249 = vmatprep.subr.mxu1 %v6215_v58 }
 0x2a5   : > { %40250 = vmatpush3.msra.mxu1 %v6215_v58 }
 0x2a6   : > { %40252 = vmatmul.mubr.msk.f32.vlgmr.msra.gmra.mxu1 %vm179_vm2, %v46258_v57 }
 0x2a7   : > { %40265 = vmatprep.mubr.msk.f32.mxu1 %vm179_vm2, %v46259_v26 }
 0x2ad   : > { %v40036_v52 = vpop.f32.mrf.mxu0 }
 0x2ae   : > { %v6154_v3 = vmul.f32 0.16666667, %v40036_v52 }
 0x2af   : > { %v4111_v24 = vpop.f32.mrf.mxu0 }
 0x2b0   : > { %v6218_v56 = vadd.f32 %v43128_v14, %v6154_v3  ;;  %v6153_v63 = vmul.f32 0.16666667, %v4111_v24 }
 0x2b2   : > { %v6217_v27 = vadd.f32 %v46168_v22, %v6153_v63  ;;  %40254 = vmatprep.subr.mxu0 %v6218_v56 }
 0x2b3   : > { %40255 = vmatpush3.msra.mxu0 %v6218_v56 }
 0x2b4   : > { %40256 = vmatprep.subr.mxu0 %v6217_v27 }
 0x2b5   : > { %40257 = vmatpush3.msra.mxu0 %v6217_v27 }
 0x2b6   : > { %40259 = vmatmul.mubr.msk.f32.vlgmr.msra.gmra.mxu0 %vm179_vm2, %v46260_v47 }
 0x2b7   : > { %40272 = vmatprep.mubr.msk.f32.mxu0 %vm179_vm2, %v46261_v51 }
 0x2b8   : > { %v40043_v45 = vpop.f32.mrf.mxu1 }
 0x2b9   : > { %v6156_v58 = vmul.f32 0.16666667, %v40043_v45 }
 0x2ba   : > { %v4186_v26 = vpop.f32.mrf.mxu1  ;;  %v40050_v52 = vpop.f32.mrf.mxu0 }
 0x2bb   : > { %v6220_v57 = vadd.f32 %v43128_v14, %v6156_v58  ;;  %v6155_v3 = vmul.f32 0.16666667, %v4186_v26  ;;  %v6158_v24 = vmul.f32 0.16666667, %v40050_v52 }
 0x2bc   : > { %v4261_v23 = vpop.f32.mrf.mxu0 }
 0x2bd   : > { %v6219_v63 = vadd.f32 %v46168_v22, %v6155_v3  ;;  %40261 = vmatprep.subr.mxu1 %v6220_v57  ;;  %v6222_v56 = vadd.f32 %v43128_v14, %v6158_v24  ;;  %v6157_v27 = vmul.f32 0.16666667, %v4261_v23 }
 0x2be   : > { %40262 = vmatpush3.msra.mxu1 %v6220_v57  ;;  %v40064_v47 = vpop.f32.mrf.mxu0 }
 0x2bf   : > { %40263 = vmatprep.subr.mxu1 %v6219_v63  ;;  %v6221_v51 = vadd.f32 %v46168_v22, %v6157_v27  ;;  %v6162_v28 = vmul.f32 0.16666667, %v40064_v47  ;;  %40268 = vmatprep.subr.mxu0 %v6222_v56 }
 0x2c0   : > { %40264 = vmatpush3.msra.mxu1 %v6219_v63  ;;  %v4411_v45 = vpop.f32.mrf.mxu0  ;;  %40269 = vmatpush3.msra.mxu0 %v6222_v56 }
 0x2c1   : > { %40266 = vmatmul.mubr.msk.f32.vlgmr.msra.gmra.mxu1 %vm179_vm2, %v43897_v42  ;;  %v6226_v26 = vadd.f32 %v43128_v14, %v6162_v28  ;;  %v40057_v58 = vpop.f32.mrf.mxu1  ;;  %v6161_v52 = vmul.f32 0.16666667, %v4411_v45  ;;  %40270 = vmatprep.subr.mxu0 %v6221_v51 }
 0x2c2   : > { %40279 = vmatprep.mubr.msk.f32.mxu1 %vm179_vm2, %v43977_v60  ;;  %v6160_v23 = vmul.f32 0.16666667, %v40057_v58  ;;  %40271 = vmatpush3.msra.mxu0 %v6221_v51 }
 0x2c3   : > { %v6225_v57 = vadd.f32 %v46168_v22, %v6161_v52  ;;  %v4336_v47 = vpop.f32.mrf.mxu1  ;;  %40273 = vmatmul.mubr.msk.f32.vlgmr.msra.gmra.mxu0 %vm179_vm2, %v43927_v8  ;;  %40282 = vmatprep.subr.mxu0 %v6226_v26 }
 0x2c4   : > { %v6224_v3 = vadd.f32 %v43128_v14, %v6160_v23  ;;  %v6159_v24 = vmul.f32 0.16666667, %v4336_v47  ;;  %v40078_v63 = vpop.f32.mrf.mxu0  ;;  %40283 = vmatpush3.msra.mxu0 %v6226_v26  ;;  %40286 = vmatprep.mubr.msk.f32.mxu0 %vm179_vm2, %v43878_v48 }
 0x2c5   : > { %v6166_v28 = vmul.f32 0.16666667, %v40078_v63  ;;  %40284 = vmatprep.subr.mxu0 %v6225_v57 }
 0x2c6   : > { %v6223_v56 = vadd.f32 %v46168_v22, %v6159_v24  ;;  %v4561_v51 = vpop.f32.mrf.mxu0  ;;  %40275 = vmatprep.subr.mxu1 %v6224_v3  ;;  %40285 = vmatpush3.msra.mxu0 %v6225_v57 }
 0x2c7   : > { %v6230_v27 = vadd.f32 %v43128_v14, %v6166_v28  ;;  %v40071_v45 = vpop.f32.mrf.mxu1  ;;  %v6165_v58 = vmul.f32 0.16666667, %v4561_v51  ;;  %40276 = vmatpush3.msra.mxu1 %v6224_v3  ;;  %40287 = vmatmul.mubr.msk.f32.vlgmr.msra.gmra.mxu0 %vm179_vm2, %v43909_v0 }
 0x2c8   : > { %v6164_v52 = vmul.f32 0.16666667, %v40071_v45  ;;  %40277 = vmatprep.subr.mxu1 %v6223_v56  ;;  %40300 = vmatprep.mubr.msk.f32.mxu0 %vm179_vm2, %v43991_v4 }
 0x2c9   : > { %v6229_v26 = vadd.f32 %v46168_v22, %v6165_v58  ;;  %v4486_v23 = vpop.f32.mrf.mxu1  ;;  %40296 = vmatprep.subr.mxu0 %v6230_v27  ;;  %40278 = vmatpush3.msra.mxu1 %v6223_v56 }
 0x2ca   : > { %v6228_v57 = vadd.f32 %v43128_v14, %v6164_v52  ;;  %v6163_v47 = vmul.f32 0.16666667, %v4486_v23  ;;  %v40092_v24 = vpop.f32.mrf.mxu0  ;;  %40297 = vmatpush3.msra.mxu0 %v6230_v27  ;;  %40280 = vmatmul.mubr.msk.f32.vlgmr.msra.gmra.mxu1 %vm179_vm2, %v43955_v34 }
 0x2cb   : > { %v6170_v3 = vmul.f32 0.16666667, %v40092_v24  ;;  %40298 = vmatprep.subr.mxu0 %v6229_v26  ;;  %40293 = vmatprep.mubr.msk.f32.mxu1 %vm179_vm2, %v43912_v15 }
 0x2cc   : > { %v6227_v63 = vadd.f32 %v46168_v22, %v6163_v47  ;;  %v4711_v28 = vpop.f32.mrf.mxu0  ;;  %40289 = vmatprep.subr.mxu1 %v6228_v57  ;;  %40299 = vmatpush3.msra.mxu0 %v6229_v26 }
 0x2cd   : > { %v6234_v56 = vadd.f32 %v43128_v14, %v6170_v3  ;;  %v40085_v51 = vpop.f32.mrf.mxu1  ;;  %v6169_v45 = vmul.f32 0.16666667, %v4711_v28  ;;  %40290 = vmatpush3.msra.mxu1 %v6228_v57  ;;  %40301 = vmatmul.mubr.msk.f32.vlgmr.msra.gmra.mxu0 %vm179_vm2, %v43985_v19 }
 0x2ce   : > { %v6168_v27 = vmul.f32 0.16666667, %v40085_v51  ;;  %40291 = vmatprep.subr.mxu1 %v6227_v63  ;;  %40314 = vmatprep.mubr.msk.f32.mxu0 %vm179_vm2, %v44036_v11 }
 0x2cf   : > { %v6233_v58 = vadd.f32 %v46168_v22, %v6169_v45  ;;  %v4636_v52 = vpop.f32.mrf.mxu1  ;;  %40310 = vmatprep.subr.mxu0 %v6234_v56  ;;  %40292 = vmatpush3.msra.mxu1 %v6227_v63 }
 0x2d0   : > { %v6232_v26 = vadd.f32 %v43128_v14, %v6168_v27  ;;  %v6167_v23 = vmul.f32 0.16666667, %v4636_v52  ;;  %v40106_v47 = vpop.f32.mrf.mxu0  ;;  %40311 = vmatpush3.msra.mxu0 %v6234_v56  ;;  %40294 = vmatmul.mubr.msk.f32.vlgmr.msra.gmra.mxu1 %vm179_vm2, %v43915_v18 }
 0x2d1   : > { %v6174_v57 = vmul.f32 0.16666667, %v40106_v47  ;;  %40312 = vmatprep.subr.mxu0 %v6233_v58  ;;  %40307 = vmatprep.mubr.msk.f32.mxu1 %vm179_vm2, %v44045_v54 }
 0x2d2   : > { %v6231_v24 = vadd.f32 %v46168_v22, %v6167_v23  ;;  %v4861_v3 = vpop.f32.mrf.mxu0  ;;  %40303 = vmatprep.subr.mxu1 %v6232_v26  ;;  %40313 = vmatpush3.msra.mxu0 %v6233_v58 }
 0x2d3   : > { %v6238_v63 = vadd.f32 %v43128_v14, %v6174_v57  ;;  %v40099_v28 = vpop.f32.mrf.mxu1  ;;  %v6173_v51 = vmul.f32 0.16666667, %v4861_v3  ;;  %40304 = vmatpush3.msra.mxu1 %v6232_v26  ;;  %40315 = vmatmul.mubr.msk.f32.vlgmr.msra.gmra.mxu0 %vm179_vm2, %v44012_v32 }
 0x2d4   : > { %v6172_v56 = vmul.f32 0.16666667, %v40099_v28  ;;  %40305 = vmatprep.subr.mxu1 %v6231_v24  ;;  %40328 = vmatprep.mubr.msk.f32.mxu0 %vm179_vm2, %v44064_v20 }
 0x2d5   : > { %v6237_v45 = vadd.f32 %v46168_v22, %v6173_v51  ;;  %v4786_v27 = vpop.f32.mrf.mxu1  ;;  %40324 = vmatprep.subr.mxu0 %v6238_v63  ;;  %40306 = vmatpush3.msra.mxu1 %v6231_v24 }
 0x2d6   : > { %v6236_v58 = vadd.f32 %v43128_v14, %v6172_v56  ;;  %v6171_v52 = vmul.f32 0.16666667, %v4786_v27  ;;  %v40120_v23 = vpop.f32.mrf.mxu0  ;;  %40325 = vmatpush3.msra.mxu0 %v6238_v63  ;;  %40308 = vmatmul.mubr.msk.f32.vlgmr.msra.gmra.mxu1 %vm179_vm2, %v44032_v9 }
 0x2d7   : > { %v6178_v26 = vmul.f32 0.16666667, %v40120_v23  ;;  %40326 = vmatprep.subr.mxu0 %v6237_v45  ;;  %40321 = vmatprep.mubr.msk.f32.mxu1 %vm179_vm2, %v44072_v40 }
 0x2d8   : > { %v6235_v47 = vadd.f32 %v46168_v22, %v6171_v52  ;;  %v5011_v57 = vpop.f32.mrf.mxu0  ;;  %40317 = vmatprep.subr.mxu1 %v6236_v58  ;;  %40327 = vmatpush3.msra.mxu0 %v6237_v45 }
 0x2d9   : > { %v6242_v24 = vadd.f32 %v43128_v14, %v6178_v26  ;;  %v40113_v3 = vpop.f32.mrf.mxu1  ;;  %v6177_v28 = vmul.f32 0.16666667, %v5011_v57  ;;  %40318 = vmatpush3.msra.mxu1 %v6236_v58  ;;  %40329 = vmatmul.mubr.msk.f32.vlgmr.msra.gmra.mxu0 %vm179_vm2, %v44051_v2 }
 0x2da   : > { %v6176_v63 = vmul.f32 0.16666667, %v40113_v3  ;;  %40319 = vmatprep.subr.mxu1 %v6235_v47  ;;  %40342 = vmatprep.mubr.msk.f32.mxu0 %vm179_vm2, %v44099_v35 }
 0x2db   : > { %v6241_v51 = vadd.f32 %v46168_v22, %v6177_v28  ;;  %v4936_v56 = vpop.f32.mrf.mxu1  ;;  %40338 = vmatprep.subr.mxu0 %v6242_v24  ;;  %40320 = vmatpush3.msra.mxu1 %v6235_v47 }
 0x2dc   : > { %v6240_v45 = vadd.f32 %v43128_v14, %v6176_v63  ;;  %v6175_v27 = vmul.f32 0.16666667, %v4936_v56  ;;  %v40134_v52 = vpop.f32.mrf.mxu0  ;;  %40339 = vmatpush3.msra.mxu0 %v6242_v24  ;;  %40322 = vmatmul.mubr.msk.f32.vlgmr.msra.gmra.mxu1 %vm179_vm2, %v44059_v1 }
 0x2dd   : > { %v6182_v58 = vmul.f32 0.16666667, %v40134_v52  ;;  %40340 = vmatprep.subr.mxu0 %v6241_v51  ;;  %40335 = vmatprep.mubr.msk.f32.mxu1 %vm179_vm2, %v44118_v43 }
 0x2de   : > { %v6239_v23 = vadd.f32 %v46168_v22, %v6175_v27  ;;  %v5161_v26 = vpop.f32.mrf.mxu0  ;;  %40331 = vmatprep.subr.mxu1 %v6240_v45  ;;  %40341 = vmatpush3.msra.mxu0 %v6241_v51 }
 0x2df   : > { %v6246_v47 = vadd.f32 %v43128_v14, %v6182_v58  ;;  %v40127_v57 = vpop.f32.mrf.mxu1  ;;  %v6181_v3 = vmul.f32 0.16666667, %v5161_v26  ;;  %40332 = vmatpush3.msra.mxu1 %v6240_v45  ;;  %40343 = vmatmul.mubr.msk.f32.vlgmr.msra.gmra.mxu0 %vm179_vm2, %v44078_v6 }
 0x2e0   : > { %v6180_v24 = vmul.f32 0.16666667, %v40127_v57  ;;  %40333 = vmatprep.subr.mxu1 %v6239_v23  ;;  %40356 = vmatprep.mubr.msk.f32.mxu0 %vm179_vm2, %v44146_v30 }
 0x2e1   : > { %v6245_v28 = vadd.f32 %v46168_v22, %v6181_v3  ;;  %v5086_v63 = vpop.f32.mrf.mxu1  ;;  %40352 = vmatprep.subr.mxu0 %v6246_v47  ;;  %40334 = vmatpush3.msra.mxu1 %v6239_v23 }
 0x2e2   : > { %v6244_v51 = vadd.f32 %v43128_v14, %v6180_v24  ;;  %v6179_v56 = vmul.f32 0.16666667, %v5086_v63  ;;  %v40148_v27 = vpop.f32.mrf.mxu0  ;;  %40353 = vmatpush3.msra.mxu0 %v6246_v47  ;;  %40336 = vmatmul.mubr.msk.f32.vlgmr.msra.gmra.mxu1 %vm179_vm2, %v44093_v37 }
 0x2e3   : > { %v6186_v45 = vmul.f32 0.16666667, %v40148_v27  ;;  %40354 = vmatprep.subr.mxu0 %v6245_v28  ;;  %40349 = vmatprep.mubr.msk.f32.mxu1 %vm179_vm2, %v44156_v29 }
 0x2e4   : > { %v6243_v52 = vadd.f32 %v46168_v22, %v6179_v56  ;;  %v5311_v58 = vpop.f32.mrf.mxu0  ;;  %40345 = vmatprep.subr.mxu1 %v6244_v51  ;;  %40355 = vmatpush3.msra.mxu0 %v6245_v28 }
 0x2e5   : > { %v6250_v23 = vadd.f32 %v43128_v14, %v6186_v45  ;;  %v40141_v26 = vpop.f32.mrf.mxu1  ;;  %v6185_v57 = vmul.f32 0.16666667, %v5311_v58  ;;  %40346 = vmatpush3.msra.mxu1 %v6244_v51  ;;  %40357 = vmatmul.mubr.msk.f32.vlgmr.msra.gmra.mxu0 %vm179_vm2, %v44124_v17 }
 0x2e6   : > { %v6184_v47 = vmul.f32 0.16666667, %v40141_v26  ;;  %40347 = vmatprep.subr.mxu1 %v6243_v52  ;;  %40370 = vmatprep.mubr.msk.f32.mxu0 %vm179_vm2, %v44183_v12 }
 0x2e7   : > { %v6249_v3 = vadd.f32 %v46168_v22, %v6185_v57  ;;  %v5236_v24 = vpop.f32.mrf.mxu1  ;;  %40366 = vmatprep.subr.mxu0 %v6250_v23  ;;  %40348 = vmatpush3.msra.mxu1 %v6243_v52 }
 0x2e8   : > { %v6248_v28 = vadd.f32 %v43128_v14, %v6184_v47  ;;  %v6183_v63 = vmul.f32 0.16666667, %v5236_v24  ;;  %v40162_v56 = vpop.f32.mrf.mxu0  ;;  %40367 = vmatpush3.msra.mxu0 %v6250_v23  ;;  %40350 = vmatmul.mubr.msk.f32.vlgmr.msra.gmra.mxu1 %vm179_vm2, %v44136_v62 }
 0x2e9   : > { %v6190_v51 = vmul.f32 0.16666667, %v40162_v56  ;;  %40368 = vmatprep.subr.mxu0 %v6249_v3  ;;  %40363 = vmatprep.mubr.msk.f32.mxu1 %vm179_vm2, %v44191_v16 }
 0x2ea   : > { %v6247_v27 = vadd.f32 %v46168_v22, %v6183_v63  ;;  %v5461_v45 = vpop.f32.mrf.mxu0  ;;  %40359 = vmatprep.subr.mxu1 %v6248_v28  ;;  %40369 = vmatpush3.msra.mxu0 %v6249_v3 }
 0x2eb   : > { %v6254_v52 = vadd.f32 %v43128_v14, %v6190_v51  ;;  %v40155_v58 = vpop.f32.mrf.mxu1  ;;  %v6189_v26 = vmul.f32 0.16666667, %v5461_v45  ;;  %40360 = vmatpush3.msra.mxu1 %v6248_v28  ;;  %40371 = vmatmul.mubr.msk.f32.vlgmr.msra.gmra.mxu0 %vm179_vm2, %v44159_v39 }
 0x2ec   : > { %v6188_v23 = vmul.f32 0.16666667, %v40155_v58  ;;  %40361 = vmatprep.subr.mxu1 %v6247_v27  ;;  %40384 = vmatprep.mubr.msk.f32.mxu0 %vm179_vm2, %v44211_v33 }
 0x2ed   : > { %v6253_v57 = vadd.f32 %v46168_v22, %v6189_v26  ;;  %v5386_v47 = vpop.f32.mrf.mxu1  ;;  %40380 = vmatprep.subr.mxu0 %v6254_v52  ;;  %40362 = vmatpush3.msra.mxu1 %v6247_v27 }
 0x2ee   : > { %v6252_v3 = vadd.f32 %v43128_v14, %v6188_v23  ;;  %v6187_v24 = vmul.f32 0.16666667, %v5386_v47  ;;  %v40176_v63 = vpop.f32.mrf.mxu0  ;;  %40381 = vmatpush3.msra.mxu0 %v6254_v52  ;;  %40364 = vmatmul.mubr.msk.f32.vlgmr.msra.gmra.mxu1 %vm179_vm2, %v44176_v13 }
 0x2ef   : > { %v6194_v28 = vmul.f32 0.16666667, %v40176_v63  ;;  %40382 = vmatprep.subr.mxu0 %v6253_v57  ;;  %40377 = vmatprep.mubr.msk.f32.mxu1 %vm179_vm2, %v44220_v41  ;;  %v46262_v63 = vld [vmem:[#allocation7_spill] sm:$0xff] }
 0x2f0   : > { %v6251_v56 = vadd.f32 %v46168_v22, %v6187_v24  ;;  %v5611_v51 = vpop.f32.mrf.mxu0  ;;  %40373 = vmatprep.subr.mxu1 %v6252_v3  ;;  %40383 = vmatpush3.msra.mxu0 %v6253_v57 }
 0x2f1   : > { %v6258_v27 = vadd.f32 %v43128_v14, %v6194_v28  ;;  %v40169_v45 = vpop.f32.mrf.mxu1  ;;  %v6193_v58 = vmul.f32 0.16666667, %v5611_v51  ;;  %40374 = vmatpush3.msra.mxu1 %v6252_v3  ;;  %40385 = vmatmul.mubr.msk.f32.vlgmr.msra.gmra.mxu0 %vm179_vm2, %v44197_v44 }
 0x2f2   : > { %v6192_v52 = vmul.f32 0.16666667, %v40169_v45  ;;  %40375 = vmatprep.subr.mxu1 %v6251_v56  ;;  %40398 = vmatprep.mubr.msk.f32.mxu0 %vm179_vm2, %v44239_v53 }
 0x2f3   : > { %v6257_v26 = vadd.f32 %v46168_v22, %v6193_v58  ;;  %v5536_v23 = vpop.f32.mrf.mxu1  ;;  %40394 = vmatprep.subr.mxu0 %v6258_v27  ;;  %40376 = vmatpush3.msra.mxu1 %v6251_v56 }
 0x2f4   : > { %v6256_v57 = vadd.f32 %v43128_v14, %v6192_v52  ;;  %v6191_v47 = vmul.f32 0.16666667, %v5536_v23  ;;  %v40190_v24 = vpop.f32.mrf.mxu0  ;;  %40395 = vmatpush3.msra.mxu0 %v6258_v27  ;;  %40378 = vmatmul.mubr.msk.f32.vlgmr.msra.gmra.mxu1 %vm179_vm2, %v44206_v7  ;;  %v46263_v52 = vld [vmem:[#allocation4_spill] sm:$0xff]  ;;  %v46264_v23 = vld [vmem:[#allocation10_spill] sm:$0xff] }
 0x2f5   : > { %v6198_v3 = vmul.f32 0.16666667, %v40190_v24  ;;  %40396 = vmatprep.subr.mxu0 %v6257_v26  ;;  %40391 = vmatprep.mubr.msk.f32.mxu1 %vm179_vm2, %v46262_v63 }
 0x2f6   : > { %v6255_v28 = vadd.f32 %v46168_v22, %v6191_v47  ;;  %v5761_v51 = vpop.f32.mrf.mxu0  ;;  %40387 = vmatprep.subr.mxu1 %v6256_v57  ;;  %40397 = vmatpush3.msra.mxu0 %v6257_v26 }
 0x2f7   : > { %v6262_v56 = vadd.f32 %v43128_v14, %v6198_v3  ;;  %v40183_v45 = vpop.f32.mrf.mxu1  ;;  %v6197_v58 = vmul.f32 0.16666667, %v5761_v51  ;;  %40388 = vmatpush3.msra.mxu1 %v6256_v57  ;;  %40399 = vmatmul.mubr.msk.f32.vlgmr.msra.gmra.mxu0 %vm179_vm2, %v46263_v52 }
 0x2f8   : > { %v6196_v27 = vmul.f32 0.16666667, %v40183_v45  ;;  %40389 = vmatprep.subr.mxu1 %v6255_v28  ;;  %40412 = vmatprep.mubr.msk.f32.mxu0 %vm179_vm2, %v46264_v23 }
 0x2f9   : > { %v6261_v24 = vadd.f32 %v46168_v22, %v6197_v58  ;;  %v5686_v63 = vpop.f32.mrf.mxu1  ;;  %40408 = vmatprep.subr.mxu0 %v6262_v56  ;;  %40390 = vmatpush3.msra.mxu1 %v6255_v28 }
 0x2fa   : > { %v6260_v26 = vadd.f32 %v43128_v14, %v6196_v27  ;;  %v6195_v47 = vmul.f32 0.16666667, %v5686_v63  ;;  %v40204_v3 = vpop.f32.mrf.mxu0  ;;  %40409 = vmatpush3.msra.mxu0 %v6262_v56  ;;  %40392 = vmatmul.mubr.msk.f32.vlgmr.msra.gmra.mxu1 %vm179_vm2, %v46249_v59 }
 0x2fb   : > { %v6202_v57 = vmul.f32 0.16666667, %v40204_v3  ;;  %40410 = vmatprep.subr.mxu0 %v6261_v24  ;;  %40405 = vmatprep.mubr.msk.f32.mxu1 %vm179_vm2, %v46250_v31 }
 0x2fc   : > { %v6259_v51 = vadd.f32 %v46168_v22, %v6195_v47  ;;  %v5911_v45 = vpop.f32.mrf.mxu0  ;;  %40401 = vmatprep.subr.mxu1 %v6260_v26  ;;  %40411 = vmatpush3.msra.mxu0 %v6261_v24 }
 0x2fd   : > { %v6266_v28 = vadd.f32 %v43128_v14, %v6202_v57  ;;  %v40197_v58 = vpop.f32.mrf.mxu1  ;;  %v6201_v27 = vmul.f32 0.16666667, %v5911_v45  ;;  %40402 = vmatpush3.msra.mxu1 %v6260_v26  ;;  %40413 = vmatmul.mubr.msk.f32.vlgmr.msra.gmra.mxu0 %vm179_vm2, %v44252_v10  ;;  %v46265_v57 = vld [vmem:[#allocation11_spill] sm:$0xff] }
 0x2fe   : > { %v6200_v63 = vmul.f32 0.16666667, %v40197_v58  ;;  %40403 = vmatprep.subr.mxu1 %v6259_v51  ;;  %40426 = vmatprep.mubr.msk.f32.mxu0 %vm179_vm2, %v44294_v25 }
 0x2ff   : > { %v6265_v56 = vadd.f32 %v46168_v22, %v6201_v27  ;;  %v5836_v3 = vpop.f32.mrf.mxu1  ;;  %40422 = vmatprep.subr.mxu0 %v6266_v28  ;;  %40404 = vmatpush3.msra.mxu1 %v6259_v51 }
 0x300   : > { %v6264_v24 = vadd.f32 %v43128_v14, %v6200_v63  ;;  %v6199_v47 = vmul.f32 0.16666667, %v5836_v3  ;;  %40423 = vmatpush3.msra.mxu0 %v6266_v28  ;;  %40406 = vmatmul.mubr.msk.f32.vlgmr.msra.gmra.mxu1 %vm179_vm2, %v44260_v36 }
 0x301   : > { %v40218_v26 = vpop.f32.mrf.mxu0  ;;  %40424 = vmatprep.subr.mxu0 %v6265_v56  ;;  %40419 = vmatprep.mubr.msk.f32.mxu1 %vm179_vm2, %v46265_v57 }
 0x302   : > { %v6263_v45 = vadd.f32 %v46168_v22, %v6199_v47  ;;  %v6206_v58 = vmul.f32 0.16666667, %v40218_v26  ;;  %v40211_v25 = vpop.f32.mrf.mxu1  ;;  %40415 = vmatprep.subr.mxu1 %v6264_v24  ;;  %40425 = vmatpush3.msra.mxu0 %v6265_v56 }
 0x303   : > { %v6204_v27 = vmul.f32 0.16666667, %v40211_v25  ;;  %v6061_v51 = vpop.f32.mrf.mxu0  ;;  %40416 = vmatpush3.msra.mxu1 %v6264_v24  ;;  %40427 = vmatmul.mubr.msk.f32.vlgmr.msra.gmra.mxu0 %vm179_vm2, %v44280_v38 }
 0x304   : > { %v6270_v28 = vadd.f32 %v43128_v14, %v6206_v58  ;;  %v6205_v63 = vmul.f32 0.16666667, %v6061_v51  ;;  %v5986_v3 = vpop.f32.mrf.mxu1  ;;  %40417 = vmatprep.subr.mxu1 %v6263_v45  ;;  %40440 = vmatprep.mubr.msk.f32.mxu0 %vm179_vm2, %v44322_v49 }
 0x305   : > { %v6268_v47 = vadd.f32 %v43128_v14, %v6204_v27  ;;  %v6203_v26 = vmul.f32 0.16666667, %v5986_v3  ;;  %40418 = vmatpush3.msra.mxu1 %v6263_v45  ;;  %v46267_v3 = vld [vmem:[#allocation24_spill] sm:$0xff] }
 0x306   : > { %v6269_v56 = vadd.f32 %v46168_v22, %v6205_v63  ;;  %40436 = vmatprep.subr.mxu0 %v6270_v28  ;;  %40420 = vmatmul.mubr.msk.f32.vlgmr.msra.gmra.mxu1 %vm179_vm2, %v44288_v46  ;;  %v46266_v63 = vld [vmem:[#allocation26_spill] sm:$0xff] }
 0x307   : > { %v6267_v25 = vadd.f32 %v46168_v22, %v6203_v26  ;;  %v40225_v24 = vpop.f32.mrf.mxu1  ;;  %40437 = vmatpush3.msra.mxu0 %v6270_v28  ;;  %40429 = vmatprep.subr.mxu1 %v6268_v47 }
 0x308   : > { %v6208_v58 = vmul.f32 0.16666667, %v40225_v24  ;;  %40438 = vmatprep.subr.mxu0 %v6269_v56  ;;  %40430 = vmatpush3.msra.mxu1 %v6268_v47 }
 0x309   : > { %v6136_v51 = vpop.f32.mrf.mxu1  ;;  %40433 = vmatprep.mubr.msk.f32.mxu1 %vm179_vm2, %v44330_v55  ;;  %40439 = vmatpush3.msra.mxu0 %v6269_v56 }
 0x30a   : > { %v6272_v45 = vadd.f32 %v43128_v14, %v6208_v58  ;;  %v6207_v27 = vmul.f32 0.16666667, %v6136_v51  ;;  %40431 = vmatprep.subr.mxu1 %v6267_v25  ;;  %40441 = vmatmul.mubr.msk.f32.vlgmr.msra.gmra.mxu0 %vm179_vm2, %v44308_v61  ;;  %v46268_v51 = vld [vmem:[#allocation31_spill] sm:$0xff] }
 0x30b   : > { %40432 = vmatpush3.msra.mxu1 %v6267_v25  ;;  %40454 = vmatprep.mubr.msk.f32.mxu0 %vm179_vm2, %v46238_v5 }
 0x30c   : > { %v6271_v28 = vadd.f32 %v46168_v22, %v6207_v27  ;;  %40434 = vmatmul.mubr.msk.f32.vlgmr.msra.gmra.mxu1 %vm179_vm2, %v44316_v21  ;;  %40443 = vmatprep.subr.mxu1 %v6272_v45 }
 0x30d   : > { %40444 = vmatpush3.msra.mxu1 %v6272_v45  ;;  %40447 = vmatprep.mubr.msk.f32.mxu1 %vm179_vm2, %v46251_v50  ;;  %v46269_v45 = vld [vmem:[#allocation19_spill] sm:$0xff] }
 0x30e   : > { %40445 = vmatprep.subr.mxu1 %v6271_v28 }
 0x30f   : > { %40446 = vmatpush3.msra.mxu1 %v6271_v28 }
 0x310   : > { %40448 = vmatmul.mubr.msk.f32.vlgmr.msra.gmra.mxu1 %vm179_vm2, %v46266_v63 }
 0x311   : > { %40461 = vmatprep.mubr.msk.f32.mxu1 %vm179_vm2, %v46267_v3 }
 0x345   : > { %v40232_v47 = vpop.f32.mrf.mxu0 }
 0x346   : > { %v8674_v26 = vmul.f32 0.2, %v40232_v47 }
 0x347   : > { %v6339_v56 = vpop.f32.mrf.mxu0 }
 0x348   : > { %v8738_v25 = vadd.f32 %v43128_v14, %v8674_v26  ;;  %v8673_v24 = vmul.f32 0.2, %v6339_v56  ;;  %v46270_v56 = vld [vmem:[#allocation32_spill] sm:$0xff] }
 0x34a   : > { %v8737_v58 = vadd.f32 %v46168_v22, %v8673_v24  ;;  %40450 = vmatprep.subr.mxu0 %v8738_v25 }
 0x34b   : > { %40451 = vmatpush3.msra.mxu0 %v8738_v25  ;;  %v46271_v25 = vld [vmem:[#allocation36_spill] sm:$0xff] }
 0x34c   : > { %40452 = vmatprep.subr.mxu0 %v8737_v58 }
 0x34d   : > { %40453 = vmatpush3.msra.mxu0 %v8737_v58 }
 0x34e   : > { %40455 = vmatmul.mubr.msk.f32.vlgmr.msra.gmra.mxu0 %vm179_vm2, %v46268_v51  ;;  %v40239_v27 = vpop.f32.mrf.mxu1 }
 0x34f   : > { %40468 = vmatprep.mubr.msk.f32.mxu0 %vm179_vm2, %v46269_v45  ;;  %v8676_v28 = vmul.f32 0.2, %v40239_v27 }
 0x350   : > { %v6414_v3 = vpop.f32.mrf.mxu1 }
 0x351   : > { %v8740_v47 = vadd.f32 %v43128_v14, %v8676_v28  ;;  %v8675_v63 = vmul.f32 0.2, %v6414_v3  ;;  %v46273_v28 = vld [vmem:[#allocation40_spill] sm:$0xff] }
 0x353   : > { %v8739_v26 = vadd.f32 %v46168_v22, %v8675_v63  ;;  %40457 = vmatprep.subr.mxu1 %v8740_v47  ;;  %v46272_v63 = vld [vmem:[#allocation35_spill] sm:$0xff] }
 0x354   : > { %40458 = vmatpush3.msra.mxu1 %v8740_v47 }
 0x355   : > { %40459 = vmatprep.subr.mxu1 %v8739_v26 }
 0x356   : > { %40460 = vmatpush3.msra.mxu1 %v8739_v26 }
 0x357   : > { %40462 = vmatmul.mubr.msk.f32.vlgmr.msra.gmra.mxu1 %vm179_vm2, %v46270_v56 }
 0x358   : > { %40475 = vmatprep.mubr.msk.f32.mxu1 %vm179_vm2, %v46271_v25 }
 0x35b   : > { %v40246_v24 = vpop.f32.mrf.mxu0 }
 0x35c   : > { %v8678_v58 = vmul.f32 0.2, %v40246_v24 }
 0x35d   : > { %v6489_v45 = vpop.f32.mrf.mxu0 }
 0x35e   : > { %v8742_v27 = vadd.f32 %v43128_v14, %v8678_v58  ;;  %v8677_v51 = vmul.f32 0.2, %v6489_v45  ;;  %v46275_v58 = vld [vmem:[#allocation46_spill] sm:$0xff] }
 0x360   : > { %v8741_v3 = vadd.f32 %v46168_v22, %v8677_v51  ;;  %40464 = vmatprep.subr.mxu0 %v8742_v27  ;;  %v46274_v51 = vld [vmem:[#allocation39_spill] sm:$0xff] }
 0x361   : > { %40465 = vmatpush3.msra.mxu0 %v8742_v27 }
 0x362   : > { %40466 = vmatprep.subr.mxu0 %v8741_v3 }
 0x363   : > { %40467 = vmatpush3.msra.mxu0 %v8741_v3 }
 0x364   : > { %40469 = vmatmul.mubr.msk.f32.vlgmr.msra.gmra.mxu0 %vm179_vm2, %v46272_v63 }
 0x365   : > { %40482 = vmatprep.mubr.msk.f32.mxu0 %vm179_vm2, %v46273_v28 }
 0x366   : > { %v40253_v47 = vpop.f32.mrf.mxu1 }
 0x367   : > { %v8680_v26 = vmul.f32 0.2, %v40253_v47 }
 0x368   : > { %v6564_v25 = vpop.f32.mrf.mxu1 }
 0x369   : > { %v8744_v24 = vadd.f32 %v43128_v14, %v8680_v26  ;;  %v8679_v56 = vmul.f32 0.2, %v6564_v25  ;;  %v46277_v26 = vld [vmem:[#allocation3_spill] sm:$0xff] }
 0x36b   : > { %v8743_v45 = vadd.f32 %v46168_v22, %v8679_v56  ;;  %40471 = vmatprep.subr.mxu1 %v8744_v24  ;;  %v46276_v56 = vld [vmem:[#allocation45_spill] sm:$0xff] }
 0x36c   : > { %40472 = vmatpush3.msra.mxu1 %v8744_v24 }
 0x36d   : > { %40473 = vmatprep.subr.mxu1 %v8743_v45 }
 0x36e   : > { %40474 = vmatpush3.msra.mxu1 %v8743_v45 }
 0x36f   : > { %40476 = vmatmul.mubr.msk.f32.vlgmr.msra.gmra.mxu1 %vm179_vm2, %v46274_v51 }
 0x370   : > { %40489 = vmatprep.mubr.msk.f32.mxu1 %vm179_vm2, %v46275_v58 }
 0x376   : > { %v40260_v27 = vpop.f32.mrf.mxu0 }
 0x377   : > { %v8682_v3 = vmul.f32 0.2, %v40260_v27 }
 0x378   : > { %v6639_v28 = vpop.f32.mrf.mxu0 }
 0x379   : > { %v8746_v47 = vadd.f32 %v43128_v14, %v8682_v3  ;;  %v8681_v63 = vmul.f32 0.2, %v6639_v28 }
 0x37b   : > { %v8745_v25 = vadd.f32 %v46168_v22, %v8681_v63  ;;  %40478 = vmatprep.subr.mxu0 %v8746_v47 }
 0x37c   : > { %40479 = vmatpush3.msra.mxu0 %v8746_v47 }
 0x37d   : > { %40480 = vmatprep.subr.mxu0 %v8745_v25 }
 0x37e   : > { %40481 = vmatpush3.msra.mxu0 %v8745_v25 }
 0x37f   : > { %40483 = vmatmul.mubr.msk.f32.vlgmr.msra.gmra.mxu0 %vm179_vm2, %v46276_v56 }
 0x380   : > { %40496 = vmatprep.mubr.msk.f32.mxu0 %vm179_vm2, %v46277_v26 }
 0x381   : > { %v40267_v24 = vpop.f32.mrf.mxu1 }
 0x382   : > { %v8684_v45 = vmul.f32 0.2, %v40267_v24 }
 0x383   : > { %v6714_v58 = vpop.f32.mrf.mxu1  ;;  %v40274_v27 = vpop.f32.mrf.mxu0 }
 0x384   : > { %v8748_v51 = vadd.f32 %v43128_v14, %v8684_v45  ;;  %v8683_v3 = vmul.f32 0.2, %v6714_v58  ;;  %v8686_v28 = vmul.f32 0.2, %v40274_v27 }
 0x385   : > { %v6789_v50 = vpop.f32.mrf.mxu0 }
 0x386   : > { %v8747_v63 = vadd.f32 %v46168_v22, %v8683_v3  ;;  %40485 = vmatprep.subr.mxu1 %v8748_v51  ;;  %v8750_v47 = vadd.f32 %v43128_v14, %v8686_v28  ;;  %v8685_v25 = vmul.f32 0.2, %v6789_v50 }
 0x387   : > { %40486 = vmatpush3.msra.mxu1 %v8748_v51  ;;  %v40288_v56 = vpop.f32.mrf.mxu0 }
 0x388   : > { %40487 = vmatprep.subr.mxu1 %v8747_v63  ;;  %v8749_v26 = vadd.f32 %v46168_v22, %v8685_v25  ;;  %v8690_v21 = vmul.f32 0.2, %v40288_v56  ;;  %40492 = vmatprep.subr.mxu0 %v8750_v47 }
 0x389   : > { %40488 = vmatpush3.msra.mxu1 %v8747_v63  ;;  %v6939_v24 = vpop.f32.mrf.mxu0  ;;  %40493 = vmatpush3.msra.mxu0 %v8750_v47 }
 0x38a   : > { %40490 = vmatmul.mubr.msk.f32.vlgmr.msra.gmra.mxu1 %vm179_vm2, %v43897_v42  ;;  %v8754_v58 = vadd.f32 %v43128_v14, %v8690_v21  ;;  %v40281_v45 = vpop.f32.mrf.mxu1  ;;  %v8689_v27 = vmul.f32 0.2, %v6939_v24  ;;  %40494 = vmatprep.subr.mxu0 %v8749_v26 }
 0x38b   : > { %40503 = vmatprep.mubr.msk.f32.mxu1 %vm179_vm2, %v43977_v60  ;;  %v8688_v50 = vmul.f32 0.2, %v40281_v45  ;;  %40495 = vmatpush3.msra.mxu0 %v8749_v26 }
 0x38c   : > { %v8753_v51 = vadd.f32 %v46168_v22, %v8689_v27  ;;  %v6864_v56 = vpop.f32.mrf.mxu1  ;;  %40497 = vmatmul.mubr.msk.f32.vlgmr.msra.gmra.mxu0 %vm179_vm2, %v43927_v8  ;;  %40506 = vmatprep.subr.mxu0 %v8754_v58 }
 0x38d   : > { %v8752_v3 = vadd.f32 %v43128_v14, %v8688_v50  ;;  %v8687_v28 = vmul.f32 0.2, %v6864_v56  ;;  %v40302_v63 = vpop.f32.mrf.mxu0  ;;  %40507 = vmatpush3.msra.mxu0 %v8754_v58  ;;  %40510 = vmatprep.mubr.msk.f32.mxu0 %vm179_vm2, %v43878_v48 }
 0x38e   : > { %v8694_v21 = vmul.f32 0.2, %v40302_v63  ;;  %40508 = vmatprep.subr.mxu0 %v8753_v51 }
 0x38f   : > { %v8751_v47 = vadd.f32 %v46168_v22, %v8687_v28  ;;  %v7089_v26 = vpop.f32.mrf.mxu0  ;;  %40499 = vmatprep.subr.mxu1 %v8752_v3  ;;  %40509 = vmatpush3.msra.mxu0 %v8753_v51 }
 0x390   : > { %v8758_v25 = vadd.f32 %v43128_v14, %v8694_v21  ;;  %v40295_v24 = vpop.f32.mrf.mxu1  ;;  %v8693_v45 = vmul.f32 0.2, %v7089_v26  ;;  %40500 = vmatpush3.msra.mxu1 %v8752_v3  ;;  %40511 = vmatmul.mubr.msk.f32.vlgmr.msra.gmra.mxu0 %vm179_vm2, %v43909_v0 }
 0x391   : > { %v8692_v27 = vmul.f32 0.2, %v40295_v24  ;;  %40501 = vmatprep.subr.mxu1 %v8751_v47  ;;  %40524 = vmatprep.mubr.msk.f32.mxu0 %vm179_vm2, %v43991_v4 }
 0x392   : > { %v8757_v58 = vadd.f32 %v46168_v22, %v8693_v45  ;;  %v7014_v50 = vpop.f32.mrf.mxu1  ;;  %40520 = vmatprep.subr.mxu0 %v8758_v25  ;;  %40502 = vmatpush3.msra.mxu1 %v8751_v47 }
 0x393   : > { %v8756_v51 = vadd.f32 %v43128_v14, %v8692_v27  ;;  %v8691_v56 = vmul.f32 0.2, %v7014_v50  ;;  %v40316_v28 = vpop.f32.mrf.mxu0  ;;  %40521 = vmatpush3.msra.mxu0 %v8758_v25  ;;  %40504 = vmatmul.mubr.msk.f32.vlgmr.msra.gmra.mxu1 %vm179_vm2, %v43955_v34 }
 0x394   : > { %v8698_v3 = vmul.f32 0.2, %v40316_v28  ;;  %40522 = vmatprep.subr.mxu0 %v8757_v58  ;;  %40517 = vmatprep.mubr.msk.f32.mxu1 %vm179_vm2, %v43912_v15 }
 0x395   : > { %v8755_v63 = vadd.f32 %v46168_v22, %v8691_v56  ;;  %v7239_v21 = vpop.f32.mrf.mxu0  ;;  %40513 = vmatprep.subr.mxu1 %v8756_v51  ;;  %40523 = vmatpush3.msra.mxu0 %v8757_v58 }
 0x396   : > { %v8762_v47 = vadd.f32 %v43128_v14, %v8698_v3  ;;  %v40309_v26 = vpop.f32.mrf.mxu1  ;;  %v8697_v24 = vmul.f32 0.2, %v7239_v21  ;;  %40514 = vmatpush3.msra.mxu1 %v8756_v51  ;;  %40525 = vmatmul.mubr.msk.f32.vlgmr.msra.gmra.mxu0 %vm179_vm2, %v43985_v19 }
 0x397   : > { %v8696_v25 = vmul.f32 0.2, %v40309_v26  ;;  %40515 = vmatprep.subr.mxu1 %v8755_v63  ;;  %40538 = vmatprep.mubr.msk.f32.mxu0 %vm179_vm2, %v44036_v11 }
 0x398   : > { %v8761_v45 = vadd.f32 %v46168_v22, %v8697_v24  ;;  %v7164_v27 = vpop.f32.mrf.mxu1  ;;  %40534 = vmatprep.subr.mxu0 %v8762_v47  ;;  %40516 = vmatpush3.msra.mxu1 %v8755_v63 }
 0x399   : > { %v8760_v58 = vadd.f32 %v43128_v14, %v8696_v25  ;;  %v8695_v50 = vmul.f32 0.2, %v7164_v27  ;;  %v40330_v56 = vpop.f32.mrf.mxu0  ;;  %40535 = vmatpush3.msra.mxu0 %v8762_v47  ;;  %40518 = vmatmul.mubr.msk.f32.vlgmr.msra.gmra.mxu1 %vm179_vm2, %v43915_v18 }
 0x39a   : > { %v8702_v51 = vmul.f32 0.2, %v40330_v56  ;;  %40536 = vmatprep.subr.mxu0 %v8761_v45  ;;  %40531 = vmatprep.mubr.msk.f32.mxu1 %vm179_vm2, %v44045_v54 }
 0x39b   : > { %v8759_v28 = vadd.f32 %v46168_v22, %v8695_v50  ;;  %v7389_v3 = vpop.f32.mrf.mxu0  ;;  %40527 = vmatprep.subr.mxu1 %v8760_v58  ;;  %40537 = vmatpush3.msra.mxu0 %v8761_v45 }
 0x39c   : > { %v8766_v63 = vadd.f32 %v43128_v14, %v8702_v51  ;;  %v40323_v21 = vpop.f32.mrf.mxu1  ;;  %v8701_v26 = vmul.f32 0.2, %v7389_v3  ;;  %40528 = vmatpush3.msra.mxu1 %v8760_v58  ;;  %40539 = vmatmul.mubr.msk.f32.vlgmr.msra.gmra.mxu0 %vm179_vm2, %v44012_v32 }
 0x39d   : > { %v8700_v47 = vmul.f32 0.2, %v40323_v21  ;;  %40529 = vmatprep.subr.mxu1 %v8759_v28  ;;  %40552 = vmatprep.mubr.msk.f32.mxu0 %vm179_vm2, %v44064_v20 }
 0x39e   : > { %v8765_v24 = vadd.f32 %v46168_v22, %v8701_v26  ;;  %v7314_v25 = vpop.f32.mrf.mxu1  ;;  %40548 = vmatprep.subr.mxu0 %v8766_v63  ;;  %40530 = vmatpush3.msra.mxu1 %v8759_v28 }
 0x39f   : > { %v8764_v45 = vadd.f32 %v43128_v14, %v8700_v47  ;;  %v8699_v27 = vmul.f32 0.2, %v7314_v25  ;;  %v40344_v50 = vpop.f32.mrf.mxu0  ;;  %40549 = vmatpush3.msra.mxu0 %v8766_v63  ;;  %40532 = vmatmul.mubr.msk.f32.vlgmr.msra.gmra.mxu1 %vm179_vm2, %v44032_v9 }
 0x3a0   : > { %v8706_v58 = vmul.f32 0.2, %v40344_v50  ;;  %40550 = vmatprep.subr.mxu0 %v8765_v24  ;;  %40545 = vmatprep.mubr.msk.f32.mxu1 %vm179_vm2, %v44072_v40 }
 0x3a1   : > { %v8763_v56 = vadd.f32 %v46168_v22, %v8699_v27  ;;  %v7539_v51 = vpop.f32.mrf.mxu0  ;;  %40541 = vmatprep.subr.mxu1 %v8764_v45  ;;  %40551 = vmatpush3.msra.mxu0 %v8765_v24 }
 0x3a2   : > { %v8770_v28 = vadd.f32 %v43128_v14, %v8706_v58  ;;  %v40337_v3 = vpop.f32.mrf.mxu1  ;;  %v8705_v21 = vmul.f32 0.2, %v7539_v51  ;;  %40542 = vmatpush3.msra.mxu1 %v8764_v45  ;;  %40553 = vmatmul.mubr.msk.f32.vlgmr.msra.gmra.mxu0 %vm179_vm2, %v44051_v2 }
 0x3a3   : > { %v8704_v63 = vmul.f32 0.2, %v40337_v3  ;;  %40543 = vmatprep.subr.mxu1 %v8763_v56  ;;  %40566 = vmatprep.mubr.msk.f32.mxu0 %vm179_vm2, %v44099_v35 }
 0x3a4   : > { %v8769_v26 = vadd.f32 %v46168_v22, %v8705_v21  ;;  %v7464_v47 = vpop.f32.mrf.mxu1  ;;  %40562 = vmatprep.subr.mxu0 %v8770_v28  ;;  %40544 = vmatpush3.msra.mxu1 %v8763_v56 }
 0x3a5   : > { %v8768_v24 = vadd.f32 %v43128_v14, %v8704_v63  ;;  %v8703_v25 = vmul.f32 0.2, %v7464_v47  ;;  %v40358_v27 = vpop.f32.mrf.mxu0  ;;  %40563 = vmatpush3.msra.mxu0 %v8770_v28  ;;  %40546 = vmatmul.mubr.msk.f32.vlgmr.msra.gmra.mxu1 %vm179_vm2, %v44059_v1 }
 0x3a6   : > { %v8710_v45 = vmul.f32 0.2, %v40358_v27  ;;  %40564 = vmatprep.subr.mxu0 %v8769_v26  ;;  %40559 = vmatprep.mubr.msk.f32.mxu1 %vm179_vm2, %v44118_v43 }
 0x3a7   : > { %v8767_v50 = vadd.f32 %v46168_v22, %v8703_v25  ;;  %v7689_v58 = vpop.f32.mrf.mxu0  ;;  %40555 = vmatprep.subr.mxu1 %v8768_v24  ;;  %40565 = vmatpush3.msra.mxu0 %v8769_v26 }
 0x3a8   : > { %v8774_v56 = vadd.f32 %v43128_v14, %v8710_v45  ;;  %v40351_v51 = vpop.f32.mrf.mxu1  ;;  %v8709_v3 = vmul.f32 0.2, %v7689_v58  ;;  %40556 = vmatpush3.msra.mxu1 %v8768_v24  ;;  %40567 = vmatmul.mubr.msk.f32.vlgmr.msra.gmra.mxu0 %vm179_vm2, %v44078_v6 }
 0x3a9   : > { %v8708_v28 = vmul.f32 0.2, %v40351_v51  ;;  %40557 = vmatprep.subr.mxu1 %v8767_v50  ;;  %40580 = vmatprep.mubr.msk.f32.mxu0 %vm179_vm2, %v44146_v30 }
 0x3aa   : > { %v8773_v21 = vadd.f32 %v46168_v22, %v8709_v3  ;;  %v7614_v63 = vpop.f32.mrf.mxu1  ;;  %40576 = vmatprep.subr.mxu0 %v8774_v56  ;;  %40558 = vmatpush3.msra.mxu1 %v8767_v50 }
 0x3ab   : > { %v8772_v26 = vadd.f32 %v43128_v14, %v8708_v28  ;;  %v8707_v47 = vmul.f32 0.2, %v7614_v63  ;;  %v40372_v25 = vpop.f32.mrf.mxu0  ;;  %40577 = vmatpush3.msra.mxu0 %v8774_v56  ;;  %40560 = vmatmul.mubr.msk.f32.vlgmr.msra.gmra.mxu1 %vm179_vm2, %v44093_v37 }
 0x3ac   : > { %v8714_v24 = vmul.f32 0.2, %v40372_v25  ;;  %40578 = vmatprep.subr.mxu0 %v8773_v21  ;;  %40573 = vmatprep.mubr.msk.f32.mxu1 %vm179_vm2, %v44156_v29 }
 0x3ad   : > { %v8771_v27 = vadd.f32 %v46168_v22, %v8707_v47  ;;  %v7839_v45 = vpop.f32.mrf.mxu0  ;;  %40569 = vmatprep.subr.mxu1 %v8772_v26  ;;  %40579 = vmatpush3.msra.mxu0 %v8773_v21 }
 0x3ae   : > { %v8778_v50 = vadd.f32 %v43128_v14, %v8714_v24  ;;  %v40365_v58 = vpop.f32.mrf.mxu1  ;;  %v8713_v51 = vmul.f32 0.2, %v7839_v45  ;;  %40570 = vmatpush3.msra.mxu1 %v8772_v26  ;;  %40581 = vmatmul.mubr.msk.f32.vlgmr.msra.gmra.mxu0 %vm179_vm2, %v44124_v17 }
 0x3af   : > { %v8712_v56 = vmul.f32 0.2, %v40365_v58  ;;  %40571 = vmatprep.subr.mxu1 %v8771_v27  ;;  %40594 = vmatprep.mubr.msk.f32.mxu0 %vm179_vm2, %v44183_v12 }
 0x3b0   : > { %v8777_v3 = vadd.f32 %v46168_v22, %v8713_v51  ;;  %v7764_v28 = vpop.f32.mrf.mxu1  ;;  %40590 = vmatprep.subr.mxu0 %v8778_v50  ;;  %40572 = vmatpush3.msra.mxu1 %v8771_v27 }
 0x3b1   : > { %v8776_v21 = vadd.f32 %v43128_v14, %v8712_v56  ;;  %v8711_v63 = vmul.f32 0.2, %v7764_v28  ;;  %v40386_v47 = vpop.f32.mrf.mxu0  ;;  %40591 = vmatpush3.msra.mxu0 %v8778_v50  ;;  %40574 = vmatmul.mubr.msk.f32.vlgmr.msra.gmra.mxu1 %vm179_vm2, %v44136_v62 }
 0x3b2   : > { %v8718_v26 = vmul.f32 0.2, %v40386_v47  ;;  %40592 = vmatprep.subr.mxu0 %v8777_v3  ;;  %40587 = vmatprep.mubr.msk.f32.mxu1 %vm179_vm2, %v44191_v16 }
 0x3b3   : > { %v8775_v25 = vadd.f32 %v46168_v22, %v8711_v63  ;;  %v7989_v24 = vpop.f32.mrf.mxu0  ;;  %40583 = vmatprep.subr.mxu1 %v8776_v21  ;;  %40593 = vmatpush3.msra.mxu0 %v8777_v3 }
 0x3b4   : > { %v8782_v27 = vadd.f32 %v43128_v14, %v8718_v26  ;;  %v40379_v45 = vpop.f32.mrf.mxu1  ;;  %v8717_v58 = vmul.f32 0.2, %v7989_v24  ;;  %40584 = vmatpush3.msra.mxu1 %v8776_v21  ;;  %40595 = vmatmul.mubr.msk.f32.vlgmr.msra.gmra.mxu0 %vm179_vm2, %v44159_v39 }
 0x3b5   : > { %v8716_v50 = vmul.f32 0.2, %v40379_v45  ;;  %40585 = vmatprep.subr.mxu1 %v8775_v25  ;;  %40608 = vmatprep.mubr.msk.f32.mxu0 %vm179_vm2, %v44211_v33 }
 0x3b6   : > { %v8781_v51 = vadd.f32 %v46168_v22, %v8717_v58  ;;  %v7914_v56 = vpop.f32.mrf.mxu1  ;;  %40604 = vmatprep.subr.mxu0 %v8782_v27  ;;  %40586 = vmatpush3.msra.mxu1 %v8775_v25 }
 0x3b7   : > { %v8780_v3 = vadd.f32 %v43128_v14, %v8716_v50  ;;  %v8715_v28 = vmul.f32 0.2, %v7914_v56  ;;  %v40400_v63 = vpop.f32.mrf.mxu0  ;;  %40605 = vmatpush3.msra.mxu0 %v8782_v27  ;;  %40588 = vmatmul.mubr.msk.f32.vlgmr.msra.gmra.mxu1 %vm179_vm2, %v44176_v13 }
 0x3b8   : > { %v8722_v21 = vmul.f32 0.2, %v40400_v63  ;;  %40606 = vmatprep.subr.mxu0 %v8781_v51  ;;  %40601 = vmatprep.mubr.msk.f32.mxu1 %vm179_vm2, %v44220_v41  ;;  %v46278_v63 = vld [vmem:[#allocation7_spill] sm:$0xff] }
 0x3b9   : > { %v8779_v47 = vadd.f32 %v46168_v22, %v8715_v28  ;;  %v8139_v26 = vpop.f32.mrf.mxu0  ;;  %40597 = vmatprep.subr.mxu1 %v8780_v3  ;;  %40607 = vmatpush3.msra.mxu0 %v8781_v51 }
 0x3ba   : > { %v8786_v25 = vadd.f32 %v43128_v14, %v8722_v21  ;;  %v40393_v24 = vpop.f32.mrf.mxu1  ;;  %v8721_v45 = vmul.f32 0.2, %v8139_v26  ;;  %40598 = vmatpush3.msra.mxu1 %v8780_v3  ;;  %40609 = vmatmul.mubr.msk.f32.vlgmr.msra.gmra.mxu0 %vm179_vm2, %v44197_v44 }
 0x3bb   : > { %v8720_v27 = vmul.f32 0.2, %v40393_v24  ;;  %40599 = vmatprep.subr.mxu1 %v8779_v47  ;;  %40622 = vmatprep.mubr.msk.f32.mxu0 %vm179_vm2, %v44239_v53 }
 0x3bc   : > { %v8785_v58 = vadd.f32 %v46168_v22, %v8721_v45  ;;  %v8064_v50 = vpop.f32.mrf.mxu1  ;;  %40618 = vmatprep.subr.mxu0 %v8786_v25  ;;  %40600 = vmatpush3.msra.mxu1 %v8779_v47 }
 0x3bd   : > { %v8784_v51 = vadd.f32 %v43128_v14, %v8720_v27  ;;  %v8719_v56 = vmul.f32 0.2, %v8064_v50  ;;  %v40414_v28 = vpop.f32.mrf.mxu0  ;;  %40619 = vmatpush3.msra.mxu0 %v8786_v25  ;;  %40602 = vmatmul.mubr.msk.f32.vlgmr.msra.gmra.mxu1 %vm179_vm2, %v44206_v7 }
 0x3be   : > { %v8726_v3 = vmul.f32 0.2, %v40414_v28  ;;  %40620 = vmatprep.subr.mxu0 %v8785_v58  ;;  %40615 = vmatprep.mubr.msk.f32.mxu1 %vm179_vm2, %v46278_v63 }
 0x3bf   : > { %v8783_v21 = vadd.f32 %v46168_v22, %v8719_v56  ;;  %v8289_v26 = vpop.f32.mrf.mxu0  ;;  %40611 = vmatprep.subr.mxu1 %v8784_v51  ;;  %40621 = vmatpush3.msra.mxu0 %v8785_v58 }
 0x3c0   : > { %v8790_v47 = vadd.f32 %v43128_v14, %v8726_v3  ;;  %v40407_v24 = vpop.f32.mrf.mxu1  ;;  %v8725_v45 = vmul.f32 0.2, %v8289_v26  ;;  %40612 = vmatpush3.msra.mxu1 %v8784_v51  ;;  %40623 = vmatmul.mubr.msk.f32.vlgmr.msra.gmra.mxu0 %vm179_vm2, %v46263_v52 }
 0x3c1   : > { %v8724_v25 = vmul.f32 0.2, %v40407_v24  ;;  %40613 = vmatprep.subr.mxu1 %v8783_v21  ;;  %40636 = vmatprep.mubr.msk.f32.mxu0 %vm179_vm2, %v46264_v23 }
 0x3c2   : > { %v8789_v27 = vadd.f32 %v46168_v22, %v8725_v45  ;;  %v8214_v50 = vpop.f32.mrf.mxu1  ;;  %40632 = vmatprep.subr.mxu0 %v8790_v47  ;;  %40614 = vmatpush3.msra.mxu1 %v8783_v21 }
 0x3c3   : > { %v8788_v58 = vadd.f32 %v43128_v14, %v8724_v25  ;;  %v8723_v56 = vmul.f32 0.2, %v8214_v50  ;;  %v40428_v28 = vpop.f32.mrf.mxu0  ;;  %40633 = vmatpush3.msra.mxu0 %v8790_v47  ;;  %40616 = vmatmul.mubr.msk.f32.vlgmr.msra.gmra.mxu1 %vm179_vm2, %v46249_v59  ;;  %v46279_v25 = vld [vmem:[#allocation9_spill] sm:$0xff] }
 0x3c4   : > { %v8730_v51 = vmul.f32 0.2, %v40428_v28  ;;  %40634 = vmatprep.subr.mxu0 %v8789_v27  ;;  %40629 = vmatprep.mubr.msk.f32.mxu1 %vm179_vm2, %v46250_v31 }
 0x3c5   : > { %v8787_v3 = vadd.f32 %v46168_v22, %v8723_v56  ;;  %v8439_v26 = vpop.f32.mrf.mxu0  ;;  %40625 = vmatprep.subr.mxu1 %v8788_v58  ;;  %40635 = vmatpush3.msra.mxu0 %v8789_v27 }
 0x3c6   : > { %v8794_v21 = vadd.f32 %v43128_v14, %v8730_v51  ;;  %v40421_v24 = vpop.f32.mrf.mxu1  ;;  %v8729_v45 = vmul.f32 0.2, %v8439_v26  ;;  %40626 = vmatpush3.msra.mxu1 %v8788_v58  ;;  %40637 = vmatmul.mubr.msk.f32.vlgmr.msra.gmra.mxu0 %vm179_vm2, %v44252_v10 }
 0x3c7   : > { %v8728_v47 = vmul.f32 0.2, %v40421_v24  ;;  %40627 = vmatprep.subr.mxu1 %v8787_v3  ;;  %40650 = vmatprep.mubr.msk.f32.mxu0 %vm179_vm2, %v46279_v25 }
 0x3c8   : > { %v8793_v50 = vadd.f32 %v46168_v22, %v8729_v45  ;;  %v8364_v28 = vpop.f32.mrf.mxu1  ;;  %40646 = vmatprep.subr.mxu0 %v8794_v21  ;;  %40628 = vmatpush3.msra.mxu1 %v8787_v3 }
 0x3c9   : > { %v8792_v27 = vadd.f32 %v43128_v14, %v8728_v47  ;;  %v8727_v56 = vmul.f32 0.2, %v8364_v28  ;;  %40647 = vmatpush3.msra.mxu0 %v8794_v21  ;;  %40630 = vmatmul.mubr.msk.f32.vlgmr.msra.gmra.mxu1 %vm179_vm2, %v44260_v36 }
 0x3ca   : > { %v40442_v58 = vpop.f32.mrf.mxu0  ;;  %40648 = vmatprep.subr.mxu0 %v8793_v50  ;;  %40643 = vmatprep.mubr.msk.f32.mxu1 %vm179_vm2, %v46265_v57 }
 0x3cb   : > { %v8791_v51 = vadd.f32 %v46168_v22, %v8727_v56  ;;  %v8734_v26 = vmul.f32 0.2, %v40442_v58  ;;  %40639 = vmatprep.subr.mxu1 %v8792_v27  ;;  %40649 = vmatpush3.msra.mxu0 %v8793_v50 }
 0x3cc   : > { %v40435_v24 = vpop.f32.mrf.mxu1  ;;  %v8589_v45 = vpop.f32.mrf.mxu0  ;;  %40640 = vmatpush3.msra.mxu1 %v8792_v27  ;;  %40651 = vmatmul.mubr.msk.f32.vlgmr.msra.gmra.mxu0 %vm179_vm2, %v44280_v38 }
 0x3cd   : > { %v8798_v3 = vadd.f32 %v43128_v14, %v8734_v26  ;;  %v8732_v21 = vmul.f32 0.2, %v40435_v24  ;;  %v8733_v47 = vmul.f32 0.2, %v8589_v45  ;;  %40641 = vmatprep.subr.mxu1 %v8791_v51  ;;  %40664 = vmatprep.mubr.msk.f32.mxu0 %vm179_vm2, %v44322_v49 }
 0x3ce   : > { %v8514_v28 = vpop.f32.mrf.mxu1  ;;  %40642 = vmatpush3.msra.mxu1 %v8791_v51 }
 0x3cf   : > { %v8796_v56 = vadd.f32 %v43128_v14, %v8732_v21  ;;  %v8797_v50 = vadd.f32 %v46168_v22, %v8733_v47  ;;  %v8731_v58 = vmul.f32 0.2, %v8514_v28  ;;  %40660 = vmatprep.subr.mxu0 %v8798_v3  ;;  %40644 = vmatmul.mubr.msk.f32.vlgmr.msra.gmra.mxu1 %vm179_vm2, %v44288_v46  ;;  %v46280_v47 = vld [vmem:[#allocation18_spill] sm:$0xff]  ;;  %v46281_v28 = vld [vmem:[#allocation25_spill] sm:$0xff] }
 0x3d0   : > { %v40449_v27 = vpop.f32.mrf.mxu1  ;;  %40661 = vmatpush3.msra.mxu0 %v8798_v3  ;;  %40657 = vmatprep.mubr.msk.f32.mxu1 %vm179_vm2, %v44330_v55 }
 0x3d1   : > { %v8795_v26 = vadd.f32 %v46168_v22, %v8731_v58  ;;  %v8736_v24 = vmul.f32 0.2, %v40449_v27  ;;  %40653 = vmatprep.subr.mxu1 %v8796_v56  ;;  %40662 = vmatprep.subr.mxu0 %v8797_v50 }
 0x3d2   : > { %v8664_v51 = vpop.f32.mrf.mxu1  ;;  %40654 = vmatpush3.msra.mxu1 %v8796_v56  ;;  %40663 = vmatpush3.msra.mxu0 %v8797_v50  ;;  %v46282_v56 = vld [vmem:[#allocation26_spill] sm:$0xff]  ;;  %v46283_v50 = vld [vmem:[#allocation24_spill] sm:$0xff] }
 0x3d3   : > { %v8800_v45 = vadd.f32 %v43128_v14, %v8736_v24  ;;  %v8735_v21 = vmul.f32 0.2, %v8664_v51  ;;  %40655 = vmatprep.subr.mxu1 %v8795_v26  ;;  %40665 = vmatmul.mubr.msk.f32.vlgmr.msra.gmra.mxu0 %vm179_vm2, %v44308_v61 }
 0x3d4   : > { %40656 = vmatpush3.msra.mxu1 %v8795_v26  ;;  %40678 = vmatprep.mubr.msk.f32.mxu0 %vm179_vm2, %v46238_v5 }
 0x3d5   : > { %v8799_v3 = vadd.f32 %v46168_v22, %v8735_v21  ;;  %40658 = vmatmul.mubr.msk.f32.vlgmr.msra.gmra.mxu1 %vm179_vm2, %v46280_v47  ;;  %40667 = vmatprep.subr.mxu1 %v8800_v45 }
 0x3d6   : > { %40668 = vmatpush3.msra.mxu1 %v8800_v45  ;;  %40671 = vmatprep.mubr.msk.f32.mxu1 %vm179_vm2, %v46281_v28  ;;  %v46284_v45 = vld [vmem:[#allocation31_spill] sm:$0xff] }
 0x3d7   : > { %40669 = vmatprep.subr.mxu1 %v8799_v3 }
 0x3d8   : > { %40670 = vmatpush3.msra.mxu1 %v8799_v3  ;;  %v46285_v3 = vld [vmem:[#allocation19_spill] sm:$0xff] }
 0x3d9   : > { %40672 = vmatmul.mubr.msk.f32.vlgmr.msra.gmra.mxu1 %vm179_vm2, %v46282_v56 }
 0x3da   : > { %40685 = vmatprep.mubr.msk.f32.mxu1 %vm179_vm2, %v46283_v50 }
 0x40e   : > { %v40456_v58 = vpop.f32.mrf.mxu0 }
 0x40f   : > { %v11202_v27 = vmul.f32 0.25, %v40456_v58 }
 0x410   : > { %v8867_v26 = vpop.f32.mrf.mxu0 }
 0x411   : > { %v11266_v24 = vadd.f32 %v43128_v14, %v11202_v27  ;;  %v11201_v51 = vmul.f32 0.25, %v8867_v26  ;;  %v46286_v26 = vld [vmem:[#allocation32_spill] sm:$0xff] }
 0x413   : > { %v11265_v21 = vadd.f32 %v46168_v22, %v11201_v51  ;;  %40674 = vmatprep.subr.mxu0 %v11266_v24 }
 0x414   : > { %40675 = vmatpush3.msra.mxu0 %v11266_v24  ;;  %v46287_v24 = vld [vmem:[#allocation36_spill] sm:$0xff] }
 0x415   : > { %40676 = vmatprep.subr.mxu0 %v11265_v21 }
 0x416   : > { %40677 = vmatpush3.msra.mxu0 %v11265_v21 }
 0x417   : > { %40679 = vmatmul.mubr.msk.f32.vlgmr.msra.gmra.mxu0 %vm179_vm2, %v46284_v45  ;;  %v40463_v56 = vpop.f32.mrf.mxu1 }
 0x418   : > { %40692 = vmatprep.mubr.msk.f32.mxu0 %vm179_vm2, %v46285_v3  ;;  %v11204_v50 = vmul.f32 0.25, %v40463_v56 }
 0x419   : > { %v8942_v28 = vpop.f32.mrf.mxu1 }
 0x41a   : > { %v11268_v58 = vadd.f32 %v43128_v14, %v11204_v50  ;;  %v11203_v47 = vmul.f32 0.25, %v8942_v28  ;;  %v46289_v50 = vld [vmem:[#allocation40_spill] sm:$0xff] }
 0x41c   : > { %v11267_v27 = vadd.f32 %v46168_v22, %v11203_v47  ;;  %40681 = vmatprep.subr.mxu1 %v11268_v58  ;;  %v46288_v47 = vld [vmem:[#allocation35_spill] sm:$0xff] }
 0x41d   : > { %40682 = vmatpush3.msra.mxu1 %v11268_v58 }
 0x41e   : > { %40683 = vmatprep.subr.mxu1 %v11267_v27 }
 0x41f   : > { %40684 = vmatpush3.msra.mxu1 %v11267_v27 }
 0x420   : > { %40686 = vmatmul.mubr.msk.f32.vlgmr.msra.gmra.mxu1 %vm179_vm2, %v46286_v26 }
 0x421   : > { %40699 = vmatprep.mubr.msk.f32.mxu1 %vm179_vm2, %v46287_v24 }
 0x424   : > { %v40470_v51 = vpop.f32.mrf.mxu0 }
 0x425   : > { %v11206_v21 = vmul.f32 0.25, %v40470_v51 }
 0x426   : > { %v9017_v3 = vpop.f32.mrf.mxu0 }
 0x427   : > { %v11270_v56 = vadd.f32 %v43128_v14, %v11206_v21  ;;  %v11205_v45 = vmul.f32 0.25, %v9017_v3  ;;  %v46291_v21 = vld [vmem:[#allocation46_spill] sm:$0xff] }
 0x429   : > { %v11269_v28 = vadd.f32 %v46168_v22, %v11205_v45  ;;  %40688 = vmatprep.subr.mxu0 %v11270_v56  ;;  %v46290_v45 = vld [vmem:[#allocation39_spill] sm:$0xff] }
 0x42a   : > { %40689 = vmatpush3.msra.mxu0 %v11270_v56 }
 0x42b   : > { %40690 = vmatprep.subr.mxu0 %v11269_v28 }
 0x42c   : > { %40691 = vmatpush3.msra.mxu0 %v11269_v28 }
 0x42d   : > { %40693 = vmatmul.mubr.msk.f32.vlgmr.msra.gmra.mxu0 %vm179_vm2, %v46288_v47 }
 0x42e   : > { %40706 = vmatprep.mubr.msk.f32.mxu0 %vm179_vm2, %v46289_v50 }
 0x42f   : > { %v40477_v58 = vpop.f32.mrf.mxu1 }
 0x430   : > { %v11208_v27 = vmul.f32 0.25, %v40477_v58 }
 0x431   : > { %v9092_v24 = vpop.f32.mrf.mxu1 }
 0x432   : > { %v11272_v51 = vadd.f32 %v43128_v14, %v11208_v27  ;;  %v11207_v26 = vmul.f32 0.25, %v9092_v24  ;;  %v46293_v27 = vld [vmem:[#allocation3_spill] sm:$0xff] }
 0x434   : > { %v11271_v3 = vadd.f32 %v46168_v22, %v11207_v26  ;;  %40695 = vmatprep.subr.mxu1 %v11272_v51  ;;  %v46292_v26 = vld [vmem:[#allocation45_spill] sm:$0xff] }
 0x435   : > { %40696 = vmatpush3.msra.mxu1 %v11272_v51 }
 0x436   : > { %40697 = vmatprep.subr.mxu1 %v11271_v3 }
 0x437   : > { %40698 = vmatpush3.msra.mxu1 %v11271_v3 }
 0x438   : > { %40700 = vmatmul.mubr.msk.f32.vlgmr.msra.gmra.mxu1 %vm179_vm2, %v46290_v45 }
 0x439   : > { %40713 = vmatprep.mubr.msk.f32.mxu1 %vm179_vm2, %v46291_v21 }
 0x43f   : > { %v40484_v56 = vpop.f32.mrf.mxu0 }
 0x440   : > { %v11210_v28 = vmul.f32 0.25, %v40484_v56 }
 0x441   : > { %v9167_v50 = vpop.f32.mrf.mxu0 }
 0x442   : > { %v11274_v58 = vadd.f32 %v43128_v14, %v11210_v28  ;;  %v11209_v47 = vmul.f32 0.25, %v9167_v50 }
 0x444   : > { %v11273_v24 = vadd.f32 %v46168_v22, %v11209_v47  ;;  %40702 = vmatprep.subr.mxu0 %v11274_v58 }
 0x445   : > { %40703 = vmatpush3.msra.mxu0 %v11274_v58 }
 0x446   : > { %40704 = vmatprep.subr.mxu0 %v11273_v24 }
 0x447   : > { %40705 = vmatpush3.msra.mxu0 %v11273_v24 }
 0x448   : > { %40707 = vmatmul.mubr.msk.f32.vlgmr.msra.gmra.mxu0 %vm179_vm2, %v46292_v26 }
 0x449   : > { %40720 = vmatprep.mubr.msk.f32.mxu0 %vm179_vm2, %v46293_v27 }
 0x44a   : > { %v40491_v51 = vpop.f32.mrf.mxu1 }
 0x44b   : > { %v11212_v3 = vmul.f32 0.25, %v40491_v51 }
 0x44c   : > { %v9242_v21 = vpop.f32.mrf.mxu1  ;;  %v40498_v56 = vpop.f32.mrf.mxu0 }
 0x44d   : > { %v11276_v45 = vadd.f32 %v43128_v14, %v11212_v3  ;;  %v11211_v28 = vmul.f32 0.25, %v9242_v21  ;;  %v11214_v50 = vmul.f32 0.25, %v40498_v56 }
 0x44e   : > { %v9317_v5 = vpop.f32.mrf.mxu0 }
 0x44f   : > { %v11275_v47 = vadd.f32 %v46168_v22, %v11211_v28  ;;  %40709 = vmatprep.subr.mxu1 %v11276_v45  ;;  %v11278_v58 = vadd.f32 %v43128_v14, %v11214_v50  ;;  %v11213_v24 = vmul.f32 0.25, %v9317_v5 }
 0x450   : > { %40710 = vmatpush3.msra.mxu1 %v11276_v45  ;;  %v40512_v26 = vpop.f32.mrf.mxu0 }
 0x451   : > { %40711 = vmatprep.subr.mxu1 %v11275_v47  ;;  %v11277_v27 = vadd.f32 %v46168_v22, %v11213_v24  ;;  %v11218_v61 = vmul.f32 0.25, %v40512_v26  ;;  %40716 = vmatprep.subr.mxu0 %v11278_v58 }
 0x452   : > { %40712 = vmatpush3.msra.mxu1 %v11275_v47  ;;  %v9467_v51 = vpop.f32.mrf.mxu0  ;;  %40717 = vmatpush3.msra.mxu0 %v11278_v58 }
 0x453   : > { %40714 = vmatmul.mubr.msk.f32.vlgmr.msra.gmra.mxu1 %vm179_vm2, %v43897_v42  ;;  %v11282_v21 = vadd.f32 %v43128_v14, %v11218_v61  ;;  %v40505_v3 = vpop.f32.mrf.mxu1  ;;  %v11217_v56 = vmul.f32 0.25, %v9467_v51  ;;  %40718 = vmatprep.subr.mxu0 %v11277_v27 }
 0x454   : > { %40727 = vmatprep.mubr.msk.f32.mxu1 %vm179_vm2, %v43977_v60  ;;  %v11216_v5 = vmul.f32 0.25, %v40505_v3  ;;  %40719 = vmatpush3.msra.mxu0 %v11277_v27 }
 0x455   : > { %v11281_v45 = vadd.f32 %v46168_v22, %v11217_v56  ;;  %v9392_v26 = vpop.f32.mrf.mxu1  ;;  %40721 = vmatmul.mubr.msk.f32.vlgmr.msra.gmra.mxu0 %vm179_vm2, %v43927_v8  ;;  %40730 = vmatprep.subr.mxu0 %v11282_v21 }
 0x456   : > { %v11280_v28 = vadd.f32 %v43128_v14, %v11216_v5  ;;  %v11215_v50 = vmul.f32 0.25, %v9392_v26  ;;  %v40526_v47 = vpop.f32.mrf.mxu0  ;;  %40731 = vmatpush3.msra.mxu0 %v11282_v21  ;;  %40734 = vmatprep.mubr.msk.f32.mxu0 %vm179_vm2, %v43878_v48 }
 0x457   : > { %v11222_v61 = vmul.f32 0.25, %v40526_v47  ;;  %40732 = vmatprep.subr.mxu0 %v11281_v45 }
 0x458   : > { %v11279_v58 = vadd.f32 %v46168_v22, %v11215_v50  ;;  %v9617_v27 = vpop.f32.mrf.mxu0  ;;  %40723 = vmatprep.subr.mxu1 %v11280_v28  ;;  %40733 = vmatpush3.msra.mxu0 %v11281_v45 }
 0x459   : > { %v11286_v24 = vadd.f32 %v43128_v14, %v11222_v61  ;;  %v40519_v51 = vpop.f32.mrf.mxu1  ;;  %v11221_v3 = vmul.f32 0.25, %v9617_v27  ;;  %40724 = vmatpush3.msra.mxu1 %v11280_v28  ;;  %40735 = vmatmul.mubr.msk.f32.vlgmr.msra.gmra.mxu0 %vm179_vm2, %v43909_v0 }
 0x45a   : > { %v11220_v56 = vmul.f32 0.25, %v40519_v51  ;;  %40725 = vmatprep.subr.mxu1 %v11279_v58  ;;  %40748 = vmatprep.mubr.msk.f32.mxu0 %vm179_vm2, %v43991_v4 }
 0x45b   : > { %v11285_v21 = vadd.f32 %v46168_v22, %v11221_v3  ;;  %v9542_v5 = vpop.f32.mrf.mxu1  ;;  %40744 = vmatprep.subr.mxu0 %v11286_v24  ;;  %40726 = vmatpush3.msra.mxu1 %v11279_v58 }
 0x45c   : > { %v11284_v45 = vadd.f32 %v43128_v14, %v11220_v56  ;;  %v11219_v26 = vmul.f32 0.25, %v9542_v5  ;;  %v40540_v50 = vpop.f32.mrf.mxu0  ;;  %40745 = vmatpush3.msra.mxu0 %v11286_v24  ;;  %40728 = vmatmul.mubr.msk.f32.vlgmr.msra.gmra.mxu1 %vm179_vm2, %v43955_v34 }
 0x45d   : > { %v11226_v28 = vmul.f32 0.25, %v40540_v50  ;;  %40746 = vmatprep.subr.mxu0 %v11285_v21  ;;  %40741 = vmatprep.mubr.msk.f32.mxu1 %vm179_vm2, %v43912_v15 }
 0x45e   : > { %v11283_v47 = vadd.f32 %v46168_v22, %v11219_v26  ;;  %v9767_v61 = vpop.f32.mrf.mxu0  ;;  %40737 = vmatprep.subr.mxu1 %v11284_v45  ;;  %40747 = vmatpush3.msra.mxu0 %v11285_v21 }
 0x45f   : > { %v11290_v58 = vadd.f32 %v43128_v14, %v11226_v28  ;;  %v40533_v27 = vpop.f32.mrf.mxu1  ;;  %v11225_v51 = vmul.f32 0.25, %v9767_v61  ;;  %40738 = vmatpush3.msra.mxu1 %v11284_v45  ;;  %40749 = vmatmul.mubr.msk.f32.vlgmr.msra.gmra.mxu0 %vm179_vm2, %v43985_v19 }
 0x460   : > { %v11224_v24 = vmul.f32 0.25, %v40533_v27  ;;  %40739 = vmatprep.subr.mxu1 %v11283_v47  ;;  %40762 = vmatprep.mubr.msk.f32.mxu0 %vm179_vm2, %v44036_v11 }
 0x461   : > { %v11289_v3 = vadd.f32 %v46168_v22, %v11225_v51  ;;  %v9692_v56 = vpop.f32.mrf.mxu1  ;;  %40758 = vmatprep.subr.mxu0 %v11290_v58  ;;  %40740 = vmatpush3.msra.mxu1 %v11283_v47 }
 0x462   : > { %v11288_v21 = vadd.f32 %v43128_v14, %v11224_v24  ;;  %v11223_v5 = vmul.f32 0.25, %v9692_v56  ;;  %v40554_v26 = vpop.f32.mrf.mxu0  ;;  %40759 = vmatpush3.msra.mxu0 %v11290_v58  ;;  %40742 = vmatmul.mubr.msk.f32.vlgmr.msra.gmra.mxu1 %vm179_vm2, %v43915_v18 }
 0x463   : > { %v11230_v45 = vmul.f32 0.25, %v40554_v26  ;;  %40760 = vmatprep.subr.mxu0 %v11289_v3  ;;  %40755 = vmatprep.mubr.msk.f32.mxu1 %vm179_vm2, %v44045_v54 }
 0x464   : > { %v11287_v50 = vadd.f32 %v46168_v22, %v11223_v5  ;;  %v9917_v28 = vpop.f32.mrf.mxu0  ;;  %40751 = vmatprep.subr.mxu1 %v11288_v21  ;;  %40761 = vmatpush3.msra.mxu0 %v11289_v3 }
 0x465   : > { %v11294_v47 = vadd.f32 %v43128_v14, %v11230_v45  ;;  %v40547_v61 = vpop.f32.mrf.mxu1  ;;  %v11229_v27 = vmul.f32 0.25, %v9917_v28  ;;  %40752 = vmatpush3.msra.mxu1 %v11288_v21  ;;  %40763 = vmatmul.mubr.msk.f32.vlgmr.msra.gmra.mxu0 %vm179_vm2, %v44012_v32 }
 0x466   : > { %v11228_v58 = vmul.f32 0.25, %v40547_v61  ;;  %40753 = vmatprep.subr.mxu1 %v11287_v50  ;;  %40776 = vmatprep.mubr.msk.f32.mxu0 %vm179_vm2, %v44064_v20 }
 0x467   : > { %v11293_v51 = vadd.f32 %v46168_v22, %v11229_v27  ;;  %v9842_v24 = vpop.f32.mrf.mxu1  ;;  %40772 = vmatprep.subr.mxu0 %v11294_v47  ;;  %40754 = vmatpush3.msra.mxu1 %v11287_v50 }
 0x468   : > { %v11292_v3 = vadd.f32 %v43128_v14, %v11228_v58  ;;  %v11227_v56 = vmul.f32 0.25, %v9842_v24  ;;  %v40568_v5 = vpop.f32.mrf.mxu0  ;;  %40773 = vmatpush3.msra.mxu0 %v11294_v47  ;;  %40756 = vmatmul.mubr.msk.f32.vlgmr.msra.gmra.mxu1 %vm179_vm2, %v44032_v9 }
 0x469   : > { %v11234_v21 = vmul.f32 0.25, %v40568_v5  ;;  %40774 = vmatprep.subr.mxu0 %v11293_v51  ;;  %40769 = vmatprep.mubr.msk.f32.mxu1 %vm179_vm2, %v44072_v40 }
 0x46a   : > { %v11291_v26 = vadd.f32 %v46168_v22, %v11227_v56  ;;  %v10067_v45 = vpop.f32.mrf.mxu0  ;;  %40765 = vmatprep.subr.mxu1 %v11292_v3  ;;  %40775 = vmatpush3.msra.mxu0 %v11293_v51 }
 0x46b   : > { %v11298_v50 = vadd.f32 %v43128_v14, %v11234_v21  ;;  %v40561_v28 = vpop.f32.mrf.mxu1  ;;  %v11233_v61 = vmul.f32 0.25, %v10067_v45  ;;  %40766 = vmatpush3.msra.mxu1 %v11292_v3  ;;  %40777 = vmatmul.mubr.msk.f32.vlgmr.msra.gmra.mxu0 %vm179_vm2, %v44051_v2 }
 0x46c   : > { %v11232_v47 = vmul.f32 0.25, %v40561_v28  ;;  %40767 = vmatprep.subr.mxu1 %v11291_v26  ;;  %40790 = vmatprep.mubr.msk.f32.mxu0 %vm179_vm2, %v44099_v35 }
 0x46d   : > { %v11297_v27 = vadd.f32 %v46168_v22, %v11233_v61  ;;  %v9992_v58 = vpop.f32.mrf.mxu1  ;;  %40786 = vmatprep.subr.mxu0 %v11298_v50  ;;  %40768 = vmatpush3.msra.mxu1 %v11291_v26 }
 0x46e   : > { %v11296_v51 = vadd.f32 %v43128_v14, %v11232_v47  ;;  %v11231_v24 = vmul.f32 0.25, %v9992_v58  ;;  %v40582_v56 = vpop.f32.mrf.mxu0  ;;  %40787 = vmatpush3.msra.mxu0 %v11298_v50  ;;  %40770 = vmatmul.mubr.msk.f32.vlgmr.msra.gmra.mxu1 %vm179_vm2, %v44059_v1 }
 0x46f   : > { %v11238_v3 = vmul.f32 0.25, %v40582_v56  ;;  %40788 = vmatprep.subr.mxu0 %v11297_v27  ;;  %40783 = vmatprep.mubr.msk.f32.mxu1 %vm179_vm2, %v44118_v43 }
 0x470   : > { %v11295_v5 = vadd.f32 %v46168_v22, %v11231_v24  ;;  %v10217_v21 = vpop.f32.mrf.mxu0  ;;  %40779 = vmatprep.subr.mxu1 %v11296_v51  ;;  %40789 = vmatpush3.msra.mxu0 %v11297_v27 }
 0x471   : > { %v11302_v26 = vadd.f32 %v43128_v14, %v11238_v3  ;;  %v40575_v45 = vpop.f32.mrf.mxu1  ;;  %v11237_v28 = vmul.f32 0.25, %v10217_v21  ;;  %40780 = vmatpush3.msra.mxu1 %v11296_v51  ;;  %40791 = vmatmul.mubr.msk.f32.vlgmr.msra.gmra.mxu0 %vm179_vm2, %v44078_v6 }
 0x472   : > { %v11236_v50 = vmul.f32 0.25, %v40575_v45  ;;  %40781 = vmatprep.subr.mxu1 %v11295_v5  ;;  %40804 = vmatprep.mubr.msk.f32.mxu0 %vm179_vm2, %v44146_v30 }
 0x473   : > { %v11301_v61 = vadd.f32 %v46168_v22, %v11237_v28  ;;  %v10142_v47 = vpop.f32.mrf.mxu1  ;;  %40800 = vmatprep.subr.mxu0 %v11302_v26  ;;  %40782 = vmatpush3.msra.mxu1 %v11295_v5 }
 0x474   : > { %v11300_v27 = vadd.f32 %v43128_v14, %v11236_v50  ;;  %v11235_v58 = vmul.f32 0.25, %v10142_v47  ;;  %v40596_v24 = vpop.f32.mrf.mxu0  ;;  %40801 = vmatpush3.msra.mxu0 %v11302_v26  ;;  %40784 = vmatmul.mubr.msk.f32.vlgmr.msra.gmra.mxu1 %vm179_vm2, %v44093_v37 }
 0x475   : > { %v11242_v51 = vmul.f32 0.25, %v40596_v24  ;;  %40802 = vmatprep.subr.mxu0 %v11301_v61  ;;  %40797 = vmatprep.mubr.msk.f32.mxu1 %vm179_vm2, %v44156_v29 }
 0x476   : > { %v11299_v56 = vadd.f32 %v46168_v22, %v11235_v58  ;;  %v10367_v3 = vpop.f32.mrf.mxu0  ;;  %40793 = vmatprep.subr.mxu1 %v11300_v27  ;;  %40803 = vmatpush3.msra.mxu0 %v11301_v61 }
 0x477   : > { %v11306_v5 = vadd.f32 %v43128_v14, %v11242_v51  ;;  %v40589_v21 = vpop.f32.mrf.mxu1  ;;  %v11241_v45 = vmul.f32 0.25, %v10367_v3  ;;  %40794 = vmatpush3.msra.mxu1 %v11300_v27  ;;  %40805 = vmatmul.mubr.msk.f32.vlgmr.msra.gmra.mxu0 %vm179_vm2, %v44124_v17 }
 0x478   : > { %v11240_v26 = vmul.f32 0.25, %v40589_v21  ;;  %40795 = vmatprep.subr.mxu1 %v11299_v56  ;;  %40818 = vmatprep.mubr.msk.f32.mxu0 %vm179_vm2, %v44183_v12 }
 0x479   : > { %v11305_v28 = vadd.f32 %v46168_v22, %v11241_v45  ;;  %v10292_v50 = vpop.f32.mrf.mxu1  ;;  %40814 = vmatprep.subr.mxu0 %v11306_v5  ;;  %40796 = vmatpush3.msra.mxu1 %v11299_v56 }
 0x47a   : > { %v11304_v61 = vadd.f32 %v43128_v14, %v11240_v26  ;;  %v11239_v47 = vmul.f32 0.25, %v10292_v50  ;;  %v40610_v58 = vpop.f32.mrf.mxu0  ;;  %40815 = vmatpush3.msra.mxu0 %v11306_v5  ;;  %40798 = vmatmul.mubr.msk.f32.vlgmr.msra.gmra.mxu1 %vm179_vm2, %v44136_v62 }
 0x47b   : > { %v11246_v27 = vmul.f32 0.25, %v40610_v58  ;;  %40816 = vmatprep.subr.mxu0 %v11305_v28  ;;  %40811 = vmatprep.mubr.msk.f32.mxu1 %vm179_vm2, %v44191_v16 }
 0x47c   : > { %v11303_v24 = vadd.f32 %v46168_v22, %v11239_v47  ;;  %v10517_v51 = vpop.f32.mrf.mxu0  ;;  %40807 = vmatprep.subr.mxu1 %v11304_v61  ;;  %40817 = vmatpush3.msra.mxu0 %v11305_v28 }
 0x47d   : > { %v11310_v56 = vadd.f32 %v43128_v14, %v11246_v27  ;;  %v40603_v3 = vpop.f32.mrf.mxu1  ;;  %v11245_v21 = vmul.f32 0.25, %v10517_v51  ;;  %40808 = vmatpush3.msra.mxu1 %v11304_v61  ;;  %40819 = vmatmul.mubr.msk.f32.vlgmr.msra.gmra.mxu0 %vm179_vm2, %v44159_v39 }
 0x47e   : > { %v11244_v5 = vmul.f32 0.25, %v40603_v3  ;;  %40809 = vmatprep.subr.mxu1 %v11303_v24  ;;  %40832 = vmatprep.mubr.msk.f32.mxu0 %vm179_vm2, %v44211_v33 }
 0x47f   : > { %v11309_v45 = vadd.f32 %v46168_v22, %v11245_v21  ;;  %v10442_v26 = vpop.f32.mrf.mxu1  ;;  %40828 = vmatprep.subr.mxu0 %v11310_v56  ;;  %40810 = vmatpush3.msra.mxu1 %v11303_v24 }
 0x480   : > { %v11308_v28 = vadd.f32 %v43128_v14, %v11244_v5  ;;  %v11243_v50 = vmul.f32 0.25, %v10442_v26  ;;  %v40624_v47 = vpop.f32.mrf.mxu0  ;;  %40829 = vmatpush3.msra.mxu0 %v11310_v56  ;;  %40812 = vmatmul.mubr.msk.f32.vlgmr.msra.gmra.mxu1 %vm179_vm2, %v44176_v13 }
 0x481   : > { %v11250_v61 = vmul.f32 0.25, %v40624_v47  ;;  %40830 = vmatprep.subr.mxu0 %v11309_v45  ;;  %40825 = vmatprep.mubr.msk.f32.mxu1 %vm179_vm2, %v44220_v41 }
 0x482   : > { %v11307_v58 = vadd.f32 %v46168_v22, %v11243_v50  ;;  %v10667_v27 = vpop.f32.mrf.mxu0  ;;  %40821 = vmatprep.subr.mxu1 %v11308_v28  ;;  %40831 = vmatpush3.msra.mxu0 %v11309_v45 }
 0x483   : > { %v11314_v24 = vadd.f32 %v43128_v14, %v11250_v61  ;;  %v40617_v51 = vpop.f32.mrf.mxu1  ;;  %v11249_v3 = vmul.f32 0.25, %v10667_v27  ;;  %40822 = vmatpush3.msra.mxu1 %v11308_v28  ;;  %40833 = vmatmul.mubr.msk.f32.vlgmr.msra.gmra.mxu0 %vm179_vm2, %v44197_v44 }
 0x484   : > { %v11248_v56 = vmul.f32 0.25, %v40617_v51  ;;  %40823 = vmatprep.subr.mxu1 %v11307_v58  ;;  %40846 = vmatprep.mubr.msk.f32.mxu0 %vm179_vm2, %v44239_v53 }
 0x485   : > { %v11313_v21 = vadd.f32 %v46168_v22, %v11249_v3  ;;  %v10592_v5 = vpop.f32.mrf.mxu1  ;;  %40842 = vmatprep.subr.mxu0 %v11314_v24  ;;  %40824 = vmatpush3.msra.mxu1 %v11307_v58 }
 0x486   : > { %v11312_v45 = vadd.f32 %v43128_v14, %v11248_v56  ;;  %v11247_v26 = vmul.f32 0.25, %v10592_v5  ;;  %v40638_v50 = vpop.f32.mrf.mxu0  ;;  %40843 = vmatpush3.msra.mxu0 %v11314_v24  ;;  %40826 = vmatmul.mubr.msk.f32.vlgmr.msra.gmra.mxu1 %vm179_vm2, %v44206_v7 }
 0x487   : > { %v11254_v28 = vmul.f32 0.25, %v40638_v50  ;;  %40844 = vmatprep.subr.mxu0 %v11313_v21  ;;  %40839 = vmatprep.mubr.msk.f32.mxu1 %vm179_vm2, %v46278_v63 }
 0x488   : > { %v11311_v47 = vadd.f32 %v46168_v22, %v11247_v26  ;;  %v10817_v61 = vpop.f32.mrf.mxu0  ;;  %40835 = vmatprep.subr.mxu1 %v11312_v45  ;;  %40845 = vmatpush3.msra.mxu0 %v11313_v21 }
 0x489   : > { %v11318_v58 = vadd.f32 %v43128_v14, %v11254_v28  ;;  %v40631_v27 = vpop.f32.mrf.mxu1  ;;  %v11253_v51 = vmul.f32 0.25, %v10817_v61  ;;  %40836 = vmatpush3.msra.mxu1 %v11312_v45  ;;  %40847 = vmatmul.mubr.msk.f32.vlgmr.msra.gmra.mxu0 %vm179_vm2, %v46263_v52 }
 0x48a   : > { %v11252_v24 = vmul.f32 0.25, %v40631_v27  ;;  %40837 = vmatprep.subr.mxu1 %v11311_v47  ;;  %40860 = vmatprep.mubr.msk.f32.mxu0 %vm179_vm2, %v46264_v23 }
 0x48b   : > { %v11317_v3 = vadd.f32 %v46168_v22, %v11253_v51  ;;  %v10742_v56 = vpop.f32.mrf.mxu1  ;;  %40856 = vmatprep.subr.mxu0 %v11318_v58  ;;  %40838 = vmatpush3.msra.mxu1 %v11311_v47 }
 0x48c   : > { %v11316_v21 = vadd.f32 %v43128_v14, %v11252_v24  ;;  %v11251_v5 = vmul.f32 0.25, %v10742_v56  ;;  %v40652_v26 = vpop.f32.mrf.mxu0  ;;  %40857 = vmatpush3.msra.mxu0 %v11318_v58  ;;  %40840 = vmatmul.mubr.msk.f32.vlgmr.msra.gmra.mxu1 %vm179_vm2, %v46249_v59 }
 0x48d   : > { %v11258_v45 = vmul.f32 0.25, %v40652_v26  ;;  %40858 = vmatprep.subr.mxu0 %v11317_v3  ;;  %40853 = vmatprep.mubr.msk.f32.mxu1 %vm179_vm2, %v46250_v31 }
 0x48e   : > { %v11315_v50 = vadd.f32 %v46168_v22, %v11251_v5  ;;  %v10967_v28 = vpop.f32.mrf.mxu0  ;;  %40849 = vmatprep.subr.mxu1 %v11316_v21  ;;  %40859 = vmatpush3.msra.mxu0 %v11317_v3 }
 0x48f   : > { %v11322_v47 = vadd.f32 %v43128_v14, %v11258_v45  ;;  %v40645_v61 = vpop.f32.mrf.mxu1  ;;  %v11257_v27 = vmul.f32 0.25, %v10967_v28  ;;  %40850 = vmatpush3.msra.mxu1 %v11316_v21  ;;  %40861 = vmatmul.mubr.msk.f32.vlgmr.msra.gmra.mxu0 %vm179_vm2, %v44252_v10 }
 0x490   : > { %v11256_v58 = vmul.f32 0.25, %v40645_v61  ;;  %40851 = vmatprep.subr.mxu1 %v11315_v50  ;;  %40874 = vmatprep.mubr.msk.f32.mxu0 %vm179_vm2, %v46279_v25 }
 0x491   : > { %v11321_v51 = vadd.f32 %v46168_v22, %v11257_v27  ;;  %v10892_v24 = vpop.f32.mrf.mxu1  ;;  %40870 = vmatprep.subr.mxu0 %v11322_v47  ;;  %40852 = vmatpush3.msra.mxu1 %v11315_v50 }
 0x492   : > { %v11320_v3 = vadd.f32 %v43128_v14, %v11256_v58  ;;  %v11255_v56 = vmul.f32 0.25, %v10892_v24  ;;  %40871 = vmatpush3.msra.mxu0 %v11322_v47  ;;  %40854 = vmatmul.mubr.msk.f32.vlgmr.msra.gmra.mxu1 %vm179_vm2, %v44260_v36 }
 0x493   : > { %v40666_v21 = vpop.f32.mrf.mxu0  ;;  %40872 = vmatprep.subr.mxu0 %v11321_v51  ;;  %40867 = vmatprep.mubr.msk.f32.mxu1 %vm179_vm2, %v46265_v57 }
 0x494   : > { %v11319_v5 = vadd.f32 %v46168_v22, %v11255_v56  ;;  %v11262_v26 = vmul.f32 0.25, %v40666_v21  ;;  %40863 = vmatprep.subr.mxu1 %v11320_v3  ;;  %40873 = vmatpush3.msra.mxu0 %v11321_v51 }
 0x495   : > { %v40659_v45 = vpop.f32.mrf.mxu1  ;;  %v11117_v28 = vpop.f32.mrf.mxu0  ;;  %40864 = vmatpush3.msra.mxu1 %v11320_v3  ;;  %40875 = vmatmul.mubr.msk.f32.vlgmr.msra.gmra.mxu0 %vm179_vm2, %v44280_v38 }
 0x496   : > { %v11326_v50 = vadd.f32 %v43128_v14, %v11262_v26  ;;  %v11260_v47 = vmul.f32 0.25, %v40659_v45  ;;  %v11261_v61 = vmul.f32 0.25, %v11117_v28  ;;  %40865 = vmatprep.subr.mxu1 %v11319_v5  ;;  %40888 = vmatprep.mubr.msk.f32.mxu0 %vm179_vm2, %v44322_v49  ;;  %v46294_v28 = vld [vmem:[#allocation17_spill] sm:$0xff] }
 0x497   : > { %v11042_v27 = vpop.f32.mrf.mxu1  ;;  %40866 = vmatpush3.msra.mxu1 %v11319_v5 }
 0x498   : > { %v11324_v58 = vadd.f32 %v43128_v14, %v11260_v47  ;;  %v11325_v51 = vadd.f32 %v46168_v22, %v11261_v61  ;;  %v11259_v24 = vmul.f32 0.25, %v11042_v27  ;;  %40884 = vmatprep.subr.mxu0 %v11326_v50  ;;  %40868 = vmatmul.mubr.msk.f32.vlgmr.msra.gmra.mxu1 %vm179_vm2, %v44288_v46  ;;  %v46296_v61 = vld [vmem:[#allocation18_spill] sm:$0xff]  ;;  %v46297_v27 = vld [vmem:[#allocation25_spill] sm:$0xff] }
 0x499   : > { %v40673_v3 = vpop.f32.mrf.mxu1  ;;  %40885 = vmatpush3.msra.mxu0 %v11326_v50  ;;  %40881 = vmatprep.mubr.msk.f32.mxu1 %vm179_vm2, %v44330_v55  ;;  %v46295_v50 = vld [vmem:[#allocation16_spill] sm:$0xff] }
 0x49a   : > { %v11323_v56 = vadd.f32 %v46168_v22, %v11259_v24  ;;  %v11264_v21 = vmul.f32 0.25, %v40673_v3  ;;  %40877 = vmatprep.subr.mxu1 %v11324_v58  ;;  %40886 = vmatprep.subr.mxu0 %v11325_v51 }
 0x49b   : > { %v11192_v5 = vpop.f32.mrf.mxu1  ;;  %40878 = vmatpush3.msra.mxu1 %v11324_v58  ;;  %40887 = vmatpush3.msra.mxu0 %v11325_v51  ;;  %v46298_v58 = vld [vmem:[#allocation26_spill] sm:$0xff]  ;;  %v46299_v51 = vld [vmem:[#allocation24_spill] sm:$0xff] }
 0x49c   : > { %v11328_v26 = vadd.f32 %v43128_v14, %v11264_v21  ;;  %v11263_v45 = vmul.f32 0.25, %v11192_v5  ;;  %40879 = vmatprep.subr.mxu1 %v11323_v56  ;;  %40889 = vmatmul.mubr.msk.f32.vlgmr.msra.gmra.mxu0 %vm179_vm2, %v46294_v28 }
 0x49d   : > { %40880 = vmatpush3.msra.mxu1 %v11323_v56  ;;  %40902 = vmatprep.mubr.msk.f32.mxu0 %vm179_vm2, %v46295_v50 }
 0x49e   : > { %v11327_v47 = vadd.f32 %v46168_v22, %v11263_v45  ;;  %40882 = vmatmul.mubr.msk.f32.vlgmr.msra.gmra.mxu1 %vm179_vm2, %v46296_v61  ;;  %40891 = vmatprep.subr.mxu1 %v11328_v26 }
 0x49f   : > { %40892 = vmatpush3.msra.mxu1 %v11328_v26  ;;  %40895 = vmatprep.mubr.msk.f32.mxu1 %vm179_vm2, %v46297_v27  ;;  %v46300_v26 = vld [vmem:[#allocation31_spill] sm:$0xff] }
 0x4a0   : > { %40893 = vmatprep.subr.mxu1 %v11327_v47 }
 0x4a1   : > { %40894 = vmatpush3.msra.mxu1 %v11327_v47  ;;  %v46301_v47 = vld [vmem:[#allocation19_spill] sm:$0xff] }
 0x4a2   : > { %40896 = vmatmul.mubr.msk.f32.vlgmr.msra.gmra.mxu1 %vm179_vm2, %v46298_v58 }
 0x4a3   : > { %40909 = vmatprep.mubr.msk.f32.mxu1 %vm179_vm2, %v46299_v51 }
 0x4d7   : > { %v40680_v24 = vpop.f32.mrf.mxu0 }
 0x4d8   : > { %v13730_v3 = vmul.f32 0.33333334, %v40680_v24 }
 0x4d9   : > { %v11395_v56 = vpop.f32.mrf.mxu0 }
 0x4da   : > { %v13794_v21 = vadd.f32 %v43128_v14, %v13730_v3  ;;  %v13729_v5 = vmul.f32 0.33333334, %v11395_v56  ;;  %v46302_v56 = vld [vmem:[#allocation32_spill] sm:$0xff] }
 0x4dc   : > { %v13793_v45 = vadd.f32 %v46168_v22, %v13729_v5  ;;  %40898 = vmatprep.subr.mxu0 %v13794_v21 }
 0x4dd   : > { %40899 = vmatpush3.msra.mxu0 %v13794_v21  ;;  %v46303_v21 = vld [vmem:[#allocation36_spill] sm:$0xff] }
 0x4de   : > { %40900 = vmatprep.subr.mxu0 %v13793_v45 }
 0x4df   : > { %40901 = vmatpush3.msra.mxu0 %v13793_v45 }
 0x4e0   : > { %40903 = vmatmul.mubr.msk.f32.vlgmr.msra.gmra.mxu0 %vm179_vm2, %v46300_v26  ;;  %v40687_v58 = vpop.f32.mrf.mxu1 }
 0x4e1   : > { %40916 = vmatprep.mubr.msk.f32.mxu0 %vm179_vm2, %v46301_v47  ;;  %v13732_v51 = vmul.f32 0.33333334, %v40687_v58 }
 0x4e2   : > { %v11470_v27 = vpop.f32.mrf.mxu1 }
 0x4e3   : > { %v13796_v24 = vadd.f32 %v43128_v14, %v13732_v51  ;;  %v13731_v61 = vmul.f32 0.33333334, %v11470_v27  ;;  %v46305_v51 = vld [vmem:[#allocation40_spill] sm:$0xff] }
 0x4e5   : > { %v13795_v3 = vadd.f32 %v46168_v22, %v13731_v61  ;;  %40905 = vmatprep.subr.mxu1 %v13796_v24  ;;  %v46304_v61 = vld [vmem:[#allocation35_spill] sm:$0xff] }
 0x4e6   : > { %40906 = vmatpush3.msra.mxu1 %v13796_v24 }
 0x4e7   : > { %40907 = vmatprep.subr.mxu1 %v13795_v3 }
 0x4e8   : > { %40908 = vmatpush3.msra.mxu1 %v13795_v3 }
 0x4e9   : > { %40910 = vmatmul.mubr.msk.f32.vlgmr.msra.gmra.mxu1 %vm179_vm2, %v46302_v56 }
 0x4ea   : > { %40923 = vmatprep.mubr.msk.f32.mxu1 %vm179_vm2, %v46303_v21 }
 0x4ed   : > { %v40694_v5 = vpop.f32.mrf.mxu0 }
 0x4ee   : > { %v13734_v45 = vmul.f32 0.33333334, %v40694_v5 }
 0x4ef   : > { %v11545_v47 = vpop.f32.mrf.mxu0 }
 0x4f0   : > { %v13798_v58 = vadd.f32 %v43128_v14, %v13734_v45  ;;  %v13733_v26 = vmul.f32 0.33333334, %v11545_v47  ;;  %v46307_v45 = vld [vmem:[#allocation46_spill] sm:$0xff] }
 0x4f2   : > { %v13797_v27 = vadd.f32 %v46168_v22, %v13733_v26  ;;  %40912 = vmatprep.subr.mxu0 %v13798_v58  ;;  %v46306_v26 = vld [vmem:[#allocation39_spill] sm:$0xff] }
 0x4f3   : > { %40913 = vmatpush3.msra.mxu0 %v13798_v58 }
 0x4f4   : > { %40914 = vmatprep.subr.mxu0 %v13797_v27 }
 0x4f5   : > { %40915 = vmatpush3.msra.mxu0 %v13797_v27 }
 0x4f6   : > { %40917 = vmatmul.mubr.msk.f32.vlgmr.msra.gmra.mxu0 %vm179_vm2, %v46304_v61 }
 0x4f7   : > { %40930 = vmatprep.mubr.msk.f32.mxu0 %vm179_vm2, %v46305_v51 }
 0x4f8   : > { %v40701_v24 = vpop.f32.mrf.mxu1 }
 0x4f9   : > { %v13736_v3 = vmul.f32 0.33333334, %v40701_v24 }
 0x4fa   : > { %v11620_v21 = vpop.f32.mrf.mxu1 }
 0x4fb   : > { %v13800_v5 = vadd.f32 %v43128_v14, %v13736_v3  ;;  %v13735_v56 = vmul.f32 0.33333334, %v11620_v21  ;;  %v46309_v3 = vld [vmem:[#allocation3_spill] sm:$0xff] }
 0x4fd   : > { %v13799_v47 = vadd.f32 %v46168_v22, %v13735_v56  ;;  %40919 = vmatprep.subr.mxu1 %v13800_v5  ;;  %v46308_v56 = vld [vmem:[#allocation45_spill] sm:$0xff] }
 0x4fe   : > { %40920 = vmatpush3.msra.mxu1 %v13800_v5 }
 0x4ff   : > { %40921 = vmatprep.subr.mxu1 %v13799_v47 }
 0x500   : > { %40922 = vmatpush3.msra.mxu1 %v13799_v47 }
 0x501   : > { %40924 = vmatmul.mubr.msk.f32.vlgmr.msra.gmra.mxu1 %vm179_vm2, %v46306_v26 }
 0x502   : > { %40937 = vmatprep.mubr.msk.f32.mxu1 %vm179_vm2, %v46307_v45 }
 0x508   : > { %v40708_v58 = vpop.f32.mrf.mxu0 }
 0x509   : > { %v13738_v27 = vmul.f32 0.33333334, %v40708_v58 }
 0x50a   : > { %v11695_v51 = vpop.f32.mrf.mxu0 }
 0x50b   : > { %v13802_v24 = vadd.f32 %v43128_v14, %v13738_v27  ;;  %v13737_v61 = vmul.f32 0.33333334, %v11695_v51 }
 0x50d   : > { %v13801_v21 = vadd.f32 %v46168_v22, %v13737_v61  ;;  %40926 = vmatprep.subr.mxu0 %v13802_v24 }
 0x50e   : > { %40927 = vmatpush3.msra.mxu0 %v13802_v24 }
 0x50f   : > { %40928 = vmatprep.subr.mxu0 %v13801_v21 }
 0x510   : > { %40929 = vmatpush3.msra.mxu0 %v13801_v21 }
 0x511   : > { %40931 = vmatmul.mubr.msk.f32.vlgmr.msra.gmra.mxu0 %vm179_vm2, %v46308_v56 }
 0x512   : > { %40944 = vmatprep.mubr.msk.f32.mxu0 %vm179_vm2, %v46309_v3 }
 0x513   : > { %v40715_v5 = vpop.f32.mrf.mxu1 }
 0x514   : > { %v13740_v47 = vmul.f32 0.33333334, %v40715_v5 }
 0x515   : > { %v11770_v45 = vpop.f32.mrf.mxu1  ;;  %v40722_v58 = vpop.f32.mrf.mxu0 }
 0x516   : > { %v13804_v26 = vadd.f32 %v43128_v14, %v13740_v47  ;;  %v13739_v27 = vmul.f32 0.33333334, %v11770_v45  ;;  %v13742_v51 = vmul.f32 0.33333334, %v40722_v58 }
 0x517   : > { %v11845_v50 = vpop.f32.mrf.mxu0 }
 0x518   : > { %v13803_v61 = vadd.f32 %v46168_v22, %v13739_v27  ;;  %40933 = vmatprep.subr.mxu1 %v13804_v26  ;;  %v13806_v24 = vadd.f32 %v43128_v14, %v13742_v51  ;;  %v13741_v21 = vmul.f32 0.33333334, %v11845_v50 }
 0x519   : > { %40934 = vmatpush3.msra.mxu1 %v13804_v26  ;;  %v40736_v56 = vpop.f32.mrf.mxu0 }
 0x51a   : > { %40935 = vmatprep.subr.mxu1 %v13803_v61  ;;  %v13805_v3 = vadd.f32 %v46168_v22, %v13741_v21  ;;  %v13746_v28 = vmul.f32 0.33333334, %v40736_v56  ;;  %40940 = vmatprep.subr.mxu0 %v13806_v24 }
 0x51b   : > { %40936 = vmatpush3.msra.mxu1 %v13803_v61  ;;  %v11995_v5 = vpop.f32.mrf.mxu0  ;;  %40941 = vmatpush3.msra.mxu0 %v13806_v24 }
 0x51c   : > { %40938 = vmatmul.mubr.msk.f32.vlgmr.msra.gmra.mxu1 %vm179_vm2, %v43897_v42  ;;  %v13810_v45 = vadd.f32 %v43128_v14, %v13746_v28  ;;  %v40729_v47 = vpop.f32.mrf.mxu1  ;;  %v13745_v58 = vmul.f32 0.33333334, %v11995_v5  ;;  %40942 = vmatprep.subr.mxu0 %v13805_v3 }
 0x51d   : > { %40951 = vmatprep.mubr.msk.f32.mxu1 %vm179_vm2, %v43977_v60  ;;  %v13744_v50 = vmul.f32 0.33333334, %v40729_v47  ;;  %40943 = vmatpush3.msra.mxu0 %v13805_v3 }
 0x51e   : > { %v13809_v26 = vadd.f32 %v46168_v22, %v13745_v58  ;;  %v11920_v56 = vpop.f32.mrf.mxu1  ;;  %40945 = vmatmul.mubr.msk.f32.vlgmr.msra.gmra.mxu0 %vm179_vm2, %v43927_v8  ;;  %40954 = vmatprep.subr.mxu0 %v13810_v45 }
 0x51f   : > { %v13808_v27 = vadd.f32 %v43128_v14, %v13744_v50  ;;  %v13743_v51 = vmul.f32 0.33333334, %v11920_v56  ;;  %v40750_v61 = vpop.f32.mrf.mxu0  ;;  %40955 = vmatpush3.msra.mxu0 %v13810_v45  ;;  %40958 = vmatprep.mubr.msk.f32.mxu0 %vm179_vm2, %v43878_v48 }
 0x520   : > { %v13750_v28 = vmul.f32 0.33333334, %v40750_v61  ;;  %40956 = vmatprep.subr.mxu0 %v13809_v26 }
 0x521   : > { %v13807_v24 = vadd.f32 %v46168_v22, %v13743_v51  ;;  %v12145_v3 = vpop.f32.mrf.mxu0  ;;  %40947 = vmatprep.subr.mxu1 %v13808_v27  ;;  %40957 = vmatpush3.msra.mxu0 %v13809_v26 }
 0x522   : > { %v13814_v21 = vadd.f32 %v43128_v14, %v13750_v28  ;;  %v40743_v5 = vpop.f32.mrf.mxu1  ;;  %v13749_v47 = vmul.f32 0.33333334, %v12145_v3  ;;  %40948 = vmatpush3.msra.mxu1 %v13808_v27  ;;  %40959 = vmatmul.mubr.msk.f32.vlgmr.msra.gmra.mxu0 %vm179_vm2, %v43909_v0 }
 0x523   : > { %v13748_v58 = vmul.f32 0.33333334, %v40743_v5  ;;  %40949 = vmatprep.subr.mxu1 %v13807_v24  ;;  %40972 = vmatprep.mubr.msk.f32.mxu0 %vm179_vm2, %v43991_v4 }
 0x524   : > { %v13813_v45 = vadd.f32 %v46168_v22, %v13749_v47  ;;  %v12070_v50 = vpop.f32.mrf.mxu1  ;;  %40968 = vmatprep.subr.mxu0 %v13814_v21  ;;  %40950 = vmatpush3.msra.mxu1 %v13807_v24 }
 0x525   : > { %v13812_v26 = vadd.f32 %v43128_v14, %v13748_v58  ;;  %v13747_v56 = vmul.f32 0.33333334, %v12070_v50  ;;  %v40764_v51 = vpop.f32.mrf.mxu0  ;;  %40969 = vmatpush3.msra.mxu0 %v13814_v21  ;;  %40952 = vmatmul.mubr.msk.f32.vlgmr.msra.gmra.mxu1 %vm179_vm2, %v43955_v34 }
 0x526   : > { %v13754_v27 = vmul.f32 0.33333334, %v40764_v51  ;;  %40970 = vmatprep.subr.mxu0 %v13813_v45  ;;  %40965 = vmatprep.mubr.msk.f32.mxu1 %vm179_vm2, %v43912_v15 }
 0x527   : > { %v13811_v61 = vadd.f32 %v46168_v22, %v13747_v56  ;;  %v12295_v28 = vpop.f32.mrf.mxu0  ;;  %40961 = vmatprep.subr.mxu1 %v13812_v26  ;;  %40971 = vmatpush3.msra.mxu0 %v13813_v45 }
 0x528   : > { %v13818_v24 = vadd.f32 %v43128_v14, %v13754_v27  ;;  %v40757_v3 = vpop.f32.mrf.mxu1  ;;  %v13753_v5 = vmul.f32 0.33333334, %v12295_v28  ;;  %40962 = vmatpush3.msra.mxu1 %v13812_v26  ;;  %40973 = vmatmul.mubr.msk.f32.vlgmr.msra.gmra.mxu0 %vm179_vm2, %v43985_v19 }
 0x529   : > { %v13752_v21 = vmul.f32 0.33333334, %v40757_v3  ;;  %40963 = vmatprep.subr.mxu1 %v13811_v61  ;;  %40986 = vmatprep.mubr.msk.f32.mxu0 %vm179_vm2, %v44036_v11 }
 0x52a   : > { %v13817_v47 = vadd.f32 %v46168_v22, %v13753_v5  ;;  %v12220_v58 = vpop.f32.mrf.mxu1  ;;  %40982 = vmatprep.subr.mxu0 %v13818_v24  ;;  %40964 = vmatpush3.msra.mxu1 %v13811_v61 }
 0x52b   : > { %v13816_v45 = vadd.f32 %v43128_v14, %v13752_v21  ;;  %v13751_v50 = vmul.f32 0.33333334, %v12220_v58  ;;  %v40778_v56 = vpop.f32.mrf.mxu0  ;;  %40983 = vmatpush3.msra.mxu0 %v13818_v24  ;;  %40966 = vmatmul.mubr.msk.f32.vlgmr.msra.gmra.mxu1 %vm179_vm2, %v43915_v18 }
 0x52c   : > { %v13758_v26 = vmul.f32 0.33333334, %v40778_v56  ;;  %40984 = vmatprep.subr.mxu0 %v13817_v47  ;;  %40979 = vmatprep.mubr.msk.f32.mxu1 %vm179_vm2, %v44045_v54 }
 0x52d   : > { %v13815_v51 = vadd.f32 %v46168_v22, %v13751_v50  ;;  %v12445_v27 = vpop.f32.mrf.mxu0  ;;  %40975 = vmatprep.subr.mxu1 %v13816_v45  ;;  %40985 = vmatpush3.msra.mxu0 %v13817_v47 }
 0x52e   : > { %v13822_v61 = vadd.f32 %v43128_v14, %v13758_v26  ;;  %v40771_v28 = vpop.f32.mrf.mxu1  ;;  %v13757_v3 = vmul.f32 0.33333334, %v12445_v27  ;;  %40976 = vmatpush3.msra.mxu1 %v13816_v45  ;;  %40987 = vmatmul.mubr.msk.f32.vlgmr.msra.gmra.mxu0 %vm179_vm2, %v44012_v32 }
 0x52f   : > { %v13756_v24 = vmul.f32 0.33333334, %v40771_v28  ;;  %40977 = vmatprep.subr.mxu1 %v13815_v51  ;;  %41000 = vmatprep.mubr.msk.f32.mxu0 %vm179_vm2, %v44064_v20 }
 0x530   : > { %v13821_v5 = vadd.f32 %v46168_v22, %v13757_v3  ;;  %v12370_v21 = vpop.f32.mrf.mxu1  ;;  %40996 = vmatprep.subr.mxu0 %v13822_v61  ;;  %40978 = vmatpush3.msra.mxu1 %v13815_v51 }
 0x531   : > { %v13820_v47 = vadd.f32 %v43128_v14, %v13756_v24  ;;  %v13755_v58 = vmul.f32 0.33333334, %v12370_v21  ;;  %v40792_v50 = vpop.f32.mrf.mxu0  ;;  %40997 = vmatpush3.msra.mxu0 %v13822_v61  ;;  %40980 = vmatmul.mubr.msk.f32.vlgmr.msra.gmra.mxu1 %vm179_vm2, %v44032_v9 }
 0x532   : > { %v13762_v45 = vmul.f32 0.33333334, %v40792_v50  ;;  %40998 = vmatprep.subr.mxu0 %v13821_v5  ;;  %40993 = vmatprep.mubr.msk.f32.mxu1 %vm179_vm2, %v44072_v40 }
 0x533   : > { %v13819_v56 = vadd.f32 %v46168_v22, %v13755_v58  ;;  %v12595_v26 = vpop.f32.mrf.mxu0  ;;  %40989 = vmatprep.subr.mxu1 %v13820_v47  ;;  %40999 = vmatpush3.msra.mxu0 %v13821_v5 }
 0x534   : > { %v13826_v51 = vadd.f32 %v43128_v14, %v13762_v45  ;;  %v40785_v27 = vpop.f32.mrf.mxu1  ;;  %v13761_v28 = vmul.f32 0.33333334, %v12595_v26  ;;  %40990 = vmatpush3.msra.mxu1 %v13820_v47  ;;  %41001 = vmatmul.mubr.msk.f32.vlgmr.msra.gmra.mxu0 %vm179_vm2, %v44051_v2 }
 0x535   : > { %v13760_v61 = vmul.f32 0.33333334, %v40785_v27  ;;  %40991 = vmatprep.subr.mxu1 %v13819_v56  ;;  %41014 = vmatprep.mubr.msk.f32.mxu0 %vm179_vm2, %v44099_v35 }
 0x536   : > { %v13825_v3 = vadd.f32 %v46168_v22, %v13761_v28  ;;  %v12520_v24 = vpop.f32.mrf.mxu1  ;;  %41010 = vmatprep.subr.mxu0 %v13826_v51  ;;  %40992 = vmatpush3.msra.mxu1 %v13819_v56 }
 0x537   : > { %v13824_v5 = vadd.f32 %v43128_v14, %v13760_v61  ;;  %v13759_v21 = vmul.f32 0.33333334, %v12520_v24  ;;  %v40806_v58 = vpop.f32.mrf.mxu0  ;;  %41011 = vmatpush3.msra.mxu0 %v13826_v51  ;;  %40994 = vmatmul.mubr.msk.f32.vlgmr.msra.gmra.mxu1 %vm179_vm2, %v44059_v1 }
 0x538   : > { %v13766_v47 = vmul.f32 0.33333334, %v40806_v58  ;;  %41012 = vmatprep.subr.mxu0 %v13825_v3  ;;  %41007 = vmatprep.mubr.msk.f32.mxu1 %vm179_vm2, %v44118_v43 }
 0x539   : > { %v13823_v50 = vadd.f32 %v46168_v22, %v13759_v21  ;;  %v12745_v45 = vpop.f32.mrf.mxu0  ;;  %41003 = vmatprep.subr.mxu1 %v13824_v5  ;;  %41013 = vmatpush3.msra.mxu0 %v13825_v3 }
 0x53a   : > { %v13830_v56 = vadd.f32 %v43128_v14, %v13766_v47  ;;  %v40799_v26 = vpop.f32.mrf.mxu1  ;;  %v13765_v27 = vmul.f32 0.33333334, %v12745_v45  ;;  %41004 = vmatpush3.msra.mxu1 %v13824_v5  ;;  %41015 = vmatmul.mubr.msk.f32.vlgmr.msra.gmra.mxu0 %vm179_vm2, %v44078_v6 }
 0x53b   : > { %v13764_v51 = vmul.f32 0.33333334, %v40799_v26  ;;  %41005 = vmatprep.subr.mxu1 %v13823_v50  ;;  %41028 = vmatprep.mubr.msk.f32.mxu0 %vm179_vm2, %v44146_v30 }
 0x53c   : > { %v13829_v28 = vadd.f32 %v46168_v22, %v13765_v27  ;;  %v12670_v61 = vpop.f32.mrf.mxu1  ;;  %41024 = vmatprep.subr.mxu0 %v13830_v56  ;;  %41006 = vmatpush3.msra.mxu1 %v13823_v50 }
 0x53d   : > { %v13828_v3 = vadd.f32 %v43128_v14, %v13764_v51  ;;  %v13763_v24 = vmul.f32 0.33333334, %v12670_v61  ;;  %v40820_v21 = vpop.f32.mrf.mxu0  ;;  %41025 = vmatpush3.msra.mxu0 %v13830_v56  ;;  %41008 = vmatmul.mubr.msk.f32.vlgmr.msra.gmra.mxu1 %vm179_vm2, %v44093_v37 }
 0x53e   : > { %v13770_v5 = vmul.f32 0.33333334, %v40820_v21  ;;  %41026 = vmatprep.subr.mxu0 %v13829_v28  ;;  %41021 = vmatprep.mubr.msk.f32.mxu1 %vm179_vm2, %v44156_v29 }
 0x53f   : > { %v13827_v58 = vadd.f32 %v46168_v22, %v13763_v24  ;;  %v12895_v47 = vpop.f32.mrf.mxu0  ;;  %41017 = vmatprep.subr.mxu1 %v13828_v3  ;;  %41027 = vmatpush3.msra.mxu0 %v13829_v28 }
 0x540   : > { %v13834_v50 = vadd.f32 %v43128_v14, %v13770_v5  ;;  %v40813_v45 = vpop.f32.mrf.mxu1  ;;  %v13769_v26 = vmul.f32 0.33333334, %v12895_v47  ;;  %41018 = vmatpush3.msra.mxu1 %v13828_v3  ;;  %41029 = vmatmul.mubr.msk.f32.vlgmr.msra.gmra.mxu0 %vm179_vm2, %v44124_v17 }
 0x541   : > { %v13768_v56 = vmul.f32 0.33333334, %v40813_v45  ;;  %41019 = vmatprep.subr.mxu1 %v13827_v58  ;;  %41042 = vmatprep.mubr.msk.f32.mxu0 %vm179_vm2, %v44183_v12 }
 0x542   : > { %v13833_v27 = vadd.f32 %v46168_v22, %v13769_v26  ;;  %v12820_v51 = vpop.f32.mrf.mxu1  ;;  %41038 = vmatprep.subr.mxu0 %v13834_v50  ;;  %41020 = vmatpush3.msra.mxu1 %v13827_v58 }
 0x543   : > { %v13832_v28 = vadd.f32 %v43128_v14, %v13768_v56  ;;  %v13767_v61 = vmul.f32 0.33333334, %v12820_v51  ;;  %v40834_v24 = vpop.f32.mrf.mxu0  ;;  %41039 = vmatpush3.msra.mxu0 %v13834_v50  ;;  %41022 = vmatmul.mubr.msk.f32.vlgmr.msra.gmra.mxu1 %vm179_vm2, %v44136_v62 }
 0x544   : > { %v13774_v3 = vmul.f32 0.33333334, %v40834_v24  ;;  %41040 = vmatprep.subr.mxu0 %v13833_v27  ;;  %41035 = vmatprep.mubr.msk.f32.mxu1 %vm179_vm2, %v44191_v16 }
 0x545   : > { %v13831_v21 = vadd.f32 %v46168_v22, %v13767_v61  ;;  %v13045_v5 = vpop.f32.mrf.mxu0  ;;  %41031 = vmatprep.subr.mxu1 %v13832_v28  ;;  %41041 = vmatpush3.msra.mxu0 %v13833_v27 }
 0x546   : > { %v13838_v58 = vadd.f32 %v43128_v14, %v13774_v3  ;;  %v40827_v47 = vpop.f32.mrf.mxu1  ;;  %v13773_v45 = vmul.f32 0.33333334, %v13045_v5  ;;  %41032 = vmatpush3.msra.mxu1 %v13832_v28  ;;  %41043 = vmatmul.mubr.msk.f32.vlgmr.msra.gmra.mxu0 %vm179_vm2, %v44159_v39 }
 0x547   : > { %v13772_v50 = vmul.f32 0.33333334, %v40827_v47  ;;  %41033 = vmatprep.subr.mxu1 %v13831_v21  ;;  %41056 = vmatprep.mubr.msk.f32.mxu0 %vm179_vm2, %v44211_v33 }
 0x548   : > { %v13837_v26 = vadd.f32 %v46168_v22, %v13773_v45  ;;  %v12970_v56 = vpop.f32.mrf.mxu1  ;;  %41052 = vmatprep.subr.mxu0 %v13838_v58  ;;  %41034 = vmatpush3.msra.mxu1 %v13831_v21 }
 0x549   : > { %v13836_v27 = vadd.f32 %v43128_v14, %v13772_v50  ;;  %v13771_v51 = vmul.f32 0.33333334, %v12970_v56  ;;  %v40848_v61 = vpop.f32.mrf.mxu0  ;;  %41053 = vmatpush3.msra.mxu0 %v13838_v58  ;;  %41036 = vmatmul.mubr.msk.f32.vlgmr.msra.gmra.mxu1 %vm179_vm2, %v44176_v13 }
 0x54a   : > { %v13778_v28 = vmul.f32 0.33333334, %v40848_v61  ;;  %41054 = vmatprep.subr.mxu0 %v13837_v26  ;;  %41049 = vmatprep.mubr.msk.f32.mxu1 %vm179_vm2, %v44220_v41 }
 0x54b   : > { %v13835_v24 = vadd.f32 %v46168_v22, %v13771_v51  ;;  %v13195_v3 = vpop.f32.mrf.mxu0  ;;  %41045 = vmatprep.subr.mxu1 %v13836_v27  ;;  %41055 = vmatpush3.msra.mxu0 %v13837_v26 }
 0x54c   : > { %v13842_v21 = vadd.f32 %v43128_v14, %v13778_v28  ;;  %v40841_v5 = vpop.f32.mrf.mxu1  ;;  %v13777_v47 = vmul.f32 0.33333334, %v13195_v3  ;;  %41046 = vmatpush3.msra.mxu1 %v13836_v27  ;;  %41057 = vmatmul.mubr.msk.f32.vlgmr.msra.gmra.mxu0 %vm179_vm2, %v44197_v44 }
 0x54d   : > { %v13776_v58 = vmul.f32 0.33333334, %v40841_v5  ;;  %41047 = vmatprep.subr.mxu1 %v13835_v24  ;;  %41070 = vmatprep.mubr.msk.f32.mxu0 %vm179_vm2, %v44239_v53 }
 0x54e   : > { %v13841_v45 = vadd.f32 %v46168_v22, %v13777_v47  ;;  %v13120_v50 = vpop.f32.mrf.mxu1  ;;  %41066 = vmatprep.subr.mxu0 %v13842_v21  ;;  %41048 = vmatpush3.msra.mxu1 %v13835_v24 }
 0x54f   : > { %v13840_v26 = vadd.f32 %v43128_v14, %v13776_v58  ;;  %v13775_v56 = vmul.f32 0.33333334, %v13120_v50  ;;  %v40862_v51 = vpop.f32.mrf.mxu0  ;;  %41067 = vmatpush3.msra.mxu0 %v13842_v21  ;;  %41050 = vmatmul.mubr.msk.f32.vlgmr.msra.gmra.mxu1 %vm179_vm2, %v44206_v7 }
 0x550   : > { %v13782_v27 = vmul.f32 0.33333334, %v40862_v51  ;;  %41068 = vmatprep.subr.mxu0 %v13841_v45  ;;  %41063 = vmatprep.mubr.msk.f32.mxu1 %vm179_vm2, %v46278_v63 }
 0x551   : > { %v13839_v61 = vadd.f32 %v46168_v22, %v13775_v56  ;;  %v13345_v28 = vpop.f32.mrf.mxu0  ;;  %41059 = vmatprep.subr.mxu1 %v13840_v26  ;;  %41069 = vmatpush3.msra.mxu0 %v13841_v45 }
 0x552   : > { %v13846_v24 = vadd.f32 %v43128_v14, %v13782_v27  ;;  %v40855_v3 = vpop.f32.mrf.mxu1  ;;  %v13781_v5 = vmul.f32 0.33333334, %v13345_v28  ;;  %41060 = vmatpush3.msra.mxu1 %v13840_v26  ;;  %41071 = vmatmul.mubr.msk.f32.vlgmr.msra.gmra.mxu0 %vm179_vm2, %v46263_v52 }
 0x553   : > { %v13780_v21 = vmul.f32 0.33333334, %v40855_v3  ;;  %41061 = vmatprep.subr.mxu1 %v13839_v61  ;;  %41084 = vmatprep.mubr.msk.f32.mxu0 %vm179_vm2, %v46264_v23 }
 0x554   : > { %v13845_v47 = vadd.f32 %v46168_v22, %v13781_v5  ;;  %v13270_v58 = vpop.f32.mrf.mxu1  ;;  %41080 = vmatprep.subr.mxu0 %v13846_v24  ;;  %41062 = vmatpush3.msra.mxu1 %v13839_v61 }
 0x555   : > { %v13844_v45 = vadd.f32 %v43128_v14, %v13780_v21  ;;  %v13779_v50 = vmul.f32 0.33333334, %v13270_v58  ;;  %v40876_v56 = vpop.f32.mrf.mxu0  ;;  %41081 = vmatpush3.msra.mxu0 %v13846_v24  ;;  %41064 = vmatmul.mubr.msk.f32.vlgmr.msra.gmra.mxu1 %vm179_vm2, %v46249_v59 }
 0x556   : > { %v13786_v26 = vmul.f32 0.33333334, %v40876_v56  ;;  %41082 = vmatprep.subr.mxu0 %v13845_v47  ;;  %41077 = vmatprep.mubr.msk.f32.mxu1 %vm179_vm2, %v46250_v31 }
 0x557   : > { %v13843_v51 = vadd.f32 %v46168_v22, %v13779_v50  ;;  %v13495_v27 = vpop.f32.mrf.mxu0  ;;  %41073 = vmatprep.subr.mxu1 %v13844_v45  ;;  %41083 = vmatpush3.msra.mxu0 %v13845_v47 }
 0x558   : > { %v13850_v61 = vadd.f32 %v43128_v14, %v13786_v26  ;;  %v40869_v28 = vpop.f32.mrf.mxu1  ;;  %v13785_v3 = vmul.f32 0.33333334, %v13495_v27  ;;  %41074 = vmatpush3.msra.mxu1 %v13844_v45  ;;  %41085 = vmatmul.mubr.msk.f32.vlgmr.msra.gmra.mxu0 %vm179_vm2, %v44252_v10 }
 0x559   : > { %v13784_v24 = vmul.f32 0.33333334, %v40869_v28  ;;  %41075 = vmatprep.subr.mxu1 %v13843_v51  ;;  %41098 = vmatprep.mubr.msk.f32.mxu0 %vm179_vm2, %v46279_v25 }
 0x55a   : > { %v13849_v5 = vadd.f32 %v46168_v22, %v13785_v3  ;;  %v13420_v21 = vpop.f32.mrf.mxu1  ;;  %41094 = vmatprep.subr.mxu0 %v13850_v61  ;;  %41076 = vmatpush3.msra.mxu1 %v13843_v51 }
 0x55b   : > { %v13848_v47 = vadd.f32 %v43128_v14, %v13784_v24  ;;  %v13783_v58 = vmul.f32 0.33333334, %v13420_v21  ;;  %41095 = vmatpush3.msra.mxu0 %v13850_v61  ;;  %41078 = vmatmul.mubr.msk.f32.vlgmr.msra.gmra.mxu1 %vm179_vm2, %v44260_v36 }
 0x55c   : > { %v40890_v45 = vpop.f32.mrf.mxu0  ;;  %41096 = vmatprep.subr.mxu0 %v13849_v5  ;;  %41091 = vmatprep.mubr.msk.f32.mxu1 %vm179_vm2, %v46265_v57 }
 0x55d   : > { %v13847_v50 = vadd.f32 %v46168_v22, %v13783_v58  ;;  %v13790_v56 = vmul.f32 0.33333334, %v40890_v45  ;;  %41087 = vmatprep.subr.mxu1 %v13848_v47  ;;  %41097 = vmatpush3.msra.mxu0 %v13849_v5 }
 0x55e   : > { %v40883_v26 = vpop.f32.mrf.mxu1  ;;  %v13645_v27 = vpop.f32.mrf.mxu0  ;;  %41088 = vmatpush3.msra.mxu1 %v13848_v47  ;;  %41099 = vmatmul.mubr.msk.f32.vlgmr.msra.gmra.mxu0 %vm179_vm2, %v44280_v38 }
 0x55f   : > { %v13854_v51 = vadd.f32 %v43128_v14, %v13790_v56  ;;  %v13788_v61 = vmul.f32 0.33333334, %v40883_v26  ;;  %v13789_v28 = vmul.f32 0.33333334, %v13645_v27  ;;  %41089 = vmatprep.subr.mxu1 %v13847_v50  ;;  %41112 = vmatprep.mubr.msk.f32.mxu0 %vm179_vm2, %v44322_v49  ;;  %v46310_v27 = vld [vmem:[#allocation17_spill] sm:$0xff] }
 0x560   : > { %v13570_v3 = vpop.f32.mrf.mxu1  ;;  %41090 = vmatpush3.msra.mxu1 %v13847_v50 }
 0x561   : > { %v13852_v24 = vadd.f32 %v43128_v14, %v13788_v61  ;;  %v13853_v5 = vadd.f32 %v46168_v22, %v13789_v28  ;;  %v13787_v21 = vmul.f32 0.33333334, %v13570_v3  ;;  %41108 = vmatprep.subr.mxu0 %v13854_v51  ;;  %41092 = vmatmul.mubr.msk.f32.vlgmr.msra.gmra.mxu1 %vm179_vm2, %v44288_v46  ;;  %v46312_v28 = vld [vmem:[#allocation18_spill] sm:$0xff]  ;;  %v46313_v3 = vld [vmem:[#allocation25_spill] sm:$0xff] }
 0x562   : > { %v40897_v47 = vpop.f32.mrf.mxu1  ;;  %41109 = vmatpush3.msra.mxu0 %v13854_v51  ;;  %41105 = vmatprep.mubr.msk.f32.mxu1 %vm179_vm2, %v44330_v55  ;;  %v46311_v51 = vld [vmem:[#allocation16_spill] sm:$0xff] }
 0x563   : > { %v13851_v58 = vadd.f32 %v46168_v22, %v13787_v21  ;;  %v13792_v45 = vmul.f32 0.33333334, %v40897_v47  ;;  %41101 = vmatprep.subr.mxu1 %v13852_v24  ;;  %41110 = vmatprep.subr.mxu0 %v13853_v5 }
 0x564   : > { %v13720_v50 = vpop.f32.mrf.mxu1  ;;  %41102 = vmatpush3.msra.mxu1 %v13852_v24  ;;  %41111 = vmatpush3.msra.mxu0 %v13853_v5  ;;  %v46314_v24 = vld [vmem:[#allocation26_spill] sm:$0xff]  ;;  %v46315_v5 = vld [vmem:[#allocation24_spill] sm:$0xff] }
 0x565   : > { %v13856_v56 = vadd.f32 %v43128_v14, %v13792_v45  ;;  %v13791_v26 = vmul.f32 0.33333334, %v13720_v50  ;;  %41103 = vmatprep.subr.mxu1 %v13851_v58  ;;  %41113 = vmatmul.mubr.msk.f32.vlgmr.msra.gmra.mxu0 %vm179_vm2, %v46310_v27 }
 0x566   : > { %41104 = vmatpush3.msra.mxu1 %v13851_v58  ;;  %41126 = vmatprep.mubr.msk.f32.mxu0 %vm179_vm2, %v46311_v51  ;;  %v46317_v51 = vld [vmem:[#allocation19_spill] sm:$0xff] }
 0x567   : > { %v13855_v61 = vadd.f32 %v46168_v22, %v13791_v26  ;;  %41106 = vmatmul.mubr.msk.f32.vlgmr.msra.gmra.mxu1 %vm179_vm2, %v46312_v28  ;;  %41115 = vmatprep.subr.mxu1 %v13856_v56 }
 0x568   : > { %41116 = vmatpush3.msra.mxu1 %v13856_v56  ;;  %41119 = vmatprep.mubr.msk.f32.mxu1 %vm179_vm2, %v46313_v3  ;;  %v46316_v56 = vld [vmem:[#allocation31_spill] sm:$0xff] }
 0x569   : > { %41117 = vmatprep.subr.mxu1 %v13855_v61 }
 0x56a   : > { %41118 = vmatpush3.msra.mxu1 %v13855_v61 }
 0x56b   : > { %41120 = vmatmul.mubr.msk.f32.vlgmr.msra.gmra.mxu1 %vm179_vm2, %v46314_v24 }
 0x56c   : > { %41133 = vmatprep.mubr.msk.f32.mxu1 %vm179_vm2, %v46315_v5 }
 0x5a0   : > { %v40904_v21 = vpop.f32.mrf.mxu0 }
 0x5a1   : > { %v16258_v47 = vmul.f32 0.5, %v40904_v21 }
 0x5a2   : > { %v13923_v58 = vpop.f32.mrf.mxu0 }
 0x5a3   : > { %v16322_v45 = vadd.f32 %v43128_v14, %v16258_v47  ;;  %v16257_v50 = vmul.f32 0.5, %v13923_v58  ;;  %v46318_v58 = vld [vmem:[#allocation32_spill] sm:$0xff] }
 0x5a5   : > { %v16321_v26 = vadd.f32 %v46168_v22, %v16257_v50  ;;  %41122 = vmatprep.subr.mxu0 %v16322_v45 }
 0x5a6   : > { %41123 = vmatpush3.msra.mxu0 %v16322_v45  ;;  %v46319_v45 = vld [vmem:[#allocation36_spill] sm:$0xff] }
 0x5a7   : > { %41124 = vmatprep.subr.mxu0 %v16321_v26 }
 0x5a8   : > { %41125 = vmatpush3.msra.mxu0 %v16321_v26 }
 0x5a9   : > { %41127 = vmatmul.mubr.msk.f32.vlgmr.msra.gmra.mxu0 %vm179_vm2, %v46316_v56  ;;  %v40911_v61 = vpop.f32.mrf.mxu1 }
 0x5aa   : > { %41140 = vmatprep.mubr.msk.f32.mxu0 %vm179_vm2, %v46317_v51  ;;  %v16260_v5 = vmul.f32 0.5, %v40911_v61 }
 0x5ab   : > { %v13998_v24 = vpop.f32.mrf.mxu1 }
 0x5ac   : > { %v16324_v21 = vadd.f32 %v43128_v14, %v16260_v5  ;;  %v16259_v3 = vmul.f32 0.5, %v13998_v24  ;;  %v46321_v5 = vld [vmem:[#allocation40_spill] sm:$0xff] }
 0x5ae   : > { %v16323_v47 = vadd.f32 %v46168_v22, %v16259_v3  ;;  %41129 = vmatprep.subr.mxu1 %v16324_v21  ;;  %v46320_v3 = vld [vmem:[#allocation35_spill] sm:$0xff] }
 0x5af   : > { %41130 = vmatpush3.msra.mxu1 %v16324_v21 }
 0x5b0   : > { %41131 = vmatprep.subr.mxu1 %v16323_v47 }
 0x5b1   : > { %41132 = vmatpush3.msra.mxu1 %v16323_v47 }
 0x5b2   : > { %41134 = vmatmul.mubr.msk.f32.vlgmr.msra.gmra.mxu1 %vm179_vm2, %v46318_v58 }
 0x5b3   : > { %41147 = vmatprep.mubr.msk.f32.mxu1 %vm179_vm2, %v46319_v45 }
 0x5b6   : > { %v40918_v50 = vpop.f32.mrf.mxu0 }
 0x5b7   : > { %v16262_v26 = vmul.f32 0.5, %v40918_v50 }
 0x5b8   : > { %v14073_v56 = vpop.f32.mrf.mxu0 }
 0x5b9   : > { %v16326_v51 = vadd.f32 %v43128_v14, %v16262_v26  ;;  %v16261_v61 = vmul.f32 0.5, %v14073_v56  ;;  %v46322_v56 = vld [vmem:[#allocation39_spill] sm:$0xff] }
 0x5bb   : > { %v16325_v24 = vadd.f32 %v46168_v22, %v16261_v61  ;;  %41136 = vmatprep.subr.mxu0 %v16326_v51 }
 0x5bc   : > { %41137 = vmatpush3.msra.mxu0 %v16326_v51  ;;  %v46323_v51 = vld [vmem:[#allocation46_spill] sm:$0xff] }
 0x5bd   : > { %41138 = vmatprep.subr.mxu0 %v16325_v24 }
 0x5be   : > { %41139 = vmatpush3.msra.mxu0 %v16325_v24 }
 0x5bf   : > { %41141 = vmatmul.mubr.msk.f32.vlgmr.msra.gmra.mxu0 %vm179_vm2, %v46320_v3 }
 0x5c0   : > { %41154 = vmatprep.mubr.msk.f32.mxu0 %vm179_vm2, %v46321_v5 }
 0x5c1   : > { %v40925_v21 = vpop.f32.mrf.mxu1 }
 0x5c2   : > { %v16264_v47 = vmul.f32 0.5, %v40925_v21 }
 0x5c3   : > { %v14148_v58 = vpop.f32.mrf.mxu1 }
 0x5c4   : > { %v16328_v45 = vadd.f32 %v43128_v14, %v16264_v47  ;;  %v16263_v50 = vmul.f32 0.5, %v14148_v58  ;;  %v46324_v58 = vld [vmem:[#allocation45_spill] sm:$0xff] }
 0x5c6   : > { %v16327_v26 = vadd.f32 %v46168_v22, %v16263_v50  ;;  %41143 = vmatprep.subr.mxu1 %v16328_v45 }
 0x5c7   : > { %41144 = vmatpush3.msra.mxu1 %v16328_v45  ;;  %v46325_v45 = vld [vmem:[#allocation3_spill] sm:$0xff] }
 0x5c8   : > { %41145 = vmatprep.subr.mxu1 %v16327_v26 }
 0x5c9   : > { %41146 = vmatpush3.msra.mxu1 %v16327_v26 }
 0x5ca   : > { %41148 = vmatmul.mubr.msk.f32.vlgmr.msra.gmra.mxu1 %vm179_vm2, %v46322_v56 }
 0x5cb   : > { %41161 = vmatprep.mubr.msk.f32.mxu1 %vm179_vm2, %v46323_v51 }
 0x5d1   : > { %v40932_v61 = vpop.f32.mrf.mxu0 }
 0x5d2   : > { %v16266_v24 = vmul.f32 0.5, %v40932_v61 }
 0x5d3   : > { %v14223_v3 = vpop.f32.mrf.mxu0 }
 0x5d4   : > { %v16330_v5 = vadd.f32 %v43128_v14, %v16266_v24  ;;  %v16265_v21 = vmul.f32 0.5, %v14223_v3 }
 0x5d6   : > { %v16329_v47 = vadd.f32 %v46168_v22, %v16265_v21  ;;  %41150 = vmatprep.subr.mxu0 %v16330_v5 }
 0x5d7   : > { %41151 = vmatpush3.msra.mxu0 %v16330_v5 }
 0x5d8   : > { %41152 = vmatprep.subr.mxu0 %v16329_v47 }
 0x5d9   : > { %41153 = vmatpush3.msra.mxu0 %v16329_v47 }
 0x5da   : > { %41155 = vmatmul.mubr.msk.f32.vlgmr.msra.gmra.mxu0 %vm179_vm2, %v46324_v58 }
 0x5db   : > { %41168 = vmatprep.mubr.msk.f32.mxu0 %vm179_vm2, %v46325_v45 }
 0x5dc   : > { %v40939_v50 = vpop.f32.mrf.mxu1 }
 0x5dd   : > { %v16268_v26 = vmul.f32 0.5, %v40939_v50 }
 0x5de   : > { %v14298_v56 = vpop.f32.mrf.mxu1  ;;  %v40946_v51 = vpop.f32.mrf.mxu0 }
 0x5df   : > { %v16332_v61 = vadd.f32 %v43128_v14, %v16268_v26  ;;  %v16267_v24 = vmul.f32 0.5, %v14298_v56  ;;  %v16270_v3 = vmul.f32 0.5, %v40946_v51 }
 0x5e0   : > { %v14373_v28 = vpop.f32.mrf.mxu0 }
 0x5e1   : > { %v16331_v21 = vadd.f32 %v46168_v22, %v16267_v24  ;;  %41157 = vmatprep.subr.mxu1 %v16332_v61  ;;  %v16334_v5 = vadd.f32 %v43128_v14, %v16270_v3  ;;  %v16269_v47 = vmul.f32 0.5, %v14373_v28 }
 0x5e2   : > { %41158 = vmatpush3.msra.mxu1 %v16332_v61  ;;  %v40960_v58 = vpop.f32.mrf.mxu0 }
 0x5e3   : > { %41159 = vmatprep.subr.mxu1 %v16331_v21  ;;  %v16333_v45 = vadd.f32 %v46168_v22, %v16269_v47  ;;  %v16274_v27 = vmul.f32 0.5, %v40960_v58  ;;  %41164 = vmatprep.subr.mxu0 %v16334_v5 }
 0x5e4   : > { %41160 = vmatpush3.msra.mxu1 %v16331_v21  ;;  %v14523_v50 = vpop.f32.mrf.mxu0  ;;  %41165 = vmatpush3.msra.mxu0 %v16334_v5 }
 0x5e5   : > { %41162 = vmatmul.mubr.msk.f32.vlgmr.msra.gmra.mxu1 %vm179_vm2, %v43897_v42  ;;  %v16338_v26 = vadd.f32 %v43128_v14, %v16274_v27  ;;  %v40953_v56 = vpop.f32.mrf.mxu1  ;;  %v16273_v51 = vmul.f32 0.5, %v14523_v50  ;;  %41166 = vmatprep.subr.mxu0 %v16333_v45 }
 0x5e6   : > { %41175 = vmatprep.mubr.msk.f32.mxu1 %vm179_vm2, %v43977_v60  ;;  %v16272_v28 = vmul.f32 0.5, %v40953_v56  ;;  %41167 = vmatpush3.msra.mxu0 %v16333_v45 }
 0x5e7   : > { %v16337_v61 = vadd.f32 %v46168_v22, %v16273_v51  ;;  %v14448_v24 = vpop.f32.mrf.mxu1  ;;  %41169 = vmatmul.mubr.msk.f32.vlgmr.msra.gmra.mxu0 %vm179_vm2, %v43927_v8  ;;  %41178 = vmatprep.subr.mxu0 %v16338_v26 }
 0x5e8   : > { %v16336_v3 = vadd.f32 %v43128_v14, %v16272_v28  ;;  %v16271_v42 = vmul.f32 0.5, %v14448_v24  ;;  %v40974_v21 = vpop.f32.mrf.mxu0  ;;  %41179 = vmatpush3.msra.mxu0 %v16338_v26  ;;  %41182 = vmatprep.mubr.msk.f32.mxu0 %vm179_vm2, %v43878_v48 }
 0x5e9   : > { %v16278_v27 = vmul.f32 0.5, %v40974_v21  ;;  %41180 = vmatprep.subr.mxu0 %v16337_v61 }
 0x5ea   : > { %v16335_v60 = vadd.f32 %v46168_v22, %v16271_v42  ;;  %v14673_v5 = vpop.f32.mrf.mxu0  ;;  %41171 = vmatprep.subr.mxu1 %v16336_v3  ;;  %41181 = vmatpush3.msra.mxu0 %v16337_v61 }
 0x5eb   : > { %v16342_v47 = vadd.f32 %v43128_v14, %v16278_v27  ;;  %v40967_v58 = vpop.f32.mrf.mxu1  ;;  %v16277_v8 = vmul.f32 0.5, %v14673_v5  ;;  %41172 = vmatpush3.msra.mxu1 %v16336_v3  ;;  %41183 = vmatmul.mubr.msk.f32.vlgmr.msra.gmra.mxu0 %vm179_vm2, %v43909_v0 }
 0x5ec   : > { %v16276_v45 = vmul.f32 0.5, %v40967_v58  ;;  %41173 = vmatprep.subr.mxu1 %v16335_v60  ;;  %41196 = vmatprep.mubr.msk.f32.mxu0 %vm179_vm2, %v43991_v4 }
 0x5ed   : > { %v16341_v48 = vadd.f32 %v46168_v22, %v16277_v8  ;;  %v14598_v50 = vpop.f32.mrf.mxu1  ;;  %41192 = vmatprep.subr.mxu0 %v16342_v47  ;;  %41174 = vmatpush3.msra.mxu1 %v16335_v60 }
 0x5ee   : > { %v16340_v26 = vadd.f32 %v43128_v14, %v16276_v45  ;;  %v16275_v56 = vmul.f32 0.5, %v14598_v50  ;;  %v40988_v51 = vpop.f32.mrf.mxu0  ;;  %41193 = vmatpush3.msra.mxu0 %v16342_v47  ;;  %41176 = vmatmul.mubr.msk.f32.vlgmr.msra.gmra.mxu1 %vm179_vm2, %v43955_v34 }
 0x5ef   : > { %v16282_v28 = vmul.f32 0.5, %v40988_v51  ;;  %41194 = vmatprep.subr.mxu0 %v16341_v48  ;;  %41189 = vmatprep.mubr.msk.f32.mxu1 %vm179_vm2, %v43912_v15 }
 0x5f0   : > { %v16339_v0 = vadd.f32 %v46168_v22, %v16275_v56  ;;  %v14823_v4 = vpop.f32.mrf.mxu0  ;;  %41185 = vmatprep.subr.mxu1 %v16340_v26  ;;  %41195 = vmatpush3.msra.mxu0 %v16341_v48 }
 0x5f1   : > { %v16346_v61 = vadd.f32 %v43128_v14, %v16282_v28  ;;  %v40981_v24 = vpop.f32.mrf.mxu1  ;;  %v16281_v3 = vmul.f32 0.5, %v14823_v4  ;;  %41186 = vmatpush3.msra.mxu1 %v16340_v26  ;;  %41197 = vmatmul.mubr.msk.f32.vlgmr.msra.gmra.mxu0 %vm179_vm2, %v43985_v19 }
 0x5f2   : > { %v16280_v42 = vmul.f32 0.5, %v40981_v24  ;;  %41187 = vmatprep.subr.mxu1 %v16339_v0  ;;  %41210 = vmatprep.mubr.msk.f32.mxu0 %vm179_vm2, %v44036_v11 }
 0x5f3   : > { %v16345_v15 = vadd.f32 %v46168_v22, %v16281_v3  ;;  %v14748_v34 = vpop.f32.mrf.mxu1  ;;  %41206 = vmatprep.subr.mxu0 %v16346_v61  ;;  %41188 = vmatpush3.msra.mxu1 %v16339_v0 }
 0x5f4   : > { %v16344_v21 = vadd.f32 %v43128_v14, %v16280_v42  ;;  %v16279_v27 = vmul.f32 0.5, %v14748_v34  ;;  %v41002_v60 = vpop.f32.mrf.mxu0  ;;  %41207 = vmatpush3.msra.mxu0 %v16346_v61  ;;  %41190 = vmatmul.mubr.msk.f32.vlgmr.msra.gmra.mxu1 %vm179_vm2, %v43915_v18 }
 0x5f5   : > { %v16286_v5 = vmul.f32 0.5, %v41002_v60  ;;  %41208 = vmatprep.subr.mxu0 %v16345_v15  ;;  %41203 = vmatprep.mubr.msk.f32.mxu1 %vm179_vm2, %v44045_v54 }
 0x5f6   : > { %v16343_v19 = vadd.f32 %v46168_v22, %v16279_v27  ;;  %v14973_v11 = vpop.f32.mrf.mxu0  ;;  %41199 = vmatprep.subr.mxu1 %v16344_v21  ;;  %41209 = vmatpush3.msra.mxu0 %v16345_v15 }
 0x5f7   : > { %v16350_v47 = vadd.f32 %v43128_v14, %v16286_v5  ;;  %v40995_v58 = vpop.f32.mrf.mxu1  ;;  %v16285_v8 = vmul.f32 0.5, %v14973_v11  ;;  %41200 = vmatpush3.msra.mxu1 %v16344_v21  ;;  %41211 = vmatmul.mubr.msk.f32.vlgmr.msra.gmra.mxu0 %vm179_vm2, %v44012_v32 }
 0x5f8   : > { %v16284_v45 = vmul.f32 0.5, %v40995_v58  ;;  %41201 = vmatprep.subr.mxu1 %v16343_v19  ;;  %41224 = vmatprep.mubr.msk.f32.mxu0 %vm179_vm2, %v44064_v20 }
 0x5f9   : > { %v16349_v18 = vadd.f32 %v46168_v22, %v16285_v8  ;;  %v14898_v54 = vpop.f32.mrf.mxu1  ;;  %41220 = vmatprep.subr.mxu0 %v16350_v47  ;;  %41202 = vmatpush3.msra.mxu1 %v16343_v19 }
 0x5fa   : > { %v16348_v48 = vadd.f32 %v43128_v14, %v16284_v45  ;;  %v16283_v50 = vmul.f32 0.5, %v14898_v54  ;;  %v41016_v26 = vpop.f32.mrf.mxu0  ;;  %41221 = vmatpush3.msra.mxu0 %v16350_v47  ;;  %41204 = vmatmul.mubr.msk.f32.vlgmr.msra.gmra.mxu1 %vm179_vm2, %v44032_v9 }
 0x5fb   : > { %v16290_v56 = vmul.f32 0.5, %v41016_v26  ;;  %41222 = vmatprep.subr.mxu0 %v16349_v18  ;;  %41217 = vmatprep.mubr.msk.f32.mxu1 %vm179_vm2, %v44072_v40 }
 0x5fc   : > { %v16347_v32 = vadd.f32 %v46168_v22, %v16283_v50  ;;  %v15123_v20 = vpop.f32.mrf.mxu0  ;;  %41213 = vmatprep.subr.mxu1 %v16348_v48  ;;  %41223 = vmatpush3.msra.mxu0 %v16349_v18 }
 0x5fd   : > { %v16354_v51 = vadd.f32 %v43128_v14, %v16290_v56  ;;  %v41009_v28 = vpop.f32.mrf.mxu1  ;;  %v16289_v0 = vmul.f32 0.5, %v15123_v20  ;;  %41214 = vmatpush3.msra.mxu1 %v16348_v48  ;;  %41225 = vmatmul.mubr.msk.f32.vlgmr.msra.gmra.mxu0 %vm179_vm2, %v44051_v2 }
 0x5fe   : > { %v16288_v4 = vmul.f32 0.5, %v41009_v28  ;;  %41215 = vmatprep.subr.mxu1 %v16347_v32  ;;  %41238 = vmatprep.mubr.msk.f32.mxu0 %vm179_vm2, %v44099_v35 }
 0x5ff   : > { %v16353_v9 = vadd.f32 %v46168_v22, %v16289_v0  ;;  %v15048_v40 = vpop.f32.mrf.mxu1  ;;  %41234 = vmatprep.subr.mxu0 %v16354_v51  ;;  %41216 = vmatpush3.msra.mxu1 %v16347_v32 }
 0x600   : > { %v16352_v61 = vadd.f32 %v43128_v14, %v16288_v4  ;;  %v16287_v24 = vmul.f32 0.5, %v15048_v40  ;;  %v41030_v3 = vpop.f32.mrf.mxu0  ;;  %41235 = vmatpush3.msra.mxu0 %v16354_v51  ;;  %41218 = vmatmul.mubr.msk.f32.vlgmr.msra.gmra.mxu1 %vm179_vm2, %v44059_v1 }
 0x601   : > { %v16294_v42 = vmul.f32 0.5, %v41030_v3  ;;  %41236 = vmatprep.subr.mxu0 %v16353_v9  ;;  %41231 = vmatprep.mubr.msk.f32.mxu1 %vm179_vm2, %v44118_v43 }
 0x602   : > { %v16351_v2 = vadd.f32 %v46168_v22, %v16287_v24  ;;  %v15273_v35 = vpop.f32.mrf.mxu0  ;;  %41227 = vmatprep.subr.mxu1 %v16352_v61  ;;  %41237 = vmatpush3.msra.mxu0 %v16353_v9 }
 0x603   : > { %v16358_v15 = vadd.f32 %v43128_v14, %v16294_v42  ;;  %v41023_v34 = vpop.f32.mrf.mxu1  ;;  %v16293_v21 = vmul.f32 0.5, %v15273_v35  ;;  %41228 = vmatpush3.msra.mxu1 %v16352_v61  ;;  %41239 = vmatmul.mubr.msk.f32.vlgmr.msra.gmra.mxu0 %vm179_vm2, %v44078_v6 }
 0x604   : > { %v16292_v27 = vmul.f32 0.5, %v41023_v34  ;;  %41229 = vmatprep.subr.mxu1 %v16351_v2  ;;  %41252 = vmatprep.mubr.msk.f32.mxu0 %vm179_vm2, %v44146_v30 }
 0x605   : > { %v16357_v1 = vadd.f32 %v46168_v22, %v16293_v21  ;;  %v15198_v43 = vpop.f32.mrf.mxu1  ;;  %41248 = vmatprep.subr.mxu0 %v16358_v15  ;;  %41230 = vmatpush3.msra.mxu1 %v16351_v2 }
 0x606   : > { %v16356_v60 = vadd.f32 %v43128_v14, %v16292_v27  ;;  %v16291_v5 = vmul.f32 0.5, %v15198_v43  ;;  %v41044_v19 = vpop.f32.mrf.mxu0  ;;  %41249 = vmatpush3.msra.mxu0 %v16358_v15  ;;  %41232 = vmatmul.mubr.msk.f32.vlgmr.msra.gmra.mxu1 %vm179_vm2, %v44093_v37 }
 0x607   : > { %v16298_v11 = vmul.f32 0.5, %v41044_v19  ;;  %41250 = vmatprep.subr.mxu0 %v16357_v1  ;;  %41245 = vmatprep.mubr.msk.f32.mxu1 %vm179_vm2, %v44156_v29 }
 0x608   : > { %v16355_v6 = vadd.f32 %v46168_v22, %v16291_v5  ;;  %v15423_v30 = vpop.f32.mrf.mxu0  ;;  %41241 = vmatprep.subr.mxu1 %v16356_v60  ;;  %41251 = vmatpush3.msra.mxu0 %v16357_v1 }
 0x609   : > { %v16362_v47 = vadd.f32 %v43128_v14, %v16298_v11  ;;  %v41037_v58 = vpop.f32.mrf.mxu1  ;;  %v16297_v8 = vmul.f32 0.5, %v15423_v30  ;;  %41242 = vmatpush3.msra.mxu1 %v16356_v60  ;;  %41253 = vmatmul.mubr.msk.f32.vlgmr.msra.gmra.mxu0 %vm179_vm2, %v44124_v17 }
 0x60a   : > { %v16296_v45 = vmul.f32 0.5, %v41037_v58  ;;  %41243 = vmatprep.subr.mxu1 %v16355_v6  ;;  %41266 = vmatprep.mubr.msk.f32.mxu0 %vm179_vm2, %v44183_v12 }
 0x60b   : > { %v16361_v37 = vadd.f32 %v46168_v22, %v16297_v8  ;;  %v15348_v29 = vpop.f32.mrf.mxu1  ;;  %41262 = vmatprep.subr.mxu0 %v16362_v47  ;;  %41244 = vmatpush3.msra.mxu1 %v16355_v6 }
 0x60c   : > { %v16360_v18 = vadd.f32 %v43128_v14, %v16296_v45  ;;  %v16295_v54 = vmul.f32 0.5, %v15348_v29  ;;  %v41058_v48 = vpop.f32.mrf.mxu0  ;;  %41263 = vmatpush3.msra.mxu0 %v16362_v47  ;;  %41246 = vmatmul.mubr.msk.f32.vlgmr.msra.gmra.mxu1 %vm179_vm2, %v44136_v62 }
 0x60d   : > { %v16302_v50 = vmul.f32 0.5, %v41058_v48  ;;  %41264 = vmatprep.subr.mxu0 %v16361_v37  ;;  %41259 = vmatprep.mubr.msk.f32.mxu1 %vm179_vm2, %v44191_v16 }
 0x60e   : > { %v16359_v17 = vadd.f32 %v46168_v22, %v16295_v54  ;;  %v15573_v12 = vpop.f32.mrf.mxu0  ;;  %41255 = vmatprep.subr.mxu1 %v16360_v18  ;;  %41265 = vmatpush3.msra.mxu0 %v16361_v37 }
 0x60f   : > { %v16366_v26 = vadd.f32 %v43128_v14, %v16302_v50  ;;  %v41051_v56 = vpop.f32.mrf.mxu1  ;;  %v16301_v32 = vmul.f32 0.5, %v15573_v12  ;;  %41256 = vmatpush3.msra.mxu1 %v16360_v18  ;;  %41267 = vmatmul.mubr.msk.f32.vlgmr.msra.gmra.mxu0 %vm179_vm2, %v44159_v39 }
 0x610   : > { %v16300_v20 = vmul.f32 0.5, %v41051_v56  ;;  %41257 = vmatprep.subr.mxu1 %v16359_v17  ;;  %41280 = vmatprep.mubr.msk.f32.mxu0 %vm179_vm2, %v44211_v33 }
 0x611   : > { %v16365_v62 = vadd.f32 %v46168_v22, %v16301_v32  ;;  %v15498_v16 = vpop.f32.mrf.mxu1  ;;  %41276 = vmatprep.subr.mxu0 %v16366_v26  ;;  %41258 = vmatpush3.msra.mxu1 %v16359_v17  ;;  %v46326_v32 = vld [vmem:[#allocation17_spill] sm:$0xff] }
 0x612   : > { %v16364_v51 = vadd.f32 %v43128_v14, %v16300_v20  ;;  %v16299_v28 = vmul.f32 0.5, %v15498_v16  ;;  %v41072_v0 = vpop.f32.mrf.mxu0  ;;  %41277 = vmatpush3.msra.mxu0 %v16366_v26  ;;  %41260 = vmatmul.mubr.msk.f32.vlgmr.msra.gmra.mxu1 %vm179_vm2, %v44176_v13  ;;  %v46327_v20 = vld [vmem:[#allocation18_spill] sm:$0xff] }
 0x613   : > { %v16306_v4 = vmul.f32 0.5, %v41072_v0  ;;  %41278 = vmatprep.subr.mxu0 %v16365_v62  ;;  %41273 = vmatprep.mubr.msk.f32.mxu1 %vm179_vm2, %v44220_v41 }
 0x614   : > { %v16363_v39 = vadd.f32 %v46168_v22, %v16299_v28  ;;  %v15723_v33 = vpop.f32.mrf.mxu0  ;;  %41269 = vmatprep.subr.mxu1 %v16364_v51  ;;  %41279 = vmatpush3.msra.mxu0 %v16365_v62  ;;  %v46329_v62 = vld [vmem:[#allocation26_spill] sm:$0xff] }
 0x615   : > { %v16370_v9 = vadd.f32 %v43128_v14, %v16306_v4  ;;  %v41065_v40 = vpop.f32.mrf.mxu1  ;;  %v16305_v61 = vmul.f32 0.5, %v15723_v33  ;;  %41270 = vmatpush3.msra.mxu1 %v16364_v51  ;;  %41281 = vmatmul.mubr.msk.f32.vlgmr.msra.gmra.mxu0 %vm179_vm2, %v44197_v44 }
 0x616   : > { %v16304_v24 = vmul.f32 0.5, %v41065_v40  ;;  %41271 = vmatprep.subr.mxu1 %v16363_v39  ;;  %41294 = vmatprep.mubr.msk.f32.mxu0 %vm179_vm2, %v44239_v53 }
 0x617   : > { %v16369_v13 = vadd.f32 %v46168_v22, %v16305_v61  ;;  %v15648_v41 = vpop.f32.mrf.mxu1  ;;  %41290 = vmatprep.subr.mxu0 %v16370_v9  ;;  %41272 = vmatpush3.msra.mxu1 %v16363_v39 }
 0x618   : > { %v16368_v3 = vadd.f32 %v43128_v14, %v16304_v24  ;;  %v16303_v42 = vmul.f32 0.5, %v15648_v41  ;;  %v41086_v2 = vpop.f32.mrf.mxu0  ;;  %41291 = vmatpush3.msra.mxu0 %v16370_v9  ;;  %41274 = vmatmul.mubr.msk.f32.vlgmr.msra.gmra.mxu1 %vm179_vm2, %v44206_v7 }
 0x619   : > { %v16310_v35 = vmul.f32 0.5, %v41086_v2  ;;  %41292 = vmatprep.subr.mxu0 %v16369_v13  ;;  %41287 = vmatprep.mubr.msk.f32.mxu1 %vm179_vm2, %v46278_v63 }
 0x61a   : > { %v16367_v44 = vadd.f32 %v46168_v22, %v16303_v42  ;;  %v15873_v53 = vpop.f32.mrf.mxu0  ;;  %41283 = vmatprep.subr.mxu1 %v16368_v3  ;;  %41293 = vmatpush3.msra.mxu0 %v16369_v13 }
 0x61b   : > { %v16374_v15 = vadd.f32 %v43128_v14, %v16310_v35  ;;  %v41079_v34 = vpop.f32.mrf.mxu1  ;;  %v16309_v21 = vmul.f32 0.5, %v15873_v53  ;;  %41284 = vmatpush3.msra.mxu1 %v16368_v3  ;;  %41295 = vmatmul.mubr.msk.f32.vlgmr.msra.gmra.mxu0 %vm179_vm2, %v46263_v52 }
 0x61c   : > { %v16308_v27 = vmul.f32 0.5, %v41079_v34  ;;  %41285 = vmatprep.subr.mxu1 %v16367_v44  ;;  %41308 = vmatprep.mubr.msk.f32.mxu0 %vm179_vm2, %v46264_v23 }
 0x61d   : > { %v16373_v7 = vadd.f32 %v46168_v22, %v16309_v21  ;;  %v15798_v63 = vpop.f32.mrf.mxu1  ;;  %41304 = vmatprep.subr.mxu0 %v16374_v15  ;;  %41286 = vmatpush3.msra.mxu1 %v16367_v44 }
 0x61e   : > { %v16372_v1 = vadd.f32 %v43128_v14, %v16308_v27  ;;  %v16307_v43 = vmul.f32 0.5, %v15798_v63  ;;  %v41100_v60 = vpop.f32.mrf.mxu0  ;;  %41305 = vmatpush3.msra.mxu0 %v16374_v15  ;;  %41288 = vmatmul.mubr.msk.f32.vlgmr.msra.gmra.mxu1 %vm179_vm2, %v46249_v59 }
 0x61f   : > { %v16314_v5 = vmul.f32 0.5, %v41100_v60  ;;  %41306 = vmatprep.subr.mxu0 %v16373_v7  ;;  %41301 = vmatprep.mubr.msk.f32.mxu1 %vm179_vm2, %v46250_v31 }
 0x620   : > { %v16371_v52 = vadd.f32 %v46168_v22, %v16307_v43  ;;  %v16023_v23 = vpop.f32.mrf.mxu0  ;;  %41297 = vmatprep.subr.mxu1 %v16372_v1  ;;  %41307 = vmatpush3.msra.mxu0 %v16373_v7 }
 0x621   : > { %v16378_v19 = vadd.f32 %v43128_v14, %v16314_v5  ;;  %v41093_v11 = vpop.f32.mrf.mxu1  ;;  %v16313_v6 = vmul.f32 0.5, %v16023_v23  ;;  %41298 = vmatpush3.msra.mxu1 %v16372_v1  ;;  %41309 = vmatmul.mubr.msk.f32.vlgmr.msra.gmra.mxu0 %vm179_vm2, %v44252_v10 }
 0x622   : > { %v16312_v30 = vmul.f32 0.5, %v41093_v11  ;;  %41299 = vmatprep.subr.mxu1 %v16371_v52  ;;  %41322 = vmatprep.mubr.msk.f32.mxu0 %vm179_vm2, %v46279_v25 }
 0x623   : > { %v16377_v59 = vadd.f32 %v46168_v22, %v16313_v6  ;;  %v15948_v31 = vpop.f32.mrf.mxu1  ;;  %41318 = vmatprep.subr.mxu0 %v16378_v19  ;;  %41300 = vmatpush3.msra.mxu1 %v16371_v52 }
 0x624   : > { %v16376_v47 = vadd.f32 %v43128_v14, %v16312_v30  ;;  %v16311_v58 = vmul.f32 0.5, %v15948_v31  ;;  %41319 = vmatpush3.msra.mxu0 %v16378_v19  ;;  %41302 = vmatmul.mubr.msk.f32.vlgmr.msra.gmra.mxu1 %vm179_vm2, %v44260_v36 }
 0x625   : > { %v41114_v8 = vpop.f32.mrf.mxu0  ;;  %41320 = vmatprep.subr.mxu0 %v16377_v59  ;;  %41315 = vmatprep.mubr.msk.f32.mxu1 %vm179_vm2, %v46265_v57 }
 0x626   : > { %v16375_v10 = vadd.f32 %v46168_v22, %v16311_v58  ;;  %v16318_v25 = vmul.f32 0.5, %v41114_v8  ;;  %41311 = vmatprep.subr.mxu1 %v16376_v47  ;;  %41321 = vmatpush3.msra.mxu0 %v16377_v59 }
 0x627   : > { %v41107_v45 = vpop.f32.mrf.mxu1  ;;  %v16173_v37 = vpop.f32.mrf.mxu0  ;;  %41312 = vmatpush3.msra.mxu1 %v16376_v47  ;;  %41323 = vmatmul.mubr.msk.f32.vlgmr.msra.gmra.mxu0 %vm179_vm2, %v44280_v38 }
 0x628   : > { %v16382_v29 = vadd.f32 %v43128_v14, %v16318_v25  ;;  %v16316_v18 = vmul.f32 0.5, %v41107_v45  ;;  %v16317_v36 = vmul.f32 0.5, %v16173_v37  ;;  %41313 = vmatprep.subr.mxu1 %v16375_v10  ;;  %41336 = vmatprep.mubr.msk.f32.mxu0 %vm179_vm2, %v44322_v49 }
 0x629   : > { %v16098_v57 = vpop.f32.mrf.mxu1  ;;  %41314 = vmatpush3.msra.mxu1 %v16375_v10 }
 0x62a   : > { %v16380_v54 = vadd.f32 %v43128_v14, %v16316_v18  ;;  %v16381_v48 = vadd.f32 %v46168_v22, %v16317_v36  ;;  %v16315_v50 = vmul.f32 0.5, %v16098_v57  ;;  %41332 = vmatprep.subr.mxu0 %v16382_v29  ;;  %41316 = vmatmul.mubr.msk.f32.vlgmr.msra.gmra.mxu1 %vm179_vm2, %v44288_v46 }
 0x62b   : > { %v41121_v38 = vpop.f32.mrf.mxu1  ;;  %41333 = vmatpush3.msra.mxu0 %v16382_v29  ;;  %41329 = vmatprep.mubr.msk.f32.mxu1 %vm179_vm2, %v44330_v55  ;;  %v46328_v55 = vld [vmem:[#allocation25_spill] sm:$0xff] }
 0x62c   : > { %v16379_v17 = vadd.f32 %v46168_v22, %v16315_v50  ;;  %v16320_v12 = vmul.f32 0.5, %v41121_v38  ;;  %41325 = vmatprep.subr.mxu1 %v16380_v54  ;;  %41334 = vmatprep.subr.mxu0 %v16381_v48 }
 0x62d   : > { %v16248_v49 = vpop.f32.mrf.mxu1  ;;  %41326 = vmatpush3.msra.mxu1 %v16380_v54  ;;  %41335 = vmatpush3.msra.mxu0 %v16381_v48 }
 0x62e   : > { %v16384_v26 = vadd.f32 %v43128_v14, %v16320_v12  ;;  %v16319_v56 = vmul.f32 0.5, %v16248_v49  ;;  %41327 = vmatprep.subr.mxu1 %v16379_v17  ;;  %41337 = vmatmul.mubr.msk.f32.vlgmr.msra.gmra.mxu0 %vm179_vm2, %v46326_v32 }
 0x62f   : > { %41328 = vmatpush3.msra.mxu1 %v16379_v17 }
 0x630   : > { %v16383_v46 = vadd.f32 %v46168_v22, %v16319_v56  ;;  %41330 = vmatmul.mubr.msk.f32.vlgmr.msra.gmra.mxu1 %vm179_vm2, %v46327_v20  ;;  %41339 = vmatprep.subr.mxu1 %v16384_v26 }
 0x631   : > { %41340 = vmatpush3.msra.mxu1 %v16384_v26  ;;  %41343 = vmatprep.mubr.msk.f32.mxu1 %vm179_vm2, %v46328_v55 }
 0x632   : > { %41341 = vmatprep.subr.mxu1 %v16383_v46 }
 0x633   : > { %41342 = vmatpush3.msra.mxu1 %v16383_v46 }
 0x634   : > { %41344 = vmatmul.mubr.msk.f32.vlgmr.msra.gmra.mxu1 %vm179_vm2, %v46329_v62 }
 0x669   : > { %v41128_v16 = vpop.f32.mrf.mxu0 }
 0x66a   : > { %v18786_v51 = vadd.f32 %v41128_v16, %v43128_v14 }
 0x66b   : > { %v16451_v28 = vpop.f32.mrf.mxu0 }
 0x66c   : > { %v18785_v0 = vadd.f32 %v46168_v22, %v16451_v28  ;;  %41346 = vmatprep.subr.mxu0 %v18786_v51 }
 0x66d   : > { %41347 = vmatpush3.msra.mxu0 %v18786_v51 }
 0x66e   : > { %41348 = vmatprep.subr.mxu0 %v18785_v0  ;;  %41350 = vmatprep.mubr.msk.f32.mxu0 %vm179_vm2, %v18785_v0 }
 0x66f   : > { %41349 = vmatpush3.msra.mxu0 %v18785_v0 }
 0x670   : > { %41351 = vmatmul.mubr.msk.f32.vlgmr.msra.gmra.mxu0 %vm179_vm2, %v18786_v51 }
 0x672   : > { %v41135_v4 = vpop.f32.mrf.mxu1 }
 0x673   : > { %v18788_v39 = vadd.f32 %v41135_v4, %v43128_v14 }
 0x674   : > { %v16526_v33 = vpop.f32.mrf.mxu1 }
 0x675   : > { %v18787_v9 = vadd.f32 %v46168_v22, %v16526_v33  ;;  %41353 = vmatprep.subr.mxu1 %v18788_v39 }
 0x676   : > { %41354 = vmatpush3.msra.mxu1 %v18788_v39 }
 0x677   : > { %41355 = vmatprep.subr.mxu1 %v18787_v9  ;;  %41357 = vmatprep.mubr.msk.f32.mxu1 %vm179_vm2, %v18787_v9 }
 0x678   : > { %41356 = vmatpush3.msra.mxu1 %v18787_v9 }
 0x679   : > { %41358 = vmatmul.mubr.msk.f32.vlgmr.msra.gmra.mxu1 %vm179_vm2, %v18788_v39 }
 0x67f   : > { %v41142_v40 = vpop.f32.mrf.mxu0 }
 0x680   : > { %v18790_v61 = vadd.f32 %v41142_v40, %v43128_v14 }
 0x681   : > { %v16601_v24 = vpop.f32.mrf.mxu0 }
 0x682   : > { %v18789_v13 = vadd.f32 %v46168_v22, %v16601_v24  ;;  %41360 = vmatprep.subr.mxu0 %v18790_v61 }
 0x683   : > { %41361 = vmatpush3.msra.mxu0 %v18790_v61 }
 0x684   : > { %41362 = vmatprep.subr.mxu0 %v18789_v13  ;;  %41364 = vmatprep.mubr.msk.f32.mxu0 %vm179_vm2, %v18789_v13 }
 0x685   : > { %41363 = vmatpush3.msra.mxu0 %v18789_v13 }
 0x686   : > { %41365 = vmatmul.mubr.msk.f32.vlgmr.msra.gmra.mxu0 %vm179_vm2, %v18790_v61 }
 0x68a   : > { %v41149_v41 = vpop.f32.mrf.mxu1 }
 0x68b   : > { %v18792_v3 = vadd.f32 %v41149_v41, %v43128_v14 }
 0x68c   : > { %v16676_v42 = vpop.f32.mrf.mxu1 }
 0x68d   : > { %v18791_v2 = vadd.f32 %v46168_v22, %v16676_v42  ;;  %41367 = vmatprep.subr.mxu1 %v18792_v3 }
 0x68e   : > { %41368 = vmatpush3.msra.mxu1 %v18792_v3 }
 0x68f   : > { %41369 = vmatprep.subr.mxu1 %v18791_v2  ;;  %41371 = vmatprep.mubr.msk.f32.mxu1 %vm179_vm2, %v18791_v2 }
 0x690   : > { %41370 = vmatpush3.msra.mxu1 %v18791_v2 }
 0x691   : > { %41372 = vmatmul.mubr.msk.f32.vlgmr.msra.gmra.mxu1 %vm179_vm2, %v18792_v3 }
 0x69a   : > { %v41156_v35 = vpop.f32.mrf.mxu0 }
 0x69b   : > { %v18794_v44 = vadd.f32 %v41156_v35, %v43128_v14 }
 0x69c   : > { %v16751_v53 = vpop.f32.mrf.mxu0 }
 0x69d   : > { %v18793_v15 = vadd.f32 %v46168_v22, %v16751_v53  ;;  %41374 = vmatprep.subr.mxu0 %v18794_v44 }
 0x69e   : > { %41375 = vmatpush3.msra.mxu0 %v18794_v44 }
 0x69f   : > { %41376 = vmatprep.subr.mxu0 %v18793_v15  ;;  %41378 = vmatprep.mubr.msk.f32.mxu0 %vm179_vm2, %v18793_v15 }
 0x6a0   : > { %41377 = vmatpush3.msra.mxu0 %v18793_v15 }
 0x6a1   : > { %41379 = vmatmul.mubr.msk.f32.vlgmr.msra.gmra.mxu0 %vm179_vm2, %v18794_v44 }
 0x6a5   : > { %v41163_v34 = vpop.f32.mrf.mxu1 }
 0x6a6   : > { %v18796_v21 = vadd.f32 %v41163_v34, %v43128_v14 }
 0x6a7   : > { %v16826_v27 = vpop.f32.mrf.mxu1  ;;  %v41170_v7 = vpop.f32.mrf.mxu0 }
 0x6a8   : > { %v18795_v63 = vadd.f32 %v46168_v22, %v16826_v27  ;;  %41381 = vmatprep.subr.mxu1 %v18796_v21  ;;  %v18798_v1 = vadd.f32 %v41170_v7, %v43128_v14 }
 0x6a9   : > { %41382 = vmatpush3.msra.mxu1 %v18796_v21  ;;  %v16901_v43 = vpop.f32.mrf.mxu0 }
 0x6aa   : > { %41383 = vmatprep.subr.mxu1 %v18795_v63  ;;  %41385 = vmatprep.mubr.msk.f32.mxu1 %vm179_vm2, %v18795_v63  ;;  %v18797_v60 = vadd.f32 %v46168_v22, %v16901_v43 }
 0x6ab   : > { %41384 = vmatpush3.msra.mxu1 %v18795_v63  ;;  %41388 = vmatprep.subr.mxu0 %v18798_v1  ;;  %v41184_v5 = vpop.f32.mrf.mxu0 }
 0x6ac   : > { %41386 = vmatmul.mubr.msk.f32.vlgmr.msra.gmra.mxu1 %vm179_vm2, %v18796_v21  ;;  %v18802_v52 = vadd.f32 %v41184_v5, %v43128_v14  ;;  %41389 = vmatpush3.msra.mxu0 %v18798_v1 }
 0x6ad   : > { %41390 = vmatprep.subr.mxu0 %v18797_v60  ;;  %41392 = vmatprep.mubr.msk.f32.mxu0 %vm179_vm2, %v18797_v60  ;;  %v17051_v23 = vpop.f32.mrf.mxu0 }
 0x6ae   : > { %v41177_v19 = vpop.f32.mrf.mxu1  ;;  %v18801_v11 = vadd.f32 %v46168_v22, %v17051_v23  ;;  %41391 = vmatpush3.msra.mxu0 %v18797_v60 }
 0x6af   : > { %v18800_v6 = vadd.f32 %v41177_v19, %v43128_v14  ;;  %41393 = vmatmul.mubr.msk.f32.vlgmr.msra.gmra.mxu0 %vm179_vm2, %v18798_v1  ;;  %41402 = vmatprep.subr.mxu0 %v18802_v52 }
 0x6b0   : > { %v16976_v30 = vpop.f32.mrf.mxu1  ;;  %41403 = vmatpush3.msra.mxu0 %v18802_v52  ;;  %41406 = vmatprep.mubr.msk.f32.mxu0 %vm179_vm2, %v18801_v11 }
 0x6b1   : > { %v18799_v59 = vadd.f32 %v46168_v22, %v16976_v30  ;;  %v41198_v31 = vpop.f32.mrf.mxu0  ;;  %41395 = vmatprep.subr.mxu1 %v18800_v6  ;;  %41404 = vmatprep.subr.mxu0 %v18801_v11 }
 0x6b2   : > { %v18806_v47 = vadd.f32 %v41198_v31, %v43128_v14  ;;  %41396 = vmatpush3.msra.mxu1 %v18800_v6  ;;  %41405 = vmatpush3.msra.mxu0 %v18801_v11 }
 0x6b3   : > { %v17201_v58 = vpop.f32.mrf.mxu0  ;;  %41397 = vmatprep.subr.mxu1 %v18799_v59  ;;  %41399 = vmatprep.mubr.msk.f32.mxu1 %vm179_vm2, %v18799_v59 }
 0x6b4   : > { %v41191_v8 = vpop.f32.mrf.mxu1  ;;  %v18805_v10 = vadd.f32 %v46168_v22, %v17201_v58  ;;  %41407 = vmatmul.mubr.msk.f32.vlgmr.msra.gmra.mxu0 %vm179_vm2, %v18802_v52  ;;  %41416 = vmatprep.subr.mxu0 %v18806_v47 }
 0x6b5   : > { %v18804_v25 = vadd.f32 %v41191_v8, %v43128_v14  ;;  %41398 = vmatpush3.msra.mxu1 %v18799_v59  ;;  %41417 = vmatpush3.msra.mxu0 %v18806_v47 }
 0x6b6   : > { %v17126_v45 = vpop.f32.mrf.mxu1  ;;  %41400 = vmatmul.mubr.msk.f32.vlgmr.msra.gmra.mxu1 %vm179_vm2, %v18800_v6  ;;  %41418 = vmatprep.subr.mxu0 %v18805_v10 }
 0x6b7   : > { %v18803_v37 = vadd.f32 %v46168_v22, %v17126_v45  ;;  %v41212_v29 = vpop.f32.mrf.mxu0  ;;  %41409 = vmatprep.subr.mxu1 %v18804_v25  ;;  %41420 = vmatprep.mubr.msk.f32.mxu0 %vm179_vm2, %v18805_v10 }
 0x6b8   : > { %v18810_v18 = vadd.f32 %v41212_v29, %v43128_v14  ;;  %41410 = vmatpush3.msra.mxu1 %v18804_v25  ;;  %41419 = vmatpush3.msra.mxu0 %v18805_v10 }
 0x6b9   : > { %v17351_v36 = vpop.f32.mrf.mxu0  ;;  %41411 = vmatprep.subr.mxu1 %v18803_v37  ;;  %41413 = vmatprep.mubr.msk.f32.mxu1 %vm179_vm2, %v18803_v37 }
 0x6ba   : > { %v41205_v57 = vpop.f32.mrf.mxu1  ;;  %v18809_v54 = vadd.f32 %v46168_v22, %v17351_v36  ;;  %41421 = vmatmul.mubr.msk.f32.vlgmr.msra.gmra.mxu0 %vm179_vm2, %v18806_v47  ;;  %41430 = vmatprep.subr.mxu0 %v18810_v18 }
 0x6bb   : > { %v18808_v48 = vadd.f32 %v41205_v57, %v43128_v14  ;;  %41412 = vmatpush3.msra.mxu1 %v18803_v37  ;;  %41431 = vmatpush3.msra.mxu0 %v18810_v18 }
 0x6bc   : > { %v17276_v50 = vpop.f32.mrf.mxu1  ;;  %41414 = vmatmul.mubr.msk.f32.vlgmr.msra.gmra.mxu1 %vm179_vm2, %v18804_v25  ;;  %41432 = vmatprep.subr.mxu0 %v18809_v54 }
 0x6bd   : > { %v18807_v38 = vadd.f32 %v46168_v22, %v17276_v50  ;;  %v41226_v17 = vpop.f32.mrf.mxu0  ;;  %41423 = vmatprep.subr.mxu1 %v18808_v48  ;;  %41434 = vmatprep.mubr.msk.f32.mxu0 %vm179_vm2, %v18809_v54 }
 0x6be   : > { %v18814_v12 = vadd.f32 %v41226_v17, %v43128_v14  ;;  %41424 = vmatpush3.msra.mxu1 %v18808_v48  ;;  %41433 = vmatpush3.msra.mxu0 %v18809_v54 }
 0x6bf   : > { %v17501_v49 = vpop.f32.mrf.mxu0  ;;  %41425 = vmatprep.subr.mxu1 %v18807_v38  ;;  %41427 = vmatprep.mubr.msk.f32.mxu1 %vm179_vm2, %v18807_v38 }
 0x6c0   : > { %v41219_v26 = vpop.f32.mrf.mxu1  ;;  %v18813_v56 = vadd.f32 %v46168_v22, %v17501_v49  ;;  %41435 = vmatmul.mubr.msk.f32.vlgmr.msra.gmra.mxu0 %vm179_vm2, %v18810_v18  ;;  %41444 = vmatprep.subr.mxu0 %v18814_v12 }
 0x6c1   : > { %v18812_v32 = vadd.f32 %v41219_v26, %v43128_v14  ;;  %41426 = vmatpush3.msra.mxu1 %v18807_v38  ;;  %41445 = vmatpush3.msra.mxu0 %v18814_v12 }
 0x6c2   : > { %v17426_v46 = vpop.f32.mrf.mxu1  ;;  %41428 = vmatmul.mubr.msk.f32.vlgmr.msra.gmra.mxu1 %vm179_vm2, %v18808_v48  ;;  %41446 = vmatprep.subr.mxu0 %v18813_v56 }
 0x6c3   : > { %v18811_v20 = vadd.f32 %v46168_v22, %v17426_v46  ;;  %v41240_v55 = vpop.f32.mrf.mxu0  ;;  %41437 = vmatprep.subr.mxu1 %v18812_v32  ;;  %41448 = vmatprep.mubr.msk.f32.mxu0 %vm179_vm2, %v18813_v56 }
 0x6c4   : > { %v18818_v62 = vadd.f32 %v41240_v55, %v43128_v14  ;;  %41438 = vmatpush3.msra.mxu1 %v18812_v32  ;;  %41447 = vmatpush3.msra.mxu0 %v18813_v56 }
 0x6c5   : > { %v17651_v16 = vpop.f32.mrf.mxu0  ;;  %41439 = vmatprep.subr.mxu1 %v18811_v20  ;;  %41441 = vmatprep.mubr.msk.f32.mxu1 %vm179_vm2, %v18811_v20 }
 0x6c6   : > { %v41233_v51 = vpop.f32.mrf.mxu1  ;;  %v18817_v28 = vadd.f32 %v46168_v22, %v17651_v16  ;;  %41449 = vmatmul.mubr.msk.f32.vlgmr.msra.gmra.mxu0 %vm179_vm2, %v18814_v12  ;;  %41458 = vmatprep.subr.mxu0 %v18818_v62 }
 0x6c7   : > { %v18816_v0 = vadd.f32 %v41233_v51, %v43128_v14  ;;  %41440 = vmatpush3.msra.mxu1 %v18811_v20  ;;  %41459 = vmatpush3.msra.mxu0 %v18818_v62 }
 0x6c8   : > { %v17576_v4 = vpop.f32.mrf.mxu1  ;;  %41442 = vmatmul.mubr.msk.f32.vlgmr.msra.gmra.mxu1 %vm179_vm2, %v18812_v32  ;;  %41460 = vmatprep.subr.mxu0 %v18817_v28 }
 0x6c9   : > { %v18815_v39 = vadd.f32 %v46168_v22, %v17576_v4  ;;  %v41254_v33 = vpop.f32.mrf.mxu0  ;;  %41451 = vmatprep.subr.mxu1 %v18816_v0  ;;  %41462 = vmatprep.mubr.msk.f32.mxu0 %vm179_vm2, %v18817_v28 }
 0x6ca   : > { %v18822_v9 = vadd.f32 %v41254_v33, %v43128_v14  ;;  %41452 = vmatpush3.msra.mxu1 %v18816_v0  ;;  %41461 = vmatpush3.msra.mxu0 %v18817_v28 }
 0x6cb   : > { %v17801_v40 = vpop.f32.mrf.mxu0  ;;  %41453 = vmatprep.subr.mxu1 %v18815_v39  ;;  %41455 = vmatprep.mubr.msk.f32.mxu1 %vm179_vm2, %v18815_v39 }
 0x6cc   : > { %v41247_v61 = vpop.f32.mrf.mxu1  ;;  %v18821_v24 = vadd.f32 %v46168_v22, %v17801_v40  ;;  %41463 = vmatmul.mubr.msk.f32.vlgmr.msra.gmra.mxu0 %vm179_vm2, %v18818_v62  ;;  %41472 = vmatprep.subr.mxu0 %v18822_v9 }
 0x6cd   : > { %v18820_v13 = vadd.f32 %v41247_v61, %v43128_v14  ;;  %41454 = vmatpush3.msra.mxu1 %v18815_v39  ;;  %41473 = vmatpush3.msra.mxu0 %v18822_v9 }
 0x6ce   : > { %v17726_v41 = vpop.f32.mrf.mxu1  ;;  %41456 = vmatmul.mubr.msk.f32.vlgmr.msra.gmra.mxu1 %vm179_vm2, %v18816_v0  ;;  %41474 = vmatprep.subr.mxu0 %v18821_v24 }
 0x6cf   : > { %v18819_v3 = vadd.f32 %v46168_v22, %v17726_v41  ;;  %v41268_v42 = vpop.f32.mrf.mxu0  ;;  %41465 = vmatprep.subr.mxu1 %v18820_v13  ;;  %41476 = vmatprep.mubr.msk.f32.mxu0 %vm179_vm2, %v18821_v24 }
 0x6d0   : > { %v18826_v2 = vadd.f32 %v41268_v42, %v43128_v14  ;;  %41466 = vmatpush3.msra.mxu1 %v18820_v13  ;;  %41475 = vmatpush3.msra.mxu0 %v18821_v24 }
 0x6d1   : > { %v17951_v35 = vpop.f32.mrf.mxu0  ;;  %41467 = vmatprep.subr.mxu1 %v18819_v3  ;;  %41469 = vmatprep.mubr.msk.f32.mxu1 %vm179_vm2, %v18819_v3 }
 0x6d2   : > { %v41261_v44 = vpop.f32.mrf.mxu1  ;;  %v18825_v53 = vadd.f32 %v46168_v22, %v17951_v35  ;;  %41477 = vmatmul.mubr.msk.f32.vlgmr.msra.gmra.mxu0 %vm179_vm2, %v18822_v9  ;;  %41486 = vmatprep.subr.mxu0 %v18826_v2 }
 0x6d3   : > { %v18824_v15 = vadd.f32 %v41261_v44, %v43128_v14  ;;  %41468 = vmatpush3.msra.mxu1 %v18819_v3  ;;  %41487 = vmatpush3.msra.mxu0 %v18826_v2 }
 0x6d4   : > { %v17876_v34 = vpop.f32.mrf.mxu1  ;;  %41470 = vmatmul.mubr.msk.f32.vlgmr.msra.gmra.mxu1 %vm179_vm2, %v18820_v13  ;;  %41488 = vmatprep.subr.mxu0 %v18825_v53 }
 0x6d5   : > { %v18823_v21 = vadd.f32 %v46168_v22, %v17876_v34  ;;  %v41282_v27 = vpop.f32.mrf.mxu0  ;;  %41479 = vmatprep.subr.mxu1 %v18824_v15  ;;  %41490 = vmatprep.mubr.msk.f32.mxu0 %vm179_vm2, %v18825_v53 }
 0x6d6   : > { %v18830_v7 = vadd.f32 %v41282_v27, %v43128_v14  ;;  %41480 = vmatpush3.msra.mxu1 %v18824_v15  ;;  %41489 = vmatpush3.msra.mxu0 %v18825_v53 }
 0x6d7   : > { %v18101_v63 = vpop.f32.mrf.mxu0  ;;  %41481 = vmatprep.subr.mxu1 %v18823_v21  ;;  %41483 = vmatprep.mubr.msk.f32.mxu1 %vm179_vm2, %v18823_v21 }
 0x6d8   : > { %v41275_v1 = vpop.f32.mrf.mxu1  ;;  %v18829_v43 = vadd.f32 %v46168_v22, %v18101_v63  ;;  %41491 = vmatmul.mubr.msk.f32.vlgmr.msra.gmra.mxu0 %vm179_vm2, %v18826_v2  ;;  %41500 = vmatprep.subr.mxu0 %v18830_v7 }
 0x6d9   : > { %v18828_v60 = vadd.f32 %v41275_v1, %v43128_v14  ;;  %41482 = vmatpush3.msra.mxu1 %v18823_v21  ;;  %41501 = vmatpush3.msra.mxu0 %v18830_v7 }
 0x6da   : > { %v18026_v5 = vpop.f32.mrf.mxu1  ;;  %41484 = vmatmul.mubr.msk.f32.vlgmr.msra.gmra.mxu1 %vm179_vm2, %v18824_v15  ;;  %41502 = vmatprep.subr.mxu0 %v18829_v43 }
 0x6db   : > { %v18827_v52 = vadd.f32 %v46168_v22, %v18026_v5  ;;  %v41296_v23 = vpop.f32.mrf.mxu0  ;;  %41493 = vmatprep.subr.mxu1 %v18828_v60  ;;  %41504 = vmatprep.mubr.msk.f32.mxu0 %vm179_vm2, %v18829_v43 }
 0x6dc   : > { %v18834_v19 = vadd.f32 %v41296_v23, %v43128_v14  ;;  %41494 = vmatpush3.msra.mxu1 %v18828_v60  ;;  %41503 = vmatpush3.msra.mxu0 %v18829_v43 }
 0x6dd   : > { %v18251_v11 = vpop.f32.mrf.mxu0  ;;  %41495 = vmatprep.subr.mxu1 %v18827_v52  ;;  %41497 = vmatprep.mubr.msk.f32.mxu1 %vm179_vm2, %v18827_v52 }
 0x6de   : > { %v41289_v6 = vpop.f32.mrf.mxu1  ;;  %v18833_v30 = vadd.f32 %v46168_v22, %v18251_v11  ;;  %41505 = vmatmul.mubr.msk.f32.vlgmr.msra.gmra.mxu0 %vm179_vm2, %v18830_v7  ;;  %41514 = vmatprep.subr.mxu0 %v18834_v19 }
 0x6df   : > { %v18832_v59 = vadd.f32 %v41289_v6, %v43128_v14  ;;  %41496 = vmatpush3.msra.mxu1 %v18827_v52  ;;  %41515 = vmatpush3.msra.mxu0 %v18834_v19 }
 0x6e0   : > { %v18176_v31 = vpop.f32.mrf.mxu1  ;;  %41498 = vmatmul.mubr.msk.f32.vlgmr.msra.gmra.mxu1 %vm179_vm2, %v18828_v60  ;;  %41516 = vmatprep.subr.mxu0 %v18833_v30 }
 0x6e1   : > { %v18831_v47 = vadd.f32 %v46168_v22, %v18176_v31  ;;  %v41310_v58 = vpop.f32.mrf.mxu0  ;;  %41507 = vmatprep.subr.mxu1 %v18832_v59  ;;  %41518 = vmatprep.mubr.msk.f32.mxu0 %vm179_vm2, %v18833_v30 }
 0x6e2   : > { %v18838_v8 = vadd.f32 %v41310_v58, %v43128_v14  ;;  %41508 = vmatpush3.msra.mxu1 %v18832_v59  ;;  %41517 = vmatpush3.msra.mxu0 %v18833_v30 }
 0x6e3   : > { %v18401_v10 = vpop.f32.mrf.mxu0  ;;  %41509 = vmatprep.subr.mxu1 %v18831_v47  ;;  %41511 = vmatprep.mubr.msk.f32.mxu1 %vm179_vm2, %v18831_v47 }
 0x6e4   : > { %v41303_v25 = vpop.f32.mrf.mxu1  ;;  %v18837_v45 = vadd.f32 %v46168_v22, %v18401_v10  ;;  %41519 = vmatmul.mubr.msk.f32.vlgmr.msra.gmra.mxu0 %vm179_vm2, %v18834_v19  ;;  %41528 = vmatprep.subr.mxu0 %v18838_v8 }
 0x6e5   : > { %v18836_v37 = vadd.f32 %v41303_v25, %v43128_v14  ;;  %41510 = vmatpush3.msra.mxu1 %v18831_v47  ;;  %41529 = vmatpush3.msra.mxu0 %v18838_v8 }
 0x6e6   : > { %v18326_v29 = vpop.f32.mrf.mxu1  ;;  %41512 = vmatmul.mubr.msk.f32.vlgmr.msra.gmra.mxu1 %vm179_vm2, %v18832_v59  ;;  %41530 = vmatprep.subr.mxu0 %v18837_v45 }
 0x6e7   : > { %v18835_v18 = vadd.f32 %v46168_v22, %v18326_v29  ;;  %v41324_v36 = vpop.f32.mrf.mxu0  ;;  %41521 = vmatprep.subr.mxu1 %v18836_v37  ;;  %41532 = vmatprep.mubr.msk.f32.mxu0 %vm179_vm2, %v18837_v45 }
 0x6e8   : > { %v18842_v57 = vadd.f32 %v41324_v36, %v43128_v14  ;;  %41522 = vmatpush3.msra.mxu1 %v18836_v37  ;;  %41531 = vmatpush3.msra.mxu0 %v18837_v45 }
 0x6e9   : > { %v18551_v54 = vpop.f32.mrf.mxu0  ;;  %41523 = vmatprep.subr.mxu1 %v18835_v18  ;;  %41525 = vmatprep.mubr.msk.f32.mxu1 %vm179_vm2, %v18835_v18 }
 0x6ea   : > { %v41317_v48 = vpop.f32.mrf.mxu1  ;;  %v18841_v50 = vadd.f32 %v46168_v22, %v18551_v54  ;;  %41533 = vmatmul.mubr.msk.f32.vlgmr.msra.gmra.mxu0 %vm179_vm2, %v18838_v8  ;;  %41542 = vmatprep.subr.mxu0 %v18842_v57 }
 0x6eb   : > { %v18840_v38 = vadd.f32 %v41317_v48, %v43128_v14  ;;  %41524 = vmatpush3.msra.mxu1 %v18835_v18  ;;  %41543 = vmatpush3.msra.mxu0 %v18842_v57 }
 0x6ec   : > { %v18476_v17 = vpop.f32.mrf.mxu1  ;;  %41526 = vmatmul.mubr.msk.f32.vlgmr.msra.gmra.mxu1 %vm179_vm2, %v18836_v37  ;;  %41544 = vmatprep.subr.mxu0 %v18841_v50 }
 0x6ed   : > { %v18839_v12 = vadd.f32 %v46168_v22, %v18476_v17  ;;  %41535 = vmatprep.subr.mxu1 %v18840_v38  ;;  %41546 = vmatprep.mubr.msk.f32.mxu0 %vm179_vm2, %v18841_v50 }
 0x6ee   : > { %v41338_v49 = vpop.f32.mrf.mxu0  ;;  %41536 = vmatpush3.msra.mxu1 %v18840_v38  ;;  %41545 = vmatpush3.msra.mxu0 %v18841_v50 }
 0x6ef   : > { %v18846_v26 = vadd.f32 %v41338_v49, %v43128_v14  ;;  %41537 = vmatprep.subr.mxu1 %v18839_v12  ;;  %41539 = vmatprep.mubr.msk.f32.mxu1 %vm179_vm2, %v18839_v12 }
 0x6f0   : > { %v41331_v56 = vpop.f32.mrf.mxu1  ;;  %v18701_v32 = vpop.f32.mrf.mxu0  ;;  %41547 = vmatmul.mubr.msk.f32.vlgmr.msra.gmra.mxu0 %vm179_vm2, %v18842_v57  ;;  %41538 = vmatpush3.msra.mxu1 %v18839_v12 }
 0x6f1   : > { %v18844_v46 = vadd.f32 %v41331_v56, %v43128_v14  ;;  %v18845_v20 = vadd.f32 %v46168_v22, %v18701_v32  ;;  %41556 = vmatprep.subr.mxu0 %v18846_v26  ;;  %41540 = vmatmul.mubr.msk.f32.vlgmr.msra.gmra.mxu1 %vm179_vm2, %v18840_v38 }
 0x6f2   : > { %v18626_v55 = vpop.f32.mrf.mxu1  ;;  %41557 = vmatpush3.msra.mxu0 %v18846_v26 }
 0x6f3   : > { %v18843_v62 = vadd.f32 %v46168_v22, %v18626_v55  ;;  %41549 = vmatprep.subr.mxu1 %v18844_v46  ;;  %41558 = vmatprep.subr.mxu0 %v18845_v20 }
 0x6f4   : > { %41560 = vmatprep.mubr.msk.f32.mxu0 %vm179_vm2, %v18845_v20  ;;  %v41345_v16 = vpop.f32.mrf.mxu1  ;;  %41550 = vmatpush3.msra.mxu1 %v18844_v46 }
 0x6f5   : > { %v18848_v51 = vadd.f32 %v41345_v16, %v43128_v14  ;;  %41559 = vmatpush3.msra.mxu0 %v18845_v20  ;;  %41551 = vmatprep.subr.mxu1 %v18843_v62 }
 0x6f6   : > { %41553 = vmatprep.mubr.msk.f32.mxu1 %vm179_vm2, %v18843_v62  ;;  %41561 = vmatmul.mubr.msk.f32.vlgmr.msra.gmra.mxu0 %vm179_vm2, %v18846_v26  ;;  %v18776_v28 = vpop.f32.mrf.mxu1 }
 0x6f7   : > { %v18847_v0 = vadd.f32 %v46168_v22, %v18776_v28  ;;  %41552 = vmatpush3.msra.mxu1 %v18843_v62 }
 0x6f8   : > { %41554 = vmatmul.mubr.msk.f32.vlgmr.msra.gmra.mxu1 %vm179_vm2, %v18844_v46  ;;  %41563 = vmatprep.subr.mxu1 %v18848_v51 }
 0x6f9   : > { %41564 = vmatpush3.msra.mxu1 %v18848_v51  ;;  %41567 = vmatprep.mubr.msk.f32.mxu1 %vm179_vm2, %v18847_v0 }
 0x6fa   : > { %41565 = vmatprep.subr.mxu1 %v18847_v0 }
 0x6fb   : > { %41566 = vmatpush3.msra.mxu1 %v18847_v0 }
 0x6fc   : > { %41568 = vmatmul.mubr.msk.f32.vlgmr.msra.gmra.mxu1 %vm179_vm2, %v18848_v51 }
 0x730   : > { %v41352_v14 = vpop.f32.mrf.mxu0 }
 0x731   : > { %41570 = vmatprep.subr.mxu0 %v41352_v14 }
 0x732   : > { %v18921_v4 = vpop.f32.mrf.mxu0  ;;  %41571 = vmatpush3.msra.mxu0 %v41352_v14 }
 0x733   : > { %41572 = vmatprep.subr.mxu0 %v18921_v4  ;;  %41574 = vmatprep.mubr.msk.f32.mxu0 %vm179_vm2, %v18921_v4 }
 0x734   : > { %41573 = vmatpush3.msra.mxu0 %v18921_v4 }
 0x735   : > { %41575 = vmatmul.mubr.msk.f32.vlgmr.msra.gmra.mxu0 %vm179_vm2, %v41352_v14 }
 0x739   : > { %v41359_v22 = vpop.f32.mrf.mxu1 }
 0x73a   : > { %41577 = vmatprep.subr.mxu1 %v41359_v22 }
 0x73b   : > { %v19002_v39 = vpop.f32.mrf.mxu1  ;;  %41578 = vmatpush3.msra.mxu1 %v41359_v22 }
 0x73c   : > { %41579 = vmatprep.subr.mxu1 %v19002_v39  ;;  %41581 = vmatprep.mubr.msk.f32.mxu1 %vm179_vm2, %v19002_v39 }
 0x73d   : > { %41580 = vmatpush3.msra.mxu1 %v19002_v39 }
 0x73e   : > { %41582 = vmatmul.mubr.msk.f32.vlgmr.msra.gmra.mxu1 %vm179_vm2, %v41359_v22 }
 0x746   : > { %v41366_v33 = vpop.f32.mrf.mxu0 }
 0x747   : > { %41584 = vmatprep.subr.mxu0 %v41366_v33 }
 0x748   : > { %v19083_v9 = vpop.f32.mrf.mxu0  ;;  %41585 = vmatpush3.msra.mxu0 %v41366_v33 }
 0x749   : > { %41586 = vmatprep.subr.mxu0 %v19083_v9  ;;  %41588 = vmatprep.mubr.msk.f32.mxu0 %vm179_vm2, %v19083_v9 }
 0x74a   : > { %41587 = vmatpush3.msra.mxu0 %v19083_v9 }
 0x74b   : > { %41589 = vmatmul.mubr.msk.f32.vlgmr.msra.gmra.mxu0 %vm179_vm2, %v41366_v33 }
 0x751   : > { %v41373_v40 = vpop.f32.mrf.mxu1 }
 0x752   : > { %41591 = vmatprep.subr.mxu1 %v41373_v40 }
 0x753   : > { %v19164_v61 = vpop.f32.mrf.mxu1  ;;  %41592 = vmatpush3.msra.mxu1 %v41373_v40 }
 0x754   : > { %41593 = vmatprep.subr.mxu1 %v19164_v61  ;;  %41595 = vmatprep.mubr.msk.f32.mxu1 %vm179_vm2, %v19164_v61 }
 0x755   : > { %41594 = vmatpush3.msra.mxu1 %v19164_v61 }
 0x756   : > { %41596 = vmatmul.mubr.msk.f32.vlgmr.msra.gmra.mxu1 %vm179_vm2, %v41373_v40 }
 0x761   : > { %v41380_v24 = vpop.f32.mrf.mxu0 }
 0x762   : > { %41598 = vmatprep.subr.mxu0 %v41380_v24 }
 0x763   : > { %v19245_v13 = vpop.f32.mrf.mxu0  ;;  %41599 = vmatpush3.msra.mxu0 %v41380_v24 }
 0x764   : > { %41600 = vmatprep.subr.mxu0 %v19245_v13  ;;  %41602 = vmatprep.mubr.msk.f32.mxu0 %vm179_vm2, %v19245_v13 }
 0x765   : > { %41601 = vmatpush3.msra.mxu0 %v19245_v13 }
 0x766   : > { %41603 = vmatmul.mubr.msk.f32.vlgmr.msra.gmra.mxu0 %vm179_vm2, %v41380_v24 }
 0x76c   : > { %v41387_v41 = vpop.f32.mrf.mxu1 }
 0x76d   : > { %41605 = vmatprep.subr.mxu1 %v41387_v41 }
 0x76e   : > { %v19326_v3 = vpop.f32.mrf.mxu1  ;;  %41606 = vmatpush3.msra.mxu1 %v41387_v41 }
 0x76f   : > { %41607 = vmatprep.subr.mxu1 %v19326_v3  ;;  %41609 = vmatprep.mubr.msk.f32.mxu1 %vm179_vm2, %v19326_v3  ;;  %v41394_v42 = vpop.f32.mrf.mxu0 }
 0x770   : > { %41608 = vmatpush3.msra.mxu1 %v19326_v3  ;;  %41612 = vmatprep.subr.mxu0 %v41394_v42 }
 0x771   : > { %41610 = vmatmul.mubr.msk.f32.vlgmr.msra.gmra.mxu1 %vm179_vm2, %v41387_v41  ;;  %v19407_v2 = vpop.f32.mrf.mxu0  ;;  %41613 = vmatpush3.msra.mxu0 %v41394_v42 }
 0x772   : > { %41614 = vmatprep.subr.mxu0 %v19407_v2  ;;  %41616 = vmatprep.mubr.msk.f32.mxu0 %vm179_vm2, %v19407_v2 }
 0x773   : > { %41615 = vmatpush3.msra.mxu0 %v19407_v2 }
 0x774   : > { %v41408_v35 = vpop.f32.mrf.mxu0  ;;  %41617 = vmatmul.mubr.msk.f32.vlgmr.msra.gmra.mxu0 %vm179_vm2, %v41394_v42 }
 0x775   : > { %41626 = vmatprep.subr.mxu0 %v41408_v35 }
 0x776   : > { %v41401_v44 = vpop.f32.mrf.mxu1  ;;  %v19569_v53 = vpop.f32.mrf.mxu0  ;;  %41627 = vmatpush3.msra.mxu0 %v41408_v35 }
 0x777   : > { %41619 = vmatprep.subr.mxu1 %v41401_v44  ;;  %41628 = vmatprep.subr.mxu0 %v19569_v53 }
 0x778   : > { %41630 = vmatprep.mubr.msk.f32.mxu0 %vm179_vm2, %v19569_v53  ;;  %v19488_v15 = vpop.f32.mrf.mxu1  ;;  %41620 = vmatpush3.msra.mxu1 %v41401_v44 }
 0x779   : > { %41629 = vmatpush3.msra.mxu0 %v19569_v53  ;;  %41621 = vmatprep.subr.mxu1 %v19488_v15 }
 0x77a   : > { %v41422_v34 = vpop.f32.mrf.mxu0  ;;  %41623 = vmatprep.mubr.msk.f32.mxu1 %vm179_vm2, %v19488_v15  ;;  %41631 = vmatmul.mubr.msk.f32.vlgmr.msra.gmra.mxu0 %vm179_vm2, %v41408_v35 }
 0x77b   : > { %41640 = vmatprep.subr.mxu0 %v41422_v34  ;;  %41622 = vmatpush3.msra.mxu1 %v19488_v15 }
 0x77c   : > { %v41415_v21 = vpop.f32.mrf.mxu1  ;;  %v19731_v27 = vpop.f32.mrf.mxu0  ;;  %41641 = vmatpush3.msra.mxu0 %v41422_v34  ;;  %41624 = vmatmul.mubr.msk.f32.vlgmr.msra.gmra.mxu1 %vm179_vm2, %v41401_v44 }
 0x77d   : > { %41633 = vmatprep.subr.mxu1 %v41415_v21  ;;  %41642 = vmatprep.subr.mxu0 %v19731_v27 }
 0x77e   : > { %41644 = vmatprep.mubr.msk.f32.mxu0 %vm179_vm2, %v19731_v27  ;;  %v19650_v7 = vpop.f32.mrf.mxu1  ;;  %41634 = vmatpush3.msra.mxu1 %v41415_v21 }
 0x77f   : > { %41643 = vmatpush3.msra.mxu0 %v19731_v27  ;;  %41635 = vmatprep.subr.mxu1 %v19650_v7 }
 0x780   : > { %v41436_v63 = vpop.f32.mrf.mxu0  ;;  %41637 = vmatprep.mubr.msk.f32.mxu1 %vm179_vm2, %v19650_v7  ;;  %41645 = vmatmul.mubr.msk.f32.vlgmr.msra.gmra.mxu0 %vm179_vm2, %v41422_v34 }
 0x781   : > { %41654 = vmatprep.subr.mxu0 %v41436_v63  ;;  %41636 = vmatpush3.msra.mxu1 %v19650_v7 }
 0x782   : > { %v41429_v1 = vpop.f32.mrf.mxu1  ;;  %v19893_v43 = vpop.f32.mrf.mxu0  ;;  %41655 = vmatpush3.msra.mxu0 %v41436_v63  ;;  %41638 = vmatmul.mubr.msk.f32.vlgmr.msra.gmra.mxu1 %vm179_vm2, %v41415_v21 }
 0x783   : > { %41647 = vmatprep.subr.mxu1 %v41429_v1  ;;  %41656 = vmatprep.subr.mxu0 %v19893_v43 }
 0x784   : > { %41658 = vmatprep.mubr.msk.f32.mxu0 %vm179_vm2, %v19893_v43  ;;  %v19812_v60 = vpop.f32.mrf.mxu1  ;;  %41648 = vmatpush3.msra.mxu1 %v41429_v1 }
 0x785   : > { %41657 = vmatpush3.msra.mxu0 %v19893_v43  ;;  %41649 = vmatprep.subr.mxu1 %v19812_v60 }
 0x786   : > { %v41450_v5 = vpop.f32.mrf.mxu0  ;;  %41651 = vmatprep.mubr.msk.f32.mxu1 %vm179_vm2, %v19812_v60  ;;  %41659 = vmatmul.mubr.msk.f32.vlgmr.msra.gmra.mxu0 %vm179_vm2, %v41436_v63 }
 0x787   : > { %41668 = vmatprep.subr.mxu0 %v41450_v5  ;;  %41650 = vmatpush3.msra.mxu1 %v19812_v60 }
 0x788   : > { %v41443_v52 = vpop.f32.mrf.mxu1  ;;  %v20055_v23 = vpop.f32.mrf.mxu0  ;;  %41669 = vmatpush3.msra.mxu0 %v41450_v5  ;;  %41652 = vmatmul.mubr.msk.f32.vlgmr.msra.gmra.mxu1 %vm179_vm2, %v41429_v1 }
 0x789   : > { %41661 = vmatprep.subr.mxu1 %v41443_v52  ;;  %41670 = vmatprep.subr.mxu0 %v20055_v23 }
 0x78a   : > { %41672 = vmatprep.mubr.msk.f32.mxu0 %vm179_vm2, %v20055_v23  ;;  %v19974_v19 = vpop.f32.mrf.mxu1  ;;  %41662 = vmatpush3.msra.mxu1 %v41443_v52 }
 0x78b   : > { %41671 = vmatpush3.msra.mxu0 %v20055_v23  ;;  %41663 = vmatprep.subr.mxu1 %v19974_v19 }
 0x78c   : > { %v41464_v11 = vpop.f32.mrf.mxu0  ;;  %41665 = vmatprep.mubr.msk.f32.mxu1 %vm179_vm2, %v19974_v19  ;;  %41673 = vmatmul.mubr.msk.f32.vlgmr.msra.gmra.mxu0 %vm179_vm2, %v41450_v5 }
 0x78d   : > { %41682 = vmatprep.subr.mxu0 %v41464_v11  ;;  %41664 = vmatpush3.msra.mxu1 %v19974_v19 }
 0x78e   : > { %v41457_v6 = vpop.f32.mrf.mxu1  ;;  %v20217_v30 = vpop.f32.mrf.mxu0  ;;  %41683 = vmatpush3.msra.mxu0 %v41464_v11  ;;  %41666 = vmatmul.mubr.msk.f32.vlgmr.msra.gmra.mxu1 %vm179_vm2, %v41443_v52 }
 0x78f   : > { %41675 = vmatprep.subr.mxu1 %v41457_v6  ;;  %41684 = vmatprep.subr.mxu0 %v20217_v30 }
 0x790   : > { %41686 = vmatprep.mubr.msk.f32.mxu0 %vm179_vm2, %v20217_v30  ;;  %v20136_v59 = vpop.f32.mrf.mxu1  ;;  %41676 = vmatpush3.msra.mxu1 %v41457_v6 }
 0x791   : > { %41685 = vmatpush3.msra.mxu0 %v20217_v30  ;;  %41677 = vmatprep.subr.mxu1 %v20136_v59 }
 0x792   : > { %v41478_v31 = vpop.f32.mrf.mxu0  ;;  %41679 = vmatprep.mubr.msk.f32.mxu1 %vm179_vm2, %v20136_v59  ;;  %41687 = vmatmul.mubr.msk.f32.vlgmr.msra.gmra.mxu0 %vm179_vm2, %v41464_v11 }
 0x793   : > { %41696 = vmatprep.subr.mxu0 %v41478_v31  ;;  %41678 = vmatpush3.msra.mxu1 %v20136_v59 }
 0x794   : > { %v41471_v47 = vpop.f32.mrf.mxu1  ;;  %v20379_v58 = vpop.f32.mrf.mxu0  ;;  %41697 = vmatpush3.msra.mxu0 %v41478_v31  ;;  %41680 = vmatmul.mubr.msk.f32.vlgmr.msra.gmra.mxu1 %vm179_vm2, %v41457_v6 }
 0x795   : > { %41689 = vmatprep.subr.mxu1 %v41471_v47  ;;  %41698 = vmatprep.subr.mxu0 %v20379_v58 }
 0x796   : > { %41700 = vmatprep.mubr.msk.f32.mxu0 %vm179_vm2, %v20379_v58  ;;  %v20298_v8 = vpop.f32.mrf.mxu1  ;;  %41690 = vmatpush3.msra.mxu1 %v41471_v47 }
 0x797   : > { %41699 = vmatpush3.msra.mxu0 %v20379_v58  ;;  %41691 = vmatprep.subr.mxu1 %v20298_v8 }
 0x798   : > { %v41492_v10 = vpop.f32.mrf.mxu0  ;;  %41693 = vmatprep.mubr.msk.f32.mxu1 %vm179_vm2, %v20298_v8  ;;  %41701 = vmatmul.mubr.msk.f32.vlgmr.msra.gmra.mxu0 %vm179_vm2, %v41478_v31 }
 0x799   : > { %41710 = vmatprep.subr.mxu0 %v41492_v10  ;;  %41692 = vmatpush3.msra.mxu1 %v20298_v8 }
 0x79a   : > { %v41485_v25 = vpop.f32.mrf.mxu1  ;;  %v20541_v45 = vpop.f32.mrf.mxu0  ;;  %41711 = vmatpush3.msra.mxu0 %v41492_v10  ;;  %41694 = vmatmul.mubr.msk.f32.vlgmr.msra.gmra.mxu1 %vm179_vm2, %v41471_v47 }
 0x79b   : > { %41703 = vmatprep.subr.mxu1 %v41485_v25  ;;  %41712 = vmatprep.subr.mxu0 %v20541_v45 }
 0x79c   : > { %41714 = vmatprep.mubr.msk.f32.mxu0 %vm179_vm2, %v20541_v45  ;;  %v20460_v37 = vpop.f32.mrf.mxu1  ;;  %41704 = vmatpush3.msra.mxu1 %v41485_v25 }
 0x79d   : > { %41713 = vmatpush3.msra.mxu0 %v20541_v45  ;;  %41705 = vmatprep.subr.mxu1 %v20460_v37 }
 0x79e   : > { %v41506_v29 = vpop.f32.mrf.mxu0  ;;  %41707 = vmatprep.mubr.msk.f32.mxu1 %vm179_vm2, %v20460_v37  ;;  %41715 = vmatmul.mubr.msk.f32.vlgmr.msra.gmra.mxu0 %vm179_vm2, %v41492_v10 }
 0x79f   : > { %41724 = vmatprep.subr.mxu0 %v41506_v29  ;;  %41706 = vmatpush3.msra.mxu1 %v20460_v37 }
 0x7a0   : > { %v41499_v18 = vpop.f32.mrf.mxu1  ;;  %v20703_v36 = vpop.f32.mrf.mxu0  ;;  %41725 = vmatpush3.msra.mxu0 %v41506_v29  ;;  %41708 = vmatmul.mubr.msk.f32.vlgmr.msra.gmra.mxu1 %vm179_vm2, %v41485_v25 }
 0x7a1   : > { %41717 = vmatprep.subr.mxu1 %v41499_v18  ;;  %41726 = vmatprep.subr.mxu0 %v20703_v36 }
 0x7a2   : > { %41728 = vmatprep.mubr.msk.f32.mxu0 %vm179_vm2, %v20703_v36  ;;  %v20622_v57 = vpop.f32.mrf.mxu1  ;;  %41718 = vmatpush3.msra.mxu1 %v41499_v18 }
 0x7a3   : > { %41727 = vmatpush3.msra.mxu0 %v20703_v36  ;;  %41719 = vmatprep.subr.mxu1 %v20622_v57 }
 0x7a4   : > { %v41520_v54 = vpop.f32.mrf.mxu0  ;;  %41721 = vmatprep.mubr.msk.f32.mxu1 %vm179_vm2, %v20622_v57  ;;  %41729 = vmatmul.mubr.msk.f32.vlgmr.msra.gmra.mxu0 %vm179_vm2, %v41506_v29 }
 0x7a5   : > { %41738 = vmatprep.subr.mxu0 %v41520_v54  ;;  %41720 = vmatpush3.msra.mxu1 %v20622_v57 }
 0x7a6   : > { %v41513_v48 = vpop.f32.mrf.mxu1  ;;  %v20865_v50 = vpop.f32.mrf.mxu0  ;;  %41739 = vmatpush3.msra.mxu0 %v41520_v54  ;;  %41722 = vmatmul.mubr.msk.f32.vlgmr.msra.gmra.mxu1 %vm179_vm2, %v41499_v18 }
 0x7a7   : > { %41731 = vmatprep.subr.mxu1 %v41513_v48  ;;  %41740 = vmatprep.subr.mxu0 %v20865_v50 }
 0x7a8   : > { %41742 = vmatprep.mubr.msk.f32.mxu0 %vm179_vm2, %v20865_v50  ;;  %v20784_v38 = vpop.f32.mrf.mxu1  ;;  %41732 = vmatpush3.msra.mxu1 %v41513_v48 }
 0x7a9   : > { %41741 = vmatpush3.msra.mxu0 %v20865_v50  ;;  %41733 = vmatprep.subr.mxu1 %v20784_v38 }
 0x7aa   : > { %v41534_v17 = vpop.f32.mrf.mxu0  ;;  %41735 = vmatprep.mubr.msk.f32.mxu1 %vm179_vm2, %v20784_v38  ;;  %41743 = vmatmul.mubr.msk.f32.vlgmr.msra.gmra.mxu0 %vm179_vm2, %v41520_v54 }
 0x7ab   : > { %41752 = vmatprep.subr.mxu0 %v41534_v17  ;;  %41734 = vmatpush3.msra.mxu1 %v20784_v38 }
 0x7ac   : > { %v41527_v12 = vpop.f32.mrf.mxu1  ;;  %v21027_v49 = vpop.f32.mrf.mxu0  ;;  %41753 = vmatpush3.msra.mxu0 %v41534_v17  ;;  %41736 = vmatmul.mubr.msk.f32.vlgmr.msra.gmra.mxu1 %vm179_vm2, %v41513_v48 }
 0x7ad   : > { %41745 = vmatprep.subr.mxu1 %v41527_v12  ;;  %41754 = vmatprep.subr.mxu0 %v21027_v49 }
 0x7ae   : > { %41756 = vmatprep.mubr.msk.f32.mxu0 %vm179_vm2, %v21027_v49  ;;  %v20946_v26 = vpop.f32.mrf.mxu1  ;;  %41746 = vmatpush3.msra.mxu1 %v41527_v12 }
 0x7af   : > { %41755 = vmatpush3.msra.mxu0 %v21027_v49  ;;  %41747 = vmatprep.subr.mxu1 %v20946_v26 }
 0x7b0   : > { %v41548_v56 = vpop.f32.mrf.mxu0  ;;  %41749 = vmatprep.mubr.msk.f32.mxu1 %vm179_vm2, %v20946_v26  ;;  %41757 = vmatmul.mubr.msk.f32.vlgmr.msra.gmra.mxu0 %vm179_vm2, %v41534_v17 }
 0x7b1   : > { %41766 = vmatprep.subr.mxu0 %v41548_v56  ;;  %v41541_v32 = vpop.f32.mrf.mxu1  ;;  %41748 = vmatpush3.msra.mxu1 %v20946_v26 }
 0x7b2   : > { %v21189_v46 = vpop.f32.mrf.mxu0  ;;  %41767 = vmatpush3.msra.mxu0 %v41548_v56  ;;  %41750 = vmatmul.mubr.msk.f32.vlgmr.msra.gmra.mxu1 %vm179_vm2, %v41527_v12 }
 0x7b3   : > { %41759 = vmatprep.subr.mxu1 %v41541_v32  ;;  %41768 = vmatprep.subr.mxu0 %v21189_v46  ;;  %v21108_v20 = vpop.f32.mrf.mxu1 }
 0x7b4   : > { %41770 = vmatprep.mubr.msk.f32.mxu0 %vm179_vm2, %v21189_v46  ;;  %41760 = vmatpush3.msra.mxu1 %v41541_v32 }
 0x7b5   : > { %41769 = vmatpush3.msra.mxu0 %v21189_v46  ;;  %41761 = vmatprep.subr.mxu1 %v21108_v20 }
 0x7b6   : > { %v41562_v55 = vpop.f32.mrf.mxu0  ;;  %41763 = vmatprep.mubr.msk.f32.mxu1 %vm179_vm2, %v21108_v20  ;;  %41771 = vmatmul.mubr.msk.f32.vlgmr.msra.gmra.mxu0 %vm179_vm2, %v41548_v56 }
 0x7b7   : > { %41780 = vmatprep.subr.mxu0 %v41562_v55  ;;  %41762 = vmatpush3.msra.mxu1 %v21108_v20 }
 0x7b8   : > { %v41555_v62 = vpop.f32.mrf.mxu1  ;;  %v21351_v16 = vpop.f32.mrf.mxu0  ;;  %41781 = vmatpush3.msra.mxu0 %v41562_v55  ;;  %41764 = vmatmul.mubr.msk.f32.vlgmr.msra.gmra.mxu1 %vm179_vm2, %v41541_v32 }
 0x7b9   : > { %41773 = vmatprep.subr.mxu1 %v41555_v62  ;;  %41782 = vmatprep.subr.mxu0 %v21351_v16 }
 0x7ba   : > { %41784 = vmatprep.mubr.msk.f32.mxu0 %vm179_vm2, %v21351_v16  ;;  %v21270_v51 = vpop.f32.mrf.mxu1  ;;  %41774 = vmatpush3.msra.mxu1 %v41555_v62 }
 0x7bb   : > { %41783 = vmatpush3.msra.mxu0 %v21351_v16  ;;  %41775 = vmatprep.subr.mxu1 %v21270_v51 }
 0x7bc   : > { %41777 = vmatprep.mubr.msk.f32.mxu1 %vm179_vm2, %v21270_v51  ;;  %41785 = vmatmul.mubr.msk.f32.vlgmr.msra.gmra.mxu0 %vm179_vm2, %v41562_v55  ;;  %v41569_v28 = vpop.f32.mrf.mxu1 }
 0x7bd   : > { %41776 = vmatpush3.msra.mxu1 %v21270_v51 }
 0x7be   : > { %41778 = vmatmul.mubr.msk.f32.vlgmr.msra.gmra.mxu1 %vm179_vm2, %v41555_v62  ;;  %41787 = vmatprep.subr.mxu1 %v41569_v28  ;;  %v21432_v0 = vpop.f32.mrf.mxu1 }
 0x7bf   : > { %41788 = vmatpush3.msra.mxu1 %v41569_v28  ;;  %41791 = vmatprep.mubr.msk.f32.mxu1 %vm179_vm2, %v21432_v0 }
 0x7c0   : > { %41789 = vmatprep.subr.mxu1 %v21432_v0 }
 0x7c1   : > { %41790 = vmatpush3.msra.mxu1 %v21432_v0 }
 0x7c2   : > { %41792 = vmatmul.mubr.msk.f32.vlgmr.msra.gmra.mxu1 %vm179_vm2, %v41569_v28 }
 0x7f5   : > { %v41576_v14 = vpop.f32.mrf.mxu0 }
 0x7f6   : > { %41794 = vmatprep.subr.mxu0 %v41576_v14 }
 0x7f7   : > { %v21513_v4 = vpop.f32.mrf.mxu0  ;;  %41795 = vmatpush3.msra.mxu0 %v41576_v14 }
 0x7f8   : > { %41796 = vmatprep.subr.mxu0 %v21513_v4  ;;  %41798 = vmatprep.mubr.msk.f32.mxu0 %vm179_vm2, %v21513_v4 }
 0x7f9   : > { %41797 = vmatpush3.msra.mxu0 %v21513_v4 }
 0x7fa   : > { %41799 = vmatmul.mubr.msk.f32.vlgmr.msra.gmra.mxu0 %vm179_vm2, %v41576_v14 }
 0x7fe   : > { %v41583_v22 = vpop.f32.mrf.mxu1 }
 0x7ff   : > { %41801 = vmatprep.subr.mxu1 %v41583_v22 }
 0x800   : > { %v21594_v39 = vpop.f32.mrf.mxu1  ;;  %41802 = vmatpush3.msra.mxu1 %v41583_v22 }
 0x801   : > { %41803 = vmatprep.subr.mxu1 %v21594_v39  ;;  %41805 = vmatprep.mubr.msk.f32.mxu1 %vm179_vm2, %v21594_v39 }
 0x802   : > { %41804 = vmatpush3.msra.mxu1 %v21594_v39 }
 0x803   : > { %41806 = vmatmul.mubr.msk.f32.vlgmr.msra.gmra.mxu1 %vm179_vm2, %v41583_v22 }
 0x80b   : > { %v41590_v33 = vpop.f32.mrf.mxu0 }
 0x80c   : > { %41808 = vmatprep.subr.mxu0 %v41590_v33 }
 0x80d   : > { %v21675_v9 = vpop.f32.mrf.mxu0  ;;  %41809 = vmatpush3.msra.mxu0 %v41590_v33 }
 0x80e   : > { %41810 = vmatprep.subr.mxu0 %v21675_v9  ;;  %41812 = vmatprep.mubr.msk.f32.mxu0 %vm179_vm2, %v21675_v9 }
 0x80f   : > { %41811 = vmatpush3.msra.mxu0 %v21675_v9 }
 0x810   : > { %41813 = vmatmul.mubr.msk.f32.vlgmr.msra.gmra.mxu0 %vm179_vm2, %v41590_v33 }
 0x816   : > { %v41597_v40 = vpop.f32.mrf.mxu1 }
 0x817   : > { %41815 = vmatprep.subr.mxu1 %v41597_v40 }
 0x818   : > { %v21756_v61 = vpop.f32.mrf.mxu1  ;;  %41816 = vmatpush3.msra.mxu1 %v41597_v40 }
 0x819   : > { %41817 = vmatprep.subr.mxu1 %v21756_v61  ;;  %41819 = vmatprep.mubr.msk.f32.mxu1 %vm179_vm2, %v21756_v61 }
 0x81a   : > { %41818 = vmatpush3.msra.mxu1 %v21756_v61 }
 0x81b   : > { %41820 = vmatmul.mubr.msk.f32.vlgmr.msra.gmra.mxu1 %vm179_vm2, %v41597_v40 }
 0x826   : > { %v41604_v24 = vpop.f32.mrf.mxu0 }
 0x827   : > { %41822 = vmatprep.subr.mxu0 %v41604_v24 }
 0x828   : > { %v21837_v13 = vpop.f32.mrf.mxu0  ;;  %41823 = vmatpush3.msra.mxu0 %v41604_v24 }
 0x829   : > { %41824 = vmatprep.subr.mxu0 %v21837_v13  ;;  %41826 = vmatprep.mubr.msk.f32.mxu0 %vm179_vm2, %v21837_v13 }
 0x82a   : > { %41825 = vmatpush3.msra.mxu0 %v21837_v13 }
 0x82b   : > { %41827 = vmatmul.mubr.msk.f32.vlgmr.msra.gmra.mxu0 %vm179_vm2, %v41604_v24 }
 0x831   : > { %v41611_v41 = vpop.f32.mrf.mxu1 }
 0x832   : > { %41829 = vmatprep.subr.mxu1 %v41611_v41 }
 0x833   : > { %v21918_v3 = vpop.f32.mrf.mxu1  ;;  %41830 = vmatpush3.msra.mxu1 %v41611_v41 }
 0x834   : > { %41831 = vmatprep.subr.mxu1 %v21918_v3  ;;  %41833 = vmatprep.mubr.msk.f32.mxu1 %vm179_vm2, %v21918_v3  ;;  %v41618_v42 = vpop.f32.mrf.mxu0 }
 0x835   : > { %41832 = vmatpush3.msra.mxu1 %v21918_v3  ;;  %41836 = vmatprep.subr.mxu0 %v41618_v42 }
 0x836   : > { %41834 = vmatmul.mubr.msk.f32.vlgmr.msra.gmra.mxu1 %vm179_vm2, %v41611_v41  ;;  %v21999_v2 = vpop.f32.mrf.mxu0  ;;  %41837 = vmatpush3.msra.mxu0 %v41618_v42 }
 0x837   : > { %41838 = vmatprep.subr.mxu0 %v21999_v2  ;;  %41840 = vmatprep.mubr.msk.f32.mxu0 %vm179_vm2, %v21999_v2 }
 0x838   : > { %41839 = vmatpush3.msra.mxu0 %v21999_v2 }
 0x839   : > { %41841 = vmatmul.mubr.msk.f32.vlgmr.msra.gmra.mxu0 %vm179_vm2, %v41618_v42 }
 0x83a   : > { %v41632_v35 = vpop.f32.mrf.mxu0 }
 0x83b   : > { %41850 = vmatprep.subr.mxu0 %v41632_v35 }
 0x83c   : > { %v41625_v44 = vpop.f32.mrf.mxu1  ;;  %v22161_v53 = vpop.f32.mrf.mxu0  ;;  %41851 = vmatpush3.msra.mxu0 %v41632_v35 }
 0x83d   : > { %41843 = vmatprep.subr.mxu1 %v41625_v44  ;;  %41852 = vmatprep.subr.mxu0 %v22161_v53 }
 0x83e   : > { %41854 = vmatprep.mubr.msk.f32.mxu0 %vm179_vm2, %v22161_v53  ;;  %v22080_v15 = vpop.f32.mrf.mxu1  ;;  %41844 = vmatpush3.msra.mxu1 %v41625_v44 }
 0x83f   : > { %41853 = vmatpush3.msra.mxu0 %v22161_v53  ;;  %41845 = vmatprep.subr.mxu1 %v22080_v15 }
 0x840   : > { %v41646_v34 = vpop.f32.mrf.mxu0  ;;  %41847 = vmatprep.mubr.msk.f32.mxu1 %vm179_vm2, %v22080_v15  ;;  %41855 = vmatmul.mubr.msk.f32.vlgmr.msra.gmra.mxu0 %vm179_vm2, %v41632_v35 }
 0x841   : > { %41864 = vmatprep.subr.mxu0 %v41646_v34  ;;  %41846 = vmatpush3.msra.mxu1 %v22080_v15 }
 0x842   : > { %v41639_v21 = vpop.f32.mrf.mxu1  ;;  %v22323_v27 = vpop.f32.mrf.mxu0  ;;  %41865 = vmatpush3.msra.mxu0 %v41646_v34  ;;  %41848 = vmatmul.mubr.msk.f32.vlgmr.msra.gmra.mxu1 %vm179_vm2, %v41625_v44 }
 0x843   : > { %41857 = vmatprep.subr.mxu1 %v41639_v21  ;;  %41866 = vmatprep.subr.mxu0 %v22323_v27 }
 0x844   : > { %41868 = vmatprep.mubr.msk.f32.mxu0 %vm179_vm2, %v22323_v27  ;;  %v22242_v7 = vpop.f32.mrf.mxu1  ;;  %41858 = vmatpush3.msra.mxu1 %v41639_v21 }
 0x845   : > { %41867 = vmatpush3.msra.mxu0 %v22323_v27  ;;  %41859 = vmatprep.subr.mxu1 %v22242_v7 }
 0x846   : > { %v41660_v63 = vpop.f32.mrf.mxu0  ;;  %41861 = vmatprep.mubr.msk.f32.mxu1 %vm179_vm2, %v22242_v7  ;;  %41869 = vmatmul.mubr.msk.f32.vlgmr.msra.gmra.mxu0 %vm179_vm2, %v41646_v34 }
 0x847   : > { %41878 = vmatprep.subr.mxu0 %v41660_v63  ;;  %41860 = vmatpush3.msra.mxu1 %v22242_v7 }
 0x848   : > { %v41653_v1 = vpop.f32.mrf.mxu1  ;;  %v22485_v43 = vpop.f32.mrf.mxu0  ;;  %41879 = vmatpush3.msra.mxu0 %v41660_v63  ;;  %41862 = vmatmul.mubr.msk.f32.vlgmr.msra.gmra.mxu1 %vm179_vm2, %v41639_v21 }
 0x849   : > { %41871 = vmatprep.subr.mxu1 %v41653_v1  ;;  %41880 = vmatprep.subr.mxu0 %v22485_v43 }
 0x84a   : > { %41882 = vmatprep.mubr.msk.f32.mxu0 %vm179_vm2, %v22485_v43  ;;  %v22404_v60 = vpop.f32.mrf.mxu1  ;;  %41872 = vmatpush3.msra.mxu1 %v41653_v1 }
 0x84b   : > { %41881 = vmatpush3.msra.mxu0 %v22485_v43  ;;  %41873 = vmatprep.subr.mxu1 %v22404_v60 }
 0x84c   : > { %v41674_v5 = vpop.f32.mrf.mxu0  ;;  %41875 = vmatprep.mubr.msk.f32.mxu1 %vm179_vm2, %v22404_v60  ;;  %41883 = vmatmul.mubr.msk.f32.vlgmr.msra.gmra.mxu0 %vm179_vm2, %v41660_v63 }
 0x84d   : > { %41892 = vmatprep.subr.mxu0 %v41674_v5  ;;  %41874 = vmatpush3.msra.mxu1 %v22404_v60 }
 0x84e   : > { %v41667_v52 = vpop.f32.mrf.mxu1  ;;  %v22647_v23 = vpop.f32.mrf.mxu0  ;;  %41893 = vmatpush3.msra.mxu0 %v41674_v5  ;;  %41876 = vmatmul.mubr.msk.f32.vlgmr.msra.gmra.mxu1 %vm179_vm2, %v41653_v1 }
 0x84f   : > { %41885 = vmatprep.subr.mxu1 %v41667_v52  ;;  %41894 = vmatprep.subr.mxu0 %v22647_v23 }
 0x850   : > { %41896 = vmatprep.mubr.msk.f32.mxu0 %vm179_vm2, %v22647_v23  ;;  %v22566_v19 = vpop.f32.mrf.mxu1  ;;  %41886 = vmatpush3.msra.mxu1 %v41667_v52 }
 0x851   : > { %41895 = vmatpush3.msra.mxu0 %v22647_v23  ;;  %41887 = vmatprep.subr.mxu1 %v22566_v19 }
 0x852   : > { %v41688_v11 = vpop.f32.mrf.mxu0  ;;  %41889 = vmatprep.mubr.msk.f32.mxu1 %vm179_vm2, %v22566_v19  ;;  %41897 = vmatmul.mubr.msk.f32.vlgmr.msra.gmra.mxu0 %vm179_vm2, %v41674_v5 }
 0x853   : > { %41906 = vmatprep.subr.mxu0 %v41688_v11  ;;  %41888 = vmatpush3.msra.mxu1 %v22566_v19 }
 0x854   : > { %v41681_v6 = vpop.f32.mrf.mxu1  ;;  %v22809_v30 = vpop.f32.mrf.mxu0  ;;  %41907 = vmatpush3.msra.mxu0 %v41688_v11  ;;  %41890 = vmatmul.mubr.msk.f32.vlgmr.msra.gmra.mxu1 %vm179_vm2, %v41667_v52 }
 0x855   : > { %41899 = vmatprep.subr.mxu1 %v41681_v6  ;;  %41908 = vmatprep.subr.mxu0 %v22809_v30 }
 0x856   : > { %41910 = vmatprep.mubr.msk.f32.mxu0 %vm179_vm2, %v22809_v30  ;;  %v22728_v59 = vpop.f32.mrf.mxu1  ;;  %41900 = vmatpush3.msra.mxu1 %v41681_v6 }
 0x857   : > { %41909 = vmatpush3.msra.mxu0 %v22809_v30  ;;  %41901 = vmatprep.subr.mxu1 %v22728_v59 }
 0x858   : > { %v41702_v31 = vpop.f32.mrf.mxu0  ;;  %41903 = vmatprep.mubr.msk.f32.mxu1 %vm179_vm2, %v22728_v59  ;;  %41911 = vmatmul.mubr.msk.f32.vlgmr.msra.gmra.mxu0 %vm179_vm2, %v41688_v11 }
 0x859   : > { %41920 = vmatprep.subr.mxu0 %v41702_v31  ;;  %41902 = vmatpush3.msra.mxu1 %v22728_v59 }
 0x85a   : > { %v41695_v47 = vpop.f32.mrf.mxu1  ;;  %v22971_v58 = vpop.f32.mrf.mxu0  ;;  %41921 = vmatpush3.msra.mxu0 %v41702_v31  ;;  %41904 = vmatmul.mubr.msk.f32.vlgmr.msra.gmra.mxu1 %vm179_vm2, %v41681_v6 }
 0x85b   : > { %41913 = vmatprep.subr.mxu1 %v41695_v47  ;;  %41922 = vmatprep.subr.mxu0 %v22971_v58 }
 0x85c   : > { %41924 = vmatprep.mubr.msk.f32.mxu0 %vm179_vm2, %v22971_v58  ;;  %v22890_v8 = vpop.f32.mrf.mxu1  ;;  %41914 = vmatpush3.msra.mxu1 %v41695_v47 }
 0x85d   : > { %41923 = vmatpush3.msra.mxu0 %v22971_v58  ;;  %41915 = vmatprep.subr.mxu1 %v22890_v8 }
 0x85e   : > { %v41716_v10 = vpop.f32.mrf.mxu0  ;;  %41917 = vmatprep.mubr.msk.f32.mxu1 %vm179_vm2, %v22890_v8  ;;  %41925 = vmatmul.mubr.msk.f32.vlgmr.msra.gmra.mxu0 %vm179_vm2, %v41702_v31 }
 0x85f   : > { %41934 = vmatprep.subr.mxu0 %v41716_v10  ;;  %41916 = vmatpush3.msra.mxu1 %v22890_v8 }
 0x860   : > { %v41709_v25 = vpop.f32.mrf.mxu1  ;;  %v23133_v45 = vpop.f32.mrf.mxu0  ;;  %41935 = vmatpush3.msra.mxu0 %v41716_v10  ;;  %41918 = vmatmul.mubr.msk.f32.vlgmr.msra.gmra.mxu1 %vm179_vm2, %v41695_v47 }
 0x861   : > { %41927 = vmatprep.subr.mxu1 %v41709_v25  ;;  %41936 = vmatprep.subr.mxu0 %v23133_v45 }
 0x862   : > { %41938 = vmatprep.mubr.msk.f32.mxu0 %vm179_vm2, %v23133_v45  ;;  %v23052_v37 = vpop.f32.mrf.mxu1  ;;  %41928 = vmatpush3.msra.mxu1 %v41709_v25 }
 0x863   : > { %41937 = vmatpush3.msra.mxu0 %v23133_v45  ;;  %41929 = vmatprep.subr.mxu1 %v23052_v37 }
 0x864   : > { %v41730_v29 = vpop.f32.mrf.mxu0  ;;  %41931 = vmatprep.mubr.msk.f32.mxu1 %vm179_vm2, %v23052_v37  ;;  %41939 = vmatmul.mubr.msk.f32.vlgmr.msra.gmra.mxu0 %vm179_vm2, %v41716_v10 }
 0x865   : > { %41948 = vmatprep.subr.mxu0 %v41730_v29  ;;  %41930 = vmatpush3.msra.mxu1 %v23052_v37 }
 0x866   : > { %v41723_v18 = vpop.f32.mrf.mxu1  ;;  %v23295_v36 = vpop.f32.mrf.mxu0  ;;  %41949 = vmatpush3.msra.mxu0 %v41730_v29  ;;  %41932 = vmatmul.mubr.msk.f32.vlgmr.msra.gmra.mxu1 %vm179_vm2, %v41709_v25 }
 0x867   : > { %41941 = vmatprep.subr.mxu1 %v41723_v18  ;;  %41950 = vmatprep.subr.mxu0 %v23295_v36 }
 0x868   : > { %41952 = vmatprep.mubr.msk.f32.mxu0 %vm179_vm2, %v23295_v36  ;;  %v23214_v57 = vpop.f32.mrf.mxu1  ;;  %41942 = vmatpush3.msra.mxu1 %v41723_v18 }
 0x869   : > { %41951 = vmatpush3.msra.mxu0 %v23295_v36  ;;  %41943 = vmatprep.subr.mxu1 %v23214_v57 }
 0x86a   : > { %v41744_v54 = vpop.f32.mrf.mxu0  ;;  %41945 = vmatprep.mubr.msk.f32.mxu1 %vm179_vm2, %v23214_v57  ;;  %41953 = vmatmul.mubr.msk.f32.vlgmr.msra.gmra.mxu0 %vm179_vm2, %v41730_v29 }
 0x86b   : > { %41962 = vmatprep.subr.mxu0 %v41744_v54  ;;  %41944 = vmatpush3.msra.mxu1 %v23214_v57 }
 0x86c   : > { %v41737_v48 = vpop.f32.mrf.mxu1  ;;  %v23457_v50 = vpop.f32.mrf.mxu0  ;;  %41963 = vmatpush3.msra.mxu0 %v41744_v54  ;;  %41946 = vmatmul.mubr.msk.f32.vlgmr.msra.gmra.mxu1 %vm179_vm2, %v41723_v18 }
 0x86d   : > { %41955 = vmatprep.subr.mxu1 %v41737_v48  ;;  %41964 = vmatprep.subr.mxu0 %v23457_v50 }
 0x86e   : > { %41966 = vmatprep.mubr.msk.f32.mxu0 %vm179_vm2, %v23457_v50  ;;  %v23376_v38 = vpop.f32.mrf.mxu1  ;;  %41956 = vmatpush3.msra.mxu1 %v41737_v48 }
 0x86f   : > { %41965 = vmatpush3.msra.mxu0 %v23457_v50  ;;  %41957 = vmatprep.subr.mxu1 %v23376_v38 }
 0x870   : > { %v41758_v17 = vpop.f32.mrf.mxu0  ;;  %41959 = vmatprep.mubr.msk.f32.mxu1 %vm179_vm2, %v23376_v38  ;;  %41967 = vmatmul.mubr.msk.f32.vlgmr.msra.gmra.mxu0 %vm179_vm2, %v41744_v54 }
 0x871   : > { %41976 = vmatprep.subr.mxu0 %v41758_v17  ;;  %41958 = vmatpush3.msra.mxu1 %v23376_v38 }
 0x872   : > { %v41751_v12 = vpop.f32.mrf.mxu1  ;;  %v23619_v49 = vpop.f32.mrf.mxu0  ;;  %41977 = vmatpush3.msra.mxu0 %v41758_v17  ;;  %41960 = vmatmul.mubr.msk.f32.vlgmr.msra.gmra.mxu1 %vm179_vm2, %v41737_v48 }
 0x873   : > { %41969 = vmatprep.subr.mxu1 %v41751_v12  ;;  %41978 = vmatprep.subr.mxu0 %v23619_v49 }
 0x874   : > { %41980 = vmatprep.mubr.msk.f32.mxu0 %vm179_vm2, %v23619_v49  ;;  %v23538_v26 = vpop.f32.mrf.mxu1  ;;  %41970 = vmatpush3.msra.mxu1 %v41751_v12 }
 0x875   : > { %41979 = vmatpush3.msra.mxu0 %v23619_v49  ;;  %41971 = vmatprep.subr.mxu1 %v23538_v26 }
 0x876   : > { %v41772_v56 = vpop.f32.mrf.mxu0  ;;  %41973 = vmatprep.mubr.msk.f32.mxu1 %vm179_vm2, %v23538_v26  ;;  %41981 = vmatmul.mubr.msk.f32.vlgmr.msra.gmra.mxu0 %vm179_vm2, %v41758_v17 }
 0x877   : > { %41990 = vmatprep.subr.mxu0 %v41772_v56  ;;  %41972 = vmatpush3.msra.mxu1 %v23538_v26 }
 0x878   : > { %v41765_v32 = vpop.f32.mrf.mxu1  ;;  %v23781_v46 = vpop.f32.mrf.mxu0  ;;  %41991 = vmatpush3.msra.mxu0 %v41772_v56  ;;  %41974 = vmatmul.mubr.msk.f32.vlgmr.msra.gmra.mxu1 %vm179_vm2, %v41751_v12 }
 0x879   : > { %41983 = vmatprep.subr.mxu1 %v41765_v32  ;;  %41992 = vmatprep.subr.mxu0 %v23781_v46 }
 0x87a   : > { %41994 = vmatprep.mubr.msk.f32.mxu0 %vm179_vm2, %v23781_v46  ;;  %v23700_v20 = vpop.f32.mrf.mxu1  ;;  %41984 = vmatpush3.msra.mxu1 %v41765_v32 }
 0x87b   : > { %41993 = vmatpush3.msra.mxu0 %v23781_v46  ;;  %41985 = vmatprep.subr.mxu1 %v23700_v20 }
 0x87c   : > { %v41786_v55 = vpop.f32.mrf.mxu0  ;;  %41987 = vmatprep.mubr.msk.f32.mxu1 %vm179_vm2, %v23700_v20  ;;  %41995 = vmatmul.mubr.msk.f32.vlgmr.msra.gmra.mxu0 %vm179_vm2, %v41772_v56 }
 0x87d   : > { %42004 = vmatprep.subr.mxu0 %v41786_v55  ;;  %41986 = vmatpush3.msra.mxu1 %v23700_v20 }
 0x87e   : > { %v41779_v62 = vpop.f32.mrf.mxu1  ;;  %v23943_v16 = vpop.f32.mrf.mxu0  ;;  %42005 = vmatpush3.msra.mxu0 %v41786_v55  ;;  %41988 = vmatmul.mubr.msk.f32.vlgmr.msra.gmra.mxu1 %vm179_vm2, %v41765_v32 }
 0x87f   : > { %41997 = vmatprep.subr.mxu1 %v41779_v62  ;;  %42006 = vmatprep.subr.mxu0 %v23943_v16 }
 0x880   : > { %42008 = vmatprep.mubr.msk.f32.mxu0 %vm179_vm2, %v23943_v16  ;;  %v23862_v51 = vpop.f32.mrf.mxu1  ;;  %41998 = vmatpush3.msra.mxu1 %v41779_v62 }
 0x881   : > { %42007 = vmatpush3.msra.mxu0 %v23943_v16  ;;  %41999 = vmatprep.subr.mxu1 %v23862_v51 }
 0x882   : > { %42001 = vmatprep.mubr.msk.f32.mxu1 %vm179_vm2, %v23862_v51  ;;  %42009 = vmatmul.mubr.msk.f32.vlgmr.msra.gmra.mxu0 %vm179_vm2, %v41786_v55  ;;  %v41793_v28 = vpop.f32.mrf.mxu1 }
 0x883   : > { %42000 = vmatpush3.msra.mxu1 %v23862_v51 }
 0x884   : > { %42002 = vmatmul.mubr.msk.f32.vlgmr.msra.gmra.mxu1 %vm179_vm2, %v41779_v62  ;;  %42011 = vmatprep.subr.mxu1 %v41793_v28  ;;  %v24024_v0 = vpop.f32.mrf.mxu1 }
 0x885   : > { %42012 = vmatpush3.msra.mxu1 %v41793_v28  ;;  %42015 = vmatprep.mubr.msk.f32.mxu1 %vm179_vm2, %v24024_v0 }
 0x886   : > { %42013 = vmatprep.subr.mxu1 %v24024_v0 }
 0x887   : > { %42014 = vmatpush3.msra.mxu1 %v24024_v0 }
 0x888   : > { %42016 = vmatmul.mubr.msk.f32.vlgmr.msra.gmra.mxu1 %vm179_vm2, %v41793_v28 }
 0x8ba   : > { %v41800_v14 = vpop.f32.mrf.mxu0 }
 0x8bb   : > { %42018 = vmatprep.subr.mxu0 %v41800_v14 }
 0x8bc   : > { %v24105_v4 = vpop.f32.mrf.mxu0  ;;  %42019 = vmatpush3.msra.mxu0 %v41800_v14 }
 0x8bd   : > { %42020 = vmatprep.subr.mxu0 %v24105_v4  ;;  %42022 = vmatprep.mubr.msk.f32.mxu0 %vm179_vm2, %v24105_v4 }
 0x8be   : > { %42021 = vmatpush3.msra.mxu0 %v24105_v4 }
 0x8bf   : > { %42023 = vmatmul.mubr.msk.f32.vlgmr.msra.gmra.mxu0 %vm179_vm2, %v41800_v14 }
 0x8c3   : > { %v41807_v22 = vpop.f32.mrf.mxu1 }
 0x8c4   : > { %42025 = vmatprep.subr.mxu1 %v41807_v22 }
 0x8c5   : > { %v24186_v39 = vpop.f32.mrf.mxu1  ;;  %42026 = vmatpush3.msra.mxu1 %v41807_v22 }
 0x8c6   : > { %42027 = vmatprep.subr.mxu1 %v24186_v39  ;;  %42029 = vmatprep.mubr.msk.f32.mxu1 %vm179_vm2, %v24186_v39 }
 0x8c7   : > { %42028 = vmatpush3.msra.mxu1 %v24186_v39 }
 0x8c8   : > { %42030 = vmatmul.mubr.msk.f32.vlgmr.msra.gmra.mxu1 %vm179_vm2, %v41807_v22 }
 0x8d0   : > { %v41814_v33 = vpop.f32.mrf.mxu0 }
 0x8d1   : > { %42032 = vmatprep.subr.mxu0 %v41814_v33 }
 0x8d2   : > { %v24267_v9 = vpop.f32.mrf.mxu0  ;;  %42033 = vmatpush3.msra.mxu0 %v41814_v33 }
 0x8d3   : > { %42034 = vmatprep.subr.mxu0 %v24267_v9  ;;  %42036 = vmatprep.mubr.msk.f32.mxu0 %vm179_vm2, %v24267_v9 }
 0x8d4   : > { %42035 = vmatpush3.msra.mxu0 %v24267_v9 }
 0x8d5   : > { %42037 = vmatmul.mubr.msk.f32.vlgmr.msra.gmra.mxu0 %vm179_vm2, %v41814_v33 }
 0x8db   : > { %v41821_v40 = vpop.f32.mrf.mxu1 }
 0x8dc   : > { %42039 = vmatprep.subr.mxu1 %v41821_v40 }
 0x8dd   : > { %v24348_v61 = vpop.f32.mrf.mxu1  ;;  %42040 = vmatpush3.msra.mxu1 %v41821_v40 }
 0x8de   : > { %42041 = vmatprep.subr.mxu1 %v24348_v61  ;;  %42043 = vmatprep.mubr.msk.f32.mxu1 %vm179_vm2, %v24348_v61 }
 0x8df   : > { %42042 = vmatpush3.msra.mxu1 %v24348_v61 }
 0x8e0   : > { %42044 = vmatmul.mubr.msk.f32.vlgmr.msra.gmra.mxu1 %vm179_vm2, %v41821_v40 }
 0x8eb   : > { %v41828_v24 = vpop.f32.mrf.mxu0 }
 0x8ec   : > { %42046 = vmatprep.subr.mxu0 %v41828_v24 }
 0x8ed   : > { %v24429_v13 = vpop.f32.mrf.mxu0  ;;  %42047 = vmatpush3.msra.mxu0 %v41828_v24 }
 0x8ee   : > { %42048 = vmatprep.subr.mxu0 %v24429_v13  ;;  %42050 = vmatprep.mubr.msk.f32.mxu0 %vm179_vm2, %v24429_v13 }
 0x8ef   : > { %42049 = vmatpush3.msra.mxu0 %v24429_v13 }
 0x8f0   : > { %42051 = vmatmul.mubr.msk.f32.vlgmr.msra.gmra.mxu0 %vm179_vm2, %v41828_v24 }
 0x8f6   : > { %v41835_v41 = vpop.f32.mrf.mxu1 }
 0x8f7   : > { %42053 = vmatprep.subr.mxu1 %v41835_v41 }
 0x8f8   : > { %v24510_v3 = vpop.f32.mrf.mxu1  ;;  %42054 = vmatpush3.msra.mxu1 %v41835_v41 }
 0x8f9   : > { %42055 = vmatprep.subr.mxu1 %v24510_v3  ;;  %42057 = vmatprep.mubr.msk.f32.mxu1 %vm179_vm2, %v24510_v3  ;;  %v41842_v42 = vpop.f32.mrf.mxu0 }
 0x8fa   : > { %42056 = vmatpush3.msra.mxu1 %v24510_v3  ;;  %42060 = vmatprep.subr.mxu0 %v41842_v42 }
 0x8fb   : > { %42058 = vmatmul.mubr.msk.f32.vlgmr.msra.gmra.mxu1 %vm179_vm2, %v41835_v41  ;;  %v24591_v2 = vpop.f32.mrf.mxu0  ;;  %42061 = vmatpush3.msra.mxu0 %v41842_v42 }
 0x8fc   : > { %42062 = vmatprep.subr.mxu0 %v24591_v2  ;;  %42064 = vmatprep.mubr.msk.f32.mxu0 %vm179_vm2, %v24591_v2 }
 0x8fd   : > { %42063 = vmatpush3.msra.mxu0 %v24591_v2 }
 0x8fe   : > { %42065 = vmatmul.mubr.msk.f32.vlgmr.msra.gmra.mxu0 %vm179_vm2, %v41842_v42 }
 0x900   : > { %v41856_v35 = vpop.f32.mrf.mxu0 }
 0x901   : > { %42074 = vmatprep.subr.mxu0 %v41856_v35 }
 0x902   : > { %v41849_v44 = vpop.f32.mrf.mxu1  ;;  %v24753_v53 = vpop.f32.mrf.mxu0  ;;  %42075 = vmatpush3.msra.mxu0 %v41856_v35 }
 0x903   : > { %42067 = vmatprep.subr.mxu1 %v41849_v44  ;;  %42076 = vmatprep.subr.mxu0 %v24753_v53 }
 0x904   : > { %42078 = vmatprep.mubr.msk.f32.mxu0 %vm179_vm2, %v24753_v53  ;;  %v24672_v15 = vpop.f32.mrf.mxu1  ;;  %42068 = vmatpush3.msra.mxu1 %v41849_v44 }
 0x905   : > { %42077 = vmatpush3.msra.mxu0 %v24753_v53  ;;  %42069 = vmatprep.subr.mxu1 %v24672_v15 }
 0x906   : > { %v41870_v34 = vpop.f32.mrf.mxu0  ;;  %42071 = vmatprep.mubr.msk.f32.mxu1 %vm179_vm2, %v24672_v15  ;;  %42079 = vmatmul.mubr.msk.f32.vlgmr.msra.gmra.mxu0 %vm179_vm2, %v41856_v35 }
 0x907   : > { %42088 = vmatprep.subr.mxu0 %v41870_v34  ;;  %42070 = vmatpush3.msra.mxu1 %v24672_v15 }
 0x908   : > { %v41863_v21 = vpop.f32.mrf.mxu1  ;;  %v24915_v27 = vpop.f32.mrf.mxu0  ;;  %42089 = vmatpush3.msra.mxu0 %v41870_v34  ;;  %42072 = vmatmul.mubr.msk.f32.vlgmr.msra.gmra.mxu1 %vm179_vm2, %v41849_v44 }
 0x909   : > { %42081 = vmatprep.subr.mxu1 %v41863_v21  ;;  %42090 = vmatprep.subr.mxu0 %v24915_v27 }
 0x90a   : > { %42092 = vmatprep.mubr.msk.f32.mxu0 %vm179_vm2, %v24915_v27  ;;  %v24834_v7 = vpop.f32.mrf.mxu1  ;;  %42082 = vmatpush3.msra.mxu1 %v41863_v21 }
 0x90b   : > { %42091 = vmatpush3.msra.mxu0 %v24915_v27  ;;  %42083 = vmatprep.subr.mxu1 %v24834_v7 }
 0x90c   : > { %v41884_v63 = vpop.f32.mrf.mxu0  ;;  %42085 = vmatprep.mubr.msk.f32.mxu1 %vm179_vm2, %v24834_v7  ;;  %42093 = vmatmul.mubr.msk.f32.vlgmr.msra.gmra.mxu0 %vm179_vm2, %v41870_v34 }
 0x90d   : > { %42102 = vmatprep.subr.mxu0 %v41884_v63  ;;  %42084 = vmatpush3.msra.mxu1 %v24834_v7 }
 0x90e   : > { %v41877_v1 = vpop.f32.mrf.mxu1  ;;  %v25077_v43 = vpop.f32.mrf.mxu0  ;;  %42103 = vmatpush3.msra.mxu0 %v41884_v63  ;;  %42086 = vmatmul.mubr.msk.f32.vlgmr.msra.gmra.mxu1 %vm179_vm2, %v41863_v21 }
 0x90f   : > { %42095 = vmatprep.subr.mxu1 %v41877_v1  ;;  %42104 = vmatprep.subr.mxu0 %v25077_v43 }
 0x910   : > { %42106 = vmatprep.mubr.msk.f32.mxu0 %vm179_vm2, %v25077_v43  ;;  %v24996_v60 = vpop.f32.mrf.mxu1  ;;  %42096 = vmatpush3.msra.mxu1 %v41877_v1 }
 0x911   : > { %42105 = vmatpush3.msra.mxu0 %v25077_v43  ;;  %42097 = vmatprep.subr.mxu1 %v24996_v60 }
 0x912   : > { %v41898_v5 = vpop.f32.mrf.mxu0  ;;  %42099 = vmatprep.mubr.msk.f32.mxu1 %vm179_vm2, %v24996_v60  ;;  %42107 = vmatmul.mubr.msk.f32.vlgmr.msra.gmra.mxu0 %vm179_vm2, %v41884_v63 }
 0x913   : > { %42116 = vmatprep.subr.mxu0 %v41898_v5  ;;  %42098 = vmatpush3.msra.mxu1 %v24996_v60 }
 0x914   : > { %v41891_v52 = vpop.f32.mrf.mxu1  ;;  %v25239_v23 = vpop.f32.mrf.mxu0  ;;  %42117 = vmatpush3.msra.mxu0 %v41898_v5  ;;  %42100 = vmatmul.mubr.msk.f32.vlgmr.msra.gmra.mxu1 %vm179_vm2, %v41877_v1 }
 0x915   : > { %42109 = vmatprep.subr.mxu1 %v41891_v52  ;;  %42118 = vmatprep.subr.mxu0 %v25239_v23 }
 0x916   : > { %42120 = vmatprep.mubr.msk.f32.mxu0 %vm179_vm2, %v25239_v23  ;;  %v25158_v19 = vpop.f32.mrf.mxu1  ;;  %42110 = vmatpush3.msra.mxu1 %v41891_v52 }
 0x917   : > { %42119 = vmatpush3.msra.mxu0 %v25239_v23  ;;  %42111 = vmatprep.subr.mxu1 %v25158_v19 }
 0x918   : > { %v41912_v11 = vpop.f32.mrf.mxu0  ;;  %42113 = vmatprep.mubr.msk.f32.mxu1 %vm179_vm2, %v25158_v19  ;;  %42121 = vmatmul.mubr.msk.f32.vlgmr.msra.gmra.mxu0 %vm179_vm2, %v41898_v5 }
 0x919   : > { %42130 = vmatprep.subr.mxu0 %v41912_v11  ;;  %42112 = vmatpush3.msra.mxu1 %v25158_v19 }
 0x91a   : > { %v41905_v6 = vpop.f32.mrf.mxu1  ;;  %v25401_v30 = vpop.f32.mrf.mxu0  ;;  %42131 = vmatpush3.msra.mxu0 %v41912_v11  ;;  %42114 = vmatmul.mubr.msk.f32.vlgmr.msra.gmra.mxu1 %vm179_vm2, %v41891_v52 }
 0x91b   : > { %42123 = vmatprep.subr.mxu1 %v41905_v6  ;;  %42132 = vmatprep.subr.mxu0 %v25401_v30 }
 0x91c   : > { %42134 = vmatprep.mubr.msk.f32.mxu0 %vm179_vm2, %v25401_v30  ;;  %v25320_v59 = vpop.f32.mrf.mxu1  ;;  %42124 = vmatpush3.msra.mxu1 %v41905_v6 }
 0x91d   : > { %42133 = vmatpush3.msra.mxu0 %v25401_v30  ;;  %42125 = vmatprep.subr.mxu1 %v25320_v59 }
 0x91e   : > { %v41926_v31 = vpop.f32.mrf.mxu0  ;;  %42127 = vmatprep.mubr.msk.f32.mxu1 %vm179_vm2, %v25320_v59  ;;  %42135 = vmatmul.mubr.msk.f32.vlgmr.msra.gmra.mxu0 %vm179_vm2, %v41912_v11 }
 0x91f   : > { %42144 = vmatprep.subr.mxu0 %v41926_v31  ;;  %42126 = vmatpush3.msra.mxu1 %v25320_v59 }
 0x920   : > { %v41919_v47 = vpop.f32.mrf.mxu1  ;;  %v25563_v58 = vpop.f32.mrf.mxu0  ;;  %42145 = vmatpush3.msra.mxu0 %v41926_v31  ;;  %42128 = vmatmul.mubr.msk.f32.vlgmr.msra.gmra.mxu1 %vm179_vm2, %v41905_v6 }
 0x921   : > { %42137 = vmatprep.subr.mxu1 %v41919_v47  ;;  %42146 = vmatprep.subr.mxu0 %v25563_v58 }
 0x922   : > { %42148 = vmatprep.mubr.msk.f32.mxu0 %vm179_vm2, %v25563_v58  ;;  %v25482_v8 = vpop.f32.mrf.mxu1  ;;  %42138 = vmatpush3.msra.mxu1 %v41919_v47 }
 0x923   : > { %42147 = vmatpush3.msra.mxu0 %v25563_v58  ;;  %42139 = vmatprep.subr.mxu1 %v25482_v8 }
 0x924   : > { %v41940_v10 = vpop.f32.mrf.mxu0  ;;  %42141 = vmatprep.mubr.msk.f32.mxu1 %vm179_vm2, %v25482_v8  ;;  %42149 = vmatmul.mubr.msk.f32.vlgmr.msra.gmra.mxu0 %vm179_vm2, %v41926_v31 }
 0x925   : > { %42158 = vmatprep.subr.mxu0 %v41940_v10  ;;  %42140 = vmatpush3.msra.mxu1 %v25482_v8 }
 0x926   : > { %v41933_v25 = vpop.f32.mrf.mxu1  ;;  %v25725_v45 = vpop.f32.mrf.mxu0  ;;  %42159 = vmatpush3.msra.mxu0 %v41940_v10  ;;  %42142 = vmatmul.mubr.msk.f32.vlgmr.msra.gmra.mxu1 %vm179_vm2, %v41919_v47 }
 0x927   : > { %42151 = vmatprep.subr.mxu1 %v41933_v25  ;;  %42160 = vmatprep.subr.mxu0 %v25725_v45 }
 0x928   : > { %42162 = vmatprep.mubr.msk.f32.mxu0 %vm179_vm2, %v25725_v45  ;;  %v25644_v37 = vpop.f32.mrf.mxu1  ;;  %42152 = vmatpush3.msra.mxu1 %v41933_v25 }
 0x929   : > { %42161 = vmatpush3.msra.mxu0 %v25725_v45  ;;  %42153 = vmatprep.subr.mxu1 %v25644_v37 }
 0x92a   : > { %v41954_v29 = vpop.f32.mrf.mxu0  ;;  %42155 = vmatprep.mubr.msk.f32.mxu1 %vm179_vm2, %v25644_v37  ;;  %42163 = vmatmul.mubr.msk.f32.vlgmr.msra.gmra.mxu0 %vm179_vm2, %v41940_v10 }
 0x92b   : > { %42172 = vmatprep.subr.mxu0 %v41954_v29  ;;  %42154 = vmatpush3.msra.mxu1 %v25644_v37 }
 0x92c   : > { %v41947_v18 = vpop.f32.mrf.mxu1  ;;  %v25887_v36 = vpop.f32.mrf.mxu0  ;;  %42173 = vmatpush3.msra.mxu0 %v41954_v29  ;;  %42156 = vmatmul.mubr.msk.f32.vlgmr.msra.gmra.mxu1 %vm179_vm2, %v41933_v25 }
 0x92d   : > { %42165 = vmatprep.subr.mxu1 %v41947_v18  ;;  %42174 = vmatprep.subr.mxu0 %v25887_v36 }
 0x92e   : > { %42176 = vmatprep.mubr.msk.f32.mxu0 %vm179_vm2, %v25887_v36  ;;  %v25806_v57 = vpop.f32.mrf.mxu1  ;;  %42166 = vmatpush3.msra.mxu1 %v41947_v18 }
 0x92f   : > { %42175 = vmatpush3.msra.mxu0 %v25887_v36  ;;  %42167 = vmatprep.subr.mxu1 %v25806_v57 }
 0x930   : > { %v41968_v54 = vpop.f32.mrf.mxu0  ;;  %42169 = vmatprep.mubr.msk.f32.mxu1 %vm179_vm2, %v25806_v57  ;;  %42177 = vmatmul.mubr.msk.f32.vlgmr.msra.gmra.mxu0 %vm179_vm2, %v41954_v29 }
 0x931   : > { %42186 = vmatprep.subr.mxu0 %v41968_v54  ;;  %42168 = vmatpush3.msra.mxu1 %v25806_v57 }
 0x932   : > { %v41961_v48 = vpop.f32.mrf.mxu1  ;;  %v26049_v50 = vpop.f32.mrf.mxu0  ;;  %42187 = vmatpush3.msra.mxu0 %v41968_v54  ;;  %42170 = vmatmul.mubr.msk.f32.vlgmr.msra.gmra.mxu1 %vm179_vm2, %v41947_v18 }
 0x933   : > { %42179 = vmatprep.subr.mxu1 %v41961_v48  ;;  %42188 = vmatprep.subr.mxu0 %v26049_v50 }
 0x934   : > { %42190 = vmatprep.mubr.msk.f32.mxu0 %vm179_vm2, %v26049_v50  ;;  %v25968_v38 = vpop.f32.mrf.mxu1  ;;  %42180 = vmatpush3.msra.mxu1 %v41961_v48 }
 0x935   : > { %42189 = vmatpush3.msra.mxu0 %v26049_v50  ;;  %42181 = vmatprep.subr.mxu1 %v25968_v38 }
 0x936   : > { %v41982_v17 = vpop.f32.mrf.mxu0  ;;  %42183 = vmatprep.mubr.msk.f32.mxu1 %vm179_vm2, %v25968_v38  ;;  %42191 = vmatmul.mubr.msk.f32.vlgmr.msra.gmra.mxu0 %vm179_vm2, %v41968_v54 }
 0x937   : > { %42200 = vmatprep.subr.mxu0 %v41982_v17  ;;  %42182 = vmatpush3.msra.mxu1 %v25968_v38 }
 0x938   : > { %v41975_v12 = vpop.f32.mrf.mxu1  ;;  %v26211_v49 = vpop.f32.mrf.mxu0  ;;  %42201 = vmatpush3.msra.mxu0 %v41982_v17  ;;  %42184 = vmatmul.mubr.msk.f32.vlgmr.msra.gmra.mxu1 %vm179_vm2, %v41961_v48 }
 0x939   : > { %42193 = vmatprep.subr.mxu1 %v41975_v12  ;;  %42202 = vmatprep.subr.mxu0 %v26211_v49 }
 0x93a   : > { %42204 = vmatprep.mubr.msk.f32.mxu0 %vm179_vm2, %v26211_v49  ;;  %v26130_v26 = vpop.f32.mrf.mxu1  ;;  %42194 = vmatpush3.msra.mxu1 %v41975_v12 }
 0x93b   : > { %42203 = vmatpush3.msra.mxu0 %v26211_v49  ;;  %42195 = vmatprep.subr.mxu1 %v26130_v26 }
 0x93c   : > { %v41996_v56 = vpop.f32.mrf.mxu0  ;;  %42197 = vmatprep.mubr.msk.f32.mxu1 %vm179_vm2, %v26130_v26  ;;  %42205 = vmatmul.mubr.msk.f32.vlgmr.msra.gmra.mxu0 %vm179_vm2, %v41982_v17 }
 0x93d   : > { %42214 = vmatprep.subr.mxu0 %v41996_v56  ;;  %42196 = vmatpush3.msra.mxu1 %v26130_v26 }
 0x93e   : > { %v41989_v32 = vpop.f32.mrf.mxu1  ;;  %v26373_v46 = vpop.f32.mrf.mxu0  ;;  %42215 = vmatpush3.msra.mxu0 %v41996_v56  ;;  %42198 = vmatmul.mubr.msk.f32.vlgmr.msra.gmra.mxu1 %vm179_vm2, %v41975_v12 }
 0x93f   : > { %42207 = vmatprep.subr.mxu1 %v41989_v32  ;;  %42216 = vmatprep.subr.mxu0 %v26373_v46 }
 0x940   : > { %42218 = vmatprep.mubr.msk.f32.mxu0 %vm179_vm2, %v26373_v46  ;;  %v26292_v20 = vpop.f32.mrf.mxu1  ;;  %42208 = vmatpush3.msra.mxu1 %v41989_v32 }
 0x941   : > { %42217 = vmatpush3.msra.mxu0 %v26373_v46  ;;  %42209 = vmatprep.subr.mxu1 %v26292_v20 }
 0x942   : > { %v42010_v55 = vpop.f32.mrf.mxu0  ;;  %42211 = vmatprep.mubr.msk.f32.mxu1 %vm179_vm2, %v26292_v20  ;;  %42219 = vmatmul.mubr.msk.f32.vlgmr.msra.gmra.mxu0 %vm179_vm2, %v41996_v56 }
 0x943   : > { %42228 = vmatprep.subr.mxu0 %v42010_v55  ;;  %42210 = vmatpush3.msra.mxu1 %v26292_v20 }
 0x944   : > { %v42003_v62 = vpop.f32.mrf.mxu1  ;;  %v26535_v16 = vpop.f32.mrf.mxu0  ;;  %42229 = vmatpush3.msra.mxu0 %v42010_v55  ;;  %42212 = vmatmul.mubr.msk.f32.vlgmr.msra.gmra.mxu1 %vm179_vm2, %v41989_v32 }
 0x945   : > { %42221 = vmatprep.subr.mxu1 %v42003_v62  ;;  %42230 = vmatprep.subr.mxu0 %v26535_v16 }
 0x946   : > { %42232 = vmatprep.mubr.msk.f32.mxu0 %vm179_vm2, %v26535_v16  ;;  %v26454_v51 = vpop.f32.mrf.mxu1  ;;  %42222 = vmatpush3.msra.mxu1 %v42003_v62 }
 0x947   : > { %42231 = vmatpush3.msra.mxu0 %v26535_v16  ;;  %42223 = vmatprep.subr.mxu1 %v26454_v51 }
 0x948   : > { %42225 = vmatprep.mubr.msk.f32.mxu1 %vm179_vm2, %v26454_v51  ;;  %42233 = vmatmul.mubr.msk.f32.vlgmr.msra.gmra.mxu0 %vm179_vm2, %v42010_v55  ;;  %v42017_v28 = vpop.f32.mrf.mxu1 }
 0x949   : > { %42224 = vmatpush3.msra.mxu1 %v26454_v51 }
 0x94a   : > { %42226 = vmatmul.mubr.msk.f32.vlgmr.msra.gmra.mxu1 %vm179_vm2, %v42003_v62  ;;  %42235 = vmatprep.subr.mxu1 %v42017_v28  ;;  %v26616_v0 = vpop.f32.mrf.mxu1 }
 0x94b   : > { %42236 = vmatpush3.msra.mxu1 %v42017_v28  ;;  %42239 = vmatprep.mubr.msk.f32.mxu1 %vm179_vm2, %v26616_v0 }
 0x94c   : > { %42237 = vmatprep.subr.mxu1 %v26616_v0 }
 0x94d   : > { %42238 = vmatpush3.msra.mxu1 %v26616_v0 }
 0x94e   : > { %42240 = vmatmul.mubr.msk.f32.vlgmr.msra.gmra.mxu1 %vm179_vm2, %v42017_v28 }
 0x97f   : > { %v42024_v14 = vpop.f32.mrf.mxu0 }
 0x980   : > { %42242 = vmatprep.subr.mxu0 %v42024_v14 }
 0x981   : > { %v26697_v4 = vpop.f32.mrf.mxu0  ;;  %42243 = vmatpush3.msra.mxu0 %v42024_v14 }
 0x982   : > { %42244 = vmatprep.subr.mxu0 %v26697_v4  ;;  %42246 = vmatprep.mubr.msk.f32.mxu0 %vm179_vm2, %v26697_v4 }
 0x983   : > { %42245 = vmatpush3.msra.mxu0 %v26697_v4 }
 0x984   : > { %42247 = vmatmul.mubr.msk.f32.vlgmr.msra.gmra.mxu0 %vm179_vm2, %v42024_v14 }
 0x988   : > { %v42031_v22 = vpop.f32.mrf.mxu1 }
 0x989   : > { %42249 = vmatprep.subr.mxu1 %v42031_v22 }
 0x98a   : > { %v26778_v39 = vpop.f32.mrf.mxu1  ;;  %42250 = vmatpush3.msra.mxu1 %v42031_v22 }
 0x98b   : > { %42251 = vmatprep.subr.mxu1 %v26778_v39  ;;  %42253 = vmatprep.mubr.msk.f32.mxu1 %vm179_vm2, %v26778_v39 }
 0x98c   : > { %42252 = vmatpush3.msra.mxu1 %v26778_v39 }
 0x98d   : > { %42254 = vmatmul.mubr.msk.f32.vlgmr.msra.gmra.mxu1 %vm179_vm2, %v42031_v22 }
 0x995   : > { %v42038_v33 = vpop.f32.mrf.mxu0 }
 0x996   : > { %42256 = vmatprep.subr.mxu0 %v42038_v33 }
 0x997   : > { %v26859_v9 = vpop.f32.mrf.mxu0  ;;  %42257 = vmatpush3.msra.mxu0 %v42038_v33 }
 0x998   : > { %42258 = vmatprep.subr.mxu0 %v26859_v9  ;;  %42260 = vmatprep.mubr.msk.f32.mxu0 %vm179_vm2, %v26859_v9 }
 0x999   : > { %42259 = vmatpush3.msra.mxu0 %v26859_v9 }
 0x99a   : > { %42261 = vmatmul.mubr.msk.f32.vlgmr.msra.gmra.mxu0 %vm179_vm2, %v42038_v33 }
 0x9a0   : > { %v42045_v40 = vpop.f32.mrf.mxu1 }
 0x9a1   : > { %42263 = vmatprep.subr.mxu1 %v42045_v40 }
 0x9a2   : > { %v26940_v61 = vpop.f32.mrf.mxu1  ;;  %42264 = vmatpush3.msra.mxu1 %v42045_v40 }
 0x9a3   : > { %42265 = vmatprep.subr.mxu1 %v26940_v61  ;;  %42267 = vmatprep.mubr.msk.f32.mxu1 %vm179_vm2, %v26940_v61 }
 0x9a4   : > { %42266 = vmatpush3.msra.mxu1 %v26940_v61 }
 0x9a5   : > { %42268 = vmatmul.mubr.msk.f32.vlgmr.msra.gmra.mxu1 %vm179_vm2, %v42045_v40 }
 0x9b0   : > { %v42052_v24 = vpop.f32.mrf.mxu0 }
 0x9b1   : > { %42270 = vmatprep.subr.mxu0 %v42052_v24 }
 0x9b2   : > { %v27021_v13 = vpop.f32.mrf.mxu0  ;;  %42271 = vmatpush3.msra.mxu0 %v42052_v24 }
 0x9b3   : > { %42272 = vmatprep.subr.mxu0 %v27021_v13  ;;  %42274 = vmatprep.mubr.msk.f32.mxu0 %vm179_vm2, %v27021_v13 }
 0x9b4   : > { %42273 = vmatpush3.msra.mxu0 %v27021_v13 }
 0x9b5   : > { %42275 = vmatmul.mubr.msk.f32.vlgmr.msra.gmra.mxu0 %vm179_vm2, %v42052_v24 }
 0x9bb   : > { %v42059_v41 = vpop.f32.mrf.mxu1 }
 0x9bc   : > { %42277 = vmatprep.subr.mxu1 %v42059_v41 }
 0x9bd   : > { %v27102_v3 = vpop.f32.mrf.mxu1  ;;  %42278 = vmatpush3.msra.mxu1 %v42059_v41 }
 0x9be   : > { %42279 = vmatprep.subr.mxu1 %v27102_v3  ;;  %42281 = vmatprep.mubr.msk.f32.mxu1 %vm179_vm2, %v27102_v3  ;;  %v42066_v42 = vpop.f32.mrf.mxu0 }
 0x9bf   : > { %42280 = vmatpush3.msra.mxu1 %v27102_v3  ;;  %42284 = vmatprep.subr.mxu0 %v42066_v42 }
 0x9c0   : > { %42282 = vmatmul.mubr.msk.f32.vlgmr.msra.gmra.mxu1 %vm179_vm2, %v42059_v41  ;;  %v27183_v2 = vpop.f32.mrf.mxu0  ;;  %42285 = vmatpush3.msra.mxu0 %v42066_v42 }
 0x9c1   : > { %42286 = vmatprep.subr.mxu0 %v27183_v2  ;;  %42288 = vmatprep.mubr.msk.f32.mxu0 %vm179_vm2, %v27183_v2 }
 0x9c2   : > { %42287 = vmatpush3.msra.mxu0 %v27183_v2 }
 0x9c3   : > { %42289 = vmatmul.mubr.msk.f32.vlgmr.msra.gmra.mxu0 %vm179_vm2, %v42066_v42 }
 0x9c6   : > { %v42080_v35 = vpop.f32.mrf.mxu0 }
 0x9c7   : > { %42298 = vmatprep.subr.mxu0 %v42080_v35 }
 0x9c8   : > { %v42073_v44 = vpop.f32.mrf.mxu1  ;;  %v27345_v53 = vpop.f32.mrf.mxu0  ;;  %42299 = vmatpush3.msra.mxu0 %v42080_v35 }
 0x9c9   : > { %42291 = vmatprep.subr.mxu1 %v42073_v44  ;;  %42300 = vmatprep.subr.mxu0 %v27345_v53 }
 0x9ca   : > { %42302 = vmatprep.mubr.msk.f32.mxu0 %vm179_vm2, %v27345_v53  ;;  %v27264_v15 = vpop.f32.mrf.mxu1  ;;  %42292 = vmatpush3.msra.mxu1 %v42073_v44 }
 0x9cb   : > { %42301 = vmatpush3.msra.mxu0 %v27345_v53  ;;  %42293 = vmatprep.subr.mxu1 %v27264_v15 }
 0x9cc   : > { %v42094_v34 = vpop.f32.mrf.mxu0  ;;  %42295 = vmatprep.mubr.msk.f32.mxu1 %vm179_vm2, %v27264_v15  ;;  %42303 = vmatmul.mubr.msk.f32.vlgmr.msra.gmra.mxu0 %vm179_vm2, %v42080_v35 }
 0x9cd   : > { %42312 = vmatprep.subr.mxu0 %v42094_v34  ;;  %42294 = vmatpush3.msra.mxu1 %v27264_v15 }
 0x9ce   : > { %v42087_v21 = vpop.f32.mrf.mxu1  ;;  %v27507_v27 = vpop.f32.mrf.mxu0  ;;  %42313 = vmatpush3.msra.mxu0 %v42094_v34  ;;  %42296 = vmatmul.mubr.msk.f32.vlgmr.msra.gmra.mxu1 %vm179_vm2, %v42073_v44 }
 0x9cf   : > { %42305 = vmatprep.subr.mxu1 %v42087_v21  ;;  %42314 = vmatprep.subr.mxu0 %v27507_v27 }
 0x9d0   : > { %42316 = vmatprep.mubr.msk.f32.mxu0 %vm179_vm2, %v27507_v27  ;;  %v27426_v7 = vpop.f32.mrf.mxu1  ;;  %42306 = vmatpush3.msra.mxu1 %v42087_v21 }
 0x9d1   : > { %42315 = vmatpush3.msra.mxu0 %v27507_v27  ;;  %42307 = vmatprep.subr.mxu1 %v27426_v7 }
 0x9d2   : > { %v42108_v63 = vpop.f32.mrf.mxu0  ;;  %42309 = vmatprep.mubr.msk.f32.mxu1 %vm179_vm2, %v27426_v7  ;;  %42317 = vmatmul.mubr.msk.f32.vlgmr.msra.gmra.mxu0 %vm179_vm2, %v42094_v34 }
 0x9d3   : > { %42326 = vmatprep.subr.mxu0 %v42108_v63  ;;  %42308 = vmatpush3.msra.mxu1 %v27426_v7 }
 0x9d4   : > { %v42101_v1 = vpop.f32.mrf.mxu1  ;;  %v27669_v43 = vpop.f32.mrf.mxu0  ;;  %42327 = vmatpush3.msra.mxu0 %v42108_v63  ;;  %42310 = vmatmul.mubr.msk.f32.vlgmr.msra.gmra.mxu1 %vm179_vm2, %v42087_v21 }
 0x9d5   : > { %42319 = vmatprep.subr.mxu1 %v42101_v1  ;;  %42328 = vmatprep.subr.mxu0 %v27669_v43 }
 0x9d6   : > { %42330 = vmatprep.mubr.msk.f32.mxu0 %vm179_vm2, %v27669_v43  ;;  %v27588_v60 = vpop.f32.mrf.mxu1  ;;  %42320 = vmatpush3.msra.mxu1 %v42101_v1 }
 0x9d7   : > { %42329 = vmatpush3.msra.mxu0 %v27669_v43  ;;  %42321 = vmatprep.subr.mxu1 %v27588_v60 }
 0x9d8   : > { %v42122_v5 = vpop.f32.mrf.mxu0  ;;  %42323 = vmatprep.mubr.msk.f32.mxu1 %vm179_vm2, %v27588_v60  ;;  %42331 = vmatmul.mubr.msk.f32.vlgmr.msra.gmra.mxu0 %vm179_vm2, %v42108_v63 }
 0x9d9   : > { %42340 = vmatprep.subr.mxu0 %v42122_v5  ;;  %42322 = vmatpush3.msra.mxu1 %v27588_v60 }
 0x9da   : > { %v42115_v52 = vpop.f32.mrf.mxu1  ;;  %v27831_v23 = vpop.f32.mrf.mxu0  ;;  %42341 = vmatpush3.msra.mxu0 %v42122_v5  ;;  %42324 = vmatmul.mubr.msk.f32.vlgmr.msra.gmra.mxu1 %vm179_vm2, %v42101_v1 }
 0x9db   : > { %42333 = vmatprep.subr.mxu1 %v42115_v52  ;;  %42342 = vmatprep.subr.mxu0 %v27831_v23 }
 0x9dc   : > { %42344 = vmatprep.mubr.msk.f32.mxu0 %vm179_vm2, %v27831_v23  ;;  %v27750_v19 = vpop.f32.mrf.mxu1  ;;  %42334 = vmatpush3.msra.mxu1 %v42115_v52 }
 0x9dd   : > { %42343 = vmatpush3.msra.mxu0 %v27831_v23  ;;  %42335 = vmatprep.subr.mxu1 %v27750_v19 }
 0x9de   : > { %v42136_v11 = vpop.f32.mrf.mxu0  ;;  %42337 = vmatprep.mubr.msk.f32.mxu1 %vm179_vm2, %v27750_v19  ;;  %42345 = vmatmul.mubr.msk.f32.vlgmr.msra.gmra.mxu0 %vm179_vm2, %v42122_v5 }
 0x9df   : > { %42354 = vmatprep.subr.mxu0 %v42136_v11  ;;  %42336 = vmatpush3.msra.mxu1 %v27750_v19 }
 0x9e0   : > { %v42129_v6 = vpop.f32.mrf.mxu1  ;;  %v27993_v30 = vpop.f32.mrf.mxu0  ;;  %42355 = vmatpush3.msra.mxu0 %v42136_v11  ;;  %42338 = vmatmul.mubr.msk.f32.vlgmr.msra.gmra.mxu1 %vm179_vm2, %v42115_v52 }
 0x9e1   : > { %42347 = vmatprep.subr.mxu1 %v42129_v6  ;;  %42356 = vmatprep.subr.mxu0 %v27993_v30 }
 0x9e2   : > { %42358 = vmatprep.mubr.msk.f32.mxu0 %vm179_vm2, %v27993_v30  ;;  %v27912_v59 = vpop.f32.mrf.mxu1  ;;  %42348 = vmatpush3.msra.mxu1 %v42129_v6 }
 0x9e3   : > { %42357 = vmatpush3.msra.mxu0 %v27993_v30  ;;  %42349 = vmatprep.subr.mxu1 %v27912_v59 }
 0x9e4   : > { %v42150_v31 = vpop.f32.mrf.mxu0  ;;  %42351 = vmatprep.mubr.msk.f32.mxu1 %vm179_vm2, %v27912_v59  ;;  %42359 = vmatmul.mubr.msk.f32.vlgmr.msra.gmra.mxu0 %vm179_vm2, %v42136_v11 }
 0x9e5   : > { %42368 = vmatprep.subr.mxu0 %v42150_v31  ;;  %42350 = vmatpush3.msra.mxu1 %v27912_v59 }
 0x9e6   : > { %v42143_v47 = vpop.f32.mrf.mxu1  ;;  %v28155_v58 = vpop.f32.mrf.mxu0  ;;  %42369 = vmatpush3.msra.mxu0 %v42150_v31  ;;  %42352 = vmatmul.mubr.msk.f32.vlgmr.msra.gmra.mxu1 %vm179_vm2, %v42129_v6 }
 0x9e7   : > { %42361 = vmatprep.subr.mxu1 %v42143_v47  ;;  %42370 = vmatprep.subr.mxu0 %v28155_v58 }
 0x9e8   : > { %42372 = vmatprep.mubr.msk.f32.mxu0 %vm179_vm2, %v28155_v58  ;;  %v28074_v8 = vpop.f32.mrf.mxu1  ;;  %42362 = vmatpush3.msra.mxu1 %v42143_v47 }
 0x9e9   : > { %42371 = vmatpush3.msra.mxu0 %v28155_v58  ;;  %42363 = vmatprep.subr.mxu1 %v28074_v8 }
 0x9ea   : > { %v42164_v10 = vpop.f32.mrf.mxu0  ;;  %42365 = vmatprep.mubr.msk.f32.mxu1 %vm179_vm2, %v28074_v8  ;;  %42373 = vmatmul.mubr.msk.f32.vlgmr.msra.gmra.mxu0 %vm179_vm2, %v42150_v31 }
 0x9eb   : > { %42382 = vmatprep.subr.mxu0 %v42164_v10  ;;  %42364 = vmatpush3.msra.mxu1 %v28074_v8 }
 0x9ec   : > { %v42157_v25 = vpop.f32.mrf.mxu1  ;;  %v28317_v45 = vpop.f32.mrf.mxu0  ;;  %42383 = vmatpush3.msra.mxu0 %v42164_v10  ;;  %42366 = vmatmul.mubr.msk.f32.vlgmr.msra.gmra.mxu1 %vm179_vm2, %v42143_v47 }
 0x9ed   : > { %42375 = vmatprep.subr.mxu1 %v42157_v25  ;;  %42384 = vmatprep.subr.mxu0 %v28317_v45 }
 0x9ee   : > { %42386 = vmatprep.mubr.msk.f32.mxu0 %vm179_vm2, %v28317_v45  ;;  %v28236_v37 = vpop.f32.mrf.mxu1  ;;  %42376 = vmatpush3.msra.mxu1 %v42157_v25 }
 0x9ef   : > { %42385 = vmatpush3.msra.mxu0 %v28317_v45  ;;  %42377 = vmatprep.subr.mxu1 %v28236_v37 }
 0x9f0   : > { %v42178_v29 = vpop.f32.mrf.mxu0  ;;  %42379 = vmatprep.mubr.msk.f32.mxu1 %vm179_vm2, %v28236_v37  ;;  %42387 = vmatmul.mubr.msk.f32.vlgmr.msra.gmra.mxu0 %vm179_vm2, %v42164_v10 }
 0x9f1   : > { %42396 = vmatprep.subr.mxu0 %v42178_v29  ;;  %42378 = vmatpush3.msra.mxu1 %v28236_v37 }
 0x9f2   : > { %v42171_v18 = vpop.f32.mrf.mxu1  ;;  %v28479_v36 = vpop.f32.mrf.mxu0  ;;  %42397 = vmatpush3.msra.mxu0 %v42178_v29  ;;  %42380 = vmatmul.mubr.msk.f32.vlgmr.msra.gmra.mxu1 %vm179_vm2, %v42157_v25 }
 0x9f3   : > { %42389 = vmatprep.subr.mxu1 %v42171_v18  ;;  %42398 = vmatprep.subr.mxu0 %v28479_v36 }
 0x9f4   : > { %42400 = vmatprep.mubr.msk.f32.mxu0 %vm179_vm2, %v28479_v36  ;;  %v28398_v57 = vpop.f32.mrf.mxu1  ;;  %42390 = vmatpush3.msra.mxu1 %v42171_v18 }
 0x9f5   : > { %42399 = vmatpush3.msra.mxu0 %v28479_v36  ;;  %42391 = vmatprep.subr.mxu1 %v28398_v57 }
 0x9f6   : > { %v42192_v54 = vpop.f32.mrf.mxu0  ;;  %42393 = vmatprep.mubr.msk.f32.mxu1 %vm179_vm2, %v28398_v57  ;;  %42401 = vmatmul.mubr.msk.f32.vlgmr.msra.gmra.mxu0 %vm179_vm2, %v42178_v29 }
 0x9f7   : > { %42410 = vmatprep.subr.mxu0 %v42192_v54  ;;  %42392 = vmatpush3.msra.mxu1 %v28398_v57 }
 0x9f8   : > { %v42185_v48 = vpop.f32.mrf.mxu1  ;;  %v28641_v50 = vpop.f32.mrf.mxu0  ;;  %42411 = vmatpush3.msra.mxu0 %v42192_v54  ;;  %42394 = vmatmul.mubr.msk.f32.vlgmr.msra.gmra.mxu1 %vm179_vm2, %v42171_v18 }
 0x9f9   : > { %42403 = vmatprep.subr.mxu1 %v42185_v48  ;;  %42412 = vmatprep.subr.mxu0 %v28641_v50 }
 0x9fa   : > { %42414 = vmatprep.mubr.msk.f32.mxu0 %vm179_vm2, %v28641_v50  ;;  %v28560_v38 = vpop.f32.mrf.mxu1  ;;  %42404 = vmatpush3.msra.mxu1 %v42185_v48 }
 0x9fb   : > { %42413 = vmatpush3.msra.mxu0 %v28641_v50  ;;  %42405 = vmatprep.subr.mxu1 %v28560_v38 }
 0x9fc   : > { %v42206_v17 = vpop.f32.mrf.mxu0  ;;  %42407 = vmatprep.mubr.msk.f32.mxu1 %vm179_vm2, %v28560_v38  ;;  %42415 = vmatmul.mubr.msk.f32.vlgmr.msra.gmra.mxu0 %vm179_vm2, %v42192_v54 }
 0x9fd   : > { %42424 = vmatprep.subr.mxu0 %v42206_v17  ;;  %42406 = vmatpush3.msra.mxu1 %v28560_v38 }
 0x9fe   : > { %v42199_v12 = vpop.f32.mrf.mxu1  ;;  %v28803_v49 = vpop.f32.mrf.mxu0  ;;  %42425 = vmatpush3.msra.mxu0 %v42206_v17  ;;  %42408 = vmatmul.mubr.msk.f32.vlgmr.msra.gmra.mxu1 %vm179_vm2, %v42185_v48 }
 0x9ff   : > { %42417 = vmatprep.subr.mxu1 %v42199_v12  ;;  %42426 = vmatprep.subr.mxu0 %v28803_v49 }
 0xa00   : > { %42428 = vmatprep.mubr.msk.f32.mxu0 %vm179_vm2, %v28803_v49  ;;  %v28722_v26 = vpop.f32.mrf.mxu1  ;;  %42418 = vmatpush3.msra.mxu1 %v42199_v12 }
 0xa01   : > { %42427 = vmatpush3.msra.mxu0 %v28803_v49  ;;  %42419 = vmatprep.subr.mxu1 %v28722_v26 }
 0xa02   : > { %v42220_v56 = vpop.f32.mrf.mxu0  ;;  %42421 = vmatprep.mubr.msk.f32.mxu1 %vm179_vm2, %v28722_v26  ;;  %42429 = vmatmul.mubr.msk.f32.vlgmr.msra.gmra.mxu0 %vm179_vm2, %v42206_v17 }
 0xa03   : > { %42438 = vmatprep.subr.mxu0 %v42220_v56  ;;  %42420 = vmatpush3.msra.mxu1 %v28722_v26 }
 0xa04   : > { %v42213_v32 = vpop.f32.mrf.mxu1  ;;  %v28965_v46 = vpop.f32.mrf.mxu0  ;;  %42439 = vmatpush3.msra.mxu0 %v42220_v56  ;;  %42422 = vmatmul.mubr.msk.f32.vlgmr.msra.gmra.mxu1 %vm179_vm2, %v42199_v12 }
 0xa05   : > { %42431 = vmatprep.subr.mxu1 %v42213_v32  ;;  %42440 = vmatprep.subr.mxu0 %v28965_v46 }
 0xa06   : > { %42442 = vmatprep.mubr.msk.f32.mxu0 %vm179_vm2, %v28965_v46  ;;  %v28884_v20 = vpop.f32.mrf.mxu1  ;;  %42432 = vmatpush3.msra.mxu1 %v42213_v32 }
 0xa07   : > { %42441 = vmatpush3.msra.mxu0 %v28965_v46  ;;  %42433 = vmatprep.subr.mxu1 %v28884_v20 }
 0xa08   : > { %v42234_v55 = vpop.f32.mrf.mxu0  ;;  %42435 = vmatprep.mubr.msk.f32.mxu1 %vm179_vm2, %v28884_v20  ;;  %42443 = vmatmul.mubr.msk.f32.vlgmr.msra.gmra.mxu0 %vm179_vm2, %v42220_v56 }
 0xa09   : > { %42452 = vmatprep.subr.mxu0 %v42234_v55  ;;  %42434 = vmatpush3.msra.mxu1 %v28884_v20 }
 0xa0a   : > { %v42227_v62 = vpop.f32.mrf.mxu1  ;;  %v29127_v16 = vpop.f32.mrf.mxu0  ;;  %42453 = vmatpush3.msra.mxu0 %v42234_v55  ;;  %42436 = vmatmul.mubr.msk.f32.vlgmr.msra.gmra.mxu1 %vm179_vm2, %v42213_v32 }
 0xa0b   : > { %42445 = vmatprep.subr.mxu1 %v42227_v62  ;;  %42454 = vmatprep.subr.mxu0 %v29127_v16 }
 0xa0c   : > { %42456 = vmatprep.mubr.msk.f32.mxu0 %vm179_vm2, %v29127_v16  ;;  %v29046_v51 = vpop.f32.mrf.mxu1  ;;  %42446 = vmatpush3.msra.mxu1 %v42227_v62 }
 0xa0d   : > { %42455 = vmatpush3.msra.mxu0 %v29127_v16  ;;  %42447 = vmatprep.subr.mxu1 %v29046_v51 }
 0xa0e   : > { %42449 = vmatprep.mubr.msk.f32.mxu1 %vm179_vm2, %v29046_v51  ;;  %42457 = vmatmul.mubr.msk.f32.vlgmr.msra.gmra.mxu0 %vm179_vm2, %v42234_v55  ;;  %v42241_v28 = vpop.f32.mrf.mxu1 }
 0xa0f   : > { %42448 = vmatpush3.msra.mxu1 %v29046_v51 }
 0xa10   : > { %42450 = vmatmul.mubr.msk.f32.vlgmr.msra.gmra.mxu1 %vm179_vm2, %v42227_v62  ;;  %42459 = vmatprep.subr.mxu1 %v42241_v28  ;;  %v29208_v0 = vpop.f32.mrf.mxu1 }
 0xa11   : > { %42460 = vmatpush3.msra.mxu1 %v42241_v28  ;;  %42463 = vmatprep.mubr.msk.f32.mxu1 %vm179_vm2, %v29208_v0 }
 0xa12   : > { %42461 = vmatprep.subr.mxu1 %v29208_v0 }
 0xa13   : > { %42462 = vmatpush3.msra.mxu1 %v29208_v0 }
 0xa14   : > { %42464 = vmatmul.mubr.msk.f32.vlgmr.msra.gmra.mxu1 %vm179_vm2, %v42241_v28 }
 0xa44   : > { %v42248_v14 = vpop.f32.mrf.mxu0 }
 0xa45   : > { %42466 = vmatprep.subr.mxu0 %v42248_v14 }
 0xa46   : > { %v29289_v4 = vpop.f32.mrf.mxu0  ;;  %42467 = vmatpush3.msra.mxu0 %v42248_v14 }
 0xa47   : > { %42468 = vmatprep.subr.mxu0 %v29289_v4  ;;  %42470 = vmatprep.mubr.msk.f32.mxu0 %vm179_vm2, %v29289_v4 }
 0xa48   : > { %42469 = vmatpush3.msra.mxu0 %v29289_v4 }
 0xa49   : > { %42471 = vmatmul.mubr.msk.f32.vlgmr.msra.gmra.mxu0 %vm179_vm2, %v42248_v14 }
 0xa4d   : > { %v42255_v22 = vpop.f32.mrf.mxu1 }
 0xa4e   : > { %42473 = vmatprep.subr.mxu1 %v42255_v22 }
 0xa4f   : > { %v29370_v39 = vpop.f32.mrf.mxu1  ;;  %42474 = vmatpush3.msra.mxu1 %v42255_v22 }
 0xa50   : > { %42475 = vmatprep.subr.mxu1 %v29370_v39  ;;  %42477 = vmatprep.mubr.msk.f32.mxu1 %vm179_vm2, %v29370_v39 }
 0xa51   : > { %42476 = vmatpush3.msra.mxu1 %v29370_v39 }
 0xa52   : > { %42478 = vmatmul.mubr.msk.f32.vlgmr.msra.gmra.mxu1 %vm179_vm2, %v42255_v22 }
 0xa5a   : > { %v42262_v33 = vpop.f32.mrf.mxu0 }
 0xa5b   : > { %42480 = vmatprep.subr.mxu0 %v42262_v33 }
 0xa5c   : > { %v29451_v9 = vpop.f32.mrf.mxu0  ;;  %42481 = vmatpush3.msra.mxu0 %v42262_v33 }
 0xa5d   : > { %42482 = vmatprep.subr.mxu0 %v29451_v9  ;;  %42484 = vmatprep.mubr.msk.f32.mxu0 %vm179_vm2, %v29451_v9 }
 0xa5e   : > { %42483 = vmatpush3.msra.mxu0 %v29451_v9 }
 0xa5f   : > { %42485 = vmatmul.mubr.msk.f32.vlgmr.msra.gmra.mxu0 %vm179_vm2, %v42262_v33 }
 0xa65   : > { %v42269_v40 = vpop.f32.mrf.mxu1 }
 0xa66   : > { %42487 = vmatprep.subr.mxu1 %v42269_v40 }
 0xa67   : > { %v29532_v61 = vpop.f32.mrf.mxu1  ;;  %42488 = vmatpush3.msra.mxu1 %v42269_v40 }
 0xa68   : > { %42489 = vmatprep.subr.mxu1 %v29532_v61  ;;  %42491 = vmatprep.mubr.msk.f32.mxu1 %vm179_vm2, %v29532_v61 }
 0xa69   : > { %42490 = vmatpush3.msra.mxu1 %v29532_v61 }
 0xa6a   : > { %42492 = vmatmul.mubr.msk.f32.vlgmr.msra.gmra.mxu1 %vm179_vm2, %v42269_v40 }
 0xa75   : > { %v42276_v24 = vpop.f32.mrf.mxu0 }
 0xa76   : > { %42494 = vmatprep.subr.mxu0 %v42276_v24 }
 0xa77   : > { %v29613_v13 = vpop.f32.mrf.mxu0  ;;  %42495 = vmatpush3.msra.mxu0 %v42276_v24 }
 0xa78   : > { %42496 = vmatprep.subr.mxu0 %v29613_v13  ;;  %42498 = vmatprep.mubr.msk.f32.mxu0 %vm179_vm2, %v29613_v13 }
 0xa79   : > { %42497 = vmatpush3.msra.mxu0 %v29613_v13 }
 0xa7a   : > { %42499 = vmatmul.mubr.msk.f32.vlgmr.msra.gmra.mxu0 %vm179_vm2, %v42276_v24 }
 0xa80   : > { %v42283_v41 = vpop.f32.mrf.mxu1 }
 0xa81   : > { %42501 = vmatprep.subr.mxu1 %v42283_v41 }
 0xa82   : > { %v29694_v3 = vpop.f32.mrf.mxu1  ;;  %42502 = vmatpush3.msra.mxu1 %v42283_v41 }
 0xa83   : > { %42503 = vmatprep.subr.mxu1 %v29694_v3  ;;  %42505 = vmatprep.mubr.msk.f32.mxu1 %vm179_vm2, %v29694_v3  ;;  %v42290_v42 = vpop.f32.mrf.mxu0 }
 0xa84   : > { %42504 = vmatpush3.msra.mxu1 %v29694_v3  ;;  %42508 = vmatprep.subr.mxu0 %v42290_v42 }
 0xa85   : > { %42506 = vmatmul.mubr.msk.f32.vlgmr.msra.gmra.mxu1 %vm179_vm2, %v42283_v41  ;;  %v29775_v2 = vpop.f32.mrf.mxu0  ;;  %42509 = vmatpush3.msra.mxu0 %v42290_v42 }
 0xa86   : > { %42510 = vmatprep.subr.mxu0 %v29775_v2  ;;  %42512 = vmatprep.mubr.msk.f32.mxu0 %vm179_vm2, %v29775_v2 }
 0xa87   : > { %42511 = vmatpush3.msra.mxu0 %v29775_v2 }
 0xa88   : > { %42513 = vmatmul.mubr.msk.f32.vlgmr.msra.gmra.mxu0 %vm179_vm2, %v42290_v42 }
 0xa8c   : > { %v42304_v35 = vpop.f32.mrf.mxu0 }
 0xa8d   : > { %42522 = vmatprep.subr.mxu0 %v42304_v35 }
 0xa8e   : > { %v42297_v44 = vpop.f32.mrf.mxu1  ;;  %v29937_v53 = vpop.f32.mrf.mxu0  ;;  %42523 = vmatpush3.msra.mxu0 %v42304_v35 }
 0xa8f   : > { %42515 = vmatprep.subr.mxu1 %v42297_v44  ;;  %42524 = vmatprep.subr.mxu0 %v29937_v53 }
 0xa90   : > { %42526 = vmatprep.mubr.msk.f32.mxu0 %vm179_vm2, %v29937_v53  ;;  %v29856_v15 = vpop.f32.mrf.mxu1  ;;  %42516 = vmatpush3.msra.mxu1 %v42297_v44 }
 0xa91   : > { %42525 = vmatpush3.msra.mxu0 %v29937_v53  ;;  %42517 = vmatprep.subr.mxu1 %v29856_v15 }
 0xa92   : > { %v42318_v34 = vpop.f32.mrf.mxu0  ;;  %42519 = vmatprep.mubr.msk.f32.mxu1 %vm179_vm2, %v29856_v15  ;;  %42527 = vmatmul.mubr.msk.f32.vlgmr.msra.gmra.mxu0 %vm179_vm2, %v42304_v35 }
 0xa93   : > { %42536 = vmatprep.subr.mxu0 %v42318_v34  ;;  %42518 = vmatpush3.msra.mxu1 %v29856_v15 }
 0xa94   : > { %v42311_v21 = vpop.f32.mrf.mxu1  ;;  %v30099_v27 = vpop.f32.mrf.mxu0  ;;  %42537 = vmatpush3.msra.mxu0 %v42318_v34  ;;  %42520 = vmatmul.mubr.msk.f32.vlgmr.msra.gmra.mxu1 %vm179_vm2, %v42297_v44 }
 0xa95   : > { %42529 = vmatprep.subr.mxu1 %v42311_v21  ;;  %42538 = vmatprep.subr.mxu0 %v30099_v27 }
 0xa96   : > { %42540 = vmatprep.mubr.msk.f32.mxu0 %vm179_vm2, %v30099_v27  ;;  %v30018_v7 = vpop.f32.mrf.mxu1  ;;  %42530 = vmatpush3.msra.mxu1 %v42311_v21 }
 0xa97   : > { %42539 = vmatpush3.msra.mxu0 %v30099_v27  ;;  %42531 = vmatprep.subr.mxu1 %v30018_v7 }
 0xa98   : > { %v42332_v63 = vpop.f32.mrf.mxu0  ;;  %42533 = vmatprep.mubr.msk.f32.mxu1 %vm179_vm2, %v30018_v7  ;;  %42541 = vmatmul.mubr.msk.f32.vlgmr.msra.gmra.mxu0 %vm179_vm2, %v42318_v34 }
 0xa99   : > { %42550 = vmatprep.subr.mxu0 %v42332_v63  ;;  %42532 = vmatpush3.msra.mxu1 %v30018_v7 }
 0xa9a   : > { %v42325_v1 = vpop.f32.mrf.mxu1  ;;  %v30261_v43 = vpop.f32.mrf.mxu0  ;;  %42551 = vmatpush3.msra.mxu0 %v42332_v63  ;;  %42534 = vmatmul.mubr.msk.f32.vlgmr.msra.gmra.mxu1 %vm179_vm2, %v42311_v21 }
 0xa9b   : > { %42543 = vmatprep.subr.mxu1 %v42325_v1  ;;  %42552 = vmatprep.subr.mxu0 %v30261_v43 }
 0xa9c   : > { %42554 = vmatprep.mubr.msk.f32.mxu0 %vm179_vm2, %v30261_v43  ;;  %v30180_v60 = vpop.f32.mrf.mxu1  ;;  %42544 = vmatpush3.msra.mxu1 %v42325_v1 }
 0xa9d   : > { %42553 = vmatpush3.msra.mxu0 %v30261_v43  ;;  %42545 = vmatprep.subr.mxu1 %v30180_v60 }
 0xa9e   : > { %v42346_v5 = vpop.f32.mrf.mxu0  ;;  %42547 = vmatprep.mubr.msk.f32.mxu1 %vm179_vm2, %v30180_v60  ;;  %42555 = vmatmul.mubr.msk.f32.vlgmr.msra.gmra.mxu0 %vm179_vm2, %v42332_v63 }
 0xa9f   : > { %42564 = vmatprep.subr.mxu0 %v42346_v5  ;;  %42546 = vmatpush3.msra.mxu1 %v30180_v60 }
 0xaa0   : > { %v42339_v52 = vpop.f32.mrf.mxu1  ;;  %v30423_v23 = vpop.f32.mrf.mxu0  ;;  %42565 = vmatpush3.msra.mxu0 %v42346_v5  ;;  %42548 = vmatmul.mubr.msk.f32.vlgmr.msra.gmra.mxu1 %vm179_vm2, %v42325_v1 }
 0xaa1   : > { %42557 = vmatprep.subr.mxu1 %v42339_v52  ;;  %42566 = vmatprep.subr.mxu0 %v30423_v23 }
 0xaa2   : > { %42568 = vmatprep.mubr.msk.f32.mxu0 %vm179_vm2, %v30423_v23  ;;  %v30342_v19 = vpop.f32.mrf.mxu1  ;;  %42558 = vmatpush3.msra.mxu1 %v42339_v52 }
 0xaa3   : > { %42567 = vmatpush3.msra.mxu0 %v30423_v23  ;;  %42559 = vmatprep.subr.mxu1 %v30342_v19 }
 0xaa4   : > { %v42360_v11 = vpop.f32.mrf.mxu0  ;;  %42561 = vmatprep.mubr.msk.f32.mxu1 %vm179_vm2, %v30342_v19  ;;  %42569 = vmatmul.mubr.msk.f32.vlgmr.msra.gmra.mxu0 %vm179_vm2, %v42346_v5 }
 0xaa5   : > { %42578 = vmatprep.subr.mxu0 %v42360_v11  ;;  %42560 = vmatpush3.msra.mxu1 %v30342_v19 }
 0xaa6   : > { %v42353_v6 = vpop.f32.mrf.mxu1  ;;  %v30585_v30 = vpop.f32.mrf.mxu0  ;;  %42579 = vmatpush3.msra.mxu0 %v42360_v11  ;;  %42562 = vmatmul.mubr.msk.f32.vlgmr.msra.gmra.mxu1 %vm179_vm2, %v42339_v52 }
 0xaa7   : > { %42571 = vmatprep.subr.mxu1 %v42353_v6  ;;  %42580 = vmatprep.subr.mxu0 %v30585_v30 }
 0xaa8   : > { %42582 = vmatprep.mubr.msk.f32.mxu0 %vm179_vm2, %v30585_v30  ;;  %v30504_v59 = vpop.f32.mrf.mxu1  ;;  %42572 = vmatpush3.msra.mxu1 %v42353_v6 }
 0xaa9   : > { %42581 = vmatpush3.msra.mxu0 %v30585_v30  ;;  %42573 = vmatprep.subr.mxu1 %v30504_v59 }
 0xaaa   : > { %v42374_v31 = vpop.f32.mrf.mxu0  ;;  %42575 = vmatprep.mubr.msk.f32.mxu1 %vm179_vm2, %v30504_v59  ;;  %42583 = vmatmul.mubr.msk.f32.vlgmr.msra.gmra.mxu0 %vm179_vm2, %v42360_v11 }
 0xaab   : > { %42592 = vmatprep.subr.mxu0 %v42374_v31  ;;  %42574 = vmatpush3.msra.mxu1 %v30504_v59 }
 0xaac   : > { %v42367_v47 = vpop.f32.mrf.mxu1  ;;  %v30747_v58 = vpop.f32.mrf.mxu0  ;;  %42593 = vmatpush3.msra.mxu0 %v42374_v31  ;;  %42576 = vmatmul.mubr.msk.f32.vlgmr.msra.gmra.mxu1 %vm179_vm2, %v42353_v6 }
 0xaad   : > { %42585 = vmatprep.subr.mxu1 %v42367_v47  ;;  %42594 = vmatprep.subr.mxu0 %v30747_v58 }
 0xaae   : > { %42596 = vmatprep.mubr.msk.f32.mxu0 %vm179_vm2, %v30747_v58  ;;  %v30666_v8 = vpop.f32.mrf.mxu1  ;;  %42586 = vmatpush3.msra.mxu1 %v42367_v47 }
 0xaaf   : > { %42595 = vmatpush3.msra.mxu0 %v30747_v58  ;;  %42587 = vmatprep.subr.mxu1 %v30666_v8 }
 0xab0   : > { %v42388_v10 = vpop.f32.mrf.mxu0  ;;  %42589 = vmatprep.mubr.msk.f32.mxu1 %vm179_vm2, %v30666_v8  ;;  %42597 = vmatmul.mubr.msk.f32.vlgmr.msra.gmra.mxu0 %vm179_vm2, %v42374_v31 }
 0xab1   : > { %42606 = vmatprep.subr.mxu0 %v42388_v10  ;;  %42588 = vmatpush3.msra.mxu1 %v30666_v8 }
 0xab2   : > { %v42381_v25 = vpop.f32.mrf.mxu1  ;;  %v30909_v45 = vpop.f32.mrf.mxu0  ;;  %42607 = vmatpush3.msra.mxu0 %v42388_v10  ;;  %42590 = vmatmul.mubr.msk.f32.vlgmr.msra.gmra.mxu1 %vm179_vm2, %v42367_v47 }
 0xab3   : > { %42599 = vmatprep.subr.mxu1 %v42381_v25  ;;  %42608 = vmatprep.subr.mxu0 %v30909_v45 }
 0xab4   : > { %42610 = vmatprep.mubr.msk.f32.mxu0 %vm179_vm2, %v30909_v45  ;;  %v30828_v37 = vpop.f32.mrf.mxu1  ;;  %42600 = vmatpush3.msra.mxu1 %v42381_v25 }
 0xab5   : > { %42609 = vmatpush3.msra.mxu0 %v30909_v45  ;;  %42601 = vmatprep.subr.mxu1 %v30828_v37 }
 0xab6   : > { %v42402_v29 = vpop.f32.mrf.mxu0  ;;  %42603 = vmatprep.mubr.msk.f32.mxu1 %vm179_vm2, %v30828_v37  ;;  %42611 = vmatmul.mubr.msk.f32.vlgmr.msra.gmra.mxu0 %vm179_vm2, %v42388_v10 }
 0xab7   : > { %42620 = vmatprep.subr.mxu0 %v42402_v29  ;;  %42602 = vmatpush3.msra.mxu1 %v30828_v37 }
 0xab8   : > { %v42395_v18 = vpop.f32.mrf.mxu1  ;;  %v31071_v36 = vpop.f32.mrf.mxu0  ;;  %42621 = vmatpush3.msra.mxu0 %v42402_v29  ;;  %42604 = vmatmul.mubr.msk.f32.vlgmr.msra.gmra.mxu1 %vm179_vm2, %v42381_v25 }
 0xab9   : > { %42613 = vmatprep.subr.mxu1 %v42395_v18  ;;  %42622 = vmatprep.subr.mxu0 %v31071_v36 }
 0xaba   : > { %42624 = vmatprep.mubr.msk.f32.mxu0 %vm179_vm2, %v31071_v36  ;;  %v30990_v57 = vpop.f32.mrf.mxu1  ;;  %42614 = vmatpush3.msra.mxu1 %v42395_v18 }
 0xabb   : > { %42623 = vmatpush3.msra.mxu0 %v31071_v36  ;;  %42615 = vmatprep.subr.mxu1 %v30990_v57 }
 0xabc   : > { %v42416_v54 = vpop.f32.mrf.mxu0  ;;  %42617 = vmatprep.mubr.msk.f32.mxu1 %vm179_vm2, %v30990_v57  ;;  %42625 = vmatmul.mubr.msk.f32.vlgmr.msra.gmra.mxu0 %vm179_vm2, %v42402_v29 }
 0xabd   : > { %42634 = vmatprep.subr.mxu0 %v42416_v54  ;;  %42616 = vmatpush3.msra.mxu1 %v30990_v57 }
 0xabe   : > { %v42409_v48 = vpop.f32.mrf.mxu1  ;;  %v31233_v50 = vpop.f32.mrf.mxu0  ;;  %42635 = vmatpush3.msra.mxu0 %v42416_v54  ;;  %42618 = vmatmul.mubr.msk.f32.vlgmr.msra.gmra.mxu1 %vm179_vm2, %v42395_v18 }
 0xabf   : > { %42627 = vmatprep.subr.mxu1 %v42409_v48  ;;  %42636 = vmatprep.subr.mxu0 %v31233_v50 }
 0xac0   : > { %42638 = vmatprep.mubr.msk.f32.mxu0 %vm179_vm2, %v31233_v50  ;;  %v31152_v38 = vpop.f32.mrf.mxu1  ;;  %42628 = vmatpush3.msra.mxu1 %v42409_v48 }
 0xac1   : > { %42637 = vmatpush3.msra.mxu0 %v31233_v50  ;;  %42629 = vmatprep.subr.mxu1 %v31152_v38 }
 0xac2   : > { %v42430_v17 = vpop.f32.mrf.mxu0  ;;  %42631 = vmatprep.mubr.msk.f32.mxu1 %vm179_vm2, %v31152_v38  ;;  %42639 = vmatmul.mubr.msk.f32.vlgmr.msra.gmra.mxu0 %vm179_vm2, %v42416_v54 }
 0xac3   : > { %42648 = vmatprep.subr.mxu0 %v42430_v17  ;;  %42630 = vmatpush3.msra.mxu1 %v31152_v38 }
 0xac4   : > { %v42423_v12 = vpop.f32.mrf.mxu1  ;;  %v31395_v49 = vpop.f32.mrf.mxu0  ;;  %42649 = vmatpush3.msra.mxu0 %v42430_v17  ;;  %42632 = vmatmul.mubr.msk.f32.vlgmr.msra.gmra.mxu1 %vm179_vm2, %v42409_v48 }
 0xac5   : > { %42641 = vmatprep.subr.mxu1 %v42423_v12  ;;  %42650 = vmatprep.subr.mxu0 %v31395_v49 }
 0xac6   : > { %42652 = vmatprep.mubr.msk.f32.mxu0 %vm179_vm2, %v31395_v49  ;;  %v31314_v26 = vpop.f32.mrf.mxu1  ;;  %42642 = vmatpush3.msra.mxu1 %v42423_v12 }
 0xac7   : > { %42651 = vmatpush3.msra.mxu0 %v31395_v49  ;;  %42643 = vmatprep.subr.mxu1 %v31314_v26 }
 0xac8   : > { %v42444_v56 = vpop.f32.mrf.mxu0  ;;  %42645 = vmatprep.mubr.msk.f32.mxu1 %vm179_vm2, %v31314_v26  ;;  %42653 = vmatmul.mubr.msk.f32.vlgmr.msra.gmra.mxu0 %vm179_vm2, %v42430_v17 }
 0xac9   : > { %42662 = vmatprep.subr.mxu0 %v42444_v56  ;;  %42644 = vmatpush3.msra.mxu1 %v31314_v26 }
 0xaca   : > { %v42437_v32 = vpop.f32.mrf.mxu1  ;;  %v31557_v46 = vpop.f32.mrf.mxu0  ;;  %42663 = vmatpush3.msra.mxu0 %v42444_v56  ;;  %42646 = vmatmul.mubr.msk.f32.vlgmr.msra.gmra.mxu1 %vm179_vm2, %v42423_v12 }
 0xacb   : > { %42655 = vmatprep.subr.mxu1 %v42437_v32  ;;  %42664 = vmatprep.subr.mxu0 %v31557_v46 }
 0xacc   : > { %42666 = vmatprep.mubr.msk.f32.mxu0 %vm179_vm2, %v31557_v46  ;;  %v31476_v20 = vpop.f32.mrf.mxu1  ;;  %42656 = vmatpush3.msra.mxu1 %v42437_v32 }
 0xacd   : > { %42665 = vmatpush3.msra.mxu0 %v31557_v46  ;;  %42657 = vmatprep.subr.mxu1 %v31476_v20 }
 0xace   : > { %v42458_v55 = vpop.f32.mrf.mxu0  ;;  %42659 = vmatprep.mubr.msk.f32.mxu1 %vm179_vm2, %v31476_v20  ;;  %42667 = vmatmul.mubr.msk.f32.vlgmr.msra.gmra.mxu0 %vm179_vm2, %v42444_v56 }
 0xacf   : > { %42676 = vmatprep.subr.mxu0 %v42458_v55  ;;  %42658 = vmatpush3.msra.mxu1 %v31476_v20 }
 0xad0   : > { %v42451_v62 = vpop.f32.mrf.mxu1  ;;  %v31719_v16 = vpop.f32.mrf.mxu0  ;;  %42677 = vmatpush3.msra.mxu0 %v42458_v55  ;;  %42660 = vmatmul.mubr.msk.f32.vlgmr.msra.gmra.mxu1 %vm179_vm2, %v42437_v32 }
 0xad1   : > { %42669 = vmatprep.subr.mxu1 %v42451_v62  ;;  %42678 = vmatprep.subr.mxu0 %v31719_v16 }
 0xad2   : > { %42680 = vmatprep.mubr.msk.f32.mxu0 %vm179_vm2, %v31719_v16  ;;  %v31638_v51 = vpop.f32.mrf.mxu1  ;;  %42670 = vmatpush3.msra.mxu1 %v42451_v62 }
 0xad3   : > { %42679 = vmatpush3.msra.mxu0 %v31719_v16  ;;  %42671 = vmatprep.subr.mxu1 %v31638_v51 }
 0xad4   : > { %42673 = vmatprep.mubr.msk.f32.mxu1 %vm179_vm2, %v31638_v51  ;;  %42681 = vmatmul.mubr.msk.f32.vlgmr.msra.gmra.mxu0 %vm179_vm2, %v42458_v55  ;;  %v42465_v28 = vpop.f32.mrf.mxu1 }
 0xad5   : > { %42672 = vmatpush3.msra.mxu1 %v31638_v51 }
 0xad6   : > { %42674 = vmatmul.mubr.msk.f32.vlgmr.msra.gmra.mxu1 %vm179_vm2, %v42451_v62  ;;  %42683 = vmatprep.subr.mxu1 %v42465_v28  ;;  %v31800_v0 = vpop.f32.mrf.mxu1 }
 0xad7   : > { %42684 = vmatpush3.msra.mxu1 %v42465_v28  ;;  %42687 = vmatprep.mubr.msk.f32.mxu1 %vm179_vm2, %v31800_v0 }
 0xad8   : > { %42685 = vmatprep.subr.mxu1 %v31800_v0 }
 0xad9   : > { %42686 = vmatpush3.msra.mxu1 %v31800_v0 }
 0xada   : > { %42688 = vmatmul.mubr.msk.f32.vlgmr.msra.gmra.mxu1 %vm179_vm2, %v42465_v28 }
 0xb09   : > { %v42472_v14 = vpop.f32.mrf.mxu0 }
 0xb0b   : > { %v31881_v4 = vpop.f32.mrf.mxu0 }
 0xb0c   : > { %42694 = vmatprep.mubr.msk.f32.mxu0 %vm179_vm2, %v31881_v4 }
 0xb12   : > { %v42479_v22 = vpop.f32.mrf.mxu1 }
 0xb13   : > { %42690 = vmatprep.subr.mxu0 %v42479_v22 }
 0xb14   : > { %v31962_v39 = vpop.f32.mrf.mxu1  ;;  %42691 = vmatpush3.msra.mxu0 %v42479_v22 }
 0xb15   : > { %42692 = vmatprep.subr.mxu0 %v31962_v39 }
 0xb16   : > { %42693 = vmatpush3.msra.mxu0 %v31962_v39 }
 0xb17   : > { %42695 = vmatmul.mubr.msk.f32.vlgmr.msra.gmra.mxu0 %vm179_vm2, %v42472_v14 }
 0xb1f   : > { %v42486_v33 = vpop.f32.mrf.mxu0 }
 0xb21   : > { %v32043_v9 = vpop.f32.mrf.mxu0 }
 0xb22   : > { %42701 = vmatprep.mubr.msk.f32.mxu1 %vm179_vm2, %v32043_v9 }
 0xb2a   : > { %v42493_v40 = vpop.f32.mrf.mxu1 }
 0xb2b   : > { %42697 = vmatprep.subr.mxu1 %v42493_v40 }
 0xb2c   : > { %v32124_v61 = vpop.f32.mrf.mxu1  ;;  %42698 = vmatpush3.msra.mxu1 %v42493_v40 }
 0xb2d   : > { %42699 = vmatprep.subr.mxu1 %v32124_v61 }
 0xb2e   : > { %42700 = vmatpush3.msra.mxu1 %v32124_v61 }
 0xb2f   : > { %42702 = vmatmul.mubr.msk.f32.vlgmr.msra.gmra.mxu1 %vm179_vm2, %v42486_v33 }
 0xb3a   : > { %v42500_v24 = vpop.f32.mrf.mxu0 }
 0xb3c   : > { %v32205_v13 = vpop.f32.mrf.mxu0 }
 0xb3d   : > { %42708 = vmatprep.mubr.msk.f32.mxu0 %vm179_vm2, %v32205_v13 }
 0xb45   : > { %v42507_v41 = vpop.f32.mrf.mxu1 }
 0xb46   : > { %42704 = vmatprep.subr.mxu0 %v42507_v41 }
 0xb47   : > { %v32286_v3 = vpop.f32.mrf.mxu1  ;;  %42705 = vmatpush3.msra.mxu0 %v42507_v41 }
 0xb48   : > { %42706 = vmatprep.subr.mxu0 %v32286_v3  ;;  %v42514_v42 = vpop.f32.mrf.mxu0 }
 0xb49   : > { %42707 = vmatpush3.msra.mxu0 %v32286_v3 }
 0xb4a   : > { %42709 = vmatmul.mubr.msk.f32.vlgmr.msra.gmra.mxu0 %vm179_vm2, %v42500_v24  ;;  %v32367_v2 = vpop.f32.mrf.mxu0 }
 0xb4b   : > { %42715 = vmatprep.mubr.msk.f32.mxu1 %vm179_vm2, %v32367_v2 }
 0xb52   : > { %v42528_v35 = vpop.f32.mrf.mxu0 }
 0xb54   : > { %v42521_v44 = vpop.f32.mrf.mxu1  ;;  %v32529_v53 = vpop.f32.mrf.mxu0 }
 0xb55   : > { %42711 = vmatprep.subr.mxu1 %v42521_v44  ;;  %42722 = vmatprep.mubr.msk.f32.mxu0 %vm179_vm2, %v32529_v53 }
 0xb56   : > { %v32448_v15 = vpop.f32.mrf.mxu1  ;;  %42712 = vmatpush3.msra.mxu1 %v42521_v44 }
 0xb57   : > { %42713 = vmatprep.subr.mxu1 %v32448_v15 }
 0xb58   : > { %v42542_v34 = vpop.f32.mrf.mxu0  ;;  %42714 = vmatpush3.msra.mxu1 %v32448_v15 }
 0xb59   : > { %42716 = vmatmul.mubr.msk.f32.vlgmr.msra.gmra.mxu1 %vm179_vm2, %v42514_v42 }
 0xb5a   : > { %v42535_v21 = vpop.f32.mrf.mxu1  ;;  %v32691_v27 = vpop.f32.mrf.mxu0 }
 0xb5b   : > { %42718 = vmatprep.subr.mxu0 %v42535_v21  ;;  %42729 = vmatprep.mubr.msk.f32.mxu1 %vm179_vm2, %v32691_v27 }
 0xb5c   : > { %v32610_v7 = vpop.f32.mrf.mxu1  ;;  %42719 = vmatpush3.msra.mxu0 %v42535_v21 }
 0xb5d   : > { %42720 = vmatprep.subr.mxu0 %v32610_v7 }
 0xb5e   : > { %v42556_v63 = vpop.f32.mrf.mxu0  ;;  %42721 = vmatpush3.msra.mxu0 %v32610_v7 }
 0xb5f   : > { %42723 = vmatmul.mubr.msk.f32.vlgmr.msra.gmra.mxu0 %vm179_vm2, %v42528_v35 }
 0xb60   : > { %v42549_v1 = vpop.f32.mrf.mxu1  ;;  %v32853_v43 = vpop.f32.mrf.mxu0 }
 0xb61   : > { %42725 = vmatprep.subr.mxu1 %v42549_v1  ;;  %42736 = vmatprep.mubr.msk.f32.mxu0 %vm179_vm2, %v32853_v43 }
 0xb62   : > { %v32772_v60 = vpop.f32.mrf.mxu1  ;;  %42726 = vmatpush3.msra.mxu1 %v42549_v1 }
 0xb63   : > { %42727 = vmatprep.subr.mxu1 %v32772_v60 }
 0xb64   : > { %v42570_v5 = vpop.f32.mrf.mxu0  ;;  %42728 = vmatpush3.msra.mxu1 %v32772_v60 }
 0xb65   : > { %42730 = vmatmul.mubr.msk.f32.vlgmr.msra.gmra.mxu1 %vm179_vm2, %v42542_v34 }
 0xb66   : > { %v42563_v52 = vpop.f32.mrf.mxu1  ;;  %v33015_v23 = vpop.f32.mrf.mxu0 }
 0xb67   : > { %42732 = vmatprep.subr.mxu0 %v42563_v52  ;;  %42743 = vmatprep.mubr.msk.f32.mxu1 %vm179_vm2, %v33015_v23 }
 0xb68   : > { %v32934_v19 = vpop.f32.mrf.mxu1  ;;  %42733 = vmatpush3.msra.mxu0 %v42563_v52 }
 0xb69   : > { %42734 = vmatprep.subr.mxu0 %v32934_v19 }
 0xb6a   : > { %v42584_v11 = vpop.f32.mrf.mxu0  ;;  %42735 = vmatpush3.msra.mxu0 %v32934_v19 }
 0xb6b   : > { %42737 = vmatmul.mubr.msk.f32.vlgmr.msra.gmra.mxu0 %vm179_vm2, %v42556_v63 }
 0xb6c   : > { %v42577_v6 = vpop.f32.mrf.mxu1  ;;  %v33177_v30 = vpop.f32.mrf.mxu0 }
 0xb6d   : > { %42739 = vmatprep.subr.mxu1 %v42577_v6  ;;  %42750 = vmatprep.mubr.msk.f32.mxu0 %vm179_vm2, %v33177_v30 }
 0xb6e   : > { %v33096_v59 = vpop.f32.mrf.mxu1  ;;  %42740 = vmatpush3.msra.mxu1 %v42577_v6 }
 0xb6f   : > { %42741 = vmatprep.subr.mxu1 %v33096_v59 }
 0xb70   : > { %v42598_v31 = vpop.f32.mrf.mxu0  ;;  %42742 = vmatpush3.msra.mxu1 %v33096_v59 }
 0xb71   : > { %42744 = vmatmul.mubr.msk.f32.vlgmr.msra.gmra.mxu1 %vm179_vm2, %v42570_v5 }
 0xb72   : > { %v42591_v47 = vpop.f32.mrf.mxu1  ;;  %v33339_v58 = vpop.f32.mrf.mxu0 }
 0xb73   : > { %42746 = vmatprep.subr.mxu0 %v42591_v47  ;;  %42757 = vmatprep.mubr.msk.f32.mxu1 %vm179_vm2, %v33339_v58 }
 0xb74   : > { %v33258_v8 = vpop.f32.mrf.mxu1  ;;  %42747 = vmatpush3.msra.mxu0 %v42591_v47 }
 0xb75   : > { %42748 = vmatprep.subr.mxu0 %v33258_v8 }
 0xb76   : > { %v42612_v10 = vpop.f32.mrf.mxu0  ;;  %42749 = vmatpush3.msra.mxu0 %v33258_v8 }
 0xb77   : > { %42751 = vmatmul.mubr.msk.f32.vlgmr.msra.gmra.mxu0 %vm179_vm2, %v42584_v11 }
 0xb78   : > { %v42605_v25 = vpop.f32.mrf.mxu1  ;;  %v33501_v45 = vpop.f32.mrf.mxu0 }
 0xb79   : > { %42753 = vmatprep.subr.mxu1 %v42605_v25  ;;  %42764 = vmatprep.mubr.msk.f32.mxu0 %vm179_vm2, %v33501_v45 }
 0xb7a   : > { %v33420_v37 = vpop.f32.mrf.mxu1  ;;  %42754 = vmatpush3.msra.mxu1 %v42605_v25 }
 0xb7b   : > { %42755 = vmatprep.subr.mxu1 %v33420_v37 }
 0xb7c   : > { %v42626_v29 = vpop.f32.mrf.mxu0  ;;  %42756 = vmatpush3.msra.mxu1 %v33420_v37 }
 0xb7d   : > { %42758 = vmatmul.mubr.msk.f32.vlgmr.msra.gmra.mxu1 %vm179_vm2, %v42598_v31 }
 0xb7e   : > { %v42619_v18 = vpop.f32.mrf.mxu1  ;;  %v33663_v36 = vpop.f32.mrf.mxu0 }
 0xb7f   : > { %42760 = vmatprep.subr.mxu0 %v42619_v18  ;;  %42771 = vmatprep.mubr.msk.f32.mxu1 %vm179_vm2, %v33663_v36 }
 0xb80   : > { %v33582_v57 = vpop.f32.mrf.mxu1  ;;  %42761 = vmatpush3.msra.mxu0 %v42619_v18 }
 0xb81   : > { %42762 = vmatprep.subr.mxu0 %v33582_v57 }
 0xb82   : > { %v42640_v54 = vpop.f32.mrf.mxu0  ;;  %42763 = vmatpush3.msra.mxu0 %v33582_v57 }
 0xb83   : > { %42765 = vmatmul.mubr.msk.f32.vlgmr.msra.gmra.mxu0 %vm179_vm2, %v42612_v10 }
 0xb84   : > { %v42633_v48 = vpop.f32.mrf.mxu1  ;;  %v33825_v50 = vpop.f32.mrf.mxu0 }
 0xb85   : > { %42767 = vmatprep.subr.mxu1 %v42633_v48  ;;  %42778 = vmatprep.mubr.msk.f32.mxu0 %vm179_vm2, %v33825_v50  ;;  %v36669_v50 = vld [vmem:[%s43124_s23] sm:$0xff] }
 0xb86   : > { %v33744_v38 = vpop.f32.mrf.mxu1  ;;  %42768 = vmatpush3.msra.mxu1 %v42633_v48 }
 0xb87   : > { %42769 = vmatprep.subr.mxu1 %v33744_v38 }
 0xb88   : > { %v42654_v17 = vpop.f32.mrf.mxu0  ;;  %42770 = vmatpush3.msra.mxu1 %v33744_v38  ;;  %v36671_v38 = vld [vmem:[%s43124_s23 + $0x10] sm:$0xff] }
 0xb89   : > { %42772 = vmatmul.mubr.msk.f32.vlgmr.msra.gmra.mxu1 %vm179_vm2, %v42626_v29 }
 0xb8a   : > { %v42647_v12 = vpop.f32.mrf.mxu1  ;;  %v33987_v49 = vpop.f32.mrf.mxu0 }
 0xb8b   : > { %42774 = vmatprep.subr.mxu0 %v42647_v12  ;;  %42785 = vmatprep.mubr.msk.f32.mxu1 %vm179_vm2, %v33987_v49  ;;  %v36670_v49 = vld [vmem:[%s43124_s23 + $0x8] sm:$0xff] }
 0xb8c   : > { %v33906_v26 = vpop.f32.mrf.mxu1  ;;  %42775 = vmatpush3.msra.mxu0 %v42647_v12 }
 0xb8d   : > { %42776 = vmatprep.subr.mxu0 %v33906_v26 }
 0xb8e   : > { %v42668_v56 = vpop.f32.mrf.mxu0  ;;  %42777 = vmatpush3.msra.mxu0 %v33906_v26  ;;  %v36673_v26 = vld [vmem:[%s43124_s23 + $0x20] sm:$0xff] }
 0xb8f   : > { %42779 = vmatmul.mubr.msk.f32.vlgmr.msra.gmra.mxu0 %vm179_vm2, %v42640_v54 }
 0xb90   : > { %v42661_v32 = vpop.f32.mrf.mxu1  ;;  %v34149_v46 = vpop.f32.mrf.mxu0 }
 0xb91   : > { %42781 = vmatprep.subr.mxu1 %v42661_v32  ;;  %42792 = vmatprep.mubr.msk.f32.mxu0 %vm179_vm2, %v34149_v46  ;;  %v36672_v46 = vld [vmem:[%s43124_s23 + $0x18] sm:$0xff] }
 0xb92   : > { %v34068_v20 = vpop.f32.mrf.mxu1  ;;  %42782 = vmatpush3.msra.mxu1 %v42661_v32 }
 0xb93   : > { %42783 = vmatprep.subr.mxu1 %v34068_v20 }
 0xb94   : > { %v42682_v55 = vpop.f32.mrf.mxu0  ;;  %42784 = vmatpush3.msra.mxu1 %v34068_v20  ;;  %v36675_v20 = vld [vmem:[%s43124_s23 + $0x30] sm:$0xff] }
 0xb95   : > { %42786 = vmatmul.mubr.msk.f32.vlgmr.msra.gmra.mxu1 %vm179_vm2, %v42654_v17 }
 0xb96   : > { %v42675_v62 = vpop.f32.mrf.mxu1  ;;  %v34311_v16 = vpop.f32.mrf.mxu0 }
 0xb97   : > { %42788 = vmatprep.subr.mxu0 %v42675_v62  ;;  %42799 = vmatprep.mubr.msk.f32.mxu1 %vm179_vm2, %v34311_v16  ;;  %v36674_v16 = vld [vmem:[%s43124_s23 + $0x28] sm:$0xff] }
 0xb98   : > { %v34230_v51 = vpop.f32.mrf.mxu1  ;;  %42789 = vmatpush3.msra.mxu0 %v42675_v62 }
 0xb99   : > { %42790 = vmatprep.subr.mxu0 %v34230_v51 }
 0xb9a   : > { %v42689_v28 = vpop.f32.mrf.mxu1  ;;  %42791 = vmatpush3.msra.mxu0 %v34230_v51 }
 0xb9b   : > { %42793 = vmatmul.mubr.msk.f32.vlgmr.msra.gmra.mxu0 %vm179_vm2, %v42668_v56  ;;  %42795 = vmatprep.subr.mxu1 %v42689_v28 }
 0xb9c   : > { %v34392_v0 = vpop.f32.mrf.mxu1  ;;  %42796 = vmatpush3.msra.mxu1 %v42689_v28 }
 0xb9d   : > { %42797 = vmatprep.subr.mxu1 %v34392_v0 }
 0xb9e   : > { %42798 = vmatpush3.msra.mxu1 %v34392_v0  ;;  %v36676_v0 = vld [vmem:[%s43124_s23 + $0x38] sm:$0xff] }
 0xb9f   : > { %42800 = vmatmul.mubr.msk.f32.vlgmr.msra.gmra.mxu1 %vm179_vm2, %v42682_v55 }
 0xbd7   : > { %v42696_v14 = vpop.f32.mrf.mxu0 }
 0xbd9   : > { %v34473_v4 = vpop.f32.mrf.mxu0 }
 0xbda   : > { %42806 = vmatprep.mubr.msk.f32.mxu0 %vm179_vm2, %v34473_v4 }
 0xbef   : > { %v42703_v22 = vpop.f32.mrf.mxu1 }
 0xbf0   : > { %42802 = vmatprep.subr.mxu0 %v42703_v22 }
 0xbf1   : > { %v34554_v39 = vpop.f32.mrf.mxu1  ;;  %42803 = vmatpush3.msra.mxu0 %v42703_v22 }
 0xbf2   : > { %42804 = vmatprep.subr.mxu0 %v34554_v39 }
 0xbf3   : > { %42805 = vmatpush3.msra.mxu0 %v34554_v39 }
 0xbf4   : > { %42807 = vmatmul.mubr.msk.f32.vlgmr.msra.gmra.mxu0 %vm179_vm2, %v42696_v14 }
 0xc0a   : > { %v42710_v33 = vpop.f32.mrf.mxu0 }
 0xc0c   : > { %v34635_v9 = vpop.f32.mrf.mxu0 }
 0xc0d   : > { %42813 = vmatprep.mubr.msk.f32.mxu1 %vm179_vm2, %v34635_v9 }
 0xc19   : > { %v42717_v40 = vpop.f32.mrf.mxu1 }
 0xc1a   : > { %42809 = vmatprep.subr.mxu1 %v42717_v40 }
 0xc1b   : > { %v34716_v61 = vpop.f32.mrf.mxu1  ;;  %42810 = vmatpush3.msra.mxu1 %v42717_v40 }
 0xc1c   : > { %42811 = vmatprep.subr.mxu1 %v34716_v61 }
 0xc1d   : > { %42812 = vmatpush3.msra.mxu1 %v34716_v61 }
 0xc1e   : > { %42814 = vmatmul.mubr.msk.f32.vlgmr.msra.gmra.mxu1 %vm179_vm2, %v42710_v33 }
 0xc1f   : > { %v42724_v24 = vpop.f32.mrf.mxu0 }
 0xc21   : > { %v34797_v13 = vpop.f32.mrf.mxu0 }
 0xc22   : > { %42820 = vmatprep.mubr.msk.f32.mxu0 %vm179_vm2, %v34797_v13 }
 0xc25   : > { %v42731_v41 = vpop.f32.mrf.mxu1 }
 0xc26   : > { %42816 = vmatprep.subr.mxu0 %v42731_v41 }
 0xc27   : > { %v34878_v3 = vpop.f32.mrf.mxu1  ;;  %42817 = vmatpush3.msra.mxu0 %v42731_v41 }
 0xc28   : > { %42818 = vmatprep.subr.mxu0 %v34878_v3 }
 0xc29   : > { %42819 = vmatpush3.msra.mxu0 %v34878_v3 }
 0xc2a   : > { %42821 = vmatmul.mubr.msk.f32.vlgmr.msra.gmra.mxu0 %vm179_vm2, %v42724_v24 }
 0xc2b   : > { %v42738_v42 = vpop.f32.mrf.mxu0 }
 0xc2d   : > { %v34959_v2 = vpop.f32.mrf.mxu0 }
 0xc2e   : > { %42827 = vmatprep.mubr.msk.f32.mxu1 %vm179_vm2, %v34959_v2 }
 0xc31   : > { %v42745_v35 = vpop.f32.mrf.mxu1 }
 0xc32   : > { %42823 = vmatprep.subr.mxu1 %v42745_v35 }
 0xc33   : > { %v35040_v44 = vpop.f32.mrf.mxu1  ;;  %42824 = vmatpush3.msra.mxu1 %v42745_v35 }
 0xc34   : > { %42825 = vmatprep.subr.mxu1 %v35040_v44 }
 0xc35   : > { %42826 = vmatpush3.msra.mxu1 %v35040_v44 }
 0xc36   : > { %42828 = vmatmul.mubr.msk.f32.vlgmr.msra.gmra.mxu1 %vm179_vm2, %v42738_v42 }
 0xc37   : > { %v42752_v53 = vpop.f32.mrf.mxu0 }
 0xc39   : > { %v35121_v15 = vpop.f32.mrf.mxu0 }
 0xc3a   : > { %42834 = vmatprep.mubr.msk.f32.mxu0 %vm179_vm2, %v35121_v15 }
 0xc3d   : > { %v42759_v34 = vpop.f32.mrf.mxu1 }
 0xc3e   : > { %42830 = vmatprep.subr.mxu0 %v42759_v34 }
 0xc3f   : > { %v35202_v21 = vpop.f32.mrf.mxu1  ;;  %42831 = vmatpush3.msra.mxu0 %v42759_v34 }
 0xc40   : > { %42832 = vmatprep.subr.mxu0 %v35202_v21 }
 0xc41   : > { %42833 = vmatpush3.msra.mxu0 %v35202_v21 }
 0xc42   : > { %42835 = vmatmul.mubr.msk.f32.vlgmr.msra.gmra.mxu0 %vm179_vm2, %v42752_v53 }
 0xc43   : > { %v42766_v27 = vpop.f32.mrf.mxu0 }
 0xc45   : > { %v35283_v7 = vpop.f32.mrf.mxu0 }
 0xc46   : > { %42841 = vmatprep.mubr.msk.f32.mxu1 %vm179_vm2, %v35283_v7 }
 0xc49   : > { %v42773_v63 = vpop.f32.mrf.mxu1 }
 0xc4a   : > { %42837 = vmatprep.subr.mxu1 %v42773_v63 }
 0xc4b   : > { %v35364_v1 = vpop.f32.mrf.mxu1  ;;  %42838 = vmatpush3.msra.mxu1 %v42773_v63 }
 0xc4c   : > { %42839 = vmatprep.subr.mxu1 %v35364_v1 }
 0xc4d   : > { %42840 = vmatpush3.msra.mxu1 %v35364_v1 }
 0xc4e   : > { %42842 = vmatmul.mubr.msk.f32.vlgmr.msra.gmra.mxu1 %vm179_vm2, %v42766_v27 }
 0xc4f   : > { %v42780_v43 = vpop.f32.mrf.mxu0 }
 0xc51   : > { %v35445_v60 = vpop.f32.mrf.mxu0 }
 0xc52   : > { %42848 = vmatprep.mubr.msk.f32.mxu0 %vm179_vm2, %v35445_v60 }
 0xc55   : > { %v42787_v5 = vpop.f32.mrf.mxu1 }
 0xc56   : > { %42844 = vmatprep.subr.mxu0 %v42787_v5 }
 0xc57   : > { %v35526_v52 = vpop.f32.mrf.mxu1  ;;  %42845 = vmatpush3.msra.mxu0 %v42787_v5 }
 0xc58   : > { %42846 = vmatprep.subr.mxu0 %v35526_v52 }
 0xc59   : > { %42847 = vmatpush3.msra.mxu0 %v35526_v52 }
 0xc5a   : > { %42849 = vmatmul.mubr.msk.f32.vlgmr.msra.gmra.mxu0 %vm179_vm2, %v42780_v43 }
 0xc5b   : > { %v42794_v23 = vpop.f32.mrf.mxu0 }
 0xc5d   : > { %v35607_v19 = vpop.f32.mrf.mxu0 }
 0xc5e   : > { %42855 = vmatprep.mubr.msk.f32.mxu1 %vm179_vm2, %v35607_v19 }
 0xc5f   : > { %v42801_v11 = vpop.f32.mrf.mxu1 }
 0xc60   : > { %42851 = vmatprep.subr.mxu1 %v42801_v11 }
 0xc61   : > { %v35688_v6 = vpop.f32.mrf.mxu1  ;;  %42852 = vmatpush3.msra.mxu1 %v42801_v11 }
 0xc62   : > { %42853 = vmatprep.subr.mxu1 %v35688_v6 }
 0xc63   : > { %42854 = vmatpush3.msra.mxu1 %v35688_v6 }
 0xc64   : > { %42856 = vmatmul.mubr.msk.f32.vlgmr.msra.gmra.mxu1 %vm179_vm2, %v42794_v23 }
 0xcb4   : > { %v42808_v30 = vpop.f32.mrf.mxu0 }
 0xcb6   : > { %v35769_v59 = vpop.f32.mrf.mxu0 }
 0xcb7   : > { %42862 = vmatprep.mubr.msk.f32.mxu0 %vm179_vm2, %v35769_v59 }
 0xcde   : > { %v42815_v31 = vpop.f32.mrf.mxu1 }
 0xcdf   : > { %42858 = vmatprep.subr.mxu0 %v42815_v31 }
 0xce0   : > { %v35850_v47 = vpop.f32.mrf.mxu1  ;;  %42859 = vmatpush3.msra.mxu0 %v42815_v31 }
 0xce1   : > { %42860 = vmatprep.subr.mxu0 %v35850_v47 }
 0xce2   : > { %42861 = vmatpush3.msra.mxu0 %v35850_v47 }
 0xce3   : > { %42863 = vmatmul.mubr.msk.f32.vlgmr.msra.gmra.mxu0 %vm179_vm2, %v42808_v30 }
 0xcea   : > { %v42822_v58 = vpop.f32.mrf.mxu0 }
 0xcec   : > { %v35931_v8 = vpop.f32.mrf.mxu0 }
 0xced   : > { %42869 = vmatprep.mubr.msk.f32.mxu1 %vm179_vm2, %v35931_v8 }
 0xcf6   : > { %v42829_v10 = vpop.f32.mrf.mxu1 }
 0xcf7   : > { %42865 = vmatprep.subr.mxu1 %v42829_v10 }
 0xcf8   : > { %v36012_v25 = vpop.f32.mrf.mxu1  ;;  %42866 = vmatpush3.msra.mxu1 %v42829_v10 }
 0xcf9   : > { %42867 = vmatprep.subr.mxu1 %v36012_v25 }
 0xcfa   : > { %42868 = vmatpush3.msra.mxu1 %v36012_v25 }
 0xcfb   : > { %42870 = vmatmul.mubr.msk.f32.vlgmr.msra.gmra.mxu1 %vm179_vm2, %v42822_v58 }
 0xd02   : > { %v42836_v45 = vpop.f32.mrf.mxu0 }
 0xd04   : > { %v36093_v37 = vpop.f32.mrf.mxu0 }
 0xd05   : > { %42876 = vmatprep.mubr.msk.f32.mxu0 %vm179_vm2, %v36093_v37 }
 0xd0e   : > { %v42843_v29 = vpop.f32.mrf.mxu1 }
 0xd0f   : > { %42872 = vmatprep.subr.mxu0 %v42843_v29 }
 0xd10   : > { %v36174_v18 = vpop.f32.mrf.mxu1  ;;  %42873 = vmatpush3.msra.mxu0 %v42843_v29 }
 0xd11   : > { %42874 = vmatprep.subr.mxu0 %v36174_v18 }
 0xd12   : > { %42875 = vmatpush3.msra.mxu0 %v36174_v18 }
 0xd13   : > { %42877 = vmatmul.mubr.msk.f32.vlgmr.msra.gmra.mxu0 %vm179_vm2, %v42836_v45 }
 0xd14   : > { %42890 = vmatprep.mubr.msk.f32.mxu0 %vm179_vm2, %v36669_v50 }
 0xd1a   : > { %v42850_v36 = vpop.f32.mrf.mxu0 }
 0xd1c   : > { %v36255_v57 = vpop.f32.mrf.mxu0 }
 0xd1d   : > { %42883 = vmatprep.mubr.msk.f32.mxu1 %vm179_vm2, %v36255_v57 }
 0xd24   : > { %v42857_v54 = vpop.f32.mrf.mxu1 }
 0xd25   : > { %42879 = vmatprep.subr.mxu1 %v42857_v54 }
 0xd26   : > { %v36336_v48 = vpop.f32.mrf.mxu1  ;;  %42880 = vmatpush3.msra.mxu1 %v42857_v54 }
 0xd27   : > { %42881 = vmatprep.subr.mxu1 %v36336_v48 }
 0xd28   : > { %42882 = vmatpush3.msra.mxu1 %v36336_v48 }
 0xd29   : > { %42884 = vmatmul.mubr.msk.f32.vlgmr.msra.gmra.mxu1 %vm179_vm2, %v42850_v36 }
 0xd2a   : > { %42897 = vmatprep.mubr.msk.f32.mxu1 %vm179_vm2, %v36671_v38 }
 0xda3   : > { %v42864_v17 = vpop.f32.mrf.mxu0 }
 0xda4   : > { %42886 = vmatprep.subr.mxu0 %v42864_v17 }
 0xda5   : > { %v36417_v12 = vpop.f32.mrf.mxu0  ;;  %42887 = vmatpush3.msra.mxu0 %v42864_v17 }
 0xda6   : > { %42888 = vmatprep.subr.mxu0 %v36417_v12 }
 0xda7   : > { %42889 = vmatpush3.msra.mxu0 %v36417_v12 }
 0xda8   : > { %42891 = vmatmul.mubr.msk.f32.vlgmr.msra.gmra.mxu0 %vm179_vm2, %v36670_v49 }
 0xda9   : > { %42904 = vmatprep.mubr.msk.f32.mxu0 %vm179_vm2, %v36673_v26 }
 0xdbb   : > { %v42871_v56 = vpop.f32.mrf.mxu1 }
 0xdbc   : > { %42893 = vmatprep.subr.mxu1 %v42871_v56 }
 0xdbd   : > { %v36498_v32 = vpop.f32.mrf.mxu1  ;;  %42894 = vmatpush3.msra.mxu1 %v42871_v56 }
 0xdbe   : > { %42895 = vmatprep.subr.mxu1 %v36498_v32 }
 0xdbf   : > { %42896 = vmatpush3.msra.mxu1 %v36498_v32 }
 0xdc0   : > { %42898 = vmatmul.mubr.msk.f32.vlgmr.msra.gmra.mxu1 %vm179_vm2, %v36672_v46 }
 0xdc1   : > { %42911 = vmatprep.mubr.msk.f32.mxu1 %vm179_vm2, %v36675_v20 }
 0xdd3   : > { %v42878_v55 = vpop.f32.mrf.mxu0 }
 0xdd4   : > { %42900 = vmatprep.subr.mxu0 %v42878_v55 }
 0xdd5   : > { %v36579_v62 = vpop.f32.mrf.mxu0  ;;  %42901 = vmatpush3.msra.mxu0 %v42878_v55 }
 0xdd6   : > { %42902 = vmatprep.subr.mxu0 %v36579_v62 }
 0xdd7   : > { %42903 = vmatpush3.msra.mxu0 %v36579_v62 }
 0xdd8   : > { %42905 = vmatmul.mubr.msk.f32.vlgmr.msra.gmra.mxu0 %vm179_vm2, %v36674_v16 }
 0xde9   : > { %v42885_v51 = vpop.f32.mrf.mxu1 }
 0xdea   : > { %42907 = vmatprep.subr.mxu1 %v42885_v51 }
 0xdeb   : > { %v36660_v28 = vpop.f32.mrf.mxu1  ;;  %42908 = vmatpush3.msra.mxu1 %v42885_v51 }
 0xdec   : > { %42909 = vmatprep.subr.mxu1 %v36660_v28 }
 0xded   : > { %42910 = vmatpush3.msra.mxu1 %v36660_v28 }
 0xdee   : > { %42912 = vmatmul.mubr.msk.f32.vlgmr.msra.gmra.mxu1 %vm179_vm2, %v36676_v0 }
 0xe68   : > { %v42892_v14 = vpop.f32.mrf.mxu0 }
 0xe69   : > { %37002 = vst.msk [vmem:[%s43124_s23 + $0x8] sm:$0xff] %vm179_vm2, %v42892_v14 }
 0xe6a   : > { %v36749_v4 = vpop.f32.mrf.mxu0 }
 0xe6b   : > { %37001 = vst.msk [vmem:[%s43124_s23] sm:$0xff] %vm179_vm2, %v36749_v4 }
 0xe80   : > { %v42899_v22 = vpop.f32.mrf.mxu1 }
 0xe81   : > { %37004 = vst.msk [vmem:[%s43124_s23 + $0x18] sm:$0xff] %vm179_vm2, %v42899_v22 }
 0xe82   : > { %v36830_v39 = vpop.f32.mrf.mxu1 }
 0xe83   : > { %37003 = vst.msk [vmem:[%s43124_s23 + $0x10] sm:$0xff] %vm179_vm2, %v36830_v39 }
 0xe98   : > { %v42906_v33 = vpop.f32.mrf.mxu0 }
 0xe99   : > { %37006 = vst.msk [vmem:[%s43124_s23 + $0x28] sm:$0xff] %vm179_vm2, %v42906_v33 }
 0xe9a   : > { %v36911_v9 = vpop.f32.mrf.mxu0 }
 0xe9b   : > { %37005 = vst.msk [vmem:[%s43124_s23 + $0x20] sm:$0xff] %vm179_vm2, %v36911_v9 }
 0xeae   : > { %v42913_v40 = vpop.f32.mrf.mxu1 }
 0xeaf   : > { %37008 = vst.msk [vmem:[%s43124_s23 + $0x38] sm:$0xff] %vm179_vm2, %v42913_v40 }
 0xeb0   : > { %v36992_v61 = vpop.f32.mrf.mxu1 }
 0xeb1   : > { %37007 = vst.msk [vmem:[%s43124_s23 + $0x30] sm:$0xff] %vm179_vm2, %v36992_v61 }
 0xeb2 PF: > { %s12_s11 = sadd.s32 1, %s43044_s11   ;;  %s46330_s9 = smov %s43040_s10 }
 0xeb3   : > { %p9_p5 = scmp.ge.s32.totalorder %s12_s11, 4   ;;  %s46331_s10 = smov %s46333_s12 }
 0xeb5   :  { %11 = sbr.rel (!%p9_p5) target bundleno = 2 (0x2), region = 62 }

</bundles_post_ra>
